<compile_context>
chip_gen: v7x
topology: tpu7x:2x2x1
jax: 0.10.0
libtpu: 0.0.40
codegen_flags: <defaults>
</compile_context>

<pallas_src>
import functools

import jax
import jax.numpy as jnp
from jax.experimental import pallas as pl
from jax.experimental.pallas import tpu as pltpu


# ----------------------------------------------------------------------------
# Pallas kernel: single-reduction-step GEMM with fused bias + optional ReLU.
# Shared by every layer (refs arrive as 2-D tiles via squeezed BlockSpecs).
# ----------------------------------------------------------------------------
def _mm_bias_act_kernel(x_ref, w_ref, b_ref, o_ref, *, apply_relu):
    y = jnp.dot(x_ref[...], w_ref[...], preferred_element_type=jnp.float32)
    y = y + b_ref[...]                       # (M, N) + (1, N) broadcast
    if apply_relu:
        y = jnp.maximum(y, 0.0)
    o_ref[...] = y.astype(o_ref.dtype)


# ----------------------------------------------------------------------------
# Conv-as-GEMM: im2col in plain JAX, GEMM+bias+ReLU in Pallas, batch-parallel.
# ----------------------------------------------------------------------------
def _im2col(x_nhwc, kh, kw, stride):
    """Patch extraction (plain JAX). Returns (B, oh*ow, kh*kw*C), oh, ow."""
    B, H, W, C = x_nhwc.shape
    oh = (H - kh) // stride + 1
    ow = (W - kw) // stride + 1
    cols = []
    for i in range(kh):
        for j in range(kw):
            cols.append(
                x_nhwc[:, i:i + stride * oh:stride, j:j + stride * ow:stride, :]
            )
    patches = jnp.stack(cols, axis=3)              # (B, oh, ow, kh*kw, C)
    return patches.reshape(B, oh * ow, kh * kw * C), oh, ow


def conv2d_relu(x_nhwc, w_mat, b_row, kh, kw, stride, *, out_dtype=jnp.bfloat16):
    """Valid conv, fused bias+ReLU. One grid block per image (batch-parallel)."""
    patches, oh, ow = _im2col(x_nhwc, kh, kw, stride)
    B, M, K = patches.shape
    Kw, N = w_mat.shape
    assert K == Kw
    out = pl.pallas_call(
        functools.partial(_mm_bias_act_kernel, apply_relu=True),
        out_shape=jax.ShapeDtypeStruct((B, M, N), out_dtype),
        grid_spec=pltpu.PrefetchScalarGridSpec(
            num_scalar_prefetch=0,
            grid=(B,),
            in_specs=[
                pl.BlockSpec((None, M, K), lambda b: (b, 0, 0)),
                pl.BlockSpec((K, N), lambda b: (0, 0)),      # weight stays resident
                pl.BlockSpec((1, N), lambda b: (0, 0)),
            ],
            out_specs=pl.BlockSpec((None, M, N), lambda b: (b, 0, 0)),
        ),
        compiler_params=pltpu.CompilerParams(dimension_semantics=("parallel",)),
    )(patches, w_mat, b_row)
    return out.reshape(B, oh, ow, N)


# ----------------------------------------------------------------------------
# Fully-connected layers
# ----------------------------------------------------------------------------
def fc_linear_relu(x, w_mat, b_row, *, tn, out_dtype):
    """relu(x @ w + b). K is one full-extent reduction step; N tiled by tn."""
    M, K = x.shape
    Kw, N = w_mat.shape
    assert K == Kw and N % tn == 0
    return pl.pallas_call(
        functools.partial(_mm_bias_act_kernel, apply_relu=True),
        out_shape=jax.ShapeDtypeStruct((M, N), out_dtype),
        grid_spec=pltpu.PrefetchScalarGridSpec(
            num_scalar_prefetch=0,
            grid=(N // tn,),
            in_specs=[
                pl.BlockSpec((M, K), lambda j: (0, 0)),
                pl.BlockSpec((K, tn), lambda j: (0, j)),
                pl.BlockSpec((1, tn), lambda j: (0, j)),
            ],
            out_specs=pl.BlockSpec((M, tn), lambda j: (0, j)),
        ),
        compiler_params=pltpu.CompilerParams(dimension_semantics=("parallel",)),
    )(x, w_mat, b_row)


def dual_head_linear_relu(h1, w_hkn, b_h1n, *, tn):
    """Both heads' second layer in ONE pallas_call.

    h1:    (M, 2*K) bf16 -- columns [0:K]=state head, [K:2K]=action head.
    w_hkn: (2, K, N) bf16 stacked weights;  b_h1n: (2, 1, N) f32.
    Returns (2, M, N) float32.
    """
    M, twoK = h1.shape
    H, K, N = w_hkn.shape
    assert twoK == H * K and N % tn == 0
    return pl.pallas_call(
        functools.partial(_mm_bias_act_kernel, apply_relu=True),
        out_shape=jax.ShapeDtypeStruct((H, M, N), jnp.float32),
        grid_spec=pltpu.PrefetchScalarGridSpec(
            num_scalar_prefetch=0,
            grid=(H, N // tn),
            in_specs=[
                pl.BlockSpec((M, K), lambda h, j: (0, h)),       # head's h1 columns
                pl.BlockSpec((None, K, tn), lambda h, j: (h, 0, j)),
                pl.BlockSpec((None, 1, tn), lambda h, j: (h, 0, j)),
            ],
            out_specs=pl.BlockSpec((None, M, tn), lambda h, j: (h, 0, j)),
        ),
        compiler_params=pltpu.CompilerParams(
            dimension_semantics=("parallel", "parallel")),
    )(h1, w_hkn, b_h1n)


# ----------------------------------------------------------------------------
# Parameters (torch-shaped synthetic init) and one-time preparation
# ----------------------------------------------------------------------------
def init_params(key, nb_actions=4):
    ks = jax.random.split(key, 18)
    s = 0.05

    def rn(k, shape):
        return jax.random.normal(k, shape, jnp.float32) * s

    return {
        "conv1_w": rn(ks[0], (32, 1, 8, 8)),   "conv1_b": rn(ks[1], (32,)),
        "conv2_w": rn(ks[2], (64, 32, 4, 4)),  "conv2_b": rn(ks[3], (64,)),
        "conv3_w": rn(ks[4], (64, 64, 3, 3)),  "conv3_b": rn(ks[5], (64,)),
        "av1_w": rn(ks[6], (1024, 3136)),      "av1_b": rn(ks[7], (1024,)),
        "av2_w": rn(ks[8], (1024, 1024)),      "av2_b": rn(ks[9], (1024,)),
        "av3_w": rn(ks[10], (nb_actions, 1024)), "av3_b": rn(ks[11], (nb_actions,)),
        "sv1_w": rn(ks[12], (1024, 3136)),     "sv1_b": rn(ks[13], (1024,)),
        "sv2_w": rn(ks[14], (1024, 1024)),     "sv2_b": rn(ks[15], (1024,)),
        "sv3_w": rn(ks[16], (1, 1024)),        "sv3_b": rn(ks[17], (1,)),
    }


def prepare_params(raw, *, conv_hw=7, conv_c=64, c_pad=128):
    """One-time weight prep (outside the per-step forward): transpose to (K,N),
    im2col row order, channel padding to 128 for lane-dense conv stores, head
    fusion/stacking, bf16 casts."""
    f32 = lambda a: a.astype(jnp.float32)
    bf16 = lambda a: a.astype(jnp.bfloat16)

    def conv_mat(w, cin_pad=None, cout_pad=None):
        # OIHW -> (kh*kw*cin, cout) in im2col (kh, kw, cin) row order.
        cout, cin, kh, kw = w.shape
        if cin_pad is not None and cin_pad > cin:          # zero rows for padded inputs
            w = jnp.pad(w, ((0, 0), (0, cin_pad - cin), (0, 0), (0, 0)))
        m = jnp.transpose(w, (2, 3, 1, 0)).reshape(-1, cout)
        if cout_pad is not None and cout_pad > cout:       # zero cols -> zero channels
            m = jnp.pad(m, ((0, 0), (0, cout_pad - cout)))
        return bf16(m)

    def conv_bias(b, cout_pad=None):
        if cout_pad is not None and cout_pad > b.shape[0]:
            b = jnp.pad(b, (0, cout_pad - b.shape[0]))
        return f32(b).reshape(1, -1)

    def fc1_mat(w):                                        # rows chw -> hwc (NHWC flatten)
        n_out = w.shape[0]
        wt = w.T.reshape(conv_c, conv_hw, conv_hw, n_out)
        return jnp.transpose(wt, (1, 2, 0, 3)).reshape(conv_c * conv_hw * conv_hw, n_out)

    fc1_w = bf16(jnp.concatenate([fc1_mat(raw["sv1_w"]), fc1_mat(raw["av1_w"])], axis=1))
    fc1_b = f32(jnp.concatenate([raw["sv1_b"], raw["av1_b"]])).reshape(1, -1)

    hd2_w = bf16(jnp.stack([raw["sv2_w"].T, raw["av2_w"].T], axis=0))          # (2,1024,1024)
    hd2_b = f32(jnp.stack([raw["sv2_b"], raw["av2_b"]], axis=0))[:, None, :]   # (2,1,1024)

    return {
        "conv1_w": conv_mat(raw["conv1_w"], cout_pad=c_pad),                 # (64, 128)
        "conv1_b": conv_bias(raw["conv1_b"], cout_pad=c_pad),
        "conv2_w": conv_mat(raw["conv2_w"], cin_pad=c_pad, cout_pad=c_pad),  # (2048, 128)
        "conv2_b": conv_bias(raw["conv2_b"], cout_pad=c_pad),
        "conv3_w": conv_mat(raw["conv3_w"], cin_pad=c_pad),                  # (1152, 64)
        "conv3_b": conv_bias(raw["conv3_b"]),
        "fc1_w": fc1_w, "fc1_b": fc1_b,
        "hd2_w": hd2_w, "hd2_b": hd2_b,
        "sv3_wT": f32(raw["sv3_w"].T), "sv3_b": f32(raw["sv3_b"]),
        "av3_wT": f32(raw["av3_w"].T), "av3_b": f32(raw["av3_b"]),
    }


# ----------------------------------------------------------------------------
# Forward pass (mirrors AtariNet.forward, eval mode)
# ----------------------------------------------------------------------------
def atari_net_forward(params, x_nchw):
    B = x_nchw.shape[0]
    # NCHW -> NHWC; single cast to bf16 (all GEMM operands/intermediates bf16).
    x = jnp.transpose(x_nchw, (0, 2, 3, 1)).astype(jnp.bfloat16)         # (B,84,84,1)

    # Conv stack (bias+ReLU fused; conv1/conv2 channels zero-padded to 128 for
    # lane-dense output stores, padded channels carry zero weights downstream).
    x = conv2d_relu(x, params["conv1_w"], params["conv1_b"], 8, 8, 4)    # (B,20,20,128)
    x = conv2d_relu(x, params["conv2_w"], params["conv2_b"], 4, 4, 2)    # (B, 9, 9,128)
    x = conv2d_relu(x, params["conv3_w"], params["conv3_b"], 3, 3, 1)    # (B, 7, 7, 64)

    # NHWC flatten; fc1 weight rows were pre-permuted chw->hwc so no transpose.
    feat = x.reshape(B, -1)                                              # (B, 3136) bf16

    # TODO(synk): nn.Dropout(p=0.2) treated as identity (eval-mode semantics).
    # Fused state/action first layers: one (3136 -> 2048) GEMM sharing feat DMA.
    h1 = fc_linear_relu(feat, params["fc1_w"], params["fc1_b"],
                        tn=512, out_dtype=jnp.bfloat16)                  # (B, 2048)

    # Both heads' second layer in ONE pallas_call via a head grid axis.
    h2 = dual_head_linear_relu(h1, params["hd2_w"], params["hd2_b"], tn=512)  # (2,B,1024)

    # Third-layer heads (~40 KFLOP) + dueling combine in plain JAX -- a
    # pallas_call launch plus an HBM round trip would dwarf the work.
    state_value = jnp.maximum(h2[0] @ params["sv3_wT"] + params["sv3_b"], 0.0)   # (B,1)
    action_value = jnp.maximum(h2[1] @ params["av3_wT"] + params["av3_b"], 0.0)  # (B,nb)

    # output = state_value + (action_value - action_value.mean())
    # torch .mean() with no dim => mean over ALL elements (incl. batch).
    return state_value + (action_value - jnp.mean(action_value))


# ----------------------------------------------------------------------------
if __name__ == "__main__":
    key = jax.random.PRNGKey(0)
    k_params, k_x = jax.random.split(key)

    nb_actions = 4
    batch = 2
    # The Linear(3136, ...) layers force the canonical Atari input: (B, 1, 84, 84).
    x = jax.random.normal(k_x, (batch, 1, 84, 84), jnp.float32)

    raw_params = init_params(k_params, nb_actions=nb_actions)
    params = prepare_params(raw_params)            # one-time weight prep (bf16, (K,N))

    fwd = jax.jit(atari_net_forward)
    out = fwd(params, x)
    jax.block_until_ready(out)

    assert out.shape == (batch, nb_actions)
    assert out.dtype == jnp.float32
    print("KERNEL_OK")
</pallas_src>

<mosaic_0001>
module attributes {stable_mosaic.version = 11 : i64} {
  func.func @_mm_bias_act_kernel(%arg0: i32, %arg1: memref<1x400x64xbf16, #tpu.memory_space<vmem>>, %arg2: memref<64x128xbf16, #tpu.memory_space<vmem>>, %arg3: memref<1x128xf32, #tpu.memory_space<vmem>>, %arg4: memref<1x400x128xbf16, #tpu.memory_space<vmem>>) attributes {dimension_semantics = [#tpu.dimension_semantics<parallel>], iteration_bounds = array<i64: 2>, scalar_prefetch = 0 : i64, scratch_operands = 0 : i64, tpu.core_type = #tpu.core_type<tc>, window_params = [{transform_indices = @transform_0, window_bounds = array<i64: 1, 400, 64>}, {pipeline_mode = #tpu.pipeline_mode<synchronous>, transform_indices = @transform_1, window_bounds = array<i64: 64, 128>}, {pipeline_mode = #tpu.pipeline_mode<synchronous>, transform_indices = @transform_2, window_bounds = array<i64: 1, 128>}, {transform_indices = @transform_3, window_bounds = array<i64: 1, 400, 128>}]} {
    %c0 = arith.constant 0 : index
    %c0_0 = arith.constant 0 : index
    %c0_1 = arith.constant 0 : index
    %0 = vector.load %arg1[%c0, %c0_0, %c0_1] : memref<1x400x64xbf16, #tpu.memory_space<vmem>>, vector<1x400x64xbf16>
    %1 = vector.shape_cast %0 : vector<1x400x64xbf16> to vector<400x64xbf16>
    %c0_2 = arith.constant 0 : index
    %c0_3 = arith.constant 0 : index
    %2 = vector.load %arg2[%c0_2, %c0_3] : memref<64x128xbf16, #tpu.memory_space<vmem>>, vector<64x128xbf16>
    %cst = arith.constant dense<0.000000e+00> : vector<400x128xf32>
    %3 = tpu.matmul %1, %2, %cst {dimension_numbers = #tpu.dot_dimension_numbers<[1], [0], [0], [1], [0, 0, 1, 1], [], []>} : vector<400x64xbf16>, vector<64x128xbf16>, vector<400x128xf32> -> vector<400x128xf32>
    %c0_4 = arith.constant 0 : index
    %c0_5 = arith.constant 0 : index
    %4 = vector.load %arg3[%c0_4, %c0_5] : memref<1x128xf32, #tpu.memory_space<vmem>>, vector<1x128xf32>
    %5 = vector.broadcast %4 : vector<1x128xf32> to vector<400x128xf32>
    %6 = arith.addf %3, %5 : vector<400x128xf32>
    %cst_6 = arith.constant 0.000000e+00 : f32
    %7 = vector.broadcast %cst_6 : f32 to vector<400x128xf32>
    %8 = arith.maximumf %6, %7 : vector<400x128xf32>
    %9 = arith.truncf %8 : vector<400x128xf32> to vector<400x128xbf16>
    %c0_7 = arith.constant 0 : index
    %c0_8 = arith.constant 0 : index
    %c0_9 = arith.constant 0 : index
    %10 = vector.load %arg4[%c0_7, %c0_8, %c0_9] : memref<1x400x128xbf16, #tpu.memory_space<vmem>>, vector<1x400x128xbf16>
    %11 = vector.shape_cast %10 : vector<1x400x128xbf16> to vector<400x128xbf16>
    %12 = vector.shape_cast %9 : vector<400x128xbf16> to vector<1x400x128xbf16>
    tpu.vector_store %arg4[%c0_7, %c0_8, %c0_9], %12 {strides = array<i32>} : memref<1x400x128xbf16, #tpu.memory_space<vmem>>, vector<1x400x128xbf16>,
    return
  }
  func.func @transform_0(%arg0: i32) -> (i32, i32, i32) {
    %c0_i32 = arith.constant 0 : i32
    %c0_i32_0 = arith.constant 0 : i32
    %c0_i32_1 = arith.constant 0 : i32
    return %arg0, %c0_i32, %c0_i32_0 : i32, i32, i32
  }
  func.func @transform_1(%arg0: i32) -> (i32, i32) {
    %c0_i32 = arith.constant 0 : i32
    %c0_i32_0 = arith.constant 0 : i32
    %c0_i32_1 = arith.constant 0 : i32
    return %c0_i32, %c0_i32_0 : i32, i32
  }
  func.func @transform_2(%arg0: i32) -> (i32, i32) {
    %c0_i32 = arith.constant 0 : i32
    %c0_i32_0 = arith.constant 0 : i32
    %c0_i32_1 = arith.constant 0 : i32
    return %c0_i32, %c0_i32_0 : i32, i32
  }
  func.func @transform_3(%arg0: i32) -> (i32, i32, i32) {
    %c0_i32 = arith.constant 0 : i32
    %c0_i32_0 = arith.constant 0 : i32
    %c0_i32_1 = arith.constant 0 : i32
    return %arg0, %c0_i32, %c0_i32_0 : i32, i32, i32
  }
}

module attributes {stable_mosaic.version = 11 : i64} {
  func.func @_mm_bias_act_kernel(%arg0: i32, %arg1: memref<1x81x2048xbf16, #tpu.memory_space<vmem>>, %arg2: memref<2048x128xbf16, #tpu.memory_space<vmem>>, %arg3: memref<1x128xf32, #tpu.memory_space<vmem>>, %arg4: memref<1x81x128xbf16, #tpu.memory_space<vmem>>) attributes {dimension_semantics = [#tpu.dimension_semantics<parallel>], iteration_bounds = array<i64: 2>, scalar_prefetch = 0 : i64, scratch_operands = 0 : i64, tpu.core_type = #tpu.core_type<tc>, window_params = [{transform_indices = @transform_0, window_bounds = array<i64: 1, 81, 2048>}, {pipeline_mode = #tpu.pipeline_mode<synchronous>, transform_indices = @transform_1, window_bounds = array<i64: 2048, 128>}, {pipeline_mode = #tpu.pipeline_mode<synchronous>, transform_indices = @transform_2, window_bounds = array<i64: 1, 128>}, {transform_indices = @transform_3, window_bounds = array<i64: 1, 81, 128>}]} {
    %c0 = arith.constant 0 : index
    %c0_0 = arith.constant 0 : index
    %c0_1 = arith.constant 0 : index
    %0 = vector.load %arg1[%c0, %c0_0, %c0_1] : memref<1x81x2048xbf16, #tpu.memory_space<vmem>>, vector<1x81x2048xbf16>
    %1 = vector.shape_cast %0 : vector<1x81x2048xbf16> to vector<81x2048xbf16>
    %c0_2 = arith.constant 0 : index
    %c0_3 = arith.constant 0 : index
    %2 = vector.load %arg2[%c0_2, %c0_3] : memref<2048x128xbf16, #tpu.memory_space<vmem>>, vector<2048x128xbf16>
    %cst = arith.constant dense<0.000000e+00> : vector<81x128xf32>
    %3 = tpu.matmul %1, %2, %cst {dimension_numbers = #tpu.dot_dimension_numbers<[1], [0], [0], [1], [0, 0, 1, 1], [], []>} : vector<81x2048xbf16>, vector<2048x128xbf16>, vector<81x128xf32> -> vector<81x128xf32>
    %c0_4 = arith.constant 0 : index
    %c0_5 = arith.constant 0 : index
    %4 = vector.load %arg3[%c0_4, %c0_5] : memref<1x128xf32, #tpu.memory_space<vmem>>, vector<1x128xf32>
    %5 = vector.broadcast %4 : vector<1x128xf32> to vector<81x128xf32>
    %6 = arith.addf %3, %5 : vector<81x128xf32>
    %cst_6 = arith.constant 0.000000e+00 : f32
    %7 = vector.broadcast %cst_6 : f32 to vector<81x128xf32>
    %8 = arith.maximumf %6, %7 : vector<81x128xf32>
    %9 = arith.truncf %8 : vector<81x128xf32> to vector<81x128xbf16>
    %c0_7 = arith.constant 0 : index
    %c0_8 = arith.constant 0 : index
    %c0_9 = arith.constant 0 : index
    %10 = vector.load %arg4[%c0_7, %c0_8, %c0_9] : memref<1x81x128xbf16, #tpu.memory_space<vmem>>, vector<1x81x128xbf16>
    %11 = vector.shape_cast %10 : vector<1x81x128xbf16> to vector<81x128xbf16>
    %12 = vector.shape_cast %9 : vector<81x128xbf16> to vector<1x81x128xbf16>
    tpu.vector_store %arg4[%c0_7, %c0_8, %c0_9], %12 {strides = array<i32>} : memref<1x81x128xbf16, #tpu.memory_space<vmem>>, vector<1x81x128xbf16>,
    return
  }
  func.func @transform_0(%arg0: i32) -> (i32, i32, i32) {
    %c0_i32 = arith.constant 0 : i32
    %c0_i32_0 = arith.constant 0 : i32
    %c0_i32_1 = arith.constant 0 : i32
    return %arg0, %c0_i32, %c0_i32_0 : i32, i32, i32
  }
  func.func @transform_1(%arg0: i32) -> (i32, i32) {
    %c0_i32 = arith.constant 0 : i32
    %c0_i32_0 = arith.constant 0 : i32
    %c0_i32_1 = arith.constant 0 : i32
    return %c0_i32, %c0_i32_0 : i32, i32
  }
  func.func @transform_2(%arg0: i32) -> (i32, i32) {
    %c0_i32 = arith.constant 0 : i32
    %c0_i32_0 = arith.constant 0 : i32
    %c0_i32_1 = arith.constant 0 : i32
    return %c0_i32, %c0_i32_0 : i32, i32
  }
  func.func @transform_3(%arg0: i32) -> (i32, i32, i32) {
    %c0_i32 = arith.constant 0 : i32
    %c0_i32_0 = arith.constant 0 : i32
    %c0_i32_1 = arith.constant 0 : i32
    return %arg0, %c0_i32, %c0_i32_0 : i32, i32, i32
  }
}

module attributes {stable_mosaic.version = 11 : i64} {
  func.func @_mm_bias_act_kernel(%arg0: i32, %arg1: memref<1x49x1152xbf16, #tpu.memory_space<vmem>>, %arg2: memref<1152x64xbf16, #tpu.memory_space<vmem>>, %arg3: memref<1x64xf32, #tpu.memory_space<vmem>>, %arg4: memref<1x49x64xbf16, #tpu.memory_space<vmem>>) attributes {dimension_semantics = [#tpu.dimension_semantics<parallel>], iteration_bounds = array<i64: 2>, scalar_prefetch = 0 : i64, scratch_operands = 0 : i64, tpu.core_type = #tpu.core_type<tc>, window_params = [{transform_indices = @transform_0, window_bounds = array<i64: 1, 49, 1152>}, {pipeline_mode = #tpu.pipeline_mode<synchronous>, transform_indices = @transform_1, window_bounds = array<i64: 1152, 64>}, {pipeline_mode = #tpu.pipeline_mode<synchronous>, transform_indices = @transform_2, window_bounds = array<i64: 1, 64>}, {transform_indices = @transform_3, window_bounds = array<i64: 1, 49, 64>}]} {
    %c0 = arith.constant 0 : index
    %c0_0 = arith.constant 0 : index
    %c0_1 = arith.constant 0 : index
    %0 = vector.load %arg1[%c0, %c0_0, %c0_1] : memref<1x49x1152xbf16, #tpu.memory_space<vmem>>, vector<1x49x1152xbf16>
    %1 = vector.shape_cast %0 : vector<1x49x1152xbf16> to vector<49x1152xbf16>
    %c0_2 = arith.constant 0 : index
    %c0_3 = arith.constant 0 : index
    %2 = vector.load %arg2[%c0_2, %c0_3] : memref<1152x64xbf16, #tpu.memory_space<vmem>>, vector<1152x64xbf16>
    %cst = arith.constant dense<0.000000e+00> : vector<49x64xf32>
    %3 = tpu.matmul %1, %2, %cst {dimension_numbers = #tpu.dot_dimension_numbers<[1], [0], [0], [1], [0, 0, 1, 1], [], []>} : vector<49x1152xbf16>, vector<1152x64xbf16>, vector<49x64xf32> -> vector<49x64xf32>
    %c0_4 = arith.constant 0 : index
    %c0_5 = arith.constant 0 : index
    %4 = vector.load %arg3[%c0_4, %c0_5] : memref<1x64xf32, #tpu.memory_space<vmem>>, vector<1x64xf32>
    %5 = vector.broadcast %4 : vector<1x64xf32> to vector<49x64xf32>
    %6 = arith.addf %3, %5 : vector<49x64xf32>
    %cst_6 = arith.constant 0.000000e+00 : f32
    %7 = vector.broadcast %cst_6 : f32 to vector<49x64xf32>
    %8 = arith.maximumf %6, %7 : vector<49x64xf32>
    %9 = arith.truncf %8 : vector<49x64xf32> to vector<49x64xbf16>
    %c0_7 = arith.constant 0 : index
    %c0_8 = arith.constant 0 : index
    %c0_9 = arith.constant 0 : index
    %10 = vector.load %arg4[%c0_7, %c0_8, %c0_9] : memref<1x49x64xbf16, #tpu.memory_space<vmem>>, vector<1x49x64xbf16>
    %11 = vector.shape_cast %10 : vector<1x49x64xbf16> to vector<49x64xbf16>
    %12 = vector.shape_cast %9 : vector<49x64xbf16> to vector<1x49x64xbf16>
    tpu.vector_store %arg4[%c0_7, %c0_8, %c0_9], %12 {strides = array<i32>} : memref<1x49x64xbf16, #tpu.memory_space<vmem>>, vector<1x49x64xbf16>,
    return
  }
  func.func @transform_0(%arg0: i32) -> (i32, i32, i32) {
    %c0_i32 = arith.constant 0 : i32
    %c0_i32_0 = arith.constant 0 : i32
    %c0_i32_1 = arith.constant 0 : i32
    return %arg0, %c0_i32, %c0_i32_0 : i32, i32, i32
  }
  func.func @transform_1(%arg0: i32) -> (i32, i32) {
    %c0_i32 = arith.constant 0 : i32
    %c0_i32_0 = arith.constant 0 : i32
    %c0_i32_1 = arith.constant 0 : i32
    return %c0_i32, %c0_i32_0 : i32, i32
  }
  func.func @transform_2(%arg0: i32) -> (i32, i32) {
    %c0_i32 = arith.constant 0 : i32
    %c0_i32_0 = arith.constant 0 : i32
    %c0_i32_1 = arith.constant 0 : i32
    return %c0_i32, %c0_i32_0 : i32, i32
  }
  func.func @transform_3(%arg0: i32) -> (i32, i32, i32) {
    %c0_i32 = arith.constant 0 : i32
    %c0_i32_0 = arith.constant 0 : i32
    %c0_i32_1 = arith.constant 0 : i32
    return %arg0, %c0_i32, %c0_i32_0 : i32, i32, i32
  }
}

module attributes {stable_mosaic.version = 11 : i64} {
  func.func @_mm_bias_act_kernel(%arg0: i32, %arg1: memref<2x3136xbf16, #tpu.memory_space<vmem>>, %arg2: memref<3136x512xbf16, #tpu.memory_space<vmem>>, %arg3: memref<1x512xf32, #tpu.memory_space<vmem>>, %arg4: memref<2x512xbf16, #tpu.memory_space<vmem>>) attributes {dimension_semantics = [#tpu.dimension_semantics<parallel>], iteration_bounds = array<i64: 4>, scalar_prefetch = 0 : i64, scratch_operands = 0 : i64, tpu.core_type = #tpu.core_type<tc>, window_params = [{pipeline_mode = #tpu.pipeline_mode<synchronous>, transform_indices = @transform_0, window_bounds = array<i64: 2, 3136>}, {transform_indices = @transform_1, window_bounds = array<i64: 3136, 512>}, {transform_indices = @transform_2, window_bounds = array<i64: 1, 512>}, {transform_indices = @transform_3, window_bounds = array<i64: 2, 512>}]} {
    %c0 = arith.constant 0 : index
    %c0_0 = arith.constant 0 : index
    %0 = vector.load %arg1[%c0, %c0_0] : memref<2x3136xbf16, #tpu.memory_space<vmem>>, vector<2x3136xbf16>
    %c0_1 = arith.constant 0 : index
    %c0_2 = arith.constant 0 : index
    %1 = vector.load %arg2[%c0_1, %c0_2] : memref<3136x512xbf16, #tpu.memory_space<vmem>>, vector<3136x512xbf16>
    %cst = arith.constant dense<0.000000e+00> : vector<2x512xf32>
    %2 = tpu.matmul %0, %1, %cst {dimension_numbers = #tpu.dot_dimension_numbers<[1], [0], [0], [1], [0, 0, 1, 1], [], []>} : vector<2x3136xbf16>, vector<3136x512xbf16>, vector<2x512xf32> -> vector<2x512xf32>
    %c0_3 = arith.constant 0 : index
    %c0_4 = arith.constant 0 : index
    %3 = vector.load %arg3[%c0_3, %c0_4] : memref<1x512xf32, #tpu.memory_space<vmem>>, vector<1x512xf32>
    %4 = vector.broadcast %3 : vector<1x512xf32> to vector<2x512xf32>
    %5 = arith.addf %2, %4 : vector<2x512xf32>
    %cst_5 = arith.constant 0.000000e+00 : f32
    %6 = vector.broadcast %cst_5 : f32 to vector<2x512xf32>
    %7 = arith.maximumf %5, %6 : vector<2x512xf32>
    %8 = arith.truncf %7 : vector<2x512xf32> to vector<2x512xbf16>
    %c0_6 = arith.constant 0 : index
    %c0_7 = arith.constant 0 : index
    %9 = vector.load %arg4[%c0_6, %c0_7] : memref<2x512xbf16, #tpu.memory_space<vmem>>, vector<2x512xbf16>
    tpu.vector_store %arg4[%c0_6, %c0_7], %8 {strides = array<i32>} : memref<2x512xbf16, #tpu.memory_space<vmem>>, vector<2x512xbf16>,
    return
  }
  func.func @transform_0(%arg0: i32) -> (i32, i32) {
    %c0_i32 = arith.constant 0 : i32
    %c0_i32_0 = arith.constant 0 : i32
    %c0_i32_1 = arith.constant 0 : i32
    return %c0_i32, %c0_i32_0 : i32, i32
  }
  func.func @transform_1(%arg0: i32) -> (i32, i32) {
    %c0_i32 = arith.constant 0 : i32
    %c0_i32_0 = arith.constant 0 : i32
    return %c0_i32, %arg0 : i32, i32
  }
  func.func @transform_2(%arg0: i32) -> (i32, i32) {
    %c0_i32 = arith.constant 0 : i32
    %c0_i32_0 = arith.constant 0 : i32
    return %c0_i32, %arg0 : i32, i32
  }
  func.func @transform_3(%arg0: i32) -> (i32, i32) {
    %c0_i32 = arith.constant 0 : i32
    %c0_i32_0 = arith.constant 0 : i32
    return %c0_i32, %arg0 : i32, i32
  }
}

module attributes {stable_mosaic.version = 11 : i64} {
  func.func @_mm_bias_act_kernel(%arg0: i32, %arg1: i32, %arg2: memref<2x1024xbf16, #tpu.memory_space<vmem>>, %arg3: memref<1x1024x512xbf16, #tpu.memory_space<vmem>>, %arg4: memref<1x1x512xf32, #tpu.memory_space<vmem>>, %arg5: memref<1x2x512xf32, #tpu.memory_space<vmem>>) attributes {dimension_semantics = [#tpu.dimension_semantics<parallel>, #tpu.dimension_semantics<parallel>], iteration_bounds = array<i64: 2, 2>, scalar_prefetch = 0 : i64, scratch_operands = 0 : i64, tpu.core_type = #tpu.core_type<tc>, window_params = [{transform_indices = @transform_0, window_bounds = array<i64: 2, 1024>}, {transform_indices = @transform_1, window_bounds = array<i64: 1, 1024, 512>}, {transform_indices = @transform_2, window_bounds = array<i64: 1, 1, 512>}, {transform_indices = @transform_3, window_bounds = array<i64: 1, 2, 512>}]} {
    %c0 = arith.constant 0 : index
    %c0_0 = arith.constant 0 : index
    %0 = vector.load %arg2[%c0, %c0_0] : memref<2x1024xbf16, #tpu.memory_space<vmem>>, vector<2x1024xbf16>
    %c0_1 = arith.constant 0 : index
    %c0_2 = arith.constant 0 : index
    %c0_3 = arith.constant 0 : index
    %1 = vector.load %arg3[%c0_1, %c0_2, %c0_3] : memref<1x1024x512xbf16, #tpu.memory_space<vmem>>, vector<1x1024x512xbf16>
    %2 = vector.shape_cast %1 : vector<1x1024x512xbf16> to vector<1024x512xbf16>
    %cst = arith.constant dense<0.000000e+00> : vector<2x512xf32>
    %3 = tpu.matmul %0, %2, %cst {dimension_numbers = #tpu.dot_dimension_numbers<[1], [0], [0], [1], [0, 0, 1, 1], [], []>} : vector<2x1024xbf16>, vector<1024x512xbf16>, vector<2x512xf32> -> vector<2x512xf32>
    %c0_4 = arith.constant 0 : index
    %c0_5 = arith.constant 0 : index
    %c0_6 = arith.constant 0 : index
    %4 = vector.load %arg4[%c0_4, %c0_5, %c0_6] : memref<1x1x512xf32, #tpu.memory_space<vmem>>, vector<1x1x512xf32>
    %5 = vector.shape_cast %4 : vector<1x1x512xf32> to vector<1x512xf32>
    %6 = vector.broadcast %5 : vector<1x512xf32> to vector<2x512xf32>
    %7 = arith.addf %3, %6 : vector<2x512xf32>
    %cst_7 = arith.constant 0.000000e+00 : f32
    %8 = vector.broadcast %cst_7 : f32 to vector<2x512xf32>
    %9 = arith.maximumf %7, %8 : vector<2x512xf32>
    %c0_8 = arith.constant 0 : index
    %c0_9 = arith.constant 0 : index
    %c0_10 = arith.constant 0 : index
    %10 = vector.load %arg5[%c0_8, %c0_9, %c0_10] : memref<1x2x512xf32, #tpu.memory_space<vmem>>, vector<1x2x512xf32>
    %11 = vector.shape_cast %10 : vector<1x2x512xf32> to vector<2x512xf32>
    %12 = vector.shape_cast %9 : vector<2x512xf32> to vector<1x2x512xf32>
    tpu.vector_store %arg5[%c0_8, %c0_9, %c0_10], %12 {strides = array<i32>} : memref<1x2x512xf32, #tpu.memory_space<vmem>>, vector<1x2x512xf32>,
    return
  }
  func.func @transform_0(%arg0: i32, %arg1: i32) -> (i32, i32) {
    %c0_i32 = arith.constant 0 : i32
    %c0_i32_0 = arith.constant 0 : i32
    return %c0_i32, %arg0 : i32, i32
  }
  func.func @transform_1(%arg0: i32, %arg1: i32) -> (i32, i32, i32) {
    %c0_i32 = arith.constant 0 : i32
    %c0_i32_0 = arith.constant 0 : i32
    return %arg0, %c0_i32, %arg1 : i32, i32, i32
  }
  func.func @transform_2(%arg0: i32, %arg1: i32) -> (i32, i32, i32) {
    %c0_i32 = arith.constant 0 : i32
    %c0_i32_0 = arith.constant 0 : i32
    return %arg0, %c0_i32, %arg1 : i32, i32, i32
  }
  func.func @transform_3(%arg0: i32, %arg1: i32) -> (i32, i32, i32) {
    %c0_i32 = arith.constant 0 : i32
    %c0_i32_0 = arith.constant 0 : i32
    return %arg0, %c0_i32, %arg1 : i32, i32, i32
  }
}

</mosaic_0001>

<bundles_post_ra>
// kernel: atari_net_forward.5
= control target key start
LH: loop header
LB: loop body
LE: loop exit
PB: predicated region body
PF: predicated region fallthrough
CT: control target
= control target key end

     0   :  { %s1578_s12 = smov 0   ;;  %s1806_s0 = inlined_call_operand.vmem [shape: bf16[2,400,64], index: 0, kind: input, shape index: {}]   ;;  %s1807_s1 = inlined_call_operand.vmem [shape: bf16[64,128], index: 1, kind: input, shape index: {}]   ;;  %s1808_s2 = inlined_call_operand.vmem [shape: f32[1,128], index: 2, kind: input, shape index: {}]   ;;  %s1809_s3 = inlined_call_operand.vmem [shape: bf16[2,400,128], index: 3, kind: output, shape index: {}]  }
   0x1 LB: > { %s1050_s13 = sadd.s32 4294967295, %s1554_s12   ;;  %p1054_p0 = scmp.ge.s32.totalorder %s1554_s12, 1  ;;  %s1554_s12 = sphi %s1578_s12, %s13_s12  }
   0x2   : > { %p137_p1 = scmp.lt.s32.totalorder %s1554_s12, 3 }
   0x4   : > { %p138_p2 = pnand %p1054_p0, %p137_p1 }
   0x5   : > { %v1519_v0 = vld [vmem:[%s1807_s1] sm:$0xff] (!%p138_p2)   ;;  %v1556_v1 = vmov (!%p138_p2), 0.0   ;;  %v1520_v2 = vld [vmem:[%s1807_s1 + $0x8] sm:$0xff] (!%p138_p2)   ;;  %p161_p3 = scmp.lt.s32.totalorder (!%p138_p2), %s1050_s13, 1  ;;  %vm1557_vm0 = vmmov (!%p138_p2), 0   ;;  %v1521_v3 = vld [vmem:[%s1807_s1 + $0x10] sm:$0xff] (!%p138_p2)  }
   0x6   : > { %141 = sbr.rel (%p138_p2) target bundleno = 339 (0x153), region = 32  ;;  %1392 = vmatprep.subr.bf16.mxu0 (!%p138_p2), %v1556_v1  ;;  %1500 = vmatprep.subr.bf16.mxu1 (!%p138_p2), %v1556_v1  ;;  %v1522_v4 = vld [vmem:[%s1807_s1 + $0x18] sm:$0xff] (!%p138_p2)   ;;  %vm386_vm1 = vcmask (!%p138_p2), 523264   ;;  %v1719_v30 = vld [vmem:[%s1808_s2] ss:$0 sm:$0xff] (!%p138_p2) }
   0x7   : > { %1393 = vmatpush3.bf16.msra.mxu0 (!%p138_p2), %v1519_v0  ;;  %1504 = vmatpush3.bf16.msra.mxu1 (!%p138_p2), %v1519_v0 }
   0x8   : > { %1394 = vmatprep.subr.bf16.mxu0 (!%p138_p2), %v1556_v1  ;;  %1501 = vmatprep.subr.bf16.mxu1 (!%p138_p2), %v1556_v1 }
   0x9   : > { %1400 = vmatprep.mubr.msk.bf16.mxu0 (!%p138_p2), %vm1557_vm0, %v1556_v1  ;;  %1452 = vmatprep.mubr.msk.bf16.mxu1 (!%p138_p2), %vm1557_vm0, %v1556_v1 }
   0xb   : > { %1395 = vmatpush3.bf16.msra.mxu0 (!%p138_p2), %v1520_v2  ;;  %1505 = vmatpush3.bf16.msra.mxu1 (!%p138_p2), %v1520_v2 }
   0xc   : > { %1396 = vmatprep.subr.bf16.mxu0 (!%p138_p2), %v1556_v1  ;;  %1502 = vmatprep.subr.bf16.mxu1 (!%p138_p2), %v1556_v1 }
   0xd   : > { %s1811_s13 = smov (!%p161_p3, %s1050_s13), 1 }
   0xe   : > { %s1508_s20 = smul.u32 200, %s1811_s13 }
   0xf   : > { %1397 = vmatpush3.bf16.msra.mxu0 %v1521_v3  ;;  %1506 = vmatpush3.bf16.msra.mxu1 %v1521_v3 }
  0x10   : > { %s1613_s23 = scalar_lea.vmem %s1806_s0, %s1508_s20  ;;  %1398 = vmatprep.subr.bf16.mxu0 %v1556_v1  ;;  %1503 = vmatprep.subr.bf16.mxu1 %v1556_v1  ;;  %s1730_s30 = scalar_lea.vmem %s1809_s3, %s1508_s20 }
  0x11   : > { %v1523_v5 = vld [vmem:[%s1613_s23] sm:$0xff]   ;;  %v1524_v6 = vld [vmem:[%s1613_s23 + $0x68] sm:$0xff]   ;;  %v1526_v8 = vld [vmem:[%s1613_s23 + $0x70] sm:$0xff]  }
  0x12   : > { %v1525_v7 = vld [vmem:[%s1613_s23 + $0x8] sm:$0xff]   ;;  %v1527_v9 = vld [vmem:[%s1613_s23 + $0x10] sm:$0xff]   ;;  %v1528_v10 = vld [vmem:[%s1613_s23 + $0x78] sm:$0xff]  }
  0x13   : > { %1399 = vmatpush3.bf16.msra.mxu0 %v1522_v4  ;;  %1507 = vmatpush3.bf16.msra.mxu1 %v1522_v4  ;;  %v1529_v11 = vld [vmem:[%s1613_s23 + $0x18] sm:$0xff]   ;;  %v1530_v12 = vld [vmem:[%s1613_s23 + $0x80] sm:$0xff]   ;;  %v1532_v14 = vld [vmem:[%s1613_s23 + $0x88] sm:$0xff]  }
  0x14   : > { %v1531_v13 = vld [vmem:[%s1613_s23 + $0x20] sm:$0xff]   ;;  %v1533_v15 = vld [vmem:[%s1613_s23 + $0x28] sm:$0xff]   ;;  %v1534_v16 = vld [vmem:[%s1613_s23 + $0x90] sm:$0xff]  }
  0x15   : > { %v1535_v17 = vld [vmem:[%s1613_s23 + $0x30] sm:$0xff]   ;;  %v1536_v18 = vld [vmem:[%s1613_s23 + $0x98] sm:$0xff]   ;;  %v1538_v20 = vld [vmem:[%s1613_s23 + $0xa0] sm:$0xff]  }
  0x16   : > { %1401 = vmatmul.mubr.msk.bf16.vlgmr.msra.gmra.mrb[0].mxu0 %vm386_vm1, %v1523_v5  ;;  %1453 = vmatmul.mubr.msk.bf16.vlgmr.msra.gmra.mrb[0].mxu1 %vm386_vm1, %v1524_v6  ;;  %v1537_v19 = vld [vmem:[%s1613_s23 + $0x38] sm:$0xff]   ;;  %v1539_v21 = vld [vmem:[%s1613_s23 + $0x40] sm:$0xff]   ;;  %v1540_v22 = vld [vmem:[%s1613_s23 + $0xa8] sm:$0xff]  }
  0x17   : > { %1404 = vmatprep.mubr.msk.bf16.mxu0 %vm1557_vm0, %v1556_v1  ;;  %1456 = vmatprep.mubr.msk.bf16.mxu1 %vm1557_vm0, %v1556_v1  ;;  %v1541_v23 = vld [vmem:[%s1613_s23 + $0x48] sm:$0xff]   ;;  %v1542_v24 = vld [vmem:[%s1613_s23 + $0xb0] sm:$0xff]   ;;  %v1544_v26 = vld [vmem:[%s1613_s23 + $0xb8] sm:$0xff]  }
  0x18   : > { %v1543_v25 = vld [vmem:[%s1613_s23 + $0x50] sm:$0xff]   ;;  %v1545_v27 = vld [vmem:[%s1613_s23 + $0x58] sm:$0xff]   ;;  %v1546_v28 = vld [vmem:[%s1613_s23 + $0xc0] sm:$0xff]  }
  0x19   : > { %v1547_v29 = vld [vmem:[%s1613_s23 + $0x60] sm:$0xff]  }
  0x1e   : > { %1405 = vmatmul.mubr.msk.bf16.gmra.mrb[4].mxu0 %vm386_vm1, %v1525_v7  ;;  %1457 = vmatmul.mubr.msk.bf16.gmra.mrb[4].mxu1 %vm386_vm1, %v1526_v8 }
  0x1f   : > { %1408 = vmatprep.mubr.msk.bf16.mxu0 %vm1557_vm0, %v1556_v1  ;;  %1460 = vmatprep.mubr.msk.bf16.mxu1 %vm1557_vm0, %v1556_v1 }
  0x26   : > { %1409 = vmatmul.mubr.msk.bf16.gmra.mrb[8].mxu0 %vm386_vm1, %v1527_v9  ;;  %1461 = vmatmul.mubr.msk.bf16.gmra.mrb[8].mxu1 %vm386_vm1, %v1528_v10 }
  0x27   : > { %1412 = vmatprep.mubr.msk.bf16.mxu0 %vm1557_vm0, %v1556_v1  ;;  %1464 = vmatprep.mubr.msk.bf16.mxu1 %vm1557_vm0, %v1556_v1 }
  0x2e   : > { %1413 = vmatmul.mubr.msk.bf16.gmra.mrb[12].mxu0 %vm386_vm1, %v1529_v11  ;;  %1465 = vmatmul.mubr.msk.bf16.gmra.mrb[12].mxu1 %vm386_vm1, %v1530_v12 }
  0x2f   : > { %1416 = vmatprep.mubr.msk.bf16.mxu0 %vm1557_vm0, %v1556_v1  ;;  %1468 = vmatprep.mubr.msk.bf16.mxu1 %vm1557_vm0, %v1556_v1 }
  0x36   : > { %1417 = vmatmul.mubr.msk.bf16.gmra.mrb[16].mxu0 %vm386_vm1, %v1531_v13  ;;  %1469 = vmatmul.mubr.msk.bf16.gmra.mrb[16].mxu1 %vm386_vm1, %v1532_v14 }
  0x37   : > { %1420 = vmatprep.mubr.msk.bf16.mxu0 %vm1557_vm0, %v1556_v1  ;;  %1472 = vmatprep.mubr.msk.bf16.mxu1 %vm1557_vm0, %v1556_v1 }
  0x3e   : > { %1421 = vmatmul.mubr.msk.bf16.gmra.mrb[20].mxu0 %vm386_vm1, %v1533_v15  ;;  %1473 = vmatmul.mubr.msk.bf16.gmra.mrb[20].mxu1 %vm386_vm1, %v1534_v16 }
  0x3f   : > { %1424 = vmatprep.mubr.msk.bf16.mxu0 %vm1557_vm0, %v1556_v1  ;;  %1476 = vmatprep.mubr.msk.bf16.mxu1 %vm1557_vm0, %v1556_v1 }
  0x46   : > { %1425 = vmatmul.mubr.msk.bf16.gmra.mrb[24].mxu0 %vm386_vm1, %v1535_v17  ;;  %1477 = vmatmul.mubr.msk.bf16.gmra.mrb[24].mxu1 %vm386_vm1, %v1536_v18 }
  0x47   : > { %1428 = vmatprep.mubr.msk.bf16.mxu0 %vm1557_vm0, %v1556_v1  ;;  %1480 = vmatprep.mubr.msk.bf16.mxu1 %vm1557_vm0, %v1556_v1 }
  0x4e   : > { %1429 = vmatmul.mubr.msk.bf16.gmra.mrb[28].mxu0 %vm386_vm1, %v1537_v19  ;;  %1481 = vmatmul.mubr.msk.bf16.gmra.mrb[28].mxu1 %vm386_vm1, %v1538_v20 }
  0x4f   : > { %1432 = vmatprep.mubr.msk.bf16.mxu0 %vm1557_vm0, %v1556_v1  ;;  %1484 = vmatprep.mubr.msk.bf16.mxu1 %vm1557_vm0, %v1556_v1 }
  0x56   : > { %1433 = vmatmul.mubr.msk.bf16.gmra.mrb[32].mxu0 %vm386_vm1, %v1539_v21  ;;  %1485 = vmatmul.mubr.msk.bf16.gmra.mrb[32].mxu1 %vm386_vm1, %v1540_v22 }
  0x57   : > { %1436 = vmatprep.mubr.msk.bf16.mxu0 %vm1557_vm0, %v1556_v1  ;;  %1488 = vmatprep.mubr.msk.bf16.mxu1 %vm1557_vm0, %v1556_v1 }
  0x5e   : > { %1437 = vmatmul.mubr.msk.bf16.gmra.mrb[36].mxu0 %vm386_vm1, %v1541_v23  ;;  %1489 = vmatmul.mubr.msk.bf16.gmra.mrb[36].mxu1 %vm386_vm1, %v1542_v24 }
  0x5f   : > { %1440 = vmatprep.mubr.msk.bf16.mxu0 %vm1557_vm0, %v1556_v1  ;;  %1492 = vmatprep.mubr.msk.bf16.mxu1 %vm1557_vm0, %v1556_v1 }
  0x66   : > { %1441 = vmatmul.mubr.msk.bf16.gmra.mrb[40].mxu0 %vm386_vm1, %v1543_v25  ;;  %1493 = vmatmul.mubr.msk.bf16.gmra.mrb[40].mxu1 %vm386_vm1, %v1544_v26 }
  0x67   : > { %1444 = vmatprep.mubr.msk.bf16.mxu0 %vm1557_vm0, %v1556_v1  ;;  %1496 = vmatprep.mubr.msk.bf16.mxu1 %vm1557_vm0, %v1556_v1 }
  0x6e   : > { %1445 = vmatmul.mubr.msk.bf16.gmra.mrb[44].mxu0 %vm386_vm1, %v1545_v27  ;;  %1497 = vmatmul.mubr.msk.bf16.gmra.mrb[44].mxu1 %vm386_vm1, %v1546_v28 }
  0x6f   : > { %1448 = vmatprep.mubr.msk.bf16.mxu0 %vm1557_vm0, %v1556_v1 }
  0x76   : > { %1449 = vmatmul.mubr.msk.bf16.gmra.mrb[48].mxu0 %vm386_vm1, %v1547_v29 }
  0xe9   : > { %v496_v31 = vpop.f32.mrb[0].mxu0  ;;  %v600_v32 = vpop.f32.mrb[0].mxu1 }
  0xea   : > { %v497_v33 = vadd.f32 %v1719_v30, %v496_v31  ;;  %v1402_v34 = vpop.f32.mrb[1].mxu0  ;;  %v601_v35 = vadd.f32 %v1719_v30, %v600_v32  ;;  %v1454_v36 = vpop.f32.mrb[1].mxu1 }
  0xeb   : > { %v499_v37 = vpop.f32.mrb[2].mxu0  ;;  %v603_v38 = vpop.f32.mrb[2].mxu1 }
  0xec   : > { %v500_v39 = vadd.f32 %v1719_v30, %v499_v37  ;;  %v1403_v40 = vpop.f32.mrb[3].mxu0  ;;  %v721_v41 = vmax.f32 %v601_v35, 0.0  ;;  %v604_v42 = vadd.f32 %v1719_v30, %v603_v38  ;;  %v1455_v43 = vpop.f32.mrb[3].mxu1  ;;  %v695_v44 = vmax.f32 %v497_v33, 0.0 }
  0xee   : > { %v696_v45 = vmax.f32 %v500_v39, 0.0  ;;  %v722_v46 = vmax.f32 %v604_v42, 0.0 }
  0xf0   : > { %v1217_v47 = vpack.c.bf16 %v696_v45, %v695_v44  ;;  %v1282_v48 = vpack.c.bf16 %v722_v46, %v721_v41 }
  0xf1   : > { %v504_v49 = vpop.f32.mrb[4].mxu0  ;;  %v608_v50 = vpop.f32.mrb[4].mxu1 }
  0xf2   : > { %1218 = vst [vmem:[%s1730_s30] sm:$0xff] %v1217_v47   ;;  %1351 = vst [vmem:[%s1730_s30 + $0x68] sm:$0xff] %v1282_v48   ;;  %v505_v51 = vadd.f32 %v1719_v30, %v504_v49  ;;  %v1406_v52 = vpop.f32.mrb[5].mxu0  ;;  %v609_v53 = vadd.f32 %v1719_v30, %v608_v50  ;;  %v1458_v54 = vpop.f32.mrb[5].mxu1 }
  0xf3   : > { %v507_v55 = vpop.f32.mrb[6].mxu0  ;;  %v611_v56 = vpop.f32.mrb[6].mxu1 }
  0xf4   : > { %v508_v57 = vadd.f32 %v1719_v30, %v507_v55  ;;  %v1407_v58 = vpop.f32.mrb[7].mxu0  ;;  %v723_v59 = vmax.f32 %v609_v53, 0.0  ;;  %v612_v60 = vadd.f32 %v1719_v30, %v611_v56  ;;  %v1459_v61 = vpop.f32.mrb[7].mxu1  ;;  %v697_v62 = vmax.f32 %v505_v51, 0.0 }
  0xf6   : > { %v698_v63 = vmax.f32 %v508_v57, 0.0  ;;  %v724_v0 = vmax.f32 %v612_v60, 0.0 }
  0xf8   : > { %v1222_v1 = vpack.c.bf16 %v698_v63, %v697_v62  ;;  %v1287_v2 = vpack.c.bf16 %v724_v0, %v723_v59 }
  0xf9   : > { %v512_v3 = vpop.f32.mrb[8].mxu0  ;;  %v616_v4 = vpop.f32.mrb[8].mxu1 }
  0xfa   : > { %1339 = vst [vmem:[%s1730_s30 + $0x8] sm:$0xff] %v1222_v1   ;;  %1352 = vst [vmem:[%s1730_s30 + $0x70] sm:$0xff] %v1287_v2   ;;  %v513_v5 = vadd.f32 %v1719_v30, %v512_v3  ;;  %v1410_v6 = vpop.f32.mrb[9].mxu0  ;;  %v617_v7 = vadd.f32 %v1719_v30, %v616_v4  ;;  %v1462_v8 = vpop.f32.mrb[9].mxu1 }
  0xfb   : > { %v515_v9 = vpop.f32.mrb[10].mxu0  ;;  %v619_v10 = vpop.f32.mrb[10].mxu1 }
  0xfc   : > { %v516_v11 = vadd.f32 %v1719_v30, %v515_v9  ;;  %v1411_v12 = vpop.f32.mrb[11].mxu0  ;;  %v725_v13 = vmax.f32 %v617_v7, 0.0  ;;  %v620_v14 = vadd.f32 %v1719_v30, %v619_v10  ;;  %v1463_v15 = vpop.f32.mrb[11].mxu1  ;;  %v699_v16 = vmax.f32 %v513_v5, 0.0 }
  0xfe   : > { %v700_v17 = vmax.f32 %v516_v11, 0.0  ;;  %v726_v18 = vmax.f32 %v620_v14, 0.0 }
 0x100   : > { %v1227_v19 = vpack.c.bf16 %v700_v17, %v699_v16  ;;  %v1292_v20 = vpack.c.bf16 %v726_v18, %v725_v13 }
 0x101   : > { %v520_v21 = vpop.f32.mrb[12].mxu0  ;;  %v624_v22 = vpop.f32.mrb[12].mxu1 }
 0x102   : > { %1340 = vst [vmem:[%s1730_s30 + $0x10] sm:$0xff] %v1227_v19   ;;  %1353 = vst [vmem:[%s1730_s30 + $0x78] sm:$0xff] %v1292_v20   ;;  %v521_v23 = vadd.f32 %v1719_v30, %v520_v21  ;;  %v1414_v24 = vpop.f32.mrb[13].mxu0  ;;  %v625_v25 = vadd.f32 %v1719_v30, %v624_v22  ;;  %v1466_v26 = vpop.f32.mrb[13].mxu1 }
 0x103   : > { %v523_v27 = vpop.f32.mrb[14].mxu0  ;;  %v627_v28 = vpop.f32.mrb[14].mxu1 }
 0x104   : > { %v524_v29 = vadd.f32 %v1719_v30, %v523_v27  ;;  %v1415_v31 = vpop.f32.mrb[15].mxu0  ;;  %v727_v32 = vmax.f32 %v625_v25, 0.0  ;;  %v628_v33 = vadd.f32 %v1719_v30, %v627_v28  ;;  %v1467_v34 = vpop.f32.mrb[15].mxu1  ;;  %v701_v35 = vmax.f32 %v521_v23, 0.0 }
 0x106   : > { %v702_v36 = vmax.f32 %v524_v29, 0.0  ;;  %v728_v37 = vmax.f32 %v628_v33, 0.0 }
 0x108   : > { %v1232_v38 = vpack.c.bf16 %v702_v36, %v701_v35  ;;  %v1297_v39 = vpack.c.bf16 %v728_v37, %v727_v32 }
 0x109   : > { %v528_v40 = vpop.f32.mrb[16].mxu0  ;;  %v632_v41 = vpop.f32.mrb[16].mxu1 }
 0x10a   : > { %1341 = vst [vmem:[%s1730_s30 + $0x18] sm:$0xff] %v1232_v38   ;;  %1354 = vst [vmem:[%s1730_s30 + $0x80] sm:$0xff] %v1297_v39   ;;  %v529_v42 = vadd.f32 %v1719_v30, %v528_v40  ;;  %v1418_v43 = vpop.f32.mrb[17].mxu0  ;;  %v633_v44 = vadd.f32 %v1719_v30, %v632_v41  ;;  %v1470_v45 = vpop.f32.mrb[17].mxu1 }
 0x10b   : > { %v531_v46 = vpop.f32.mrb[18].mxu0  ;;  %v635_v47 = vpop.f32.mrb[18].mxu1 }
 0x10c   : > { %v532_v48 = vadd.f32 %v1719_v30, %v531_v46  ;;  %v1419_v49 = vpop.f32.mrb[19].mxu0  ;;  %v729_v50 = vmax.f32 %v633_v44, 0.0  ;;  %v636_v51 = vadd.f32 %v1719_v30, %v635_v47  ;;  %v1471_v52 = vpop.f32.mrb[19].mxu1  ;;  %v703_v53 = vmax.f32 %v529_v42, 0.0 }
 0x10e   : > { %v704_v54 = vmax.f32 %v532_v48, 0.0  ;;  %v730_v55 = vmax.f32 %v636_v51, 0.0 }
 0x110   : > { %v1237_v56 = vpack.c.bf16 %v704_v54, %v703_v53  ;;  %v1302_v57 = vpack.c.bf16 %v730_v55, %v729_v50 }
 0x111   : > { %v536_v58 = vpop.f32.mrb[20].mxu0  ;;  %v640_v59 = vpop.f32.mrb[20].mxu1 }
 0x112   : > { %1342 = vst [vmem:[%s1730_s30 + $0x20] sm:$0xff] %v1237_v56   ;;  %1355 = vst [vmem:[%s1730_s30 + $0x88] sm:$0xff] %v1302_v57   ;;  %v537_v60 = vadd.f32 %v1719_v30, %v536_v58  ;;  %v1422_v61 = vpop.f32.mrb[21].mxu0  ;;  %v641_v62 = vadd.f32 %v1719_v30, %v640_v59  ;;  %v1474_v63 = vpop.f32.mrb[21].mxu1 }
 0x113   : > { %v539_v0 = vpop.f32.mrb[22].mxu0  ;;  %v643_v1 = vpop.f32.mrb[22].mxu1 }
 0x114   : > { %v540_v2 = vadd.f32 %v1719_v30, %v539_v0  ;;  %v1423_v3 = vpop.f32.mrb[23].mxu0  ;;  %v731_v4 = vmax.f32 %v641_v62, 0.0  ;;  %v644_v5 = vadd.f32 %v1719_v30, %v643_v1  ;;  %v1475_v6 = vpop.f32.mrb[23].mxu1  ;;  %v705_v7 = vmax.f32 %v537_v60, 0.0 }
 0x116   : > { %v706_v8 = vmax.f32 %v540_v2, 0.0  ;;  %v732_v9 = vmax.f32 %v644_v5, 0.0 }
 0x118   : > { %v1242_v10 = vpack.c.bf16 %v706_v8, %v705_v7  ;;  %v1307_v11 = vpack.c.bf16 %v732_v9, %v731_v4 }
 0x119   : > { %v544_v12 = vpop.f32.mrb[24].mxu0  ;;  %v648_v13 = vpop.f32.mrb[24].mxu1 }
 0x11a   : > { %1343 = vst [vmem:[%s1730_s30 + $0x28] sm:$0xff] %v1242_v10   ;;  %1356 = vst [vmem:[%s1730_s30 + $0x90] sm:$0xff] %v1307_v11   ;;  %v545_v14 = vadd.f32 %v1719_v30, %v544_v12  ;;  %v1426_v15 = vpop.f32.mrb[25].mxu0  ;;  %v649_v16 = vadd.f32 %v1719_v30, %v648_v13  ;;  %v1478_v17 = vpop.f32.mrb[25].mxu1 }
 0x11b   : > { %v547_v18 = vpop.f32.mrb[26].mxu0  ;;  %v651_v19 = vpop.f32.mrb[26].mxu1 }
 0x11c   : > { %v548_v20 = vadd.f32 %v1719_v30, %v547_v18  ;;  %v1427_v21 = vpop.f32.mrb[27].mxu0  ;;  %v733_v22 = vmax.f32 %v649_v16, 0.0  ;;  %v652_v23 = vadd.f32 %v1719_v30, %v651_v19  ;;  %v1479_v24 = vpop.f32.mrb[27].mxu1  ;;  %v707_v25 = vmax.f32 %v545_v14, 0.0 }
 0x11e   : > { %v708_v26 = vmax.f32 %v548_v20, 0.0  ;;  %v734_v27 = vmax.f32 %v652_v23, 0.0 }
 0x120   : > { %v1247_v28 = vpack.c.bf16 %v708_v26, %v707_v25  ;;  %v1312_v29 = vpack.c.bf16 %v734_v27, %v733_v22 }
 0x121   : > { %v552_v31 = vpop.f32.mrb[28].mxu0  ;;  %v656_v32 = vpop.f32.mrb[28].mxu1 }
 0x122   : > { %1344 = vst [vmem:[%s1730_s30 + $0x30] sm:$0xff] %v1247_v28   ;;  %1357 = vst [vmem:[%s1730_s30 + $0x98] sm:$0xff] %v1312_v29   ;;  %v553_v33 = vadd.f32 %v1719_v30, %v552_v31  ;;  %v1430_v34 = vpop.f32.mrb[29].mxu0  ;;  %v657_v35 = vadd.f32 %v1719_v30, %v656_v32  ;;  %v1482_v36 = vpop.f32.mrb[29].mxu1 }
 0x123   : > { %v555_v37 = vpop.f32.mrb[30].mxu0  ;;  %v659_v38 = vpop.f32.mrb[30].mxu1 }
 0x124   : > { %v556_v39 = vadd.f32 %v1719_v30, %v555_v37  ;;  %v1431_v40 = vpop.f32.mrb[31].mxu0  ;;  %v735_v41 = vmax.f32 %v657_v35, 0.0  ;;  %v660_v42 = vadd.f32 %v1719_v30, %v659_v38  ;;  %v1483_v43 = vpop.f32.mrb[31].mxu1  ;;  %v709_v44 = vmax.f32 %v553_v33, 0.0 }
 0x126   : > { %v710_v45 = vmax.f32 %v556_v39, 0.0  ;;  %v736_v46 = vmax.f32 %v660_v42, 0.0 }
 0x128   : > { %v1252_v47 = vpack.c.bf16 %v710_v45, %v709_v44  ;;  %v1317_v48 = vpack.c.bf16 %v736_v46, %v735_v41 }
 0x129   : > { %v560_v49 = vpop.f32.mrb[32].mxu0  ;;  %v664_v50 = vpop.f32.mrb[32].mxu1 }
 0x12a   : > { %1345 = vst [vmem:[%s1730_s30 + $0x38] sm:$0xff] %v1252_v47   ;;  %1358 = vst [vmem:[%s1730_s30 + $0xa0] sm:$0xff] %v1317_v48   ;;  %v561_v51 = vadd.f32 %v1719_v30, %v560_v49  ;;  %v1434_v52 = vpop.f32.mrb[33].mxu0  ;;  %v665_v53 = vadd.f32 %v1719_v30, %v664_v50  ;;  %v1486_v54 = vpop.f32.mrb[33].mxu1 }
 0x12b   : > { %v563_v55 = vpop.f32.mrb[34].mxu0  ;;  %v667_v56 = vpop.f32.mrb[34].mxu1 }
 0x12c   : > { %v564_v57 = vadd.f32 %v1719_v30, %v563_v55  ;;  %v1435_v58 = vpop.f32.mrb[35].mxu0  ;;  %v737_v59 = vmax.f32 %v665_v53, 0.0  ;;  %v668_v60 = vadd.f32 %v1719_v30, %v667_v56  ;;  %v1487_v61 = vpop.f32.mrb[35].mxu1  ;;  %v711_v62 = vmax.f32 %v561_v51, 0.0 }
 0x12e   : > { %v712_v63 = vmax.f32 %v564_v57, 0.0  ;;  %v738_v0 = vmax.f32 %v668_v60, 0.0 }
 0x130   : > { %v1257_v1 = vpack.c.bf16 %v712_v63, %v711_v62  ;;  %v1322_v2 = vpack.c.bf16 %v738_v0, %v737_v59 }
 0x131   : > { %v568_v3 = vpop.f32.mrb[36].mxu0  ;;  %v672_v4 = vpop.f32.mrb[36].mxu1 }
 0x132   : > { %1346 = vst [vmem:[%s1730_s30 + $0x40] sm:$0xff] %v1257_v1   ;;  %1359 = vst [vmem:[%s1730_s30 + $0xa8] sm:$0xff] %v1322_v2   ;;  %v569_v5 = vadd.f32 %v1719_v30, %v568_v3  ;;  %v1438_v6 = vpop.f32.mrb[37].mxu0  ;;  %v673_v7 = vadd.f32 %v1719_v30, %v672_v4  ;;  %v1490_v8 = vpop.f32.mrb[37].mxu1 }
 0x133   : > { %v571_v9 = vpop.f32.mrb[38].mxu0  ;;  %v675_v10 = vpop.f32.mrb[38].mxu1 }
 0x134   : > { %v572_v11 = vadd.f32 %v1719_v30, %v571_v9  ;;  %v1439_v12 = vpop.f32.mrb[39].mxu0  ;;  %v739_v13 = vmax.f32 %v673_v7, 0.0  ;;  %v676_v14 = vadd.f32 %v1719_v30, %v675_v10  ;;  %v1491_v15 = vpop.f32.mrb[39].mxu1  ;;  %v713_v16 = vmax.f32 %v569_v5, 0.0 }
 0x136   : > { %v714_v17 = vmax.f32 %v572_v11, 0.0  ;;  %v740_v18 = vmax.f32 %v676_v14, 0.0 }
 0x138   : > { %v1262_v19 = vpack.c.bf16 %v714_v17, %v713_v16  ;;  %v1327_v20 = vpack.c.bf16 %v740_v18, %v739_v13 }
 0x139   : > { %v576_v21 = vpop.f32.mrb[40].mxu0  ;;  %v680_v22 = vpop.f32.mrb[40].mxu1 }
 0x13a   : > { %1347 = vst [vmem:[%s1730_s30 + $0x48] sm:$0xff] %v1262_v19   ;;  %1360 = vst [vmem:[%s1730_s30 + $0xb0] sm:$0xff] %v1327_v20   ;;  %v577_v23 = vadd.f32 %v1719_v30, %v576_v21  ;;  %v1442_v24 = vpop.f32.mrb[41].mxu0  ;;  %v681_v25 = vadd.f32 %v1719_v30, %v680_v22  ;;  %v1494_v26 = vpop.f32.mrb[41].mxu1 }
 0x13b   : > { %v579_v27 = vpop.f32.mrb[42].mxu0  ;;  %v683_v28 = vpop.f32.mrb[42].mxu1 }
 0x13c   : > { %v580_v29 = vadd.f32 %v1719_v30, %v579_v27  ;;  %v1443_v31 = vpop.f32.mrb[43].mxu0  ;;  %v741_v32 = vmax.f32 %v681_v25, 0.0  ;;  %v684_v33 = vadd.f32 %v1719_v30, %v683_v28  ;;  %v1495_v34 = vpop.f32.mrb[43].mxu1  ;;  %v715_v35 = vmax.f32 %v577_v23, 0.0 }
 0x13e   : > { %v716_v36 = vmax.f32 %v580_v29, 0.0  ;;  %v742_v37 = vmax.f32 %v684_v33, 0.0 }
 0x140   : > { %v1267_v38 = vpack.c.bf16 %v716_v36, %v715_v35  ;;  %v1332_v39 = vpack.c.bf16 %v742_v37, %v741_v32 }
 0x141   : > { %v584_v40 = vpop.f32.mrb[44].mxu0  ;;  %v688_v41 = vpop.f32.mrb[44].mxu1 }
 0x142   : > { %1348 = vst [vmem:[%s1730_s30 + $0x50] sm:$0xff] %v1267_v38   ;;  %1361 = vst [vmem:[%s1730_s30 + $0xb8] sm:$0xff] %v1332_v39   ;;  %v585_v42 = vadd.f32 %v1719_v30, %v584_v40  ;;  %v1446_v43 = vpop.f32.mrb[45].mxu0  ;;  %v689_v44 = vadd.f32 %v1719_v30, %v688_v41  ;;  %v1498_v45 = vpop.f32.mrb[45].mxu1 }
 0x143   : > { %v587_v46 = vpop.f32.mrb[46].mxu0  ;;  %v691_v47 = vpop.f32.mrb[46].mxu1 }
 0x144   : > { %v588_v48 = vadd.f32 %v1719_v30, %v587_v46  ;;  %v1447_v49 = vpop.f32.mrb[47].mxu0  ;;  %v743_v50 = vmax.f32 %v689_v44, 0.0  ;;  %v692_v51 = vadd.f32 %v1719_v30, %v691_v47  ;;  %v1499_v52 = vpop.f32.mrb[47].mxu1  ;;  %v717_v53 = vmax.f32 %v585_v42, 0.0 }
 0x146   : > { %v718_v54 = vmax.f32 %v588_v48, 0.0  ;;  %v744_v55 = vmax.f32 %v692_v51, 0.0 }
 0x148   : > { %v1272_v56 = vpack.c.bf16 %v718_v54, %v717_v53  ;;  %v1337_v57 = vpack.c.bf16 %v744_v55, %v743_v50 }
 0x149   : > { %v592_v58 = vpop.f32.mrb[48].mxu0 }
 0x14a   : > { %1349 = vst [vmem:[%s1730_s30 + $0x58] sm:$0xff] %v1272_v56   ;;  %1362 = vst [vmem:[%s1730_s30 + $0xc0] sm:$0xff] %v1337_v57   ;;  %v593_v59 = vadd.f32 %v1719_v30, %v592_v58  ;;  %v1450_v60 = vpop.f32.mrb[49].mxu0 }
 0x14b   : > { %v595_v61 = vpop.f32.mrb[50].mxu0 }
 0x14c   : > { %v596_v62 = vadd.f32 %v1719_v30, %v595_v61  ;;  %v1451_v63 = vpop.f32.mrb[51].mxu0  ;;  %v719_v0 = vmax.f32 %v593_v59, 0.0 }
 0x14e   : > { %v720_v1 = vmax.f32 %v596_v62, 0.0 }
 0x150   : > { %v1277_v2 = vpack.c.bf16 %v720_v1, %v719_v0 }
 0x152   : > { %1350 = vst [vmem:[%s1730_s30 + $0x60] sm:$0xff] %v1277_v2  }
 0x153 PF: > { %s13_s12 = sadd.s32 1, %s1554_s12  }
 0x154   : > { %p10_p4 = scmp.ge.s32.totalorder %s13_s12, 4  }
 0x156   :  { %12 = sbr.rel (!%p10_p4) target bundleno = 1 (0x1), region = 62 }

// kernel: atari_net_forward.6
= control target key start
LH: loop header
LB: loop body
LE: loop exit
PB: predicated region body
PF: predicated region fallthrough
CT: control target
= control target key end

     0   :  { %s3397_s12 = smov 0   ;;  %s4020_s0 = inlined_call_operand.vmem [shape: bf16[2,81,2048], index: 0, kind: input, shape index: {}]   ;;  %s4021_s1 = inlined_call_operand.vmem [shape: bf16[2048,128], index: 1, kind: input, shape index: {}]   ;;  %s4022_s2 = inlined_call_operand.vmem [shape: f32[1,128], index: 2, kind: input, shape index: {}]   ;;  %s4023_s3 = inlined_call_operand.vmem [shape: bf16[2,81,128], index: 3, kind: output, shape index: {}]  }
   0x1 LB: > { %s2514_s13 = sadd.s32 4294967295, %s3375_s12   ;;  %p2518_p0 = scmp.ge.s32.totalorder %s3375_s12, 1  ;;  %s3375_s12 = sphi %s3397_s12, %s13_s12  }
   0x2   : > { %p137_p1 = scmp.lt.s32.totalorder %s3375_s12, 3 }
   0x4   : > { %p138_p2 = pnand %p2518_p0, %p137_p1 }
   0x5   : > { %v3225_v0 = vld [vmem:[%s4021_s1 + $0x40] sm:$0xff] (!%p138_p2)   ;;  %v3229_v4 = vld [vmem:[%s4021_s1 + $0x48] sm:$0xff] (!%p138_p2)   ;;  %v3233_v8 = vld [vmem:[%s4021_s1 + $0x50] sm:$0xff] (!%p138_p2)   ;;  %p161_p3 = scmp.lt.s32.totalorder (!%p138_p2), %s2514_s13, 1  ;;  %vm2453_vm0 = vcmask (!%p138_p2), 1040384  }
   0x6   : > { %141 = sbr.rel (%p138_p2) target bundleno = 448 (0x1c0), region = 32  ;;  %v3226_v1 = vld [vmem:[%s4021_s1 + $0xc0] sm:$0xff] (!%p138_p2)   ;;  %2799 = vmatprep.subr.bf16.mxu0 (!%p138_p2), %v3225_v0  ;;  %v3230_v5 = vld [vmem:[%s4021_s1 + $0xc8] sm:$0xff] (!%p138_p2)   ;;  %v3234_v9 = vld [vmem:[%s4021_s1 + $0xd0] sm:$0xff] (!%p138_p2)   ;;  %vm2454_vm1 = vsmask.f32 (!%p138_p2), 256 }
   0x7   : > { %v3227_v2 = vld [vmem:[%s4021_s1] sm:$0xff] (!%p138_p2)   ;;  %2851 = vmatprep.subr.bf16.mxu1 (!%p138_p2), %v3226_v1  ;;  %v3231_v6 = vld [vmem:[%s4021_s1 + $0x8] sm:$0xff] (!%p138_p2)   ;;  %v3235_v10 = vld [vmem:[%s4021_s1 + $0x10] sm:$0xff] (!%p138_p2)  }
   0x8   : > { %v3228_v3 = vld [vmem:[%s4021_s1 + $0x80] sm:$0xff] (!%p138_p2)   ;;  %2800 = vmatpush3.bf16.msra.mxu0 (!%p138_p2), %v3227_v2  ;;  %v3232_v7 = vld [vmem:[%s4021_s1 + $0x88] sm:$0xff] (!%p138_p2)   ;;  %v3236_v11 = vld [vmem:[%s4021_s1 + $0x90] sm:$0xff] (!%p138_p2)  }
   0x9   : > { %2852 = vmatpush3.bf16.msra.mxu1 (!%p138_p2), %v3228_v3  ;;  %2801 = vmatprep.subr.bf16.mxu0 (!%p138_p2), %v3229_v4  ;;  %v3237_v12 = vld [vmem:[%s4021_s1 + $0x58] sm:$0xff] (!%p138_p2)   ;;  %v3241_v16 = vld [vmem:[%s4021_s1 + $0x60] sm:$0xff] (!%p138_p2)   ;;  %v3245_v20 = vld [vmem:[%s4021_s1 + $0x68] sm:$0xff] (!%p138_p2)  }
   0xa   : > { %2853 = vmatprep.subr.bf16.mxu1 (!%p138_p2), %v3230_v5  ;;  %v3238_v13 = vld [vmem:[%s4021_s1 + $0xd8] sm:$0xff] (!%p138_p2)   ;;  %v3242_v17 = vld [vmem:[%s4021_s1 + $0xe0] sm:$0xff] (!%p138_p2)   ;;  %v3246_v21 = vld [vmem:[%s4021_s1 + $0xe8] sm:$0xff] (!%p138_p2)  }
   0xb   : > { %v3239_v14 = vld [vmem:[%s4021_s1 + $0x18] sm:$0xff] (!%p138_p2)   ;;  %v3243_v18 = vld [vmem:[%s4021_s1 + $0x20] sm:$0xff] (!%p138_p2)   ;;  %v3247_v22 = vld [vmem:[%s4021_s1 + $0x28] sm:$0xff] (!%p138_p2)  }
   0xc   : > { %2802 = vmatpush3.bf16.msra.mxu0 (!%p138_p2), %v3231_v6  ;;  %v3240_v15 = vld [vmem:[%s4021_s1 + $0x98] sm:$0xff] (!%p138_p2)   ;;  %v3244_v19 = vld [vmem:[%s4021_s1 + $0xa0] sm:$0xff] (!%p138_p2)   ;;  %v3248_v23 = vld [vmem:[%s4021_s1 + $0xa8] sm:$0xff] (!%p138_p2)  }
   0xd   : > { %2854 = vmatpush3.bf16.msra.mxu1 %v3232_v7  ;;  %2803 = vmatprep.subr.bf16.mxu0 %v3233_v8  ;;  %s4025_s13 = smov (!%p161_p3, %s2514_s13), 1  ;;  %v3249_v24 = vld [vmem:[%s4021_s1 + $0x70] sm:$0xff]   ;;  %v3253_v28 = vld [vmem:[%s4021_s1 + $0x78] sm:$0xff]   ;;  %v3257_v40 = vld [vmem:[%s4021_s1 + $0x140] sm:$0xff]  }
   0xe   : > { %2855 = vmatprep.subr.bf16.mxu1 %v3234_v9  ;;  %v3250_v25 = vld [vmem:[%s4021_s1 + $0xf0] sm:$0xff]   ;;  %s3215_s16 = smul.u32 704, %s4025_s13  ;;  %v3254_v29 = vld [vmem:[%s4021_s1 + $0xf8] sm:$0xff]   ;;  %v3258_v41 = vld [vmem:[%s4021_s1 + $0x100] sm:$0xff]  }
   0xf   : > { %v3251_v26 = vld [vmem:[%s4021_s1 + $0x30] sm:$0xff]   ;;  %v3255_v30 = vld [vmem:[%s4021_s1 + $0x38] sm:$0xff]   ;;  %v3259_v42 = vld [vmem:[%s4021_s1 + $0x1c0] sm:$0xff]  }
  0x10   : > { %2804 = vmatpush3.bf16.msra.mxu0 %v3235_v10  ;;  %v3252_v27 = vld [vmem:[%s4021_s1 + $0xb0] sm:$0xff]   ;;  %s3505_s27 = scalar_lea.vmem %s4020_s0, %s3215_s16  ;;  %v3256_v31 = vld [vmem:[%s4021_s1 + $0xb8] sm:$0xff]   ;;  %v3260_v43 = vld [vmem:[%s4021_s1 + $0x180] sm:$0xff]  }
  0x11   : > { %2856 = vmatpush3.bf16.msra.mxu1 %v3236_v11  ;;  %2805 = vmatprep.subr.bf16.mxu0 %v3237_v12  ;;  %v172_v32 = vld [vmem:[%s3505_s27] sm:$0xff]  ;;  %v173_v34 = vld [vmem:[%s3505_s27 + $0x8] sm:$0xff]  ;;  %v3265_v56 = vld [vmem:[%s4021_s1 + $0x150] sm:$0xff]  }
  0x12   : > { %2857 = vmatprep.subr.bf16.mxu1 %v3238_v13  ;;  %v180_v33 = vld [vmem:[%s3505_s27 + $0x40] sm:$0xff]  ;;  %v181_v37 = vld [vmem:[%s3505_s27 + $0x48] sm:$0xff]  ;;  %v3266_v57 = vld [vmem:[%s4021_s1 + $0x110] sm:$0xff]  }
  0x13   : > { %v2522_v35 = vcombine.low %v172_v32, %v180_v33  ;;  %v2523_v36 = vcombine.high %v172_v32, %v180_v33  ;;  %v2524_v38 = vcombine.low %v173_v34, %v181_v37  ;;  %v2525_v39 = vcombine.high %v173_v34, %v181_v37  ;;  %v3261_v44 = vld [vmem:[%s4021_s1 + $0x148] sm:$0xff]   ;;  %v188_v45 = vld [vmem:[%s3505_s27 + $0x80] sm:$0xff]  ;;  %v3267_v58 = vld [vmem:[%s4021_s1 + $0x1d0] sm:$0xff]  }
  0x14   : > { %2806 = vmatpush3.bf16.msra.mxu0 %v3239_v14  ;;  %v196_v46 = vld [vmem:[%s3505_s27 + $0xc0] sm:$0xff]  ;;  %v189_v48 = vld [vmem:[%s3505_s27 + $0x88] sm:$0xff]  ;;  %v3268_v1 = vld [vmem:[%s4021_s1 + $0x190] sm:$0xff]  }
  0x15   : > { %2858 = vmatpush3.bf16.msra.mxu1 %v3240_v15  ;;  %2807 = vmatprep.subr.bf16.mxu0 %v3241_v16  ;;  %v2539_v47 = vcombine.high %v188_v45, %v196_v46  ;;  %v197_v49 = vld [vmem:[%s3505_s27 + $0xc8] sm:$0xff]  ;;  %v2538_v52 = vcombine.low %v188_v45, %v196_v46  ;;  %v204_v59 = vld [vmem:[%s3505_s27 + $0x100] sm:$0xff]  ;;  %v3269_v3 = vld [vmem:[%s4021_s1 + $0x158] sm:$0xff]  }
  0x16   : > { %2859 = vmatprep.subr.bf16.mxu1 %v3242_v17  ;;  %1779 = vmatprep.mubr.bf16.mxu0 %v2523_v36  ;;  %v2541_v50 = vcombine.high %v189_v48, %v197_v49  ;;  %v3262_v51 = vld [vmem:[%s4021_s1 + $0x108] sm:$0xff]   ;;  %v2540_v53 = vcombine.low %v189_v48, %v197_v49  ;;  %v212_v60 = vld [vmem:[%s3505_s27 + $0x140] sm:$0xff]  ;;  %v3270_v5 = vld [vmem:[%s4021_s1 + $0x118] sm:$0xff]  }
  0x17   : > { %1859 = vmatprep.mubr.bf16.mxu1 %v2525_v39  ;;  %v3263_v54 = vld [vmem:[%s4021_s1 + $0x1c8] sm:$0xff]   ;;  %v2555_v63 = vcombine.high %v204_v59, %v212_v60  ;;  %v2554_v2 = vcombine.low %v204_v59, %v212_v60  ;;  %v3271_v6 = vld [vmem:[%s4021_s1 + $0x1d8] sm:$0xff]   ;;  %v220_v8 = vld [vmem:[%s3505_s27 + $0x180] sm:$0xff] }
  0x18   : > { %2808 = vmatpush3.bf16.msra.mxu0 %v3243_v18  ;;  %v3264_v55 = vld [vmem:[%s4021_s1 + $0x188] sm:$0xff]   ;;  %v3272_v7 = vld [vmem:[%s4021_s1 + $0x198] sm:$0xff]   ;;  %v228_v9 = vld [vmem:[%s3505_s27 + $0x1c0] sm:$0xff] }
  0x19   : > { %2860 = vmatpush3.bf16.msra.mxu1 %v3244_v19  ;;  %2809 = vmatprep.subr.bf16.mxu0 %v3245_v20  ;;  %v205_v61 = vld [vmem:[%s3505_s27 + $0x108] sm:$0xff]  ;;  %v2571_v11 = vcombine.high %v220_v8, %v228_v9  ;;  %v3273_v14 = vld [vmem:[%s4021_s1 + $0x160] sm:$0xff]   ;;  %v2570_v16 = vcombine.low %v220_v8, %v228_v9  ;;  %v3282_v32 = vld [vmem:[%s4021_s1 + $0x130] sm:$0xff]  }
  0x1a   : > { %2861 = vmatprep.subr.bf16.mxu1 %v3246_v21  ;;  %v213_v62 = vld [vmem:[%s3505_s27 + $0x148] sm:$0xff]  ;;  %v3274_v15 = vld [vmem:[%s4021_s1 + $0x120] sm:$0xff]   ;;  %v3283_v34 = vld [vmem:[%s4021_s1 + $0x1f0] sm:$0xff]  }
  0x1b   : > { %v2557_v0 = vcombine.high %v205_v61, %v213_v62  ;;  %v2556_v4 = vcombine.low %v205_v61, %v213_v62  ;;  %v221_v10 = vld [vmem:[%s3505_s27 + $0x188] sm:$0xff]  ;;  %v3275_v17 = vld [vmem:[%s4021_s1 + $0x1e0] sm:$0xff]   ;;  %v3286_v39 = vld [vmem:[%s4021_s1 + $0x1b0] sm:$0xff]  }
  0x1c   : > { %2810 = vmatpush3.bf16.msra.mxu0 %v3247_v22  ;;  %v229_v12 = vld [vmem:[%s3505_s27 + $0x1c8] sm:$0xff]  ;;  %v3276_v19 = vld [vmem:[%s4021_s1 + $0x1a0] sm:$0xff]   ;;  %v182_v45 = vld [vmem:[%s3505_s27 + $0x50] sm:$0xff] }
  0x1d   : > { %2862 = vmatpush3.bf16.msra.mxu1 %v3248_v23  ;;  %2811 = vmatprep.subr.bf16.mxu0 %v3249_v24  ;;  %v2573_v13 = vcombine.high %v221_v10, %v229_v12  ;;  %v2572_v18 = vcombine.low %v221_v10, %v229_v12  ;;  %v3277_v20 = vld [vmem:[%s4021_s1 + $0x168] sm:$0xff]   ;;  %v236_v21 = vld [vmem:[%s3505_s27 + $0x200] sm:$0xff]  ;;  %v183_v48 = vld [vmem:[%s3505_s27 + $0x58] sm:$0xff] }
  0x1e   : > { %2863 = vmatprep.subr.bf16.mxu1 %v3250_v25  ;;  %v244_v22 = vld [vmem:[%s3505_s27 + $0x240] sm:$0xff]  ;;  %v237_v24 = vld [vmem:[%s3505_s27 + $0x208] sm:$0xff]  ;;  %v199_v59 = vld [vmem:[%s3505_s27 + $0xd8] sm:$0xff] }
  0x1f   : > { %v2587_v23 = vcombine.high %v236_v21, %v244_v22  ;;  %v245_v25 = vld [vmem:[%s3505_s27 + $0x248] sm:$0xff]  ;;  %v3296_v61 = vld [vmem:[%s4021_s1 + $0x280] sm:$0xff]   ;;  %v207_v8 = vld [vmem:[%s3505_s27 + $0x118] sm:$0xff] }
  0x20   : > { %2812 = vmatpush3.bf16.msra.mxu0 %v3251_v26  ;;  %v2589_v26 = vcombine.high %v237_v24, %v245_v25  ;;  %v2588_v33 = vcombine.low %v237_v24, %v245_v25  ;;  %v253_v37 = vld [vmem:[%s3505_s27 + $0x288] sm:$0x11]  ;;  %v215_v9 = vld [vmem:[%s3505_s27 + $0x158] sm:$0xff]  ;;  %v3302_v12 = vld [vmem:[%s4021_s1 + $0x210] sm:$0xff]  }
  0x21   : > { %2864 = vmatpush3.bf16.msra.mxu1 %v3252_v27  ;;  %2813 = vmatprep.subr.bf16.mxu0 %v3253_v28  ;;  %v3278_v27 = vld [vmem:[%s4021_s1 + $0x128] sm:$0xff]   ;;  %v2604_v49 = vcombine.low %v253_v37, %v253_v37  ;;  %v231_v24 = vld [vmem:[%s3505_s27 + $0x1d8] sm:$0xff]  ;;  %vm2455_vm2 = vmand %vm2453_vm0, %vm2454_vm1 }
  0x22   : > { %2865 = vmatprep.subr.bf16.mxu1 %v3254_v29  ;;  %v3279_v28 = vld [vmem:[%s4021_s1 + $0x1e8] sm:$0xff]  }
  0x23   : > { %v3280_v29 = vld [vmem:[%s4021_s1 + $0x1a8] sm:$0xff]  }
  0x24   : > { %2814 = vmatpush3.bf16.msra.mxu0 %v3255_v30  ;;  %v3281_v30 = vld [vmem:[%s4021_s1 + $0x170] sm:$0xff]   ;;  %v3297_v62 = vld [vmem:[%s4021_s1 + $0x248] sm:$0xff]  }
  0x25   : > { %2866 = vmatpush3.bf16.msra.mxu1 %v3256_v31  ;;  %2903 = vmatprep.subr.bf16.mxu0 %v3257_v40  ;;  %v2586_v31 = vcombine.low %v236_v21, %v244_v22  ;;  %v3289_v40 = vld [vmem:[%s4021_s1 + $0x178] sm:$0xff]  }
  0x26   : > { %2955 = vmatprep.subr.bf16.mxu1 %v3259_v42  ;;  %v3291_v42 = vld [vmem:[%s4021_s1 + $0x1f8] sm:$0xff]  }
  0x27   : > { %1780 = vmatmul.mubr.bf16.vlgmr.msra.gmra.mrb[0].mxu0 %v2522_v35  ;;  %v252_v35 = vld [vmem:[%s3505_s27 + $0x280] sm:$0x11]  ;;  %v3308_v21 = vld [vmem:[%s4021_s1 + $0x298] sm:$0xff]  }
  0x28   : > { %1860 = vmatmul.mubr.bf16.vlgmr.msra.gmra.mrb[0].mxu1 %v2524_v38  ;;  %2904 = vmatpush3.bf16.msra.mxu0 %v3258_v41  ;;  %v2603_v36 = vcombine.high %v252_v35, %v252_v35  ;;  %v2605_v38 = vcombine.high %v253_v37, %v253_v37  ;;  %v3290_v41 = vld [vmem:[%s4021_s1 + $0x138] sm:$0xff]   ;;  %v2602_v46 = vcombine.low %v252_v35, %v252_v35  ;;  %v3315_v35 = vld [vmem:[%s4021_s1 + $0x2e8] sm:$0xff]  }
  0x29   : > { %2956 = vmatpush3.bf16.msra.mxu1 %v3260_v43  ;;  %2905 = vmatprep.subr.bf16.mxu0 %v3261_v44  ;;  %v3292_v43 = vld [vmem:[%s4021_s1 + $0x1b8] sm:$0xff]   ;;  %v174_v44 = vld [vmem:[%s3505_s27 + $0x10] sm:$0xff] }
  0x2a   : > { %1787 = vmatprep.mubr.bf16.mxu0 %v2539_v47  ;;  %1867 = vmatprep.mubr.bf16.mxu1 %v2541_v50  ;;  %v175_v47 = vld [vmem:[%s3505_s27 + $0x18] sm:$0xff]  ;;  %v2527_v50 = vcombine.high %v174_v44, %v182_v45 }
  0x2b   : > { %2957 = vmatprep.subr.bf16.mxu1 %v3263_v54  ;;  %v190_v54 = vld [vmem:[%s3505_s27 + $0x90] sm:$0xff]  ;;  %v2528_v60 = vcombine.low %v175_v47, %v183_v48  ;;  %v223_v22 = vld [vmem:[%s3505_s27 + $0x198] sm:$0xff] }
  0x2c   : > { %2906 = vmatpush3.bf16.msra.mxu0 %v3262_v51  ;;  %v3293_v51 = vld [vmem:[%s4021_s1 + $0x240] sm:$0xff]   ;;  %v247_v37 = vld [vmem:[%s3505_s27 + $0x258] sm:$0xff] }
  0x2d   : > { %2958 = vmatpush3.bf16.msra.mxu1 %v3264_v55  ;;  %2907 = vmatprep.subr.bf16.mxu0 %v3265_v56  ;;  %v198_v55 = vld [vmem:[%s3505_s27 + $0xd0] sm:$0xff]  ;;  %v3294_v56 = vld [vmem:[%s4021_s1 + $0x200] sm:$0xff]  }
  0x2e   : > { %2959 = vmatprep.subr.bf16.mxu1 %v3267_v58  ;;  %v2526_v58 = vcombine.low %v174_v44, %v182_v45  ;;  %v2542_v10 = vcombine.low %v190_v54, %v198_v55  ;;  %v3318_v45 = vld [vmem:[%s4021_s1 + $0x230] sm:$0xff]  }
  0x2f   : > { %1788 = vmatmul.mubr.bf16.gmra.mrb[4].mxu0 %v2538_v52  ;;  %v2529_v52 = vcombine.high %v175_v47, %v183_v48  ;;  %v3322_v47 = vld [vmem:[%s4021_s1 + $0x2b0] sm:$0xff]   ;;  %v3325_v48 = vld [vmem:[%s4021_s1 + $0x278] sm:$0xff]  }
  0x30   : > { %1868 = vmatmul.mubr.bf16.gmra.mrb[4].mxu1 %v2540_v53  ;;  %2908 = vmatpush3.bf16.msra.mxu0 %v3266_v57  ;;  %v3295_v53 = vld [vmem:[%s4021_s1 + $0x2c0] sm:$0xff]   ;;  %v191_v57 = vld [vmem:[%s3505_s27 + $0x98] sm:$0xff] }
  0x31   : > { %1795 = vmatprep.mubr.bf16.mxu0 %v2555_v63  ;;  %1875 = vmatprep.mubr.bf16.mxu1 %v2557_v0  ;;  %v2543_v63 = vcombine.high %v190_v54, %v198_v55  ;;  %v2545_v0 = vcombine.high %v191_v57, %v199_v59  ;;  %v3329_v55 = vld [vmem:[%s4021_s1 + $0x340] sm:$0xff]  }
  0x32   : > { %2960 = vmatpush3.bf16.msra.mxu1 %v3268_v1  ;;  %2909 = vmatprep.subr.bf16.mxu0 %v3269_v3  ;;  %v3298_v1 = vld [vmem:[%s4021_s1 + $0x208] sm:$0xff]  }
  0x33   : > { %2961 = vmatprep.subr.bf16.mxu1 %v3271_v6  ;;  %v3300_v3 = vld [vmem:[%s4021_s1 + $0x288] sm:$0xff]   ;;  %v206_v6 = vld [vmem:[%s3505_s27 + $0x110] sm:$0xff] }
  0x34   : > { %2910 = vmatpush3.bf16.msra.mxu0 %v3270_v5  ;;  %v3303_v5 = vld [vmem:[%s4021_s1 + $0x2d0] sm:$0xff]  }
  0x35   : > { %2911 = vmatprep.subr.bf16.mxu0 %v3273_v14  ;;  %v2561_v14 = vcombine.high %v207_v8, %v215_v9 }
  0x36   : > { %2962 = vmatpush3.bf16.msra.mxu1 %v3272_v7  ;;  %v214_v7 = vld [vmem:[%s3505_s27 + $0x150] sm:$0xff] }
  0x37   : > { %1796 = vmatmul.mubr.bf16.gmra.mrb[8].mxu0 %v2554_v2  ;;  %2963 = vmatprep.subr.bf16.mxu1 %v3275_v17  ;;  %v3299_v2 = vld [vmem:[%s4021_s1 + $0x2c8] sm:$0xff]   ;;  %v3306_v17 = vld [vmem:[%s4021_s1 + $0x218] sm:$0xff]   ;;  %v2558_v25 = vcombine.low %v206_v6, %v214_v7 }
  0x38   : > { %1876 = vmatmul.mubr.bf16.gmra.mrb[8].mxu1 %v2556_v4  ;;  %1803 = vmatprep.mubr.bf16.mxu0 %v2571_v11  ;;  %v3301_v4 = vld [vmem:[%s4021_s1 + $0x250] sm:$0xff]   ;;  %v2544_v11 = vcombine.low %v191_v57, %v199_v59  ;;  %v3331_v59 = vld [vmem:[%s4021_s1 + $0x3c0] sm:$0xff]  }
  0x39   : > { %1883 = vmatprep.mubr.bf16.mxu1 %v2573_v13  ;;  %2912 = vmatpush3.bf16.msra.mxu0 %v3274_v15  ;;  %v2559_v13 = vcombine.high %v206_v6, %v214_v7  ;;  %v3304_v15 = vld [vmem:[%s4021_s1 + $0x290] sm:$0xff]   ;;  %v193_v6 = vld [vmem:[%s3505_s27 + $0xa8] sm:$0xff] }
  0x3a   : > { %2964 = vmatpush3.bf16.msra.mxu1 %v3276_v19  ;;  %2913 = vmatprep.subr.bf16.mxu0 %v3277_v20  ;;  %v222_v19 = vld [vmem:[%s3505_s27 + $0x190] sm:$0xff] }
  0x3b   : > { %2965 = vmatprep.subr.bf16.mxu1 %v3279_v28  ;;  %v230_v20 = vld [vmem:[%s3505_s27 + $0x1d0] sm:$0xff] }
  0x3c   : > { %v2575_v28 = vcombine.high %v222_v19, %v230_v20 }
  0x3d   : > { %2914 = vmatpush3.bf16.msra.mxu0 %v3278_v27  ;;  %v2560_v27 = vcombine.low %v207_v8, %v215_v9  ;;  %v201_v8 = vld [vmem:[%s3505_s27 + $0xe8] sm:$0xff] }
  0x3e   : > { %2966 = vmatpush3.bf16.msra.mxu1 %v3280_v29  ;;  %2915 = vmatprep.subr.bf16.mxu0 %v3281_v30  ;;  %v2577_v29 = vcombine.high %v223_v22, %v231_v24  ;;  %v3310_v30 = vld [vmem:[%s4021_s1 + $0x220] sm:$0xff]  }
  0x3f   : > { %1804 = vmatmul.mubr.bf16.gmra.mrb[12].mxu0 %v2570_v16  ;;  %2967 = vmatprep.subr.bf16.mxu1 %v3283_v34  ;;  %v3305_v16 = vld [vmem:[%s4021_s1 + $0x258] sm:$0xff]   ;;  %v246_v34 = vld [vmem:[%s3505_s27 + $0x250] sm:$0xff] }
  0x40   : > { %1884 = vmatmul.mubr.bf16.gmra.mrb[12].mxu1 %v2572_v18  ;;  %1811 = vmatprep.mubr.bf16.mxu0 %v2587_v23  ;;  %v3307_v18 = vld [vmem:[%s4021_s1 + $0x2d8] sm:$0xff]   ;;  %v3309_v23 = vld [vmem:[%s4021_s1 + $0x260] sm:$0xff]  }
  0x41   : > { %1891 = vmatprep.mubr.bf16.mxu1 %v2589_v26  ;;  %2916 = vmatpush3.bf16.msra.mxu0 %v3282_v32  ;;  %v3311_v26 = vld [vmem:[%s4021_s1 + $0x2e0] sm:$0xff]   ;;  %v3313_v32 = vld [vmem:[%s4021_s1 + $0x268] sm:$0xff]  }
  0x42   : > { %2968 = vmatpush3.bf16.msra.mxu1 %v3286_v39  ;;  %2917 = vmatprep.subr.bf16.mxu0 %v3289_v40  ;;  %v3316_v39 = vld [vmem:[%s4021_s1 + $0x2a8] sm:$0xff]   ;;  %v3317_v40 = vld [vmem:[%s4021_s1 + $0x270] sm:$0xff]  }
  0x43   : > { %2969 = vmatprep.subr.bf16.mxu1 %v3291_v42  ;;  %v3319_v42 = vld [vmem:[%s4021_s1 + $0x2f0] sm:$0xff]  }
  0x45   : > { %2918 = vmatpush3.bf16.msra.mxu0 %v3290_v41  ;;  %v2574_v41 = vcombine.low %v222_v19, %v230_v20  ;;  %v3339_v19 = vld [vmem:[%s4021_s1 + $0x3d0] sm:$0xff]   ;;  %v208_v20 = vld [vmem:[%s3505_s27 + $0x120] sm:$0xff] }
  0x46   : > { %2970 = vmatpush3.bf16.msra.mxu1 %v3292_v43  ;;  %3007 = vmatprep.subr.bf16.mxu0 %v3293_v51  ;;  %v2576_v43 = vcombine.low %v223_v22, %v231_v24  ;;  %v3326_v51 = vld [vmem:[%s4021_s1 + $0x238] sm:$0xff]   ;;  %v209_v22 = vld [vmem:[%s3505_s27 + $0x128] sm:$0xff] }
  0x47   : > { %1812 = vmatmul.mubr.bf16.gmra.mrb[16].mxu0 %v2586_v31  ;;  %3059 = vmatprep.subr.bf16.mxu1 %v3295_v53  ;;  %v3312_v31 = vld [vmem:[%s4021_s1 + $0x2a0] sm:$0xff]   ;;  %v3328_v53 = vld [vmem:[%s4021_s1 + $0x2b8] sm:$0xff]  }
  0x48   : > { %1892 = vmatmul.mubr.bf16.gmra.mrb[16].mxu1 %v2588_v33  ;;  %1819 = vmatprep.mubr.bf16.mxu0 %v2603_v36  ;;  %v238_v33 = vld [vmem:[%s3505_s27 + $0x210] sm:$0xff]  ;;  %v239_v36 = vld [vmem:[%s3505_s27 + $0x218] sm:$0xff] }
  0x49   : > { %1899 = vmatprep.mubr.bf16.mxu1 %v2605_v38  ;;  %v3314_v38 = vld [vmem:[%s4021_s1 + $0x228] sm:$0xff]   ;;  %v2591_v44 = vcombine.high %v238_v33, %v246_v34  ;;  %v2590_v54 = vcombine.low %v238_v33, %v246_v34  ;;  %v224_v33 = vld [vmem:[%s3505_s27 + $0x1a0] sm:$0xff] }
  0x4a   : > { %v232_v34 = vld [vmem:[%s3505_s27 + $0x1e0] sm:$0xff] }
  0x4f   : > { %1820 = vmatmul.mubr.bf16.gmra.mrb[20].mxu0 %v2602_v46  ;;  %v2593_v46 = vcombine.high %v239_v36, %v247_v37 }
  0x50   : > { %1900 = vmatmul.mubr.bf16.gmra.mrb[20].mxu1 %v2604_v49  ;;  %1939 = vmatprep.mubr.bf16.mxu0 %v2527_v50  ;;  %v3327_v49 = vld [vmem:[%s4021_s1 + $0x2f8] sm:$0xff]   ;;  %v254_v50 = vld [vmem:[%s3505_s27 + $0x290] sm:$0x11] }
  0x51   : > { %2019 = vmatprep.mubr.bf16.mxu1 %v2529_v52  ;;  %v255_v52 = vld [vmem:[%s3505_s27 + $0x298] sm:$0x11]  ;;  %v2607_v57 = vcombine.high %v254_v50, %v254_v50 }
  0x57   : > { %1940 = vmatmul.mubr.bf16.vlgmr.msra.gmra.mrb[24].mxu0 %v2526_v58  ;;  %v2609_v58 = vcombine.high %v255_v52, %v255_v52 }
  0x58   : > { %2020 = vmatmul.mubr.bf16.vlgmr.msra.gmra.mrb[24].mxu1 %v2528_v60  ;;  %3008 = vmatpush3.bf16.msra.mxu0 %v3294_v56  ;;  %v2592_v56 = vcombine.low %v239_v36, %v247_v37  ;;  %v176_v60 = vld [vmem:[%s3505_s27 + $0x20] sm:$0xff]  ;;  %v225_v36 = vld [vmem:[%s3505_s27 + $0x1a8] sm:$0xff] }
  0x59   : > { %3060 = vmatpush3.bf16.msra.mxu1 %v3296_v61  ;;  %3009 = vmatprep.subr.bf16.mxu0 %v3297_v62  ;;  %v184_v61 = vld [vmem:[%s3505_s27 + $0x60] sm:$0xff]  ;;  %v177_v62 = vld [vmem:[%s3505_s27 + $0x28] sm:$0xff] }
  0x5a   : > { %1947 = vmatprep.mubr.bf16.mxu0 %v2543_v63  ;;  %2027 = vmatprep.mubr.bf16.mxu1 %v2545_v0  ;;  %v185_v63 = vld [vmem:[%s3505_s27 + $0x68] sm:$0xff]  ;;  %v2606_v0 = vcombine.low %v254_v50, %v254_v50  ;;  %v2530_v7 = vcombine.low %v176_v60, %v184_v61  ;;  %v3345_v37 = vld [vmem:[%s4021_s1 + $0x360] sm:$0xff]  }
  0x5b   : > { %3061 = vmatprep.subr.bf16.mxu1 %v3299_v2  ;;  %v2531_v2 = vcombine.high %v176_v60, %v184_v61  ;;  %v2532_v9 = vcombine.low %v177_v62, %v185_v63  ;;  %v241_v50 = vld [vmem:[%s3505_s27 + $0x228] sm:$0xff]  ;;  %v3354_v60 = vld [vmem:[%s4021_s1 + $0x330] sm:$0xff]  }
  0x5c   : > { %3010 = vmatpush3.bf16.msra.mxu0 %v3298_v1  ;;  %v2608_v1 = vcombine.low %v255_v52, %v255_v52  ;;  %v249_v52 = vld [vmem:[%s3505_s27 + $0x268] sm:$0xff]  ;;  %v3358_v61 = vld [vmem:[%s4021_s1 + $0x3b0] sm:$0xff]  }
  0x5d   : > { %3062 = vmatpush3.bf16.msra.mxu1 %v3300_v3  ;;  %3011 = vmatprep.subr.bf16.mxu0 %v3301_v4  ;;  %v2533_v3 = vcombine.high %v177_v62, %v185_v63  ;;  %v192_v4 = vld [vmem:[%s3505_s27 + $0xa0] sm:$0xff]  ;;  %v3361_v62 = vld [vmem:[%s4021_s1 + $0x378] sm:$0xff]  }
  0x5e   : > { %3063 = vmatprep.subr.bf16.mxu1 %v3303_v5  ;;  %v200_v5 = vld [vmem:[%s3505_s27 + $0xe0] sm:$0xff]  ;;  %v3363_v63 = vld [vmem:[%s4021_s1 + $0x3f8] sm:$0xff]  }
  0x5f   : > { %1948 = vmatmul.mubr.bf16.gmra.mrb[28].mxu0 %v2542_v10  ;;  %v3330_v10 = vld [vmem:[%s4021_s1 + $0x300] sm:$0xff]   ;;  %v2546_v24 = vcombine.low %v192_v4, %v200_v5 }
  0x60   : > { %2028 = vmatmul.mubr.bf16.gmra.mrb[28].mxu1 %v2544_v11  ;;  %3012 = vmatpush3.bf16.msra.mxu0 %v3302_v12  ;;  %v3332_v11 = vld [vmem:[%s4021_s1 + $0x380] sm:$0xff]   ;;  %v3333_v12 = vld [vmem:[%s4021_s1 + $0x348] sm:$0xff]  }
  0x61   : > { %1955 = vmatprep.mubr.bf16.mxu0 %v2559_v13  ;;  %2035 = vmatprep.mubr.bf16.mxu1 %v2561_v14  ;;  %v2547_v13 = vcombine.high %v192_v4, %v200_v5  ;;  %v2549_v14 = vcombine.high %v193_v6, %v201_v8  ;;  %v2596_v5 = vcombine.low %v241_v50, %v249_v52 }
  0x62   : > { %3064 = vmatpush3.bf16.msra.mxu1 %v3304_v15  ;;  %3013 = vmatprep.subr.bf16.mxu0 %v3305_v16  ;;  %v3334_v15 = vld [vmem:[%s4021_s1 + $0x308] sm:$0xff]  }
  0x63   : > { %3065 = vmatprep.subr.bf16.mxu1 %v3307_v18  ;;  %v3335_v16 = vld [vmem:[%s4021_s1 + $0x3c8] sm:$0xff]   ;;  %v3337_v18 = vld [vmem:[%s4021_s1 + $0x350] sm:$0xff]  }
  0x64   : > { %3014 = vmatpush3.bf16.msra.mxu0 %v3306_v17  ;;  %v3336_v17 = vld [vmem:[%s4021_s1 + $0x388] sm:$0xff]  }
  0x65   : > { %3015 = vmatprep.subr.bf16.mxu0 %v3309_v23  ;;  %v217_v23 = vld [vmem:[%s3505_s27 + $0x168] sm:$0xff] }
  0x66   : > { %3066 = vmatpush3.bf16.msra.mxu1 %v3308_v21  ;;  %v216_v21 = vld [vmem:[%s3505_s27 + $0x160] sm:$0xff] }
  0x67   : > { %1956 = vmatmul.mubr.bf16.gmra.mrb[32].mxu0 %v2558_v25  ;;  %3067 = vmatprep.subr.bf16.mxu1 %v3311_v26  ;;  %v2548_v25 = vcombine.low %v193_v6, %v201_v8  ;;  %v3338_v26 = vld [vmem:[%s4021_s1 + $0x310] sm:$0xff]  }
  0x68   : > { %2036 = vmatmul.mubr.bf16.gmra.mrb[32].mxu1 %v2560_v27  ;;  %1963 = vmatprep.mubr.bf16.mxu0 %v2575_v28  ;;  %v3340_v27 = vld [vmem:[%s4021_s1 + $0x390] sm:$0xff]   ;;  %v2563_v28 = vcombine.high %v208_v20, %v216_v21 }
  0x69   : > { %2043 = vmatprep.mubr.bf16.mxu1 %v2577_v29  ;;  %3016 = vmatpush3.bf16.msra.mxu0 %v3310_v30  ;;  %v2565_v29 = vcombine.high %v209_v22, %v217_v23  ;;  %v3341_v30 = vld [vmem:[%s4021_s1 + $0x358] sm:$0xff]   ;;  %v178_v8 = vld [vmem:[%s3505_s27 + $0x30] sm:$0xff] }
  0x6a   : > { %3068 = vmatpush3.bf16.msra.mxu1 %v3312_v31  ;;  %3017 = vmatprep.subr.bf16.mxu0 %v3313_v32  ;;  %v3342_v31 = vld [vmem:[%s4021_s1 + $0x318] sm:$0xff]  }
  0x6b   : > { %3069 = vmatprep.subr.bf16.mxu1 %v3315_v35  ;;  %v3343_v32 = vld [vmem:[%s4021_s1 + $0x3d8] sm:$0xff]  }
  0x6c   : > { %v3344_v35 = vld [vmem:[%s4021_s1 + $0x398] sm:$0xff]  }
  0x6d   : > { %3018 = vmatpush3.bf16.msra.mxu0 %v3314_v38  ;;  %v233_v38 = vld [vmem:[%s3505_s27 + $0x1e8] sm:$0xff] }
  0x6e   : > { %3070 = vmatpush3.bf16.msra.mxu1 %v3316_v39  ;;  %3019 = vmatprep.subr.bf16.mxu0 %v3317_v40  ;;  %v2562_v39 = vcombine.low %v208_v20, %v216_v21  ;;  %v3347_v40 = vld [vmem:[%s4021_s1 + $0x3e0] sm:$0xff]  }
  0x6f   : > { %1964 = vmatmul.mubr.bf16.gmra.mrb[36].mxu0 %v2574_v41  ;;  %3071 = vmatprep.subr.bf16.mxu1 %v3319_v42  ;;  %v2564_v41 = vcombine.low %v209_v22, %v217_v23  ;;  %v2579_v42 = vcombine.high %v224_v33, %v232_v34 }
  0x70   : > { %2044 = vmatmul.mubr.bf16.gmra.mrb[36].mxu1 %v2576_v43  ;;  %1971 = vmatprep.mubr.bf16.mxu0 %v2591_v44  ;;  %v3346_v43 = vld [vmem:[%s4021_s1 + $0x320] sm:$0xff]   ;;  %v2581_v44 = vcombine.high %v225_v36, %v233_v38 }
  0x71   : > { %2051 = vmatprep.mubr.bf16.mxu1 %v2593_v46  ;;  %3020 = vmatpush3.bf16.msra.mxu0 %v3318_v45  ;;  %v3348_v45 = vld [vmem:[%s4021_s1 + $0x3a0] sm:$0xff]   ;;  %v3349_v46 = vld [vmem:[%s4021_s1 + $0x368] sm:$0xff]  }
  0x72   : > { %3072 = vmatpush3.bf16.msra.mxu1 %v3322_v47  ;;  %3021 = vmatprep.subr.bf16.mxu0 %v3325_v48  ;;  %v3351_v47 = vld [vmem:[%s4021_s1 + $0x3e8] sm:$0xff]   ;;  %v240_v48 = vld [vmem:[%s3505_s27 + $0x220] sm:$0xff] }
  0x73   : > { %3073 = vmatprep.subr.bf16.mxu1 %v3327_v49  ;;  %v248_v49 = vld [vmem:[%s3505_s27 + $0x260] sm:$0xff] }
  0x74   : > { %v2594_v4 = vcombine.low %v240_v48, %v248_v49 }
  0x75   : > { %3022 = vmatpush3.bf16.msra.mxu0 %v3326_v51  ;;  %v3350_v51 = vld [vmem:[%s4021_s1 + $0x328] sm:$0xff]  }
  0x76   : > { %3074 = vmatpush3.bf16.msra.mxu1 %v3328_v53  ;;  %3111 = vmatprep.subr.bf16.mxu0 %v3329_v55  ;;  %v3352_v53 = vld [vmem:[%s4021_s1 + $0x3a8] sm:$0xff]   ;;  %v2578_v55 = vcombine.low %v224_v33, %v232_v34  ;;  %v234_v33 = vld [vmem:[%s3505_s27 + $0x1f0] sm:$0xff]  ;;  %v227_v34 = vld [vmem:[%s3505_s27 + $0x1b8] sm:$0xff] }
  0x77   : > { %1972 = vmatmul.mubr.bf16.gmra.mrb[40].mxu0 %v2590_v54  ;;  %3163 = vmatprep.subr.bf16.mxu1 %v3331_v59  ;;  %v3353_v54 = vld [vmem:[%s4021_s1 + $0x370] sm:$0xff]   ;;  %v2597_v59 = vcombine.high %v241_v50, %v249_v52 }
  0x78   : > { %2052 = vmatmul.mubr.bf16.gmra.mrb[40].mxu1 %v2592_v56  ;;  %1979 = vmatprep.mubr.bf16.mxu0 %v2607_v57  ;;  %v3355_v56 = vld [vmem:[%s4021_s1 + $0x3f0] sm:$0xff]   ;;  %v2580_v57 = vcombine.low %v225_v36, %v233_v38 }
  0x79   : > { %2059 = vmatprep.mubr.bf16.mxu1 %v2609_v58  ;;  %v2595_v58 = vcombine.high %v240_v48, %v248_v49  ;;  %v258_v48 = vld [vmem:[%s3505_s27 + $0x2b0] sm:$0x11]  ;;  %v259_v49 = vld [vmem:[%s3505_s27 + $0x2b8] sm:$0x11] }
  0x7a   : > { %v2615_v52 = vcombine.high %v258_v48, %v258_v48 }
  0x7f   : > { %1980 = vmatmul.mubr.bf16.gmra.mrb[44].mxu0 %v2606_v0  ;;  %v256_v0 = vld [vmem:[%s3505_s27 + $0x2a0] sm:$0x11] }
  0x80   : > { %2060 = vmatmul.mubr.bf16.gmra.mrb[44].mxu1 %v2608_v1  ;;  %2099 = vmatprep.mubr.bf16.mxu0 %v2531_v2  ;;  %v3362_v1 = vld [vmem:[%s4021_s1 + $0x338] sm:$0xff]   ;;  %v257_v2 = vld [vmem:[%s3505_s27 + $0x2a8] sm:$0x11]  ;;  %v2611_v6 = vcombine.high %v256_v0, %v256_v0 }
  0x81   : > { %2179 = vmatprep.mubr.bf16.mxu1 %v2533_v3  ;;  %v3364_v3 = vld [vmem:[%s4021_s1 + $0x3b8] sm:$0xff]  }
  0x87   : > { %2100 = vmatmul.mubr.bf16.vlgmr.msra.gmra.mrb[48].mxu0 %v2530_v7  ;;  %v2613_v7 = vcombine.high %v257_v2, %v257_v2 }
  0x88   : > { %2180 = vmatmul.mubr.bf16.vlgmr.msra.gmra.mrb[48].mxu1 %v2532_v9  ;;  %3112 = vmatpush3.bf16.msra.mxu0 %v3330_v10  ;;  %v186_v9 = vld [vmem:[%s3505_s27 + $0x70] sm:$0xff]  ;;  %v179_v10 = vld [vmem:[%s3505_s27 + $0x38] sm:$0xff] }
  0x89   : > { %3164 = vmatpush3.bf16.msra.mxu1 %v3332_v11  ;;  %3113 = vmatprep.subr.bf16.mxu0 %v3333_v12  ;;  %v187_v11 = vld [vmem:[%s3505_s27 + $0x78] sm:$0xff]  ;;  %v2610_v12 = vcombine.low %v256_v0, %v256_v0  ;;  %v2534_v20 = vcombine.low %v178_v8, %v186_v9 }
  0x8a   : > { %2107 = vmatprep.mubr.bf16.mxu0 %v2547_v13  ;;  %2187 = vmatprep.mubr.bf16.mxu1 %v2549_v14  ;;  %v2612_v13 = vcombine.low %v257_v2, %v257_v2  ;;  %v2535_v14 = vcombine.high %v178_v8, %v186_v9  ;;  %v2536_v21 = vcombine.low %v179_v10, %v187_v11 }
  0x8b   : > { %3165 = vmatprep.subr.bf16.mxu1 %v3335_v16  ;;  %v194_v16 = vld [vmem:[%s3505_s27 + $0xb0] sm:$0xff] }
  0x8c   : > { %3114 = vmatpush3.bf16.msra.mxu0 %v3334_v15  ;;  %v2537_v15 = vcombine.high %v179_v10, %v187_v11 }
  0x8d   : > { %3166 = vmatpush3.bf16.msra.mxu1 %v3336_v17  ;;  %3115 = vmatprep.subr.bf16.mxu0 %v3337_v18  ;;  %v202_v17 = vld [vmem:[%s3505_s27 + $0xf0] sm:$0xff]  ;;  %v195_v18 = vld [vmem:[%s3505_s27 + $0xb8] sm:$0xff] }
  0x8e   : > { %3167 = vmatprep.subr.bf16.mxu1 %v3339_v19  ;;  %v203_v19 = vld [vmem:[%s3505_s27 + $0xf8] sm:$0xff]  ;;  %v2551_v22 = vcombine.high %v194_v16, %v202_v17 }
  0x8f   : > { %2108 = vmatmul.mubr.bf16.gmra.mrb[52].mxu0 %v2546_v24  ;;  %v2553_v23 = vcombine.high %v195_v18, %v203_v19  ;;  %v210_v24 = vld [vmem:[%s3505_s27 + $0x130] sm:$0xff] }
  0x90   : > { %2188 = vmatmul.mubr.bf16.gmra.mrb[52].mxu1 %v2548_v25  ;;  %3116 = vmatpush3.bf16.msra.mxu0 %v3338_v26  ;;  %v218_v25 = vld [vmem:[%s3505_s27 + $0x170] sm:$0xff]  ;;  %v211_v26 = vld [vmem:[%s3505_s27 + $0x138] sm:$0xff] }
  0x91   : > { %2115 = vmatprep.mubr.bf16.mxu0 %v2563_v28  ;;  %2195 = vmatprep.mubr.bf16.mxu1 %v2565_v29  ;;  %v2550_v28 = vcombine.low %v194_v16, %v202_v17  ;;  %v2552_v29 = vcombine.low %v195_v18, %v203_v19  ;;  %v2566_v36 = vcombine.low %v210_v24, %v218_v25 }
  0x92   : > { %3168 = vmatpush3.bf16.msra.mxu1 %v3340_v27  ;;  %3117 = vmatprep.subr.bf16.mxu0 %v3341_v30  ;;  %v219_v27 = vld [vmem:[%s3505_s27 + $0x178] sm:$0xff]  ;;  %v2567_v30 = vcombine.high %v210_v24, %v218_v25 }
  0x93   : > { %3169 = vmatprep.subr.bf16.mxu1 %v3343_v32  ;;  %v226_v32 = vld [vmem:[%s3505_s27 + $0x1b0] sm:$0xff] }
  0x94   : > { %3118 = vmatpush3.bf16.msra.mxu0 %v3342_v31  ;;  %v2569_v31 = vcombine.high %v211_v26, %v219_v27  ;;  %v2583_v38 = vcombine.high %v226_v32, %v234_v33 }
  0x95   : > { %3119 = vmatprep.subr.bf16.mxu0 %v3345_v37  ;;  %v2568_v37 = vcombine.low %v211_v26, %v219_v27 }
  0x96   : > { %3170 = vmatpush3.bf16.msra.mxu1 %v3344_v35  ;;  %v235_v35 = vld [vmem:[%s3505_s27 + $0x1f8] sm:$0xff] }
  0x97   : > { %2116 = vmatmul.mubr.bf16.gmra.mrb[56].mxu0 %v2562_v39  ;;  %3171 = vmatprep.subr.bf16.mxu1 %v3347_v40  ;;  %v2585_v39 = vcombine.high %v227_v34, %v235_v35  ;;  %v242_v40 = vld [vmem:[%s3505_s27 + $0x230] sm:$0xff] }
  0x98   : > { %2196 = vmatmul.mubr.bf16.gmra.mrb[56].mxu1 %v2564_v41  ;;  %2123 = vmatprep.mubr.bf16.mxu0 %v2579_v42  ;;  %v250_v41 = vld [vmem:[%s3505_s27 + $0x270] sm:$0xff]  ;;  %v243_v42 = vld [vmem:[%s3505_s27 + $0x238] sm:$0xff] }
  0x99   : > { %2203 = vmatprep.mubr.bf16.mxu1 %v2581_v44  ;;  %3120 = vmatpush3.bf16.msra.mxu0 %v3346_v43  ;;  %v251_v43 = vld [vmem:[%s3505_s27 + $0x278] sm:$0xff]  ;;  %v2582_v44 = vcombine.low %v226_v32, %v234_v33  ;;  %v2598_v50 = vcombine.low %v242_v40, %v250_v41  ;;  %s3216_s27 = smul.u32 44, %s4025_s13 }
  0x9a   : > { %3172 = vmatpush3.bf16.msra.mxu1 %v3348_v45  ;;  %3121 = vmatprep.subr.bf16.mxu0 %v3349_v46  ;;  %v2584_v45 = vcombine.low %v227_v34, %v235_v35  ;;  %v2599_v46 = vcombine.high %v242_v40, %v250_v41 }
  0x9b   : > { %3173 = vmatprep.subr.bf16.mxu1 %v3351_v47  ;;  %v2601_v47 = vcombine.high %v243_v42, %v251_v43  ;;  %s3999_s9 = scalar_lea.vmem %s4023_s3, %s3216_s27 }
  0x9d   : > { %3122 = vmatpush3.bf16.msra.mxu0 %v3350_v51  ;;  %v2600_v51 = vcombine.low %v243_v42, %v251_v43 }
  0x9e   : > { %3174 = vmatpush3.bf16.msra.mxu1 %v3352_v53  ;;  %3123 = vmatprep.subr.bf16.mxu0 %v3353_v54  ;;  %v2617_v53 = vcombine.high %v259_v49, %v259_v49  ;;  %v2614_v54 = vcombine.low %v258_v48, %v258_v48 }
  0x9f   : > { %2124 = vmatmul.mubr.bf16.gmra.mrb[60].mxu0 %v2578_v55  ;;  %3175 = vmatprep.subr.bf16.mxu1 %v3355_v56  ;;  %v2616_v55 = vcombine.low %v259_v49, %v259_v49 }
  0xa0   : > { %2204 = vmatmul.mubr.bf16.gmra.mrb[60].mxu1 %v2580_v57  ;;  %2131 = vmatprep.mubr.bf16.mxu0 %v2595_v58  ;;  %v3892_v58 = vld [vmem:[%s4022_s2] ss:$0 sm:$0xff] }
  0xa1   : > { %2211 = vmatprep.mubr.bf16.mxu1 %v2597_v59  ;;  %3124 = vmatpush3.bf16.msra.mxu0 %v3354_v60 }
  0xa2   : > { %3176 = vmatpush3.bf16.msra.mxu1 %v3358_v61  ;;  %3125 = vmatprep.subr.bf16.mxu0 %v3361_v62 }
  0xa3   : > { %3177 = vmatprep.subr.bf16.mxu1 %v3363_v63 }
  0xa5   : > { %3126 = vmatpush3.bf16.msra.mxu0 %v3362_v1 }
  0xa6   : > { %3178 = vmatpush3.bf16.msra.mxu1 %v3364_v3 }
  0xa7   : > { %2132 = vmatmul.mubr.bf16.gmra.mrb[64].mxu0 %v2594_v4 }
  0xa8   : > { %2212 = vmatmul.mubr.bf16.gmra.mrb[64].mxu1 %v2596_v5  ;;  %2139 = vmatprep.mubr.bf16.mxu0 %v2611_v6 }
  0xa9   : > { %2219 = vmatprep.mubr.bf16.mxu1 %v2613_v7 }
  0xaf   : > { %2140 = vmatmul.mubr.bf16.gmra.mrb[68].mxu0 %v2610_v12 }
  0xb0   : > { %2220 = vmatmul.mubr.bf16.gmra.mrb[68].mxu1 %v2612_v13  ;;  %2259 = vmatprep.mubr.bf16.mxu0 %v2535_v14 }
  0xb1   : > { %2339 = vmatprep.mubr.bf16.mxu1 %v2537_v15 }
  0xb7   : > { %2260 = vmatmul.mubr.bf16.vlgmr.msra.gmra.mrb[72].mxu0 %v2534_v20 }
  0xb8   : > { %2340 = vmatmul.mubr.bf16.vlgmr.msra.gmra.mrb[72].mxu1 %v2536_v21  ;;  %2267 = vmatprep.mubr.bf16.mxu0 %v2551_v22 }
  0xb9   : > { %2347 = vmatprep.mubr.bf16.mxu1 %v2553_v23 }
  0xbf   : > { %2268 = vmatmul.mubr.bf16.gmra.mrb[76].mxu0 %v2550_v28 }
  0xc0   : > { %2348 = vmatmul.mubr.bf16.gmra.mrb[76].mxu1 %v2552_v29  ;;  %2275 = vmatprep.mubr.bf16.mxu0 %v2567_v30 }
  0xc1   : > { %2355 = vmatprep.mubr.bf16.mxu1 %v2569_v31 }
  0xc7   : > { %2276 = vmatmul.mubr.bf16.gmra.mrb[80].mxu0 %v2566_v36 }
  0xc8   : > { %2356 = vmatmul.mubr.bf16.gmra.mrb[80].mxu1 %v2568_v37  ;;  %2283 = vmatprep.mubr.bf16.mxu0 %v2583_v38 }
  0xc9   : > { %2363 = vmatprep.mubr.bf16.mxu1 %v2585_v39 }
  0xcf   : > { %2284 = vmatmul.mubr.bf16.gmra.mrb[84].mxu0 %v2582_v44 }
  0xd0   : > { %2364 = vmatmul.mubr.bf16.gmra.mrb[84].mxu1 %v2584_v45  ;;  %2291 = vmatprep.mubr.bf16.mxu0 %v2599_v46 }
  0xd1   : > { %2371 = vmatprep.mubr.bf16.mxu1 %v2601_v47 }
  0xd7   : > { %2292 = vmatmul.mubr.bf16.gmra.mrb[88].mxu0 %v2598_v50 }
  0xd8   : > { %2372 = vmatmul.mubr.bf16.gmra.mrb[88].mxu1 %v2600_v51  ;;  %2299 = vmatprep.mubr.bf16.mxu0 %v2615_v52 }
  0xd9   : > { %2379 = vmatprep.mubr.bf16.mxu1 %v2617_v53 }
  0xdf   : > { %2300 = vmatmul.mubr.bf16.gmra.mrb[92].mxu0 %v2614_v54 }
  0xe0   : > { %2380 = vmatmul.mubr.bf16.gmra.mrb[92].mxu1 %v2616_v55 }
  0xfa   : > { %v2815_v56 = vpop.f32.mrb[0].mxu0 }
  0xfb   : > { %v2867_v57 = vpop.f32.mrb[0].mxu1  ;;  %v2816_v59 = vpop.f32.mrb[1].mxu0 }
  0xfc   : > { %v2817_v60 = vadd.f32 %v2816_v59, %v2815_v56  ;;  %v2868_v61 = vpop.f32.mrb[1].mxu1  ;;  %v2818_v62 = vpop.f32.mrb[2].mxu0 }
  0xfd   : > { %v2869_v63 = vadd.f32 %v2868_v61, %v2867_v57  ;;  %v2870_v0 = vpop.f32.mrb[2].mxu1  ;;  %v2819_v1 = vpop.f32.mrb[3].mxu0 }
  0xfe   : > { %v1782_v2 = vadd.f32 %v2817_v60, %v3892_v58  ;;  %v2820_v3 = vadd.f32 %v2819_v1, %v2818_v62  ;;  %v2871_v4 = vpop.f32.mrb[3].mxu1 }
  0xff   : > { %v2872_v5 = vadd.f32 %v2871_v4, %v2870_v0 }
 0x100   : > { %v3895_v6 = vadd.f32 %v2869_v63, %v1782_v2  ;;  %v1785_v7 = vadd.f32 %v2820_v3, %v3892_v58 }
 0x102   : > { %v3898_v8 = vadd.f32 %v2872_v5, %v1785_v7  ;;  %v2821_v9 = vpop.f32.mrb[4].mxu0 }
 0x103   : > { %v2873_v10 = vpop.f32.mrb[4].mxu1  ;;  %v2822_v11 = vpop.f32.mrb[5].mxu0 }
 0x104   : > { %v2823_v12 = vadd.f32 %v2822_v11, %v2821_v9  ;;  %v2874_v13 = vpop.f32.mrb[5].mxu1  ;;  %v2824_v14 = vpop.f32.mrb[6].mxu0 }
 0x105   : > { %v2875_v15 = vadd.f32 %v2874_v13, %v2873_v10  ;;  %v2876_v16 = vpop.f32.mrb[6].mxu1  ;;  %v2825_v17 = vpop.f32.mrb[7].mxu0 }
 0x106   : > { %v1790_v18 = vadd.f32 %v2823_v12, %v3892_v58  ;;  %v2826_v19 = vadd.f32 %v2825_v17, %v2824_v14  ;;  %v2877_v20 = vpop.f32.mrb[7].mxu1 }
 0x107   : > { %v2878_v21 = vadd.f32 %v2877_v20, %v2876_v16 }
 0x108   : > { %v3901_v22 = vadd.f32 %v2875_v15, %v1790_v18  ;;  %v1793_v23 = vadd.f32 %v2826_v19, %v3892_v58 }
 0x10a   : > { %v3904_v24 = vadd.f32 %v2878_v21, %v1793_v23  ;;  %v2827_v25 = vpop.f32.mrb[8].mxu0 }
 0x10b   : > { %v2879_v26 = vpop.f32.mrb[8].mxu1  ;;  %v2828_v27 = vpop.f32.mrb[9].mxu0 }
 0x10c   : > { %v2829_v28 = vadd.f32 %v2828_v27, %v2827_v25  ;;  %v2880_v29 = vpop.f32.mrb[9].mxu1  ;;  %v2830_v30 = vpop.f32.mrb[10].mxu0 }
 0x10d   : > { %v2881_v31 = vadd.f32 %v2880_v29, %v2879_v26  ;;  %v2882_v32 = vpop.f32.mrb[10].mxu1  ;;  %v2831_v33 = vpop.f32.mrb[11].mxu0 }
 0x10e   : > { %v1798_v34 = vadd.f32 %v2829_v28, %v3892_v58  ;;  %v2832_v35 = vadd.f32 %v2831_v33, %v2830_v30  ;;  %v2883_v36 = vpop.f32.mrb[11].mxu1 }
 0x10f   : > { %v2884_v37 = vadd.f32 %v2883_v36, %v2882_v32 }
 0x110   : > { %v3907_v38 = vadd.f32 %v2881_v31, %v1798_v34  ;;  %v1801_v39 = vadd.f32 %v2832_v35, %v3892_v58 }
 0x112   : > { %v3910_v40 = vadd.f32 %v2884_v37, %v1801_v39  ;;  %v2833_v41 = vpop.f32.mrb[12].mxu0 }
 0x113   : > { %v2885_v42 = vpop.f32.mrb[12].mxu1  ;;  %v2834_v43 = vpop.f32.mrb[13].mxu0 }
 0x114   : > { %v2835_v44 = vadd.f32 %v2834_v43, %v2833_v41  ;;  %v2886_v45 = vpop.f32.mrb[13].mxu1  ;;  %v2836_v46 = vpop.f32.mrb[14].mxu0 }
 0x115   : > { %v2887_v47 = vadd.f32 %v2886_v45, %v2885_v42  ;;  %v2888_v48 = vpop.f32.mrb[14].mxu1  ;;  %v2837_v49 = vpop.f32.mrb[15].mxu0 }
 0x116   : > { %v1806_v50 = vadd.f32 %v2835_v44, %v3892_v58  ;;  %v2838_v51 = vadd.f32 %v2837_v49, %v2836_v46  ;;  %v2889_v52 = vpop.f32.mrb[15].mxu1 }
 0x117   : > { %v2890_v53 = vadd.f32 %v2889_v52, %v2888_v48 }
 0x118   : > { %v3913_v54 = vadd.f32 %v2887_v47, %v1806_v50  ;;  %v1809_v55 = vadd.f32 %v2838_v51, %v3892_v58 }
 0x11a   : > { %v3916_v56 = vadd.f32 %v2890_v53, %v1809_v55  ;;  %v2839_v57 = vpop.f32.mrb[16].mxu0 }
 0x11b   : > { %v2891_v59 = vpop.f32.mrb[16].mxu1  ;;  %v2840_v60 = vpop.f32.mrb[17].mxu0 }
 0x11c   : > { %v2841_v61 = vadd.f32 %v2840_v60, %v2839_v57  ;;  %v2892_v62 = vpop.f32.mrb[17].mxu1  ;;  %v2842_v63 = vpop.f32.mrb[18].mxu0 }
 0x11d   : > { %v2893_v0 = vadd.f32 %v2892_v62, %v2891_v59  ;;  %v2894_v1 = vpop.f32.mrb[18].mxu1  ;;  %v2843_v2 = vpop.f32.mrb[19].mxu0 }
 0x11e   : > { %v1814_v3 = vadd.f32 %v2841_v61, %v3892_v58  ;;  %v2844_v4 = vadd.f32 %v2843_v2, %v2842_v63  ;;  %v2895_v5 = vpop.f32.mrb[19].mxu1 }
 0x11f   : > { %v2896_v7 = vadd.f32 %v2895_v5, %v2894_v1 }
 0x120   : > { %v3919_v9 = vadd.f32 %v2893_v0, %v1814_v3  ;;  %v1817_v10 = vadd.f32 %v2844_v4, %v3892_v58 }
 0x122   : > { %v3922_v11 = vadd.f32 %v2896_v7, %v1817_v10  ;;  %v2845_v12 = vpop.f32.mrb[20].mxu0 }
 0x123   : > { %v2897_v13 = vpop.f32.mrb[20].mxu1  ;;  %v2846_v14 = vpop.f32.mrb[21].mxu0 }
 0x124   : > { %v2847_v15 = vadd.f32 %v2846_v14, %v2845_v12  ;;  %v2898_v16 = vpop.f32.mrb[21].mxu1  ;;  %v2848_v17 = vpop.f32.mrb[22].mxu0 }
 0x125   : > { %v2899_v18 = vadd.f32 %v2898_v16, %v2897_v13  ;;  %v2900_v19 = vpop.f32.mrb[22].mxu1  ;;  %v2849_v20 = vpop.f32.mrb[23].mxu0 }
 0x126   : > { %v1822_v21 = vadd.f32 %v2847_v15, %v3892_v58  ;;  %v2901_v23 = vpop.f32.mrb[23].mxu1 }
 0x128   : > { %v3925_v25 = vadd.f32 %v2899_v18, %v1822_v21 }
 0x12a   : > { %v2919_v26 = vpop.f32.mrb[24].mxu0 }
 0x12b   : > { %v2971_v27 = vpop.f32.mrb[24].mxu1  ;;  %v2920_v28 = vpop.f32.mrb[25].mxu0 }
 0x12c   : > { %v2921_v29 = vadd.f32 %v2920_v28, %v2919_v26  ;;  %v2972_v30 = vpop.f32.mrb[25].mxu1  ;;  %v2922_v31 = vpop.f32.mrb[26].mxu0 }
 0x12d   : > { %v2973_v32 = vadd.f32 %v2972_v30, %v2971_v27  ;;  %v2974_v33 = vpop.f32.mrb[26].mxu1  ;;  %v2923_v34 = vpop.f32.mrb[27].mxu0 }
 0x12e   : > { %v1942_v35 = vadd.f32 %v2921_v29, %v3895_v6  ;;  %v2924_v36 = vadd.f32 %v2923_v34, %v2922_v31  ;;  %v2975_v37 = vpop.f32.mrb[27].mxu1 }
 0x12f   : > { %v2976_v39 = vadd.f32 %v2975_v37, %v2974_v33 }
 0x130   : > { %v3928_v41 = vadd.f32 %v2973_v32, %v1942_v35  ;;  %v1945_v58 = vadd.f32 %v2924_v36, %v3898_v8 }
 0x132   : > { %v3931_v42 = vadd.f32 %v2976_v39, %v1945_v58  ;;  %v2925_v43 = vpop.f32.mrb[28].mxu0 }
 0x133   : > { %v2977_v44 = vpop.f32.mrb[28].mxu1  ;;  %v2926_v45 = vpop.f32.mrb[29].mxu0 }
 0x134   : > { %v2927_v46 = vadd.f32 %v2926_v45, %v2925_v43  ;;  %v2978_v47 = vpop.f32.mrb[29].mxu1  ;;  %v2928_v48 = vpop.f32.mrb[30].mxu0 }
 0x135   : > { %v2979_v49 = vadd.f32 %v2978_v47, %v2977_v44  ;;  %v2980_v50 = vpop.f32.mrb[30].mxu1  ;;  %v2929_v51 = vpop.f32.mrb[31].mxu0 }
 0x136   : > { %v1950_v6 = vadd.f32 %v2927_v46, %v3901_v22  ;;  %v2930_v52 = vadd.f32 %v2929_v51, %v2928_v48  ;;  %v2981_v53 = vpop.f32.mrb[31].mxu1 }
 0x137   : > { %v2982_v55 = vadd.f32 %v2981_v53, %v2980_v50 }
 0x138   : > { %v3934_v57 = vadd.f32 %v2979_v49, %v1950_v6  ;;  %v1953_v8 = vadd.f32 %v2930_v52, %v3904_v24 }
 0x13a   : > { %v3937_v59 = vadd.f32 %v2982_v55, %v1953_v8  ;;  %v2931_v60 = vpop.f32.mrb[32].mxu0 }
 0x13b   : > { %v2983_v61 = vpop.f32.mrb[32].mxu1  ;;  %v2932_v62 = vpop.f32.mrb[33].mxu0 }
 0x13c   : > { %v2933_v63 = vadd.f32 %v2932_v62, %v2931_v60  ;;  %v2984_v0 = vpop.f32.mrb[33].mxu1  ;;  %v2934_v1 = vpop.f32.mrb[34].mxu0 }
 0x13d   : > { %v2985_v2 = vadd.f32 %v2984_v0, %v2983_v61  ;;  %v2986_v3 = vpop.f32.mrb[34].mxu1  ;;  %v2935_v4 = vpop.f32.mrb[35].mxu0 }
 0x13e   : > { %v1958_v22 = vadd.f32 %v2933_v63, %v3907_v38  ;;  %v2936_v5 = vadd.f32 %v2935_v4, %v2934_v1  ;;  %v2987_v7 = vpop.f32.mrb[35].mxu1 }
 0x13f   : > { %v2988_v10 = vadd.f32 %v2987_v7, %v2986_v3 }
 0x140   : > { %v3940_v12 = vadd.f32 %v2985_v2, %v1958_v22  ;;  %v1961_v24 = vadd.f32 %v2936_v5, %v3910_v40 }
 0x142   : > { %v3943_v13 = vadd.f32 %v2988_v10, %v1961_v24  ;;  %v2937_v14 = vpop.f32.mrb[36].mxu0 }
 0x143   : > { %v2989_v15 = vpop.f32.mrb[36].mxu1  ;;  %v2938_v16 = vpop.f32.mrb[37].mxu0 }
 0x144   : > { %v2939_v17 = vadd.f32 %v2938_v16, %v2937_v14  ;;  %v2990_v18 = vpop.f32.mrb[37].mxu1  ;;  %v2940_v19 = vpop.f32.mrb[38].mxu0 }
 0x145   : > { %v2991_v20 = vadd.f32 %v2990_v18, %v2989_v15  ;;  %v2992_v21 = vpop.f32.mrb[38].mxu1  ;;  %v2941_v23 = vpop.f32.mrb[39].mxu0 }
 0x146   : > { %v1966_v38 = vadd.f32 %v2939_v17, %v3913_v54  ;;  %v2942_v26 = vadd.f32 %v2941_v23, %v2940_v19  ;;  %v2993_v27 = vpop.f32.mrb[39].mxu1 }
 0x147   : > { %v2994_v28 = vadd.f32 %v2993_v27, %v2992_v21 }
 0x148   : > { %v3946_v29 = vadd.f32 %v2991_v20, %v1966_v38  ;;  %v1969_v40 = vadd.f32 %v2942_v26, %v3916_v56 }
 0x14a   : > { %v3949_v30 = vadd.f32 %v2994_v28, %v1969_v40  ;;  %v2943_v31 = vpop.f32.mrb[40].mxu0 }
 0x14b   : > { %v2995_v32 = vpop.f32.mrb[40].mxu1  ;;  %v2944_v33 = vpop.f32.mrb[41].mxu0 }
 0x14c   : > { %v2945_v34 = vadd.f32 %v2944_v33, %v2943_v31  ;;  %v2996_v35 = vpop.f32.mrb[41].mxu1  ;;  %v2946_v36 = vpop.f32.mrb[42].mxu0 }
 0x14d   : > { %v2997_v37 = vadd.f32 %v2996_v35, %v2995_v32  ;;  %v2998_v39 = vpop.f32.mrb[42].mxu1  ;;  %v2947_v58 = vpop.f32.mrb[43].mxu0 }
 0x14e   : > { %v1974_v54 = vadd.f32 %v2945_v34, %v3919_v9  ;;  %v2948_v43 = vadd.f32 %v2947_v58, %v2946_v36  ;;  %v2999_v44 = vpop.f32.mrb[43].mxu1 }
 0x14f   : > { %v3000_v45 = vadd.f32 %v2999_v44, %v2998_v39 }
 0x150   : > { %v3952_v46 = vadd.f32 %v2997_v37, %v1974_v54  ;;  %v1977_v56 = vadd.f32 %v2948_v43, %v3922_v11 }
 0x152   : > { %v3955_v47 = vadd.f32 %v3000_v45, %v1977_v56  ;;  %v2949_v48 = vpop.f32.mrb[44].mxu0 }
 0x153   : > { %v3001_v49 = vpop.f32.mrb[44].mxu1  ;;  %v2950_v50 = vpop.f32.mrb[45].mxu0 }
 0x154   : > { %v2951_v51 = vadd.f32 %v2950_v50, %v2949_v48  ;;  %v3002_v6 = vpop.f32.mrb[45].mxu1  ;;  %v2952_v52 = vpop.f32.mrb[46].mxu0 }
 0x155   : > { %v3003_v53 = vadd.f32 %v3002_v6, %v3001_v49  ;;  %v3004_v55 = vpop.f32.mrb[46].mxu1  ;;  %v2953_v8 = vpop.f32.mrb[47].mxu0 }
 0x156   : > { %v1982_v9 = vadd.f32 %v2951_v51, %v3925_v25  ;;  %v3005_v60 = vpop.f32.mrb[47].mxu1 }
 0x158   : > { %v3958_v61 = vadd.f32 %v3003_v53, %v1982_v9 }
 0x15a   : > { %v3023_v62 = vpop.f32.mrb[48].mxu0 }
 0x15b   : > { %v3075_v63 = vpop.f32.mrb[48].mxu1  ;;  %v3024_v0 = vpop.f32.mrb[49].mxu0 }
 0x15c   : > { %v3025_v11 = vadd.f32 %v3024_v0, %v3023_v62  ;;  %v3076_v1 = vpop.f32.mrb[49].mxu1  ;;  %v3026_v2 = vpop.f32.mrb[50].mxu0 }
 0x15d   : > { %v3077_v3 = vadd.f32 %v3076_v1, %v3075_v63  ;;  %v3078_v4 = vpop.f32.mrb[50].mxu1  ;;  %v3027_v22 = vpop.f32.mrb[51].mxu0 }
 0x15e   : > { %v2102_v5 = vadd.f32 %v3025_v11, %v3928_v41  ;;  %v3028_v7 = vadd.f32 %v3027_v22, %v3026_v2  ;;  %v3079_v10 = vpop.f32.mrb[51].mxu1 }
 0x15f   : > { %v3080_v24 = vadd.f32 %v3079_v10, %v3078_v4 }
 0x160   : > { %v3961_v14 = vadd.f32 %v3077_v3, %v2102_v5  ;;  %v2105_v25 = vadd.f32 %v3028_v7, %v3931_v42 }
 0x162   : > { %v3964_v15 = vadd.f32 %v3080_v24, %v2105_v25  ;;  %v3029_v16 = vpop.f32.mrb[52].mxu0 }
 0x163   : > { %v3081_v17 = vpop.f32.mrb[52].mxu1  ;;  %v3030_v18 = vpop.f32.mrb[53].mxu0 }
 0x164   : > { %v3031_v19 = vadd.f32 %v3030_v18, %v3029_v16  ;;  %v3082_v20 = vpop.f32.mrb[53].mxu1  ;;  %v3032_v21 = vpop.f32.mrb[54].mxu0 }
 0x165   : > { %v3083_v23 = vadd.f32 %v3082_v20, %v3081_v17  ;;  %v3084_v38 = vpop.f32.mrb[54].mxu1  ;;  %v3033_v26 = vpop.f32.mrb[55].mxu0 }
 0x166   : > { %v2110_v41 = vadd.f32 %v3031_v19, %v3934_v57  ;;  %v3034_v27 = vadd.f32 %v3033_v26, %v3032_v21  ;;  %v3085_v28 = vpop.f32.mrb[55].mxu1 }
 0x167   : > { %v3086_v40 = vadd.f32 %v3085_v28, %v3084_v38 }
 0x168   : > { %v3967_v31 = vadd.f32 %v3083_v23, %v2110_v41  ;;  %v2113_v42 = vadd.f32 %v3034_v27, %v3937_v59 }
 0x16a   : > { %v3970_v32 = vadd.f32 %v3086_v40, %v2113_v42  ;;  %v3035_v33 = vpop.f32.mrb[56].mxu0 }
 0x16b   : > { %v3087_v34 = vpop.f32.mrb[56].mxu1  ;;  %v3036_v35 = vpop.f32.mrb[57].mxu0 }
 0x16c   : > { %v3037_v36 = vadd.f32 %v3036_v35, %v3035_v33  ;;  %v3088_v37 = vpop.f32.mrb[57].mxu1  ;;  %v3038_v39 = vpop.f32.mrb[58].mxu0 }
 0x16d   : > { %v3089_v58 = vadd.f32 %v3088_v37, %v3087_v34  ;;  %v3090_v54 = vpop.f32.mrb[58].mxu1  ;;  %v3039_v43 = vpop.f32.mrb[59].mxu0 }
 0x16e   : > { %v2118_v57 = vadd.f32 %v3037_v36, %v3940_v12  ;;  %v3040_v44 = vadd.f32 %v3039_v43, %v3038_v39  ;;  %v3091_v45 = vpop.f32.mrb[59].mxu1 }
 0x16f   : > { %v3092_v56 = vadd.f32 %v3091_v45, %v3090_v54 }
 0x170   : > { %v3973_v48 = vadd.f32 %v3089_v58, %v2118_v57  ;;  %v2121_v59 = vadd.f32 %v3040_v44, %v3943_v13 }
 0x172   : > { %v3976_v49 = vadd.f32 %v3092_v56, %v2121_v59  ;;  %v3041_v50 = vpop.f32.mrb[60].mxu0 }
 0x173   : > { %v3093_v51 = vpop.f32.mrb[60].mxu1  ;;  %v3042_v6 = vpop.f32.mrb[61].mxu0 }
 0x174   : > { %v3043_v52 = vadd.f32 %v3042_v6, %v3041_v50  ;;  %v3094_v53 = vpop.f32.mrb[61].mxu1  ;;  %v3044_v55 = vpop.f32.mrb[62].mxu0 }
 0x175   : > { %v3095_v8 = vadd.f32 %v3094_v53, %v3093_v51  ;;  %v3096_v9 = vpop.f32.mrb[62].mxu1  ;;  %v3045_v60 = vpop.f32.mrb[63].mxu0 }
 0x176   : > { %v2126_v12 = vadd.f32 %v3043_v52, %v3946_v29  ;;  %v3046_v62 = vadd.f32 %v3045_v60, %v3044_v55  ;;  %v3097_v63 = vpop.f32.mrb[63].mxu1 }
 0x177   : > { %v3098_v0 = vadd.f32 %v3097_v63, %v3096_v9 }
 0x178   : > { %v3979_v11 = vadd.f32 %v3095_v8, %v2126_v12  ;;  %v2129_v13 = vadd.f32 %v3046_v62, %v3949_v30 }
 0x17a   : > { %v3982_v1 = vadd.f32 %v3098_v0, %v2129_v13  ;;  %v3047_v2 = vpop.f32.mrb[64].mxu0 }
 0x17b   : > { %v3099_v3 = vpop.f32.mrb[64].mxu1  ;;  %v3048_v4 = vpop.f32.mrb[65].mxu0 }
 0x17c   : > { %v3049_v22 = vadd.f32 %v3048_v4, %v3047_v2  ;;  %v3100_v5 = vpop.f32.mrb[65].mxu1  ;;  %v3050_v7 = vpop.f32.mrb[66].mxu0 }
 0x17d   : > { %v3101_v10 = vadd.f32 %v3100_v5, %v3099_v3  ;;  %v3102_v24 = vpop.f32.mrb[66].mxu1  ;;  %v3051_v25 = vpop.f32.mrb[67].mxu0 }
 0x17e   : > { %v2134_v29 = vadd.f32 %v3049_v22, %v3952_v46  ;;  %v3052_v16 = vadd.f32 %v3051_v25, %v3050_v7  ;;  %v3103_v17 = vpop.f32.mrb[67].mxu1 }
 0x17f   : > { %v3104_v18 = vadd.f32 %v3103_v17, %v3102_v24 }
 0x180   : > { %v3985_v19 = vadd.f32 %v3101_v10, %v2134_v29  ;;  %v2137_v30 = vadd.f32 %v3052_v16, %v3955_v47 }
 0x182   : > { %v3988_v20 = vadd.f32 %v3104_v18, %v2137_v30  ;;  %v3053_v21 = vpop.f32.mrb[68].mxu0 }
 0x183   : > { %v3105_v23 = vpop.f32.mrb[68].mxu1  ;;  %v3054_v38 = vpop.f32.mrb[69].mxu0 }
 0x184   : > { %v3055_v26 = vadd.f32 %v3054_v38, %v3053_v21  ;;  %v3106_v41 = vpop.f32.mrb[69].mxu1  ;;  %v3056_v27 = vpop.f32.mrb[70].mxu0 }
 0x185   : > { %v3107_v28 = vadd.f32 %v3106_v41, %v3105_v23  ;;  %v3108_v40 = vpop.f32.mrb[70].mxu1  ;;  %v3057_v42 = vpop.f32.mrb[71].mxu0 }
 0x186   : > { %v2142_v46 = vadd.f32 %v3055_v26, %v3958_v61  ;;  %v3109_v33 = vpop.f32.mrb[71].mxu1 }
 0x188   : > { %v3991_v34 = vadd.f32 %v3107_v28, %v2142_v46 }
 0x18a   : > { %v3127_v35 = vpop.f32.mrb[72].mxu0 }
 0x18b   : > { %v3179_v36 = vpop.f32.mrb[72].mxu1  ;;  %v3128_v47 = vpop.f32.mrb[73].mxu0 }
 0x18c   : > { %v3129_v37 = vadd.f32 %v3128_v47, %v3127_v35  ;;  %v3180_v39 = vpop.f32.mrb[73].mxu1  ;;  %v3130_v58 = vpop.f32.mrb[74].mxu0 }
 0x18d   : > { %v3181_v54 = vadd.f32 %v3180_v39, %v3179_v36  ;;  %v3182_v43 = vpop.f32.mrb[74].mxu1  ;;  %v3131_v57 = vpop.f32.mrb[75].mxu0 }
 0x18e   : > { %v2262_v44 = vadd.f32 %v3129_v37, %v3961_v14  ;;  %v3132_v45 = vadd.f32 %v3131_v57, %v3130_v58  ;;  %v3183_v56 = vpop.f32.mrb[75].mxu1 }
 0x18f   : > { %v3184_v59 = vadd.f32 %v3183_v56, %v3182_v43 }
 0x190   : > { %v2342_v50 = vadd.f32 %v3181_v54, %v2262_v44  ;;  %v2265_v61 = vadd.f32 %v3132_v45, %v3964_v15 }
 0x192   : > { %v2345_v51 = vadd.f32 %v3184_v59, %v2265_v61  ;;  %v3133_v6 = vpop.f32.mrb[76].mxu0  ;;  %v2387_v55 = vmax.f32 %v2342_v50, 0.0 }
 0x193   : > { %v3185_v52 = vpop.f32.mrb[76].mxu1  ;;  %v3134_v53 = vpop.f32.mrb[77].mxu0 }
 0x194   : > { %v2388_v8 = vmax.f32 %v2345_v51, 0.0  ;;  %v3135_v9 = vadd.f32 %v3134_v53, %v3133_v6  ;;  %v3186_v60 = vpop.f32.mrb[77].mxu1  ;;  %v3136_v12 = vpop.f32.mrb[78].mxu0 }
 0x195   : > { %v3187_v14 = vadd.f32 %v3186_v60, %v3185_v52  ;;  %v3188_v62 = vpop.f32.mrb[78].mxu1  ;;  %v3137_v63 = vpop.f32.mrb[79].mxu0 }
 0x196   : > { %v2773_v15 = vpack.c.bf16 %v2388_v8, %v2387_v55  ;;  %v2270_v0 = vadd.f32 %v3135_v9, %v3967_v31  ;;  %v3138_v13 = vadd.f32 %v3137_v63, %v3136_v12  ;;  %v3189_v2 = vpop.f32.mrb[79].mxu1 }
 0x197   : > { %v3190_v3 = vadd.f32 %v3189_v2, %v3188_v62 }
 0x198   : > { %2774 = vst [vmem:[%s3999_s9] sm:$0xff] %v2773_v15   ;;  %v2350_v4 = vadd.f32 %v3187_v14, %v2270_v0  ;;  %v2273_v22 = vadd.f32 %v3138_v13, %v3970_v32 }
 0x19a   : > { %v2353_v5 = vadd.f32 %v3190_v3, %v2273_v22  ;;  %v3139_v7 = vpop.f32.mrb[80].mxu0  ;;  %v2389_v25 = vmax.f32 %v2350_v4, 0.0 }
 0x19b   : > { %v3191_v10 = vpop.f32.mrb[80].mxu1  ;;  %v3140_v24 = vpop.f32.mrb[81].mxu0 }
 0x19c   : > { %v2390_v29 = vmax.f32 %v2353_v5, 0.0  ;;  %v3141_v16 = vadd.f32 %v3140_v24, %v3139_v7  ;;  %v3192_v17 = vpop.f32.mrb[81].mxu1  ;;  %v3142_v18 = vpop.f32.mrb[82].mxu0 }
 0x19d   : > { %v3193_v30 = vadd.f32 %v3192_v17, %v3191_v10  ;;  %v3194_v21 = vpop.f32.mrb[82].mxu1  ;;  %v3143_v31 = vpop.f32.mrb[83].mxu0 }
 0x19e   : > { %v2778_v23 = vpack.c.bf16 %v2390_v29, %v2389_v25  ;;  %v2278_v38 = vadd.f32 %v3141_v16, %v3973_v48  ;;  %v3144_v26 = vadd.f32 %v3143_v31, %v3142_v18  ;;  %v3195_v41 = vpop.f32.mrb[83].mxu1  ;;  %v2456_v31 = vld [vmem:[%s3999_s9 + $0x28] sm:$0x1] }
 0x19f   : > { %v3196_v27 = vadd.f32 %v3195_v41, %v3194_v21 }
 0x1a0   : > { %2795 = vst [vmem:[%s3999_s9 + $0x8] sm:$0xff] %v2778_v23   ;;  %v2358_v32 = vadd.f32 %v3193_v30, %v2278_v38  ;;  %v2281_v28 = vadd.f32 %v3144_v26, %v3976_v49 }
 0x1a2   : > { %v2361_v40 = vadd.f32 %v3196_v27, %v2281_v28  ;;  %v3145_v42 = vpop.f32.mrb[84].mxu0  ;;  %v2391_v35 = vmax.f32 %v2358_v32, 0.0 }
 0x1a3   : > { %v3197_v46 = vpop.f32.mrb[84].mxu1  ;;  %v3146_v33 = vpop.f32.mrb[85].mxu0 }
 0x1a4   : > { %v2392_v36 = vmax.f32 %v2361_v40, 0.0  ;;  %v3147_v47 = vadd.f32 %v3146_v33, %v3145_v42  ;;  %v3198_v37 = vpop.f32.mrb[85].mxu1  ;;  %v3148_v39 = vpop.f32.mrb[86].mxu0 }
 0x1a5   : > { %v3199_v58 = vadd.f32 %v3198_v37, %v3197_v46  ;;  %v3200_v54 = vpop.f32.mrb[86].mxu1  ;;  %v3149_v48 = vpop.f32.mrb[87].mxu0 }
 0x1a6   : > { %v2783_v43 = vpack.c.bf16 %v2392_v36, %v2391_v35  ;;  %v2286_v57 = vadd.f32 %v3147_v47, %v3979_v11  ;;  %v3150_v44 = vadd.f32 %v3149_v48, %v3148_v39  ;;  %v3201_v45 = vpop.f32.mrb[87].mxu1 }
 0x1a7   : > { %v3202_v56 = vadd.f32 %v3201_v45, %v3200_v54 }
 0x1a8   : > { %2796 = vst [vmem:[%s3999_s9 + $0x10] sm:$0xff] %v2783_v43   ;;  %v2366_v49 = vadd.f32 %v3199_v58, %v2286_v57  ;;  %v2289_v59 = vadd.f32 %v3150_v44, %v3982_v1 }
 0x1aa   : > { %v2369_v50 = vadd.f32 %v3202_v56, %v2289_v59  ;;  %v3151_v61 = vpop.f32.mrb[88].mxu0  ;;  %v2393_v52 = vmax.f32 %v2366_v49, 0.0 }
 0x1ab   : > { %v3203_v51 = vpop.f32.mrb[88].mxu1  ;;  %v3152_v6 = vpop.f32.mrb[89].mxu0 }
 0x1ac   : > { %v2394_v53 = vmax.f32 %v2369_v50, 0.0  ;;  %v3153_v55 = vadd.f32 %v3152_v6, %v3151_v61  ;;  %v3204_v8 = vpop.f32.mrb[89].mxu1  ;;  %v3154_v9 = vpop.f32.mrb[90].mxu0 }
 0x1ad   : > { %v3205_v60 = vadd.f32 %v3204_v8, %v3203_v51  ;;  %v3206_v12 = vpop.f32.mrb[90].mxu1  ;;  %v3155_v11 = vpop.f32.mrb[91].mxu0 }
 0x1ae   : > { %v2788_v14 = vpack.c.bf16 %v2394_v53, %v2393_v52  ;;  %v2294_v62 = vadd.f32 %v3153_v55, %v3985_v19  ;;  %v3156_v63 = vadd.f32 %v3155_v11, %v3154_v9  ;;  %v3207_v15 = vpop.f32.mrb[91].mxu1 }
 0x1af   : > { %v3208_v0 = vadd.f32 %v3207_v15, %v3206_v12 }
 0x1b0   : > { %2797 = vst [vmem:[%s3999_s9 + $0x18] sm:$0xff] %v2788_v14   ;;  %v2374_v1 = vadd.f32 %v3205_v60, %v2294_v62  ;;  %v2297_v13 = vadd.f32 %v3156_v63, %v3988_v20 }
 0x1b2   : > { %v2377_v2 = vadd.f32 %v3208_v0, %v2297_v13  ;;  %v3157_v3 = vpop.f32.mrb[92].mxu0  ;;  %v2395_v5 = vmax.f32 %v2374_v1, 0.0 }
 0x1b3   : > { %v3209_v4 = vpop.f32.mrb[92].mxu1  ;;  %v3158_v22 = vpop.f32.mrb[93].mxu0 }
 0x1b4   : > { %v2396_v7 = vmax.f32 %v2377_v2, 0.0  ;;  %v3159_v10 = vadd.f32 %v3158_v22, %v3157_v3  ;;  %v3210_v24 = vpop.f32.mrb[93].mxu1  ;;  %v3160_v25 = vpop.f32.mrb[94].mxu0 }
 0x1b5   : > { %v3211_v19 = vadd.f32 %v3210_v24, %v3209_v4  ;;  %v3212_v29 = vpop.f32.mrb[94].mxu1  ;;  %v3161_v16 = vpop.f32.mrb[95].mxu0 }
 0x1b6   : > { %v2793_v17 = vpack.c.bf16 %v2396_v7, %v2395_v5  ;;  %v2302_v18 = vadd.f32 %v3159_v10, %v3991_v34  ;;  %v3213_v30 = vpop.f32.mrb[95].mxu1 }
 0x1b8   : > { %2798 = vst [vmem:[%s3999_s9 + $0x20] sm:$0xff] %v2793_v17   ;;  %v2382_v20 = vadd.f32 %v3211_v19, %v2302_v18 }
 0x1ba   : > { %v2397_v21 = vmax.f32 %v2382_v20, 0.0 }
 0x1bc   : > { %v2769_v23 = vpack.c.bf16 %v2397_v21, %v2397_v21 }
 0x1be   : > { %v2457_v38 = vsel %vm2455_vm2, %v2769_v23, %v2456_v31 }
 0x1bf   : > { %2458 = vst [vmem:[%s3999_s9 + $0x28] sm:$0x1] %v2457_v38 }
 0x1c0 PF: > { %s13_s12 = sadd.s32 1, %s3375_s12  }
 0x1c1   : > { %p10_p4 = scmp.ge.s32.totalorder %s13_s12, 4  }
 0x1c3   :  { %12 = sbr.rel (!%p10_p4) target bundleno = 1 (0x1), region = 62 }

// kernel: atari_net_forward.7
= control target key start
LH: loop header
LB: loop body
LE: loop exit
PB: predicated region body
PF: predicated region fallthrough
CT: control target
= control target key end

     0   :  { %s1886_s12 = smov 0   ;;  %s2185_s0 = inlined_call_operand.vmem [shape: bf16[2,49,1152], index: 0, kind: input, shape index: {}]   ;;  %s2186_s1 = inlined_call_operand.vmem [shape: bf16[1152,64], index: 1, kind: input, shape index: {}]   ;;  %s2187_s2 = inlined_call_operand.vmem [shape: f32[1,64], index: 2, kind: input, shape index: {}]   ;;  %s2188_s3 = inlined_call_operand.vmem [shape: bf16[2,49,64], index: 3, kind: output, shape index: {}]  }
   0x1 LB: > { %s1384_s13 = sadd.s32 4294967295, %s1864_s12   ;;  %p1388_p0 = scmp.ge.s32.totalorder %s1864_s12, 1  ;;  %s1864_s12 = sphi %s1886_s12, %s13_s12  }
   0x2   : > { %p137_p1 = scmp.lt.s32.totalorder %s1864_s12, 3 }
   0x4   : > { %p138_p2 = pnand %p1388_p0, %p137_p1 }
   0x5   : > { %v1738_v0 = vld [vmem:[%s2186_s1 + $0x40] sm:$0xff] (!%p138_p2)   ;;  %v1742_v4 = vld [vmem:[%s2186_s1 + $0x48] sm:$0xff] (!%p138_p2)   ;;  %v1746_v8 = vld [vmem:[%s2186_s1 + $0x50] sm:$0xff] (!%p138_p2)   ;;  %p161_p3 = scmp.lt.s32.totalorder (!%p138_p2), %s1384_s13, 1  ;;  %vm1323_vm0 = vcmask (!%p138_p2), 516096   ;;  %vm1316_vm2 = vcmask (!%p138_p2), 519168  }
   0x6   : > { %141 = sbr.rel (%p138_p2) target bundleno = 327 (0x147), region = 32  ;;  %v1739_v1 = vld [vmem:[%s2186_s1 + $0xc0] sm:$0xff] (!%p138_p2)   ;;  %1516 = vmatprep.subr.bf16.mxu0 (!%p138_p2), %v1738_v0  ;;  %v1743_v5 = vld [vmem:[%s2186_s1 + $0xc8] sm:$0xff] (!%p138_p2)   ;;  %v1747_v9 = vld [vmem:[%s2186_s1 + $0xd0] sm:$0xff] (!%p138_p2)   ;;  %vm1324_vm1 = vsmask.f32 (!%p138_p2), 256 }
   0x7   : > { %v1740_v2 = vld [vmem:[%s2186_s1] sm:$0xff] (!%p138_p2)   ;;  %1556 = vmatprep.subr.bf16.mxu1 (!%p138_p2), %v1739_v1  ;;  %v1744_v6 = vld [vmem:[%s2186_s1 + $0x8] sm:$0xff] (!%p138_p2)   ;;  %v1748_v10 = vld [vmem:[%s2186_s1 + $0x10] sm:$0xff] (!%p138_p2)  }
   0x8   : > { %v1741_v3 = vld [vmem:[%s2186_s1 + $0x80] sm:$0xff] (!%p138_p2)   ;;  %1517 = vmatpush3.bf16.msra.mxu0 (!%p138_p2), %v1740_v2  ;;  %v1745_v7 = vld [vmem:[%s2186_s1 + $0x88] sm:$0xff] (!%p138_p2)   ;;  %v1749_v11 = vld [vmem:[%s2186_s1 + $0x90] sm:$0xff] (!%p138_p2)  }
   0x9   : > { %1557 = vmatpush3.bf16.msra.mxu1 (!%p138_p2), %v1741_v3  ;;  %1518 = vmatprep.subr.bf16.mxu0 (!%p138_p2), %v1742_v4  ;;  %v1750_v12 = vld [vmem:[%s2186_s1 + $0x58] sm:$0xff] (!%p138_p2)   ;;  %v1754_v16 = vld [vmem:[%s2186_s1 + $0x60] sm:$0xff] (!%p138_p2)   ;;  %v1758_v20 = vld [vmem:[%s2186_s1 + $0x68] sm:$0xff] (!%p138_p2)  }
   0xa   : > { %1558 = vmatprep.subr.bf16.mxu1 (!%p138_p2), %v1743_v5  ;;  %v1751_v13 = vld [vmem:[%s2186_s1 + $0xd8] sm:$0xff] (!%p138_p2)   ;;  %v1755_v17 = vld [vmem:[%s2186_s1 + $0xe0] sm:$0xff] (!%p138_p2)   ;;  %v1759_v21 = vld [vmem:[%s2186_s1 + $0xe8] sm:$0xff] (!%p138_p2)  }
   0xb   : > { %v1752_v14 = vld [vmem:[%s2186_s1 + $0x18] sm:$0xff] (!%p138_p2)   ;;  %v1756_v18 = vld [vmem:[%s2186_s1 + $0x20] sm:$0xff] (!%p138_p2)   ;;  %v1760_v22 = vld [vmem:[%s2186_s1 + $0x28] sm:$0xff] (!%p138_p2)  }
   0xc   : > { %1519 = vmatpush3.bf16.msra.mxu0 (!%p138_p2), %v1744_v6  ;;  %v1753_v15 = vld [vmem:[%s2186_s1 + $0x98] sm:$0xff] (!%p138_p2)   ;;  %v1757_v19 = vld [vmem:[%s2186_s1 + $0xa0] sm:$0xff] (!%p138_p2)   ;;  %v1761_v23 = vld [vmem:[%s2186_s1 + $0xa8] sm:$0xff] (!%p138_p2)  }
   0xd   : > { %1559 = vmatpush3.bf16.msra.mxu1 %v1745_v7  ;;  %1520 = vmatprep.subr.bf16.mxu0 %v1746_v8  ;;  %s2190_s13 = smov (!%p161_p3, %s1384_s13), 1  ;;  %v1762_v24 = vld [vmem:[%s2186_s1 + $0x70] sm:$0xff]   ;;  %v1766_v28 = vld [vmem:[%s2186_s1 + $0x78] sm:$0xff]   ;;  %v1776_v36 = vld [vmem:[%s2186_s1 + $0x140] sm:$0xff]  }
   0xe   : > { %1560 = vmatprep.subr.bf16.mxu1 %v1747_v9  ;;  %v1763_v25 = vld [vmem:[%s2186_s1 + $0xf0] sm:$0xff]   ;;  %s1728_s16 = smul.u32 252, %s2190_s13  ;;  %v1767_v29 = vld [vmem:[%s2186_s1 + $0xf8] sm:$0xff]   ;;  %v1777_v37 = vld [vmem:[%s2186_s1 + $0x1c0] sm:$0xff]  }
   0xf   : > { %v1764_v26 = vld [vmem:[%s2186_s1 + $0x30] sm:$0xff]   ;;  %v1768_v30 = vld [vmem:[%s2186_s1 + $0x38] sm:$0xff]   ;;  %v1778_v38 = vld [vmem:[%s2186_s1 + $0x100] sm:$0xff]  }
  0x10   : > { %1521 = vmatpush3.bf16.msra.mxu0 %v1748_v10  ;;  %v1765_v27 = vld [vmem:[%s2186_s1 + $0xb0] sm:$0xff]   ;;  %s1994_s27 = scalar_lea.vmem %s2185_s0, %s1728_s16  ;;  %v1769_v31 = vld [vmem:[%s2186_s1 + $0xb8] sm:$0xff]   ;;  %v1779_v39 = vld [vmem:[%s2186_s1 + $0x180] sm:$0xff]  }
  0x11   : > { %1561 = vmatpush3.bf16.msra.mxu1 %v1749_v11  ;;  %1522 = vmatprep.subr.bf16.mxu0 %v1750_v12  ;;  %v1770_v32 = vld [vmem:[%s1994_s27] ss:$36 sps:$4 sm:$0xff]   ;;  %v1773_v34 = vld [vmem:[%s1994_s27 + $0x8] ss:$36 sps:$4 sm:$0xff]   ;;  %v1786_v45 = vld [vmem:[%s1994_s27 + $0x54] ss:$36 sps:$4 sm:$0xff]  }
  0x12   : > { %1562 = vmatprep.subr.bf16.mxu1 %v1751_v13  ;;  %v1772_v33 = vld [vmem:[%s1994_s27 + $0x4] ss:$36 sps:$4 sm:$0xff]   ;;  %v1775_v35 = vld [vmem:[%s1994_s27 + $0xc] ss:$36 sps:$4 sm:$0xff]   ;;  %v1794_v52 = vld [vmem:[%s2186_s1 + $0x158] sm:$0xff]  }
  0x13   : > { %992 = vmatprep.mubr.bf16.mxu0 %v1772_v33  ;;  %1056 = vmatprep.mubr.bf16.mxu1 %v1775_v35  ;;  %v1780_v40 = vld [vmem:[%s2186_s1 + $0x148] sm:$0xff]   ;;  %v1789_v47 = vld [vmem:[%s1994_s27 + $0x50] ss:$36 sps:$4 sm:$0xff]   ;;  %v1795_v53 = vld [vmem:[%s2186_s1 + $0x1d8] sm:$0xff]  }
  0x14   : > { %1523 = vmatpush3.bf16.msra.mxu0 %v1752_v14  ;;  %v1781_v41 = vld [vmem:[%s2186_s1 + $0x1c8] sm:$0xff]   ;;  %v1790_v48 = vld [vmem:[%s2186_s1 + $0x150] sm:$0xff]   ;;  %v1796_v54 = vld [vmem:[%s2186_s1 + $0x118] sm:$0xff]  }
  0x15   : > { %1563 = vmatpush3.bf16.msra.mxu1 %v1753_v15  ;;  %1524 = vmatprep.subr.bf16.mxu0 %v1754_v16  ;;  %v1782_v42 = vld [vmem:[%s2186_s1 + $0x108] sm:$0xff]   ;;  %v1791_v49 = vld [vmem:[%s2186_s1 + $0x1d0] sm:$0xff]   ;;  %v1797_v55 = vld [vmem:[%s2186_s1 + $0x198] sm:$0xff]  }
  0x16   : > { %1564 = vmatprep.subr.bf16.mxu1 %v1755_v17  ;;  %v1783_v43 = vld [vmem:[%s2186_s1 + $0x188] sm:$0xff]   ;;  %v1792_v50 = vld [vmem:[%s2186_s1 + $0x110] sm:$0xff]   ;;  %v1800_v57 = vld [vmem:[%s1994_s27 + $0x9c] ss:$36 sps:$4 sm:$0xff]  }
  0x17   : > { %v1784_v44 = vld [vmem:[%s1994_s27 + $0x4c] ss:$36 sps:$4 sm:$0xff]   ;;  %v1798_v56 = vld [vmem:[%s1994_s27 + $0x94] ss:$36 sps:$4 sm:$0xff]   ;;  %v1804_v60 = vld [vmem:[%s2186_s1 + $0x160] sm:$0xff]  }
  0x18   : > { %1525 = vmatpush3.bf16.msra.mxu0 %v1756_v18  ;;  %v1788_v46 = vld [vmem:[%s1994_s27 + $0x48] ss:$36 sps:$4 sm:$0xff]   ;;  %v1793_v51 = vld [vmem:[%s2186_s1 + $0x190] sm:$0xff]   ;;  %v1803_v59 = vld [vmem:[%s1994_s27 + $0x98] ss:$36 sps:$4 sm:$0xff]  }
  0x19   : > { %1565 = vmatpush3.bf16.msra.mxu1 %v1757_v19  ;;  %1526 = vmatprep.subr.bf16.mxu0 %v1758_v20  ;;  %v1802_v58 = vld [vmem:[%s1994_s27 + $0x90] ss:$36 sps:$4 sm:$0xff]   ;;  %v1805_v61 = vld [vmem:[%s2186_s1 + $0x1e0] sm:$0xff]   ;;  %v1808_v0 = vld [vmem:[%s2186_s1 + $0x168] sm:$0xff]  }
  0x1a   : > { %1566 = vmatprep.subr.bf16.mxu1 %v1759_v21  ;;  %v1806_v62 = vld [vmem:[%s2186_s1 + $0x120] sm:$0xff]   ;;  %v1809_v1 = vld [vmem:[%s2186_s1 + $0x1e8] sm:$0xff]   ;;  %v202_v4 = vld [vmem:[%s1994_s27 + $0xd8] sm:$0x11] }
  0x1b   : > { %v1807_v63 = vld [vmem:[%s2186_s1 + $0x1a0] sm:$0xff]   ;;  %v1810_v2 = vld [vmem:[%s2186_s1 + $0x128] sm:$0xff]   ;;  %v1420_v6 = vcombine.high %v202_v4, %v202_v4  ;;  %v1419_v8 = vcombine.low %v202_v4, %v202_v4  ;;  %v1816_v10 = vld [vmem:[%s2186_s1 + $0x170] sm:$0xff]  }
  0x1c   : > { %1527 = vmatpush3.bf16.msra.mxu0 %v1760_v22  ;;  %v1811_v3 = vld [vmem:[%s2186_s1 + $0x1a8] sm:$0xff]   ;;  %v203_v5 = vld [vmem:[%s1994_s27 + $0xe0] sm:$0x11]  ;;  %v1817_v11 = vld [vmem:[%s2186_s1 + $0x1f0] sm:$0xff]  }
  0x1d   : > { %1567 = vmatpush3.bf16.msra.mxu1 %v1761_v23  ;;  %1528 = vmatprep.subr.bf16.mxu0 %v1762_v24  ;;  %v1422_v7 = vcombine.high %v203_v5, %v203_v5  ;;  %v1421_v9 = vcombine.low %v203_v5, %v203_v5  ;;  %v1818_v12 = vld [vmem:[%s2186_s1 + $0x130] sm:$0xff]   ;;  %v1820_v14 = vld [vmem:[%s2186_s1 + $0x178] sm:$0xff]   ;;  %v1830_v22 = vld [vmem:[%s2186_s1 + $0x200] sm:$0xff]  }
  0x1e   : > { %1568 = vmatprep.subr.bf16.mxu1 %v1763_v25  ;;  %v1819_v13 = vld [vmem:[%s2186_s1 + $0x1b0] sm:$0xff]   ;;  %v1821_v15 = vld [vmem:[%s2186_s1 + $0x1f8] sm:$0xff]   ;;  %v1831_v23 = vld [vmem:[%s2186_s1 + $0x208] sm:$0xff]  }
  0x1f   : > { %v1822_v16 = vld [vmem:[%s2186_s1 + $0x138] sm:$0xff]   ;;  %v1824_v18 = vld [vmem:[%s1994_s27 + $0x10] ss:$36 sps:$4 sm:$0xff]   ;;  %v1834_v25 = vld [vmem:[%s1994_s27 + $0x64] ss:$36 sps:$4 sm:$0xff]  }
  0x20   : > { %1529 = vmatpush3.bf16.msra.mxu0 %v1764_v26  ;;  %v1823_v17 = vld [vmem:[%s2186_s1 + $0x1b8] sm:$0xff]   ;;  %v204_v33 = vld [vmem:[%s1994_s27 + $0xe8] sm:$0x11]  ;;  %v1844_v35 = vld [vmem:[%s1994_s27 + $0xa0] ss:$36 sps:$4 sm:$0xff]  }
  0x21   : > { %1569 = vmatpush3.bf16.msra.mxu1 %v1765_v27  ;;  %1530 = vmatprep.subr.bf16.mxu0 %v1766_v28  ;;  %v1826_v19 = vld [vmem:[%s1994_s27 + $0x14] ss:$36 sps:$4 sm:$0xff]   ;;  %v1829_v21 = vld [vmem:[%s1994_s27 + $0x1c] ss:$36 sps:$4 sm:$0xff]   ;;  %vm1325_vm3 = vmand %vm1323_vm0, %vm1324_vm1 }
  0x22   : > { %1570 = vmatprep.subr.bf16.mxu1 %v1767_v29  ;;  %v1827_v20 = vld [vmem:[%s1994_s27 + $0x18] ss:$36 sps:$4 sm:$0xff]   ;;  %v1838_v27 = vld [vmem:[%s2186_s1 + $0x210] sm:$0xff]   ;;  %v1837_v28 = vld [vmem:[%s1994_s27 + $0x60] ss:$36 sps:$4 sm:$0xff]  }
  0x23   : > { %v1832_v24 = vld [vmem:[%s1994_s27 + $0x5c] ss:$36 sps:$4 sm:$0xff]   ;;  %v1840_v29 = vld [vmem:[%s1994_s27 + $0xa4] ss:$36 sps:$4 sm:$0xff]  }
  0x24   : > { %1531 = vmatpush3.bf16.msra.mxu0 %v1768_v30  ;;  %v1836_v26 = vld [vmem:[%s1994_s27 + $0x58] ss:$36 sps:$4 sm:$0xff]   ;;  %v1842_v30 = vld [vmem:[%s1994_s27 + $0xac] ss:$36 sps:$4 sm:$0xff]  }
  0x25   : > { %1571 = vmatpush3.bf16.msra.mxu1 %v1769_v31  ;;  %1596 = vmatprep.subr.bf16.mxu0 %v1776_v36  ;;  %v1839_v31 = vld [vmem:[%s2186_s1 + $0x218] sm:$0xff]   ;;  %v1845_v36 = vld [vmem:[%s1994_s27 + $0xa8] ss:$36 sps:$4 sm:$0xff]  }
  0x26   : > { %1636 = vmatprep.subr.bf16.mxu1 %v1777_v37  ;;  %v1424_v37 = vcombine.high %v204_v33, %v204_v33 }
  0x27   : > { %993 = vmatmul.mubr.bf16.vlgmr.msra.gmra.mrb[0].mxu0 %v1770_v32  ;;  %v1846_v32 = vld [vmem:[%s2186_s1 + $0x220] sm:$0xff]  }
  0x28   : > { %1057 = vmatmul.mubr.bf16.vlgmr.msra.gmra.mrb[0].mxu1 %v1773_v34  ;;  %1597 = vmatpush3.bf16.msra.mxu0 %v1778_v38  ;;  %v205_v34 = vld [vmem:[%s1994_s27 + $0xf0] sm:$0x11] }
  0x29   : > { %1637 = vmatpush3.bf16.msra.mxu1 %v1779_v39  ;;  %1598 = vmatprep.subr.bf16.mxu0 %v1780_v40  ;;  %v1426_v38 = vcombine.high %v205_v34, %v205_v34  ;;  %v1847_v39 = vld [vmem:[%s2186_s1 + $0x228] sm:$0xff]   ;;  %v1852_v40 = vld [vmem:[%s2186_s1 + $0x230] sm:$0xff]  }
  0x2a   : > { %1638 = vmatprep.subr.bf16.mxu1 %v1781_v41  ;;  %1000 = vmatprep.mubr.bf16.mxu0 %v1784_v44  ;;  %v1423_v41 = vcombine.low %v204_v33, %v204_v33  ;;  %v1855_v44 = vld [vmem:[%s1994_s27 + $0xb0] ss:$36 sps:$4 sm:$0xff]  }
  0x2b   : > { %1064 = vmatprep.mubr.bf16.mxu1 %v1786_v45  ;;  %v1853_v45 = vld [vmem:[%s2186_s1 + $0x238] sm:$0xff]  }
  0x2c   : > { %1599 = vmatpush3.bf16.msra.mxu0 %v1782_v42  ;;  %v1425_v42 = vcombine.low %v205_v34, %v205_v34 }
  0x2d   : > { %1639 = vmatpush3.bf16.msra.mxu1 %v1783_v43  ;;  %1600 = vmatprep.subr.bf16.mxu0 %v1790_v48  ;;  %v1854_v43 = vld [vmem:[%s1994_s27 + $0x20] ss:$36 sps:$4 sm:$0xff]  }
  0x2e   : > { %1640 = vmatprep.subr.bf16.mxu1 %v1791_v49 }
  0x2f   : > { %1001 = vmatmul.mubr.bf16.gmra.mrb[4].mxu0 %v1788_v46  ;;  %v1856_v46 = vld [vmem:[%s1994_s27 + $0x68] ss:$36 sps:$4 sm:$0xff]  }
  0x30   : > { %1065 = vmatmul.mubr.bf16.gmra.mrb[4].mxu1 %v1789_v47  ;;  %1601 = vmatpush3.bf16.msra.mxu0 %v1792_v50  ;;  %v1857_v47 = vld [vmem:[%s1994_s27 + $0xf8] ss:$0 sps:$4 sm:$0x11]   ;;  %v1391_v50 = vld [vmem:[%s2187_s2] ss:$0 sm:$0xff]  ;;  %s1729_s27 = smul.u32 28, %s2190_s13 }
  0x31   : > { %1641 = vmatpush3.bf16.msra.mxu1 %v1793_v51  ;;  %1602 = vmatprep.subr.bf16.mxu0 %v1794_v52 }
  0x32   : > { %1642 = vmatprep.subr.bf16.mxu1 %v1795_v53  ;;  %1008 = vmatprep.mubr.bf16.mxu0 %v1798_v56  ;;  %s2163_s19 = scalar_lea.vmem %s2188_s3, %s1729_s27 }
  0x33   : > { %1072 = vmatprep.mubr.bf16.mxu1 %v1800_v57 }
  0x34   : > { %1603 = vmatpush3.bf16.msra.mxu0 %v1796_v54 }
  0x35   : > { %1643 = vmatpush3.bf16.msra.mxu1 %v1797_v55  ;;  %1604 = vmatprep.subr.bf16.mxu0 %v1804_v60 }
  0x36   : > { %1644 = vmatprep.subr.bf16.mxu1 %v1805_v61 }
  0x37   : > { %1009 = vmatmul.mubr.bf16.gmra.mrb[8].mxu0 %v1802_v58 }
  0x38   : > { %1073 = vmatmul.mubr.bf16.gmra.mrb[8].mxu1 %v1803_v59  ;;  %1605 = vmatpush3.bf16.msra.mxu0 %v1806_v62 }
  0x39   : > { %1645 = vmatpush3.bf16.msra.mxu1 %v1807_v63  ;;  %1606 = vmatprep.subr.bf16.mxu0 %v1808_v0 }
  0x3a   : > { %1646 = vmatprep.subr.bf16.mxu1 %v1809_v1  ;;  %1016 = vmatprep.mubr.bf16.mxu0 %v1420_v6 }
  0x3b   : > { %1080 = vmatprep.mubr.bf16.mxu1 %v1422_v7 }
  0x3c   : > { %1607 = vmatpush3.bf16.msra.mxu0 %v1810_v2 }
  0x3d   : > { %1647 = vmatpush3.bf16.msra.mxu1 %v1811_v3  ;;  %1608 = vmatprep.subr.bf16.mxu0 %v1816_v10 }
  0x3e   : > { %1648 = vmatprep.subr.bf16.mxu1 %v1817_v11 }
  0x3f   : > { %1017 = vmatmul.mubr.bf16.gmra.mrb[12].mxu0 %v1419_v8 }
  0x40   : > { %1081 = vmatmul.mubr.bf16.gmra.mrb[12].mxu1 %v1421_v9  ;;  %1609 = vmatpush3.bf16.msra.mxu0 %v1818_v12 }
  0x41   : > { %1649 = vmatpush3.bf16.msra.mxu1 %v1819_v13  ;;  %1610 = vmatprep.subr.bf16.mxu0 %v1820_v14 }
  0x42   : > { %1650 = vmatprep.subr.bf16.mxu1 %v1821_v15  ;;  %1120 = vmatprep.mubr.bf16.mxu0 %v1826_v19 }
  0x43   : > { %1184 = vmatprep.mubr.bf16.mxu1 %v1829_v21 }
  0x44   : > { %1611 = vmatpush3.bf16.msra.mxu0 %v1822_v16 }
  0x45   : > { %1651 = vmatpush3.bf16.msra.mxu1 %v1823_v17  ;;  %1688 = vmatprep.subr.bf16.mxu0 %v1830_v22 }
  0x46   : > { %1712 = vmatprep.subr.bf16.mxu1 %v1830_v22 }
  0x47   : > { %1121 = vmatmul.mubr.bf16.vlgmr.msra.gmra.mrb[16].mxu0 %v1824_v18 }
  0x48   : > { %1185 = vmatmul.mubr.bf16.vlgmr.msra.gmra.mrb[16].mxu1 %v1827_v20  ;;  %1689 = vmatpush3.bf16.msra.mxu0 %v1830_v22 }
  0x49   : > { %1720 = vmatpush3.bf16.msra.mxu1 %v1830_v22  ;;  %1690 = vmatprep.subr.bf16.mxu0 %v1831_v23 }
  0x4a   : > { %1713 = vmatprep.subr.bf16.mxu1 %v1831_v23  ;;  %1128 = vmatprep.mubr.bf16.mxu0 %v1832_v24 }
  0x4b   : > { %1192 = vmatprep.mubr.bf16.mxu1 %v1834_v25 }
  0x4c   : > { %1691 = vmatpush3.bf16.msra.mxu0 %v1831_v23 }
  0x4d   : > { %1721 = vmatpush3.bf16.msra.mxu1 %v1831_v23  ;;  %1692 = vmatprep.subr.bf16.mxu0 %v1838_v27 }
  0x4e   : > { %1714 = vmatprep.subr.bf16.mxu1 %v1838_v27 }
  0x4f   : > { %1129 = vmatmul.mubr.bf16.gmra.mrb[20].mxu0 %v1836_v26 }
  0x50   : > { %1193 = vmatmul.mubr.bf16.gmra.mrb[20].mxu1 %v1837_v28  ;;  %1136 = vmatprep.mubr.bf16.mxu0 %v1840_v29 }
  0x51   : > { %1693 = vmatpush3.bf16.msra.mxu0 %v1838_v27  ;;  %1200 = vmatprep.mubr.bf16.mxu1 %v1842_v30 }
  0x52   : > { %1722 = vmatpush3.bf16.msra.mxu1 %v1838_v27  ;;  %1694 = vmatprep.subr.bf16.mxu0 %v1839_v31 }
  0x53   : > { %1715 = vmatprep.subr.bf16.mxu1 %v1839_v31 }
  0x55   : > { %1695 = vmatpush3.bf16.msra.mxu0 %v1839_v31 }
  0x56   : > { %1723 = vmatpush3.bf16.msra.mxu1 %v1839_v31  ;;  %1696 = vmatprep.subr.bf16.mxu0 %v1846_v32 }
  0x57   : > { %1137 = vmatmul.mubr.bf16.gmra.mrb[24].mxu0 %v1844_v35  ;;  %1716 = vmatprep.subr.bf16.mxu1 %v1846_v32 }
  0x58   : > { %1201 = vmatmul.mubr.bf16.gmra.mrb[24].mxu1 %v1845_v36  ;;  %1144 = vmatprep.mubr.bf16.mxu0 %v1424_v37 }
  0x59   : > { %1697 = vmatpush3.bf16.msra.mxu0 %v1846_v32  ;;  %1208 = vmatprep.mubr.bf16.mxu1 %v1426_v38 }
  0x5a   : > { %1724 = vmatpush3.bf16.msra.mxu1 %v1846_v32  ;;  %1698 = vmatprep.subr.bf16.mxu0 %v1847_v39 }
  0x5b   : > { %1717 = vmatprep.subr.bf16.mxu1 %v1847_v39 }
  0x5d   : > { %1699 = vmatpush3.bf16.msra.mxu0 %v1847_v39 }
  0x5e   : > { %1725 = vmatpush3.bf16.msra.mxu1 %v1847_v39  ;;  %1700 = vmatprep.subr.bf16.mxu0 %v1852_v40 }
  0x5f   : > { %1145 = vmatmul.mubr.bf16.gmra.mrb[28].mxu0 %v1423_v41  ;;  %1718 = vmatprep.subr.bf16.mxu1 %v1852_v40 }
  0x60   : > { %1209 = vmatmul.mubr.bf16.gmra.mrb[28].mxu1 %v1425_v42  ;;  %1704 = vmatprep.mubr.bf16.mxu0 %v1854_v43 }
  0x61   : > { %1701 = vmatpush3.bf16.msra.mxu0 %v1852_v40  ;;  %1708 = vmatprep.mubr.bf16.mxu1 %v1855_v44 }
  0x62   : > { %1726 = vmatpush3.bf16.msra.mxu1 %v1852_v40  ;;  %1702 = vmatprep.subr.bf16.mxu0 %v1853_v45 }
  0x63   : > { %1719 = vmatprep.subr.bf16.mxu1 %v1853_v45 }
  0x65   : > { %1703 = vmatpush3.bf16.msra.mxu0 %v1853_v45 }
  0x66   : > { %1727 = vmatpush3.bf16.msra.mxu1 %v1853_v45 }
  0x68   : > { %1705 = vmatmul.mubr.bf16.vlgmr.msra.gmra.mrb[32].mxu0 %v1856_v46 }
  0x69   : > { %1709 = vmatmul.mubr.bf16.vlgmr.msra.gmra.mrb[32].mxu1 %v1857_v47 }
  0xfa   : > { %v1532_v48 = vpop.f32.mrb[0].mxu0 }
  0xfb   : > { %v1572_v49 = vpop.f32.mrb[0].mxu1  ;;  %v1533_v51 = vpop.f32.mrb[1].mxu0 }
  0xfc   : > { %v1534_v52 = vadd.f32 %v1533_v51, %v1532_v48  ;;  %v1573_v53 = vpop.f32.mrb[1].mxu1  ;;  %v1535_v54 = vpop.f32.mrb[2].mxu0 }
  0xfd   : > { %v1574_v55 = vadd.f32 %v1573_v53, %v1572_v49  ;;  %v1575_v56 = vpop.f32.mrb[2].mxu1  ;;  %v1536_v57 = vpop.f32.mrb[3].mxu0 }
  0xfe   : > { %v995_v58 = vadd.f32 %v1534_v52, %v1391_v50  ;;  %v1537_v59 = vadd.f32 %v1536_v57, %v1535_v54  ;;  %v1576_v60 = vpop.f32.mrb[3].mxu1 }
  0xff   : > { %v1577_v61 = vadd.f32 %v1576_v60, %v1575_v56 }
 0x100   : > { %v1059_v62 = vadd.f32 %v1574_v55, %v995_v58  ;;  %v998_v63 = vadd.f32 %v1537_v59, %v1391_v50 }
 0x102   : > { %v1062_v0 = vadd.f32 %v1577_v61, %v998_v63  ;;  %v1538_v1 = vpop.f32.mrb[4].mxu0 }
 0x103   : > { %v1578_v2 = vpop.f32.mrb[4].mxu1  ;;  %v1539_v3 = vpop.f32.mrb[5].mxu0 }
 0x104   : > { %v1540_v4 = vadd.f32 %v1539_v3, %v1538_v1  ;;  %v1579_v5 = vpop.f32.mrb[5].mxu1  ;;  %v1541_v6 = vpop.f32.mrb[6].mxu0 }
 0x105   : > { %v1580_v7 = vadd.f32 %v1579_v5, %v1578_v2  ;;  %v1581_v8 = vpop.f32.mrb[6].mxu1  ;;  %v1542_v9 = vpop.f32.mrb[7].mxu0 }
 0x106   : > { %v1003_v10 = vadd.f32 %v1540_v4, %v1391_v50  ;;  %v1543_v11 = vadd.f32 %v1542_v9, %v1541_v6  ;;  %v1582_v12 = vpop.f32.mrb[7].mxu1 }
 0x107   : > { %v1583_v13 = vadd.f32 %v1582_v12, %v1581_v8 }
 0x108   : > { %v1067_v14 = vadd.f32 %v1580_v7, %v1003_v10  ;;  %v1006_v15 = vadd.f32 %v1543_v11, %v1391_v50 }
 0x10a   : > { %v1070_v16 = vadd.f32 %v1583_v13, %v1006_v15  ;;  %v1544_v17 = vpop.f32.mrb[8].mxu0 }
 0x10b   : > { %v1584_v18 = vpop.f32.mrb[8].mxu1  ;;  %v1545_v19 = vpop.f32.mrb[9].mxu0 }
 0x10c   : > { %v1546_v20 = vadd.f32 %v1545_v19, %v1544_v17  ;;  %v1585_v21 = vpop.f32.mrb[9].mxu1  ;;  %v1547_v22 = vpop.f32.mrb[10].mxu0 }
 0x10d   : > { %v1586_v23 = vadd.f32 %v1585_v21, %v1584_v18  ;;  %v1587_v24 = vpop.f32.mrb[10].mxu1  ;;  %v1548_v25 = vpop.f32.mrb[11].mxu0 }
 0x10e   : > { %v1011_v26 = vadd.f32 %v1546_v20, %v1391_v50  ;;  %v1549_v27 = vadd.f32 %v1548_v25, %v1547_v22  ;;  %v1588_v28 = vpop.f32.mrb[11].mxu1 }
 0x10f   : > { %v1589_v29 = vadd.f32 %v1588_v28, %v1587_v24 }
 0x110   : > { %v1075_v30 = vadd.f32 %v1586_v23, %v1011_v26  ;;  %v1014_v31 = vadd.f32 %v1549_v27, %v1391_v50 }
 0x112   : > { %v1078_v32 = vadd.f32 %v1589_v29, %v1014_v31  ;;  %v1550_v33 = vpop.f32.mrb[12].mxu0 }
 0x113   : > { %v1590_v34 = vpop.f32.mrb[12].mxu1  ;;  %v1551_v35 = vpop.f32.mrb[13].mxu0 }
 0x114   : > { %v1591_v36 = vpop.f32.mrb[13].mxu1  ;;  %v1552_v37 = vadd.f32 %v1551_v35, %v1550_v33  ;;  %v1553_v39 = vpop.f32.mrb[14].mxu0 }
 0x115   : > { %v1592_v38 = vadd.f32 %v1591_v36, %v1590_v34  ;;  %v1593_v40 = vpop.f32.mrb[14].mxu1  ;;  %v1554_v41 = vpop.f32.mrb[15].mxu0 }
 0x116   : > { %v1594_v42 = vpop.f32.mrb[15].mxu1  ;;  %v1019_v43 = vadd.f32 %v1552_v37, %v1391_v50 }
 0x118   : > { %v1083_v44 = vadd.f32 %v1592_v38, %v1019_v43 }
 0x11a   : > { %v1612_v45 = vpop.f32.mrb[16].mxu0 }
 0x11b   : > { %v1652_v46 = vpop.f32.mrb[16].mxu1  ;;  %v1613_v47 = vpop.f32.mrb[17].mxu0 }
 0x11c   : > { %v1614_v48 = vadd.f32 %v1613_v47, %v1612_v45  ;;  %v1653_v49 = vpop.f32.mrb[17].mxu1  ;;  %v1615_v51 = vpop.f32.mrb[18].mxu0 }
 0x11d   : > { %v1654_v52 = vadd.f32 %v1653_v49, %v1652_v46  ;;  %v1655_v53 = vpop.f32.mrb[18].mxu1  ;;  %v1616_v54 = vpop.f32.mrb[19].mxu0 }
 0x11e   : > { %v1123_v55 = vadd.f32 %v1614_v48, %v1059_v62  ;;  %v1617_v56 = vadd.f32 %v1616_v54, %v1615_v51  ;;  %v1656_v57 = vpop.f32.mrb[19].mxu1 }
 0x11f   : > { %v1657_v58 = vadd.f32 %v1656_v57, %v1655_v53 }
 0x120   : > { %v1126_v59 = vadd.f32 %v1617_v56, %v1062_v0  ;;  %v1187_v60 = vadd.f32 %v1654_v52, %v1123_v55 }
 0x122   : > { %v1618_v61 = vpop.f32.mrb[20].mxu0  ;;  %v2157_v63 = vadd.f32 %v1657_v58, %v1126_v59 }
 0x123   : > { %v1658_v50 = vpop.f32.mrb[20].mxu1  ;;  %v1619_v1 = vpop.f32.mrb[21].mxu0 }
 0x124   : > { %v1620_v2 = vadd.f32 %v1619_v1, %v1618_v61  ;;  %v1659_v3 = vpop.f32.mrb[21].mxu1  ;;  %v1621_v4 = vpop.f32.mrb[22].mxu0 }
 0x125   : > { %v1660_v5 = vadd.f32 %v1659_v3, %v1658_v50  ;;  %v1661_v6 = vpop.f32.mrb[22].mxu1  ;;  %v1622_v7 = vpop.f32.mrb[23].mxu0 }
 0x126   : > { %v1131_v8 = vadd.f32 %v1620_v2, %v1067_v14  ;;  %v1623_v9 = vadd.f32 %v1622_v7, %v1621_v4  ;;  %v1662_v10 = vpop.f32.mrb[23].mxu1 }
 0x127   : > { %v1663_v62 = vadd.f32 %v1662_v10, %v1661_v6 }
 0x128   : > { %v1134_v11 = vadd.f32 %v1623_v9, %v1070_v16  ;;  %v1195_v12 = vadd.f32 %v1660_v5, %v1131_v8 }
 0x12a   : > { %v1624_v13 = vpop.f32.mrb[24].mxu0  ;;  %v1198_v0 = vadd.f32 %v1663_v62, %v1134_v11 }
 0x12b   : > { %v1664_v15 = vpop.f32.mrb[24].mxu1  ;;  %v1625_v17 = vpop.f32.mrb[25].mxu0 }
 0x12c   : > { %v1626_v18 = vadd.f32 %v1625_v17, %v1624_v13  ;;  %v1665_v19 = vpop.f32.mrb[25].mxu1  ;;  %v1627_v20 = vpop.f32.mrb[26].mxu0 }
 0x12d   : > { %v1666_v21 = vadd.f32 %v1665_v19, %v1664_v15  ;;  %v1667_v22 = vpop.f32.mrb[26].mxu1  ;;  %v1628_v23 = vpop.f32.mrb[27].mxu0 }
 0x12e   : > { %v1139_v24 = vadd.f32 %v1626_v18, %v1075_v30  ;;  %v1629_v25 = vadd.f32 %v1628_v23, %v1627_v20  ;;  %v1668_v26 = vpop.f32.mrb[27].mxu1 }
 0x12f   : > { %v1669_v27 = vadd.f32 %v1668_v26, %v1667_v22 }
 0x130   : > { %v1142_v14 = vadd.f32 %v1629_v25, %v1078_v32  ;;  %v1203_v28 = vadd.f32 %v1666_v21, %v1139_v24 }
 0x132   : > { %v1630_v29 = vpop.f32.mrb[28].mxu0  ;;  %v1206_v16 = vadd.f32 %v1669_v27, %v1142_v14 }
 0x133   : > { %v1670_v31 = vpop.f32.mrb[28].mxu1  ;;  %v1631_v33 = vpop.f32.mrb[29].mxu0 }
 0x134   : > { %v1632_v34 = vadd.f32 %v1631_v33, %v1630_v29  ;;  %v1671_v35 = vpop.f32.mrb[29].mxu1  ;;  %v1633_v36 = vpop.f32.mrb[30].mxu0 }
 0x135   : > { %v1672_v37 = vadd.f32 %v1671_v35, %v1670_v31  ;;  %v1673_v38 = vpop.f32.mrb[30].mxu1  ;;  %v1634_v39 = vpop.f32.mrb[31].mxu0 }
 0x136   : > { %v1147_v40 = vadd.f32 %v1632_v34, %v1083_v44  ;;  %v1674_v41 = vpop.f32.mrb[31].mxu1 }
 0x138   : > { %v1211_v42 = vadd.f32 %v1672_v37, %v1147_v40 }
 0x13b   : > { %v1706_v30 = vpop.f32.mrb[32].mxu0 }
 0x13c   : > { %v1259_v43 = vadd.f32 %v1706_v30, %v1195_v12  ;;  %v1710_v45 = vpop.f32.mrb[32].mxu1  ;;  %v1250_v46 = vpop.f32.mrb[33].mxu0 }
 0x13d   : > { %v1275_v32 = vadd.f32 %v1710_v45, %v1211_v42  ;;  %v1251_v47 = vadd.f32 %v1250_v46, %v1187_v60  ;;  %v1266_v48 = vpop.f32.mrb[33].mxu1  ;;  %v1707_v49 = vpop.f32.mrb[34].mxu0  ;;  %v1326_v60 = vld [vmem:[%s2163_s19 + $0x18] sm:$0x1] }
 0x13e   : > { %v1282_v44 = vmax.f32 %v1259_v43, 0.0  ;;  %v1267_v51 = vadd.f32 %v1266_v48, %v1203_v28  ;;  %v1262_v52 = vadd.f32 %v1707_v49, %v1198_v0  ;;  %v1711_v53 = vpop.f32.mrb[34].mxu1  ;;  %v1253_v54 = vpop.f32.mrb[35].mxu0 }
 0x13f   : > { %v1286_v55 = vmax.f32 %v1275_v32, 0.0  ;;  %v1280_v56 = vmax.f32 %v1251_v47, 0.0  ;;  %v1254_v57 = vadd.f32 %v1253_v54, %v2157_v63  ;;  %v1269_v58 = vpop.f32.mrb[35].mxu1 }
 0x140   : > { %v1511_v59 = vpack.c.bf16 %v1282_v44, %v1282_v44  ;;  %v1284_v61 = vmax.f32 %v1267_v51, 0.0  ;;  %v1283_v50 = vmax.f32 %v1262_v52, 0.0  ;;  %v1270_v1 = vadd.f32 %v1269_v58, %v1206_v16 }
 0x141   : > { %v1515_v2 = vpack.c.bf16 %v1286_v55, %v1286_v55  ;;  %v1509_v3 = vpack.c.bf16 %v1280_v56, %v1280_v56  ;;  %v1281_v4 = vmax.f32 %v1254_v57, 0.0 }
 0x142   : > { %1319 = vst.msk [vmem:[%s2163_s19 + $0x8] sm:$0xf] %vm1316_vm2, %v1511_v59  ;;  %v1513_v63 = vpack.c.bf16 %v1284_v61, %v1284_v61  ;;  %v1512_v5 = vpack.c.bf16 %v1283_v50, %v1283_v50  ;;  %v1285_v6 = vmax.f32 %v1270_v1, 0.0 }
 0x143   : > { %v1327_v7 = vsel %vm1325_vm3, %v1515_v2, %v1326_v60  ;;  %1317 = vst.msk [vmem:[%s2163_s19] sm:$0xf] %vm1316_vm2, %v1509_v3  ;;  %v1510_v8 = vpack.c.bf16 %v1281_v4, %v1281_v4 }
 0x144   : > { %1328 = vst [vmem:[%s2163_s19 + $0x18] sm:$0x1] %v1327_v7  ;;  %1321 = vst.msk [vmem:[%s2163_s19 + $0x10] sm:$0xf] %vm1316_vm2, %v1513_v63  ;;  %v1514_v9 = vpack.c.bf16 %v1285_v6, %v1285_v6 }
 0x145   : > { %1320 = vst.msk [vmem:[%s2163_s19 + $0xc] sm:$0xf] %vm1316_vm2, %v1512_v5  ;;  %1318 = vst.msk [vmem:[%s2163_s19 + $0x4] sm:$0xf] %vm1316_vm2, %v1510_v8 }
 0x146   : > { %1322 = vst.msk [vmem:[%s2163_s19 + $0x14] sm:$0xf] %vm1316_vm2, %v1514_v9 }
 0x147 PF: > { %s13_s12 = sadd.s32 1, %s1864_s12  }
 0x148   : > { %p10_p4 = scmp.ge.s32.totalorder %s13_s12, 4  }
 0x14a   :  { %12 = sbr.rel (!%p10_p4) target bundleno = 1 (0x1), region = 62 }

// kernel: atari_net_forward.9
= control target key start
LH: loop header
LB: loop body
LE: loop exit
PB: predicated region body
PF: predicated region fallthrough
CT: control target
= control target key end

     0   :  { %s3693_s12 = smov 0   ;;  %s3695_s13 = smov 0   ;;  %s4602_s0 = inlined_call_operand.vmem [shape: bf16[2,2048], index: 0, kind: input, shape index: {}]   ;;  %s4603_s1 = inlined_call_operand.vmem [shape: bf16[2,1024,1024], index: 1, kind: input, shape index: {}]   ;;  %s4604_s2 = inlined_call_operand.vmem [shape: f32[2,1,1024], index: 2, kind: input, shape index: {}]   ;;  %s4605_s3 = inlined_call_operand.vmem [shape: f32[2,2,1024], index: 3, kind: output, shape index: {}]  }
   0x1   :  { %s3697_s14 = smov 0   ;;  %s3699_s15 = smov 0  }
   0x2   :  { %s3701_s16 = smov 0   ;;  %s3703_s17 = smov 0  }
   0x3   :  { %s3705_s18 = smov 0  }
   0x4 LB: > { %s22_s19 = sadd.s32 1, %s3661_s16  ;;  %s25_s20 = sadd.s32 1, %s3665_s17  ;;  %s3669_s18 = sphi %s3705_s18, %s13_s18   ;;  %s3665_s17 = sphi %s3703_s17, %s4611_s17   ;;  %s3661_s16 = sphi %s3701_s16, %s4610_s16   ;;  %s3657_s15 = sphi %s3699_s15, %s4609_s15   ;;  %s3653_s14 = sphi %s3697_s14, %s4608_s14   ;;  %s3649_s13 = sphi %s3695_s13, %s4607_s13   ;;  %s3645_s12 = sphi %s3693_s12, %s4606_s12  }
   0x5   : > { %p23_p0 = scmp.ge.s32.totalorder %s22_s19, 2  ;;  %p67_p1 = scmp.ne.s32.totalorder %s3649_s13, %s3645_s12 }
   0x6   : > { %p68_p2 = scmp.eq.s32.totalorder %s3669_s18, 0  ;;  %s60_s24 = sadd.s32 1, %s3649_s13 }
   0x7   : > { %s4613_s19 = smov (%p23_p0, %s22_s19), 0  ;;  %s4615_s20 = smov (!%p23_p0, %s25_s20), %s3665_s17 }
   0x8   : > { %p69_p3 = por %p68_p2, %p67_p1  ;;  %p27_p4 = scmp.ge.s32.totalorder %s4615_s20, 2 }
   0x9   : > { %s56_s21 = ssub.s32 %s3661_s16, %s4613_s19  ;;  %p2873_p6 = scmp.ge.s32.totalorder %s3669_s18, 4 }
   0xa   : > { %s4617_s20 = smov (%p27_p4, %s4615_s20), 0 }
   0xb   : > { %s55_s22 = ssub.s32 %s3665_s17, %s4617_s20  ;;  %149 = sbr.rel (%p2873_p6) target bundleno = 153 (0x99), region = 16 }
   0xc   : > { %s57_s23 = sor.u32 %s56_s21, %s55_s22 }
   0xd   : > { %p58_p5 = scmp.eq.s32.totalorder %s57_s23, 0 }
   0xf   : > { %s3744_s25 = scalar_select %p58_p5, %s3649_s13, %s60_s24  }
  0x12   : > { %160 = sbr.rel (!%p69_p3) target bundleno = 153 (0x99), region = 24  ;;  %s162_s26 = sand.u32 (%p69_p3), 1, %s3649_s13  }
  0x13   : > { %s2875_s27 = sshll.u32 (%p69_p3), %s3661_s16, 2  ;;  %s2874_s28 = sshll.u32 (%p69_p3), %s162_s26, 11 }
  0x14   : > { %s2876_s29 = sshll.u32 (%p69_p3), %s3665_s17, 10  ;;  %s3758_s8 = scalar_lea.vmem (%p69_p3), [#allocation2], %s2874_s28 }
  0x15   : > { %s167_s30 = sadd.s32 (%p69_p3), %s2876_s29, %s2875_s27 }
  0x16   : > { %s2877_s4 = sshll.u32 (%p69_p3), %s167_s30, 2 }
  0x17   : > { %s3753_s7 = scalar_lea.vmem (%p69_p3), %s4603_s1, %s2877_s4 }
  0x18   : > { %v182_v0 = vld [vmem:[%s3753_s7] sm:$0xff] (%p69_p3)  ;;  %v184_v1 = vld [vmem:[%s3753_s7 + $0x8] sm:$0xff] (%p69_p3) }
  0x19   : > { %v186_v2 = vld [vmem:[%s3753_s7 + $0x20] sm:$0xff]  ;;  %183 = vst [vmem:[%s3758_s8] sm:$0xff] %v182_v0  ;;  %185 = vst [vmem:[%s3758_s8 + $0x8] sm:$0xff] %v184_v1  ;;  %v188_v3 = vld [vmem:[%s3753_s7 + $0x28] sm:$0xff] }
  0x1a   : > { %187 = vst [vmem:[%s3758_s8 + $0x10] sm:$0xff] %v186_v2  ;;  %v190_v4 = vld [vmem:[%s3753_s7 + $0x40] sm:$0xff]  ;;  %v192_v5 = vld [vmem:[%s3753_s7 + $0x48] sm:$0xff]  ;;  %189 = vst [vmem:[%s3758_s8 + $0x18] sm:$0xff] %v188_v3 }
  0x1b   : > { %191 = vst [vmem:[%s3758_s8 + $0x20] sm:$0xff] %v190_v4  ;;  %193 = vst [vmem:[%s3758_s8 + $0x28] sm:$0xff] %v192_v5  ;;  %v194_v6 = vld [vmem:[%s3753_s7 + $0x60] sm:$0xff]  ;;  %v196_v7 = vld [vmem:[%s3753_s7 + $0x68] sm:$0xff] }
  0x1c   : > { %v198_v8 = vld [vmem:[%s3753_s7 + $0x80] sm:$0xff]  ;;  %195 = vst [vmem:[%s3758_s8 + $0x30] sm:$0xff] %v194_v6  ;;  %197 = vst [vmem:[%s3758_s8 + $0x38] sm:$0xff] %v196_v7  ;;  %v200_v9 = vld [vmem:[%s3753_s7 + $0x88] sm:$0xff] }
  0x1d   : > { %199 = vst [vmem:[%s3758_s8 + $0x40] sm:$0xff] %v198_v8  ;;  %v202_v10 = vld [vmem:[%s3753_s7 + $0xa0] sm:$0xff]  ;;  %v204_v11 = vld [vmem:[%s3753_s7 + $0xa8] sm:$0xff]  ;;  %201 = vst [vmem:[%s3758_s8 + $0x48] sm:$0xff] %v200_v9 }
  0x1e   : > { %203 = vst [vmem:[%s3758_s8 + $0x50] sm:$0xff] %v202_v10  ;;  %205 = vst [vmem:[%s3758_s8 + $0x58] sm:$0xff] %v204_v11  ;;  %v206_v12 = vld [vmem:[%s3753_s7 + $0xc0] sm:$0xff]  ;;  %v208_v13 = vld [vmem:[%s3753_s7 + $0xc8] sm:$0xff] }
  0x1f   : > { %v210_v14 = vld [vmem:[%s3753_s7 + $0xe0] sm:$0xff]  ;;  %207 = vst [vmem:[%s3758_s8 + $0x60] sm:$0xff] %v206_v12  ;;  %209 = vst [vmem:[%s3758_s8 + $0x68] sm:$0xff] %v208_v13  ;;  %v212_v15 = vld [vmem:[%s3753_s7 + $0xe8] sm:$0xff] }
  0x20   : > { %211 = vst [vmem:[%s3758_s8 + $0x70] sm:$0xff] %v210_v14  ;;  %v214_v16 = vld [vmem:[%s3753_s7 + $0x100] sm:$0xff]  ;;  %v216_v17 = vld [vmem:[%s3753_s7 + $0x108] sm:$0xff]  ;;  %213 = vst [vmem:[%s3758_s8 + $0x78] sm:$0xff] %v212_v15 }
  0x21   : > { %215 = vst [vmem:[%s3758_s8 + $0x80] sm:$0xff] %v214_v16  ;;  %217 = vst [vmem:[%s3758_s8 + $0x88] sm:$0xff] %v216_v17  ;;  %v218_v18 = vld [vmem:[%s3753_s7 + $0x120] sm:$0xff]  ;;  %v220_v19 = vld [vmem:[%s3753_s7 + $0x128] sm:$0xff] }
  0x22   : > { %v222_v20 = vld [vmem:[%s3753_s7 + $0x140] sm:$0xff]  ;;  %219 = vst [vmem:[%s3758_s8 + $0x90] sm:$0xff] %v218_v18  ;;  %221 = vst [vmem:[%s3758_s8 + $0x98] sm:$0xff] %v220_v19  ;;  %v224_v21 = vld [vmem:[%s3753_s7 + $0x148] sm:$0xff] }
  0x23   : > { %223 = vst [vmem:[%s3758_s8 + $0xa0] sm:$0xff] %v222_v20  ;;  %v226_v22 = vld [vmem:[%s3753_s7 + $0x160] sm:$0xff]  ;;  %v228_v23 = vld [vmem:[%s3753_s7 + $0x168] sm:$0xff]  ;;  %225 = vst [vmem:[%s3758_s8 + $0xa8] sm:$0xff] %v224_v21 }
  0x24   : > { %227 = vst [vmem:[%s3758_s8 + $0xb0] sm:$0xff] %v226_v22  ;;  %229 = vst [vmem:[%s3758_s8 + $0xb8] sm:$0xff] %v228_v23  ;;  %v230_v24 = vld [vmem:[%s3753_s7 + $0x180] sm:$0xff]  ;;  %v232_v25 = vld [vmem:[%s3753_s7 + $0x188] sm:$0xff] }
  0x25   : > { %v234_v26 = vld [vmem:[%s3753_s7 + $0x1a0] sm:$0xff]  ;;  %231 = vst [vmem:[%s3758_s8 + $0xc0] sm:$0xff] %v230_v24  ;;  %233 = vst [vmem:[%s3758_s8 + $0xc8] sm:$0xff] %v232_v25  ;;  %v236_v27 = vld [vmem:[%s3753_s7 + $0x1a8] sm:$0xff] }
  0x26   : > { %235 = vst [vmem:[%s3758_s8 + $0xd0] sm:$0xff] %v234_v26  ;;  %v238_v28 = vld [vmem:[%s3753_s7 + $0x1c0] sm:$0xff]  ;;  %v240_v29 = vld [vmem:[%s3753_s7 + $0x1c8] sm:$0xff]  ;;  %237 = vst [vmem:[%s3758_s8 + $0xd8] sm:$0xff] %v236_v27 }
  0x27   : > { %239 = vst [vmem:[%s3758_s8 + $0xe0] sm:$0xff] %v238_v28  ;;  %241 = vst [vmem:[%s3758_s8 + $0xe8] sm:$0xff] %v240_v29  ;;  %v242_v30 = vld [vmem:[%s3753_s7 + $0x1e0] sm:$0xff]  ;;  %v244_v31 = vld [vmem:[%s3753_s7 + $0x1e8] sm:$0xff] }
  0x28   : > { %v246_v32 = vld [vmem:[%s3753_s7 + $0x200] sm:$0xff]  ;;  %243 = vst [vmem:[%s3758_s8 + $0xf0] sm:$0xff] %v242_v30  ;;  %245 = vst [vmem:[%s3758_s8 + $0xf8] sm:$0xff] %v244_v31  ;;  %v248_v33 = vld [vmem:[%s3753_s7 + $0x208] sm:$0xff] }
  0x29   : > { %247 = vst [vmem:[%s3758_s8 + $0x100] sm:$0xff] %v246_v32  ;;  %v250_v34 = vld [vmem:[%s3753_s7 + $0x220] sm:$0xff]  ;;  %v252_v35 = vld [vmem:[%s3753_s7 + $0x228] sm:$0xff]  ;;  %249 = vst [vmem:[%s3758_s8 + $0x108] sm:$0xff] %v248_v33 }
  0x2a   : > { %251 = vst [vmem:[%s3758_s8 + $0x110] sm:$0xff] %v250_v34  ;;  %253 = vst [vmem:[%s3758_s8 + $0x118] sm:$0xff] %v252_v35  ;;  %v254_v36 = vld [vmem:[%s3753_s7 + $0x240] sm:$0xff]  ;;  %v256_v37 = vld [vmem:[%s3753_s7 + $0x248] sm:$0xff] }
  0x2b   : > { %v258_v38 = vld [vmem:[%s3753_s7 + $0x260] sm:$0xff]  ;;  %255 = vst [vmem:[%s3758_s8 + $0x120] sm:$0xff] %v254_v36  ;;  %257 = vst [vmem:[%s3758_s8 + $0x128] sm:$0xff] %v256_v37  ;;  %v260_v39 = vld [vmem:[%s3753_s7 + $0x268] sm:$0xff] }
  0x2c   : > { %259 = vst [vmem:[%s3758_s8 + $0x130] sm:$0xff] %v258_v38  ;;  %v262_v40 = vld [vmem:[%s3753_s7 + $0x280] sm:$0xff]  ;;  %v264_v41 = vld [vmem:[%s3753_s7 + $0x288] sm:$0xff]  ;;  %261 = vst [vmem:[%s3758_s8 + $0x138] sm:$0xff] %v260_v39 }
  0x2d   : > { %263 = vst [vmem:[%s3758_s8 + $0x140] sm:$0xff] %v262_v40  ;;  %265 = vst [vmem:[%s3758_s8 + $0x148] sm:$0xff] %v264_v41  ;;  %v266_v42 = vld [vmem:[%s3753_s7 + $0x2a0] sm:$0xff]  ;;  %v268_v43 = vld [vmem:[%s3753_s7 + $0x2a8] sm:$0xff] }
  0x2e   : > { %v270_v44 = vld [vmem:[%s3753_s7 + $0x2c0] sm:$0xff]  ;;  %267 = vst [vmem:[%s3758_s8 + $0x150] sm:$0xff] %v266_v42  ;;  %269 = vst [vmem:[%s3758_s8 + $0x158] sm:$0xff] %v268_v43  ;;  %v272_v45 = vld [vmem:[%s3753_s7 + $0x2c8] sm:$0xff] }
  0x2f   : > { %271 = vst [vmem:[%s3758_s8 + $0x160] sm:$0xff] %v270_v44  ;;  %v274_v46 = vld [vmem:[%s3753_s7 + $0x2e0] sm:$0xff]  ;;  %v276_v47 = vld [vmem:[%s3753_s7 + $0x2e8] sm:$0xff]  ;;  %273 = vst [vmem:[%s3758_s8 + $0x168] sm:$0xff] %v272_v45 }
  0x30   : > { %275 = vst [vmem:[%s3758_s8 + $0x170] sm:$0xff] %v274_v46  ;;  %277 = vst [vmem:[%s3758_s8 + $0x178] sm:$0xff] %v276_v47  ;;  %v278_v48 = vld [vmem:[%s3753_s7 + $0x300] sm:$0xff]  ;;  %v280_v49 = vld [vmem:[%s3753_s7 + $0x308] sm:$0xff] }
  0x31   : > { %v282_v50 = vld [vmem:[%s3753_s7 + $0x320] sm:$0xff]  ;;  %279 = vst [vmem:[%s3758_s8 + $0x180] sm:$0xff] %v278_v48  ;;  %281 = vst [vmem:[%s3758_s8 + $0x188] sm:$0xff] %v280_v49  ;;  %v284_v51 = vld [vmem:[%s3753_s7 + $0x328] sm:$0xff] }
  0x32   : > { %283 = vst [vmem:[%s3758_s8 + $0x190] sm:$0xff] %v282_v50  ;;  %v286_v52 = vld [vmem:[%s3753_s7 + $0x340] sm:$0xff]  ;;  %v288_v53 = vld [vmem:[%s3753_s7 + $0x348] sm:$0xff]  ;;  %285 = vst [vmem:[%s3758_s8 + $0x198] sm:$0xff] %v284_v51 }
  0x33   : > { %287 = vst [vmem:[%s3758_s8 + $0x1a0] sm:$0xff] %v286_v52  ;;  %289 = vst [vmem:[%s3758_s8 + $0x1a8] sm:$0xff] %v288_v53  ;;  %v290_v54 = vld [vmem:[%s3753_s7 + $0x360] sm:$0xff]  ;;  %v292_v55 = vld [vmem:[%s3753_s7 + $0x368] sm:$0xff] }
  0x34   : > { %v294_v56 = vld [vmem:[%s3753_s7 + $0x380] sm:$0xff]  ;;  %291 = vst [vmem:[%s3758_s8 + $0x1b0] sm:$0xff] %v290_v54  ;;  %293 = vst [vmem:[%s3758_s8 + $0x1b8] sm:$0xff] %v292_v55  ;;  %v296_v57 = vld [vmem:[%s3753_s7 + $0x388] sm:$0xff] }
  0x35   : > { %295 = vst [vmem:[%s3758_s8 + $0x1c0] sm:$0xff] %v294_v56  ;;  %v298_v58 = vld [vmem:[%s3753_s7 + $0x3a0] sm:$0xff]  ;;  %v300_v59 = vld [vmem:[%s3753_s7 + $0x3a8] sm:$0xff]  ;;  %297 = vst [vmem:[%s3758_s8 + $0x1c8] sm:$0xff] %v296_v57 }
  0x36   : > { %299 = vst [vmem:[%s3758_s8 + $0x1d0] sm:$0xff] %v298_v58  ;;  %301 = vst [vmem:[%s3758_s8 + $0x1d8] sm:$0xff] %v300_v59  ;;  %v302_v60 = vld [vmem:[%s3753_s7 + $0x3c0] sm:$0xff]  ;;  %v304_v61 = vld [vmem:[%s3753_s7 + $0x3c8] sm:$0xff] }
  0x37   : > { %v306_v62 = vld [vmem:[%s3753_s7 + $0x3e0] sm:$0xff]  ;;  %303 = vst [vmem:[%s3758_s8 + $0x1e0] sm:$0xff] %v302_v60  ;;  %305 = vst [vmem:[%s3758_s8 + $0x1e8] sm:$0xff] %v304_v61  ;;  %v308_v63 = vld [vmem:[%s3753_s7 + $0x3e8] sm:$0xff] }
  0x38   : > { %307 = vst [vmem:[%s3758_s8 + $0x1f0] sm:$0xff] %v306_v62  ;;  %v310_v0 = vld [vmem:[%s3753_s7 + $0x400] sm:$0xff]  ;;  %v312_v1 = vld [vmem:[%s3753_s7 + $0x408] sm:$0xff]  ;;  %309 = vst [vmem:[%s3758_s8 + $0x1f8] sm:$0xff] %v308_v63 }
  0x39   : > { %311 = vst [vmem:[%s3758_s8 + $0x200] sm:$0xff] %v310_v0  ;;  %313 = vst [vmem:[%s3758_s8 + $0x208] sm:$0xff] %v312_v1  ;;  %v314_v2 = vld [vmem:[%s3753_s7 + $0x420] sm:$0xff]  ;;  %v316_v3 = vld [vmem:[%s3753_s7 + $0x428] sm:$0xff] }
  0x3a   : > { %v318_v4 = vld [vmem:[%s3753_s7 + $0x440] sm:$0xff]  ;;  %315 = vst [vmem:[%s3758_s8 + $0x210] sm:$0xff] %v314_v2  ;;  %317 = vst [vmem:[%s3758_s8 + $0x218] sm:$0xff] %v316_v3  ;;  %v320_v5 = vld [vmem:[%s3753_s7 + $0x448] sm:$0xff] }
  0x3b   : > { %319 = vst [vmem:[%s3758_s8 + $0x220] sm:$0xff] %v318_v4  ;;  %v322_v6 = vld [vmem:[%s3753_s7 + $0x460] sm:$0xff]  ;;  %v324_v7 = vld [vmem:[%s3753_s7 + $0x468] sm:$0xff]  ;;  %321 = vst [vmem:[%s3758_s8 + $0x228] sm:$0xff] %v320_v5 }
  0x3c   : > { %323 = vst [vmem:[%s3758_s8 + $0x230] sm:$0xff] %v322_v6  ;;  %325 = vst [vmem:[%s3758_s8 + $0x238] sm:$0xff] %v324_v7  ;;  %v326_v8 = vld [vmem:[%s3753_s7 + $0x480] sm:$0xff]  ;;  %v328_v9 = vld [vmem:[%s3753_s7 + $0x488] sm:$0xff] }
  0x3d   : > { %v330_v10 = vld [vmem:[%s3753_s7 + $0x4a0] sm:$0xff]  ;;  %327 = vst [vmem:[%s3758_s8 + $0x240] sm:$0xff] %v326_v8  ;;  %329 = vst [vmem:[%s3758_s8 + $0x248] sm:$0xff] %v328_v9  ;;  %v332_v11 = vld [vmem:[%s3753_s7 + $0x4a8] sm:$0xff] }
  0x3e   : > { %331 = vst [vmem:[%s3758_s8 + $0x250] sm:$0xff] %v330_v10  ;;  %v334_v12 = vld [vmem:[%s3753_s7 + $0x4c0] sm:$0xff]  ;;  %v336_v13 = vld [vmem:[%s3753_s7 + $0x4c8] sm:$0xff]  ;;  %333 = vst [vmem:[%s3758_s8 + $0x258] sm:$0xff] %v332_v11 }
  0x3f   : > { %335 = vst [vmem:[%s3758_s8 + $0x260] sm:$0xff] %v334_v12  ;;  %337 = vst [vmem:[%s3758_s8 + $0x268] sm:$0xff] %v336_v13  ;;  %v338_v14 = vld [vmem:[%s3753_s7 + $0x4e0] sm:$0xff]  ;;  %v340_v15 = vld [vmem:[%s3753_s7 + $0x4e8] sm:$0xff] }
  0x40   : > { %v342_v16 = vld [vmem:[%s3753_s7 + $0x500] sm:$0xff]  ;;  %339 = vst [vmem:[%s3758_s8 + $0x270] sm:$0xff] %v338_v14  ;;  %341 = vst [vmem:[%s3758_s8 + $0x278] sm:$0xff] %v340_v15  ;;  %v344_v17 = vld [vmem:[%s3753_s7 + $0x508] sm:$0xff] }
  0x41   : > { %343 = vst [vmem:[%s3758_s8 + $0x280] sm:$0xff] %v342_v16  ;;  %v346_v18 = vld [vmem:[%s3753_s7 + $0x520] sm:$0xff]  ;;  %v348_v19 = vld [vmem:[%s3753_s7 + $0x528] sm:$0xff]  ;;  %345 = vst [vmem:[%s3758_s8 + $0x288] sm:$0xff] %v344_v17 }
  0x42   : > { %347 = vst [vmem:[%s3758_s8 + $0x290] sm:$0xff] %v346_v18  ;;  %349 = vst [vmem:[%s3758_s8 + $0x298] sm:$0xff] %v348_v19  ;;  %v350_v20 = vld [vmem:[%s3753_s7 + $0x540] sm:$0xff]  ;;  %v352_v21 = vld [vmem:[%s3753_s7 + $0x548] sm:$0xff] }
  0x43   : > { %v354_v22 = vld [vmem:[%s3753_s7 + $0x560] sm:$0xff]  ;;  %351 = vst [vmem:[%s3758_s8 + $0x2a0] sm:$0xff] %v350_v20  ;;  %353 = vst [vmem:[%s3758_s8 + $0x2a8] sm:$0xff] %v352_v21  ;;  %v356_v23 = vld [vmem:[%s3753_s7 + $0x568] sm:$0xff] }
  0x44   : > { %355 = vst [vmem:[%s3758_s8 + $0x2b0] sm:$0xff] %v354_v22  ;;  %v358_v24 = vld [vmem:[%s3753_s7 + $0x580] sm:$0xff]  ;;  %v360_v25 = vld [vmem:[%s3753_s7 + $0x588] sm:$0xff]  ;;  %357 = vst [vmem:[%s3758_s8 + $0x2b8] sm:$0xff] %v356_v23 }
  0x45   : > { %359 = vst [vmem:[%s3758_s8 + $0x2c0] sm:$0xff] %v358_v24  ;;  %361 = vst [vmem:[%s3758_s8 + $0x2c8] sm:$0xff] %v360_v25  ;;  %v362_v26 = vld [vmem:[%s3753_s7 + $0x5a0] sm:$0xff]  ;;  %v364_v27 = vld [vmem:[%s3753_s7 + $0x5a8] sm:$0xff] }
  0x46   : > { %v366_v28 = vld [vmem:[%s3753_s7 + $0x5c0] sm:$0xff]  ;;  %363 = vst [vmem:[%s3758_s8 + $0x2d0] sm:$0xff] %v362_v26  ;;  %365 = vst [vmem:[%s3758_s8 + $0x2d8] sm:$0xff] %v364_v27  ;;  %v368_v29 = vld [vmem:[%s3753_s7 + $0x5c8] sm:$0xff] }
  0x47   : > { %367 = vst [vmem:[%s3758_s8 + $0x2e0] sm:$0xff] %v366_v28  ;;  %v370_v30 = vld [vmem:[%s3753_s7 + $0x5e0] sm:$0xff]  ;;  %v372_v31 = vld [vmem:[%s3753_s7 + $0x5e8] sm:$0xff]  ;;  %369 = vst [vmem:[%s3758_s8 + $0x2e8] sm:$0xff] %v368_v29 }
  0x48   : > { %371 = vst [vmem:[%s3758_s8 + $0x2f0] sm:$0xff] %v370_v30  ;;  %373 = vst [vmem:[%s3758_s8 + $0x2f8] sm:$0xff] %v372_v31  ;;  %v374_v32 = vld [vmem:[%s3753_s7 + $0x600] sm:$0xff]  ;;  %v376_v33 = vld [vmem:[%s3753_s7 + $0x608] sm:$0xff] }
  0x49   : > { %v378_v34 = vld [vmem:[%s3753_s7 + $0x620] sm:$0xff]  ;;  %375 = vst [vmem:[%s3758_s8 + $0x300] sm:$0xff] %v374_v32  ;;  %377 = vst [vmem:[%s3758_s8 + $0x308] sm:$0xff] %v376_v33  ;;  %v380_v35 = vld [vmem:[%s3753_s7 + $0x628] sm:$0xff] }
  0x4a   : > { %379 = vst [vmem:[%s3758_s8 + $0x310] sm:$0xff] %v378_v34  ;;  %v382_v36 = vld [vmem:[%s3753_s7 + $0x640] sm:$0xff]  ;;  %v384_v37 = vld [vmem:[%s3753_s7 + $0x648] sm:$0xff]  ;;  %381 = vst [vmem:[%s3758_s8 + $0x318] sm:$0xff] %v380_v35 }
  0x4b   : > { %383 = vst [vmem:[%s3758_s8 + $0x320] sm:$0xff] %v382_v36  ;;  %385 = vst [vmem:[%s3758_s8 + $0x328] sm:$0xff] %v384_v37  ;;  %v386_v38 = vld [vmem:[%s3753_s7 + $0x660] sm:$0xff]  ;;  %v388_v39 = vld [vmem:[%s3753_s7 + $0x668] sm:$0xff] }
  0x4c   : > { %v390_v40 = vld [vmem:[%s3753_s7 + $0x680] sm:$0xff]  ;;  %387 = vst [vmem:[%s3758_s8 + $0x330] sm:$0xff] %v386_v38  ;;  %389 = vst [vmem:[%s3758_s8 + $0x338] sm:$0xff] %v388_v39  ;;  %v392_v41 = vld [vmem:[%s3753_s7 + $0x688] sm:$0xff] }
  0x4d   : > { %391 = vst [vmem:[%s3758_s8 + $0x340] sm:$0xff] %v390_v40  ;;  %v394_v42 = vld [vmem:[%s3753_s7 + $0x6a0] sm:$0xff]  ;;  %v396_v43 = vld [vmem:[%s3753_s7 + $0x6a8] sm:$0xff]  ;;  %393 = vst [vmem:[%s3758_s8 + $0x348] sm:$0xff] %v392_v41 }
  0x4e   : > { %395 = vst [vmem:[%s3758_s8 + $0x350] sm:$0xff] %v394_v42  ;;  %397 = vst [vmem:[%s3758_s8 + $0x358] sm:$0xff] %v396_v43  ;;  %v398_v44 = vld [vmem:[%s3753_s7 + $0x6c0] sm:$0xff]  ;;  %v400_v45 = vld [vmem:[%s3753_s7 + $0x6c8] sm:$0xff] }
  0x4f   : > { %v402_v46 = vld [vmem:[%s3753_s7 + $0x6e0] sm:$0xff]  ;;  %399 = vst [vmem:[%s3758_s8 + $0x360] sm:$0xff] %v398_v44  ;;  %401 = vst [vmem:[%s3758_s8 + $0x368] sm:$0xff] %v400_v45  ;;  %v404_v47 = vld [vmem:[%s3753_s7 + $0x6e8] sm:$0xff] }
  0x50   : > { %403 = vst [vmem:[%s3758_s8 + $0x370] sm:$0xff] %v402_v46  ;;  %v406_v48 = vld [vmem:[%s3753_s7 + $0x700] sm:$0xff]  ;;  %v408_v49 = vld [vmem:[%s3753_s7 + $0x708] sm:$0xff]  ;;  %405 = vst [vmem:[%s3758_s8 + $0x378] sm:$0xff] %v404_v47 }
  0x51   : > { %407 = vst [vmem:[%s3758_s8 + $0x380] sm:$0xff] %v406_v48  ;;  %409 = vst [vmem:[%s3758_s8 + $0x388] sm:$0xff] %v408_v49  ;;  %v410_v50 = vld [vmem:[%s3753_s7 + $0x720] sm:$0xff]  ;;  %v412_v51 = vld [vmem:[%s3753_s7 + $0x728] sm:$0xff] }
  0x52   : > { %v414_v52 = vld [vmem:[%s3753_s7 + $0x740] sm:$0xff]  ;;  %411 = vst [vmem:[%s3758_s8 + $0x390] sm:$0xff] %v410_v50  ;;  %413 = vst [vmem:[%s3758_s8 + $0x398] sm:$0xff] %v412_v51  ;;  %v416_v53 = vld [vmem:[%s3753_s7 + $0x748] sm:$0xff] }
  0x53   : > { %415 = vst [vmem:[%s3758_s8 + $0x3a0] sm:$0xff] %v414_v52  ;;  %v418_v54 = vld [vmem:[%s3753_s7 + $0x760] sm:$0xff]  ;;  %v420_v55 = vld [vmem:[%s3753_s7 + $0x768] sm:$0xff]  ;;  %417 = vst [vmem:[%s3758_s8 + $0x3a8] sm:$0xff] %v416_v53 }
  0x54   : > { %419 = vst [vmem:[%s3758_s8 + $0x3b0] sm:$0xff] %v418_v54  ;;  %421 = vst [vmem:[%s3758_s8 + $0x3b8] sm:$0xff] %v420_v55  ;;  %v422_v56 = vld [vmem:[%s3753_s7 + $0x780] sm:$0xff]  ;;  %v424_v57 = vld [vmem:[%s3753_s7 + $0x788] sm:$0xff] }
  0x55   : > { %v426_v58 = vld [vmem:[%s3753_s7 + $0x7a0] sm:$0xff]  ;;  %423 = vst [vmem:[%s3758_s8 + $0x3c0] sm:$0xff] %v422_v56  ;;  %425 = vst [vmem:[%s3758_s8 + $0x3c8] sm:$0xff] %v424_v57  ;;  %v428_v59 = vld [vmem:[%s3753_s7 + $0x7a8] sm:$0xff] }
  0x56   : > { %427 = vst [vmem:[%s3758_s8 + $0x3d0] sm:$0xff] %v426_v58  ;;  %v430_v60 = vld [vmem:[%s3753_s7 + $0x7c0] sm:$0xff]  ;;  %v432_v61 = vld [vmem:[%s3753_s7 + $0x7c8] sm:$0xff]  ;;  %429 = vst [vmem:[%s3758_s8 + $0x3d8] sm:$0xff] %v428_v59 }
  0x57   : > { %431 = vst [vmem:[%s3758_s8 + $0x3e0] sm:$0xff] %v430_v60  ;;  %433 = vst [vmem:[%s3758_s8 + $0x3e8] sm:$0xff] %v432_v61  ;;  %v434_v62 = vld [vmem:[%s3753_s7 + $0x7e0] sm:$0xff]  ;;  %v436_v63 = vld [vmem:[%s3753_s7 + $0x7e8] sm:$0xff] }
  0x58   : > { %v438_v0 = vld [vmem:[%s3753_s7 + $0x800] sm:$0xff]  ;;  %435 = vst [vmem:[%s3758_s8 + $0x3f0] sm:$0xff] %v434_v62  ;;  %437 = vst [vmem:[%s3758_s8 + $0x3f8] sm:$0xff] %v436_v63  ;;  %v440_v1 = vld [vmem:[%s3753_s7 + $0x808] sm:$0xff] }
  0x59   : > { %439 = vst [vmem:[%s3758_s8 + $0x400] sm:$0xff] %v438_v0  ;;  %v442_v2 = vld [vmem:[%s3753_s7 + $0x820] sm:$0xff]  ;;  %v444_v3 = vld [vmem:[%s3753_s7 + $0x828] sm:$0xff]  ;;  %441 = vst [vmem:[%s3758_s8 + $0x408] sm:$0xff] %v440_v1 }
  0x5a   : > { %443 = vst [vmem:[%s3758_s8 + $0x410] sm:$0xff] %v442_v2  ;;  %445 = vst [vmem:[%s3758_s8 + $0x418] sm:$0xff] %v444_v3  ;;  %v446_v4 = vld [vmem:[%s3753_s7 + $0x840] sm:$0xff]  ;;  %v448_v5 = vld [vmem:[%s3753_s7 + $0x848] sm:$0xff] }
  0x5b   : > { %v450_v6 = vld [vmem:[%s3753_s7 + $0x860] sm:$0xff]  ;;  %447 = vst [vmem:[%s3758_s8 + $0x420] sm:$0xff] %v446_v4  ;;  %449 = vst [vmem:[%s3758_s8 + $0x428] sm:$0xff] %v448_v5  ;;  %v452_v7 = vld [vmem:[%s3753_s7 + $0x868] sm:$0xff] }
  0x5c   : > { %451 = vst [vmem:[%s3758_s8 + $0x430] sm:$0xff] %v450_v6  ;;  %v454_v8 = vld [vmem:[%s3753_s7 + $0x880] sm:$0xff]  ;;  %v456_v9 = vld [vmem:[%s3753_s7 + $0x888] sm:$0xff]  ;;  %453 = vst [vmem:[%s3758_s8 + $0x438] sm:$0xff] %v452_v7 }
  0x5d   : > { %455 = vst [vmem:[%s3758_s8 + $0x440] sm:$0xff] %v454_v8  ;;  %457 = vst [vmem:[%s3758_s8 + $0x448] sm:$0xff] %v456_v9  ;;  %v458_v10 = vld [vmem:[%s3753_s7 + $0x8a0] sm:$0xff]  ;;  %v460_v11 = vld [vmem:[%s3753_s7 + $0x8a8] sm:$0xff] }
  0x5e   : > { %v462_v12 = vld [vmem:[%s3753_s7 + $0x8c0] sm:$0xff]  ;;  %459 = vst [vmem:[%s3758_s8 + $0x450] sm:$0xff] %v458_v10  ;;  %461 = vst [vmem:[%s3758_s8 + $0x458] sm:$0xff] %v460_v11  ;;  %v464_v13 = vld [vmem:[%s3753_s7 + $0x8c8] sm:$0xff] }
  0x5f   : > { %463 = vst [vmem:[%s3758_s8 + $0x460] sm:$0xff] %v462_v12  ;;  %v466_v14 = vld [vmem:[%s3753_s7 + $0x8e0] sm:$0xff]  ;;  %v468_v15 = vld [vmem:[%s3753_s7 + $0x8e8] sm:$0xff]  ;;  %465 = vst [vmem:[%s3758_s8 + $0x468] sm:$0xff] %v464_v13 }
  0x60   : > { %467 = vst [vmem:[%s3758_s8 + $0x470] sm:$0xff] %v466_v14  ;;  %469 = vst [vmem:[%s3758_s8 + $0x478] sm:$0xff] %v468_v15  ;;  %v470_v16 = vld [vmem:[%s3753_s7 + $0x900] sm:$0xff]  ;;  %v472_v17 = vld [vmem:[%s3753_s7 + $0x908] sm:$0xff] }
  0x61   : > { %v474_v18 = vld [vmem:[%s3753_s7 + $0x920] sm:$0xff]  ;;  %471 = vst [vmem:[%s3758_s8 + $0x480] sm:$0xff] %v470_v16  ;;  %473 = vst [vmem:[%s3758_s8 + $0x488] sm:$0xff] %v472_v17  ;;  %v476_v19 = vld [vmem:[%s3753_s7 + $0x928] sm:$0xff] }
  0x62   : > { %475 = vst [vmem:[%s3758_s8 + $0x490] sm:$0xff] %v474_v18  ;;  %v478_v20 = vld [vmem:[%s3753_s7 + $0x940] sm:$0xff]  ;;  %v480_v21 = vld [vmem:[%s3753_s7 + $0x948] sm:$0xff]  ;;  %477 = vst [vmem:[%s3758_s8 + $0x498] sm:$0xff] %v476_v19 }
  0x63   : > { %479 = vst [vmem:[%s3758_s8 + $0x4a0] sm:$0xff] %v478_v20  ;;  %481 = vst [vmem:[%s3758_s8 + $0x4a8] sm:$0xff] %v480_v21  ;;  %v482_v22 = vld [vmem:[%s3753_s7 + $0x960] sm:$0xff]  ;;  %v484_v23 = vld [vmem:[%s3753_s7 + $0x968] sm:$0xff] }
  0x64   : > { %v486_v24 = vld [vmem:[%s3753_s7 + $0x980] sm:$0xff]  ;;  %483 = vst [vmem:[%s3758_s8 + $0x4b0] sm:$0xff] %v482_v22  ;;  %485 = vst [vmem:[%s3758_s8 + $0x4b8] sm:$0xff] %v484_v23  ;;  %v488_v25 = vld [vmem:[%s3753_s7 + $0x988] sm:$0xff] }
  0x65   : > { %487 = vst [vmem:[%s3758_s8 + $0x4c0] sm:$0xff] %v486_v24  ;;  %v490_v26 = vld [vmem:[%s3753_s7 + $0x9a0] sm:$0xff]  ;;  %v492_v27 = vld [vmem:[%s3753_s7 + $0x9a8] sm:$0xff]  ;;  %489 = vst [vmem:[%s3758_s8 + $0x4c8] sm:$0xff] %v488_v25 }
  0x66   : > { %491 = vst [vmem:[%s3758_s8 + $0x4d0] sm:$0xff] %v490_v26  ;;  %493 = vst [vmem:[%s3758_s8 + $0x4d8] sm:$0xff] %v492_v27  ;;  %v494_v28 = vld [vmem:[%s3753_s7 + $0x9c0] sm:$0xff]  ;;  %v496_v29 = vld [vmem:[%s3753_s7 + $0x9c8] sm:$0xff] }
  0x67   : > { %v498_v30 = vld [vmem:[%s3753_s7 + $0x9e0] sm:$0xff]  ;;  %495 = vst [vmem:[%s3758_s8 + $0x4e0] sm:$0xff] %v494_v28  ;;  %497 = vst [vmem:[%s3758_s8 + $0x4e8] sm:$0xff] %v496_v29  ;;  %v500_v31 = vld [vmem:[%s3753_s7 + $0x9e8] sm:$0xff] }
  0x68   : > { %499 = vst [vmem:[%s3758_s8 + $0x4f0] sm:$0xff] %v498_v30  ;;  %v502_v32 = vld [vmem:[%s3753_s7 + $0xa00] sm:$0xff]  ;;  %v504_v33 = vld [vmem:[%s3753_s7 + $0xa08] sm:$0xff]  ;;  %501 = vst [vmem:[%s3758_s8 + $0x4f8] sm:$0xff] %v500_v31 }
  0x69   : > { %503 = vst [vmem:[%s3758_s8 + $0x500] sm:$0xff] %v502_v32  ;;  %505 = vst [vmem:[%s3758_s8 + $0x508] sm:$0xff] %v504_v33  ;;  %v506_v34 = vld [vmem:[%s3753_s7 + $0xa20] sm:$0xff]  ;;  %v508_v35 = vld [vmem:[%s3753_s7 + $0xa28] sm:$0xff] }
  0x6a   : > { %v510_v36 = vld [vmem:[%s3753_s7 + $0xa40] sm:$0xff]  ;;  %507 = vst [vmem:[%s3758_s8 + $0x510] sm:$0xff] %v506_v34  ;;  %509 = vst [vmem:[%s3758_s8 + $0x518] sm:$0xff] %v508_v35  ;;  %v512_v37 = vld [vmem:[%s3753_s7 + $0xa48] sm:$0xff] }
  0x6b   : > { %511 = vst [vmem:[%s3758_s8 + $0x520] sm:$0xff] %v510_v36  ;;  %v514_v38 = vld [vmem:[%s3753_s7 + $0xa60] sm:$0xff]  ;;  %v516_v39 = vld [vmem:[%s3753_s7 + $0xa68] sm:$0xff]  ;;  %513 = vst [vmem:[%s3758_s8 + $0x528] sm:$0xff] %v512_v37 }
  0x6c   : > { %515 = vst [vmem:[%s3758_s8 + $0x530] sm:$0xff] %v514_v38  ;;  %517 = vst [vmem:[%s3758_s8 + $0x538] sm:$0xff] %v516_v39  ;;  %v518_v40 = vld [vmem:[%s3753_s7 + $0xa80] sm:$0xff]  ;;  %v520_v41 = vld [vmem:[%s3753_s7 + $0xa88] sm:$0xff] }
  0x6d   : > { %v522_v42 = vld [vmem:[%s3753_s7 + $0xaa0] sm:$0xff]  ;;  %519 = vst [vmem:[%s3758_s8 + $0x540] sm:$0xff] %v518_v40  ;;  %521 = vst [vmem:[%s3758_s8 + $0x548] sm:$0xff] %v520_v41  ;;  %v524_v43 = vld [vmem:[%s3753_s7 + $0xaa8] sm:$0xff] }
  0x6e   : > { %523 = vst [vmem:[%s3758_s8 + $0x550] sm:$0xff] %v522_v42  ;;  %v526_v44 = vld [vmem:[%s3753_s7 + $0xac0] sm:$0xff]  ;;  %v528_v45 = vld [vmem:[%s3753_s7 + $0xac8] sm:$0xff]  ;;  %525 = vst [vmem:[%s3758_s8 + $0x558] sm:$0xff] %v524_v43 }
  0x6f   : > { %527 = vst [vmem:[%s3758_s8 + $0x560] sm:$0xff] %v526_v44  ;;  %529 = vst [vmem:[%s3758_s8 + $0x568] sm:$0xff] %v528_v45  ;;  %v530_v46 = vld [vmem:[%s3753_s7 + $0xae0] sm:$0xff]  ;;  %v532_v47 = vld [vmem:[%s3753_s7 + $0xae8] sm:$0xff] }
  0x70   : > { %v534_v48 = vld [vmem:[%s3753_s7 + $0xb00] sm:$0xff]  ;;  %531 = vst [vmem:[%s3758_s8 + $0x570] sm:$0xff] %v530_v46  ;;  %533 = vst [vmem:[%s3758_s8 + $0x578] sm:$0xff] %v532_v47  ;;  %v536_v49 = vld [vmem:[%s3753_s7 + $0xb08] sm:$0xff] }
  0x71   : > { %535 = vst [vmem:[%s3758_s8 + $0x580] sm:$0xff] %v534_v48  ;;  %v538_v50 = vld [vmem:[%s3753_s7 + $0xb20] sm:$0xff]  ;;  %v540_v51 = vld [vmem:[%s3753_s7 + $0xb28] sm:$0xff]  ;;  %537 = vst [vmem:[%s3758_s8 + $0x588] sm:$0xff] %v536_v49 }
  0x72   : > { %539 = vst [vmem:[%s3758_s8 + $0x590] sm:$0xff] %v538_v50  ;;  %541 = vst [vmem:[%s3758_s8 + $0x598] sm:$0xff] %v540_v51  ;;  %v542_v52 = vld [vmem:[%s3753_s7 + $0xb40] sm:$0xff]  ;;  %v544_v53 = vld [vmem:[%s3753_s7 + $0xb48] sm:$0xff] }
  0x73   : > { %v546_v54 = vld [vmem:[%s3753_s7 + $0xb60] sm:$0xff]  ;;  %543 = vst [vmem:[%s3758_s8 + $0x5a0] sm:$0xff] %v542_v52  ;;  %545 = vst [vmem:[%s3758_s8 + $0x5a8] sm:$0xff] %v544_v53  ;;  %v548_v55 = vld [vmem:[%s3753_s7 + $0xb68] sm:$0xff] }
  0x74   : > { %547 = vst [vmem:[%s3758_s8 + $0x5b0] sm:$0xff] %v546_v54  ;;  %v550_v56 = vld [vmem:[%s3753_s7 + $0xb80] sm:$0xff]  ;;  %v552_v57 = vld [vmem:[%s3753_s7 + $0xb88] sm:$0xff]  ;;  %549 = vst [vmem:[%s3758_s8 + $0x5b8] sm:$0xff] %v548_v55 }
  0x75   : > { %551 = vst [vmem:[%s3758_s8 + $0x5c0] sm:$0xff] %v550_v56  ;;  %553 = vst [vmem:[%s3758_s8 + $0x5c8] sm:$0xff] %v552_v57  ;;  %v554_v58 = vld [vmem:[%s3753_s7 + $0xba0] sm:$0xff]  ;;  %v556_v59 = vld [vmem:[%s3753_s7 + $0xba8] sm:$0xff] }
  0x76   : > { %v558_v60 = vld [vmem:[%s3753_s7 + $0xbc0] sm:$0xff]  ;;  %555 = vst [vmem:[%s3758_s8 + $0x5d0] sm:$0xff] %v554_v58  ;;  %557 = vst [vmem:[%s3758_s8 + $0x5d8] sm:$0xff] %v556_v59  ;;  %v560_v61 = vld [vmem:[%s3753_s7 + $0xbc8] sm:$0xff] }
  0x77   : > { %559 = vst [vmem:[%s3758_s8 + $0x5e0] sm:$0xff] %v558_v60  ;;  %v562_v62 = vld [vmem:[%s3753_s7 + $0xbe0] sm:$0xff]  ;;  %v564_v63 = vld [vmem:[%s3753_s7 + $0xbe8] sm:$0xff]  ;;  %561 = vst [vmem:[%s3758_s8 + $0x5e8] sm:$0xff] %v560_v61 }
  0x78   : > { %563 = vst [vmem:[%s3758_s8 + $0x5f0] sm:$0xff] %v562_v62  ;;  %565 = vst [vmem:[%s3758_s8 + $0x5f8] sm:$0xff] %v564_v63  ;;  %v566_v0 = vld [vmem:[%s3753_s7 + $0xc00] sm:$0xff]  ;;  %v568_v1 = vld [vmem:[%s3753_s7 + $0xc08] sm:$0xff] }
  0x79   : > { %v570_v2 = vld [vmem:[%s3753_s7 + $0xc20] sm:$0xff]  ;;  %567 = vst [vmem:[%s3758_s8 + $0x600] sm:$0xff] %v566_v0  ;;  %569 = vst [vmem:[%s3758_s8 + $0x608] sm:$0xff] %v568_v1  ;;  %v572_v3 = vld [vmem:[%s3753_s7 + $0xc28] sm:$0xff] }
  0x7a   : > { %571 = vst [vmem:[%s3758_s8 + $0x610] sm:$0xff] %v570_v2  ;;  %v574_v4 = vld [vmem:[%s3753_s7 + $0xc40] sm:$0xff]  ;;  %v576_v5 = vld [vmem:[%s3753_s7 + $0xc48] sm:$0xff]  ;;  %573 = vst [vmem:[%s3758_s8 + $0x618] sm:$0xff] %v572_v3 }
  0x7b   : > { %575 = vst [vmem:[%s3758_s8 + $0x620] sm:$0xff] %v574_v4  ;;  %577 = vst [vmem:[%s3758_s8 + $0x628] sm:$0xff] %v576_v5  ;;  %v578_v6 = vld [vmem:[%s3753_s7 + $0xc60] sm:$0xff]  ;;  %v580_v7 = vld [vmem:[%s3753_s7 + $0xc68] sm:$0xff] }
  0x7c   : > { %v582_v8 = vld [vmem:[%s3753_s7 + $0xc80] sm:$0xff]  ;;  %579 = vst [vmem:[%s3758_s8 + $0x630] sm:$0xff] %v578_v6  ;;  %581 = vst [vmem:[%s3758_s8 + $0x638] sm:$0xff] %v580_v7  ;;  %v584_v9 = vld [vmem:[%s3753_s7 + $0xc88] sm:$0xff] }
  0x7d   : > { %583 = vst [vmem:[%s3758_s8 + $0x640] sm:$0xff] %v582_v8  ;;  %v586_v10 = vld [vmem:[%s3753_s7 + $0xca0] sm:$0xff]  ;;  %v588_v11 = vld [vmem:[%s3753_s7 + $0xca8] sm:$0xff]  ;;  %585 = vst [vmem:[%s3758_s8 + $0x648] sm:$0xff] %v584_v9 }
  0x7e   : > { %587 = vst [vmem:[%s3758_s8 + $0x650] sm:$0xff] %v586_v10  ;;  %589 = vst [vmem:[%s3758_s8 + $0x658] sm:$0xff] %v588_v11  ;;  %v590_v12 = vld [vmem:[%s3753_s7 + $0xcc0] sm:$0xff]  ;;  %v592_v13 = vld [vmem:[%s3753_s7 + $0xcc8] sm:$0xff] }
  0x7f   : > { %v594_v14 = vld [vmem:[%s3753_s7 + $0xce0] sm:$0xff]  ;;  %591 = vst [vmem:[%s3758_s8 + $0x660] sm:$0xff] %v590_v12  ;;  %593 = vst [vmem:[%s3758_s8 + $0x668] sm:$0xff] %v592_v13  ;;  %v596_v15 = vld [vmem:[%s3753_s7 + $0xce8] sm:$0xff] }
  0x80   : > { %595 = vst [vmem:[%s3758_s8 + $0x670] sm:$0xff] %v594_v14  ;;  %v598_v16 = vld [vmem:[%s3753_s7 + $0xd00] sm:$0xff]  ;;  %v600_v17 = vld [vmem:[%s3753_s7 + $0xd08] sm:$0xff]  ;;  %597 = vst [vmem:[%s3758_s8 + $0x678] sm:$0xff] %v596_v15 }
  0x81   : > { %599 = vst [vmem:[%s3758_s8 + $0x680] sm:$0xff] %v598_v16  ;;  %601 = vst [vmem:[%s3758_s8 + $0x688] sm:$0xff] %v600_v17  ;;  %v602_v18 = vld [vmem:[%s3753_s7 + $0xd20] sm:$0xff]  ;;  %v604_v19 = vld [vmem:[%s3753_s7 + $0xd28] sm:$0xff] }
  0x82   : > { %v606_v20 = vld [vmem:[%s3753_s7 + $0xd40] sm:$0xff]  ;;  %603 = vst [vmem:[%s3758_s8 + $0x690] sm:$0xff] %v602_v18  ;;  %605 = vst [vmem:[%s3758_s8 + $0x698] sm:$0xff] %v604_v19  ;;  %v608_v21 = vld [vmem:[%s3753_s7 + $0xd48] sm:$0xff] }
  0x83   : > { %607 = vst [vmem:[%s3758_s8 + $0x6a0] sm:$0xff] %v606_v20  ;;  %v610_v22 = vld [vmem:[%s3753_s7 + $0xd60] sm:$0xff]  ;;  %v612_v23 = vld [vmem:[%s3753_s7 + $0xd68] sm:$0xff]  ;;  %609 = vst [vmem:[%s3758_s8 + $0x6a8] sm:$0xff] %v608_v21 }
  0x84   : > { %611 = vst [vmem:[%s3758_s8 + $0x6b0] sm:$0xff] %v610_v22  ;;  %613 = vst [vmem:[%s3758_s8 + $0x6b8] sm:$0xff] %v612_v23  ;;  %v614_v24 = vld [vmem:[%s3753_s7 + $0xd80] sm:$0xff]  ;;  %v616_v25 = vld [vmem:[%s3753_s7 + $0xd88] sm:$0xff] }
  0x85   : > { %v618_v26 = vld [vmem:[%s3753_s7 + $0xda0] sm:$0xff]  ;;  %615 = vst [vmem:[%s3758_s8 + $0x6c0] sm:$0xff] %v614_v24  ;;  %617 = vst [vmem:[%s3758_s8 + $0x6c8] sm:$0xff] %v616_v25  ;;  %v620_v27 = vld [vmem:[%s3753_s7 + $0xda8] sm:$0xff] }
  0x86   : > { %619 = vst [vmem:[%s3758_s8 + $0x6d0] sm:$0xff] %v618_v26  ;;  %v622_v28 = vld [vmem:[%s3753_s7 + $0xdc0] sm:$0xff]  ;;  %v624_v29 = vld [vmem:[%s3753_s7 + $0xdc8] sm:$0xff]  ;;  %621 = vst [vmem:[%s3758_s8 + $0x6d8] sm:$0xff] %v620_v27 }
  0x87   : > { %623 = vst [vmem:[%s3758_s8 + $0x6e0] sm:$0xff] %v622_v28  ;;  %625 = vst [vmem:[%s3758_s8 + $0x6e8] sm:$0xff] %v624_v29  ;;  %v626_v30 = vld [vmem:[%s3753_s7 + $0xde0] sm:$0xff]  ;;  %v628_v31 = vld [vmem:[%s3753_s7 + $0xde8] sm:$0xff] }
  0x88   : > { %v630_v32 = vld [vmem:[%s3753_s7 + $0xe00] sm:$0xff]  ;;  %627 = vst [vmem:[%s3758_s8 + $0x6f0] sm:$0xff] %v626_v30  ;;  %629 = vst [vmem:[%s3758_s8 + $0x6f8] sm:$0xff] %v628_v31  ;;  %v632_v33 = vld [vmem:[%s3753_s7 + $0xe08] sm:$0xff] }
  0x89   : > { %631 = vst [vmem:[%s3758_s8 + $0x700] sm:$0xff] %v630_v32  ;;  %v634_v34 = vld [vmem:[%s3753_s7 + $0xe20] sm:$0xff]  ;;  %v636_v35 = vld [vmem:[%s3753_s7 + $0xe28] sm:$0xff]  ;;  %633 = vst [vmem:[%s3758_s8 + $0x708] sm:$0xff] %v632_v33 }
  0x8a   : > { %635 = vst [vmem:[%s3758_s8 + $0x710] sm:$0xff] %v634_v34  ;;  %637 = vst [vmem:[%s3758_s8 + $0x718] sm:$0xff] %v636_v35  ;;  %v638_v36 = vld [vmem:[%s3753_s7 + $0xe40] sm:$0xff]  ;;  %v640_v37 = vld [vmem:[%s3753_s7 + $0xe48] sm:$0xff] }
  0x8b   : > { %v642_v38 = vld [vmem:[%s3753_s7 + $0xe60] sm:$0xff]  ;;  %639 = vst [vmem:[%s3758_s8 + $0x720] sm:$0xff] %v638_v36  ;;  %641 = vst [vmem:[%s3758_s8 + $0x728] sm:$0xff] %v640_v37  ;;  %v644_v39 = vld [vmem:[%s3753_s7 + $0xe68] sm:$0xff] }
  0x8c   : > { %643 = vst [vmem:[%s3758_s8 + $0x730] sm:$0xff] %v642_v38  ;;  %v646_v40 = vld [vmem:[%s3753_s7 + $0xe80] sm:$0xff]  ;;  %v648_v41 = vld [vmem:[%s3753_s7 + $0xe88] sm:$0xff]  ;;  %645 = vst [vmem:[%s3758_s8 + $0x738] sm:$0xff] %v644_v39 }
  0x8d   : > { %647 = vst [vmem:[%s3758_s8 + $0x740] sm:$0xff] %v646_v40  ;;  %649 = vst [vmem:[%s3758_s8 + $0x748] sm:$0xff] %v648_v41  ;;  %v650_v42 = vld [vmem:[%s3753_s7 + $0xea0] sm:$0xff]  ;;  %v652_v43 = vld [vmem:[%s3753_s7 + $0xea8] sm:$0xff] }
  0x8e   : > { %v654_v44 = vld [vmem:[%s3753_s7 + $0xec0] sm:$0xff]  ;;  %651 = vst [vmem:[%s3758_s8 + $0x750] sm:$0xff] %v650_v42  ;;  %653 = vst [vmem:[%s3758_s8 + $0x758] sm:$0xff] %v652_v43  ;;  %v656_v45 = vld [vmem:[%s3753_s7 + $0xec8] sm:$0xff] }
  0x8f   : > { %655 = vst [vmem:[%s3758_s8 + $0x760] sm:$0xff] %v654_v44  ;;  %v658_v46 = vld [vmem:[%s3753_s7 + $0xee0] sm:$0xff]  ;;  %v660_v47 = vld [vmem:[%s3753_s7 + $0xee8] sm:$0xff]  ;;  %657 = vst [vmem:[%s3758_s8 + $0x768] sm:$0xff] %v656_v45 }
  0x90   : > { %659 = vst [vmem:[%s3758_s8 + $0x770] sm:$0xff] %v658_v46  ;;  %661 = vst [vmem:[%s3758_s8 + $0x778] sm:$0xff] %v660_v47  ;;  %v662_v48 = vld [vmem:[%s3753_s7 + $0xf00] sm:$0xff]  ;;  %v664_v49 = vld [vmem:[%s3753_s7 + $0xf08] sm:$0xff] }
  0x91   : > { %v666_v50 = vld [vmem:[%s3753_s7 + $0xf20] sm:$0xff]  ;;  %663 = vst [vmem:[%s3758_s8 + $0x780] sm:$0xff] %v662_v48  ;;  %665 = vst [vmem:[%s3758_s8 + $0x788] sm:$0xff] %v664_v49  ;;  %v668_v51 = vld [vmem:[%s3753_s7 + $0xf28] sm:$0xff] }
  0x92   : > { %667 = vst [vmem:[%s3758_s8 + $0x790] sm:$0xff] %v666_v50  ;;  %v670_v52 = vld [vmem:[%s3753_s7 + $0xf40] sm:$0xff]  ;;  %v672_v53 = vld [vmem:[%s3753_s7 + $0xf48] sm:$0xff]  ;;  %669 = vst [vmem:[%s3758_s8 + $0x798] sm:$0xff] %v668_v51 }
  0x93   : > { %671 = vst [vmem:[%s3758_s8 + $0x7a0] sm:$0xff] %v670_v52  ;;  %673 = vst [vmem:[%s3758_s8 + $0x7a8] sm:$0xff] %v672_v53  ;;  %v674_v54 = vld [vmem:[%s3753_s7 + $0xf60] sm:$0xff]  ;;  %v676_v55 = vld [vmem:[%s3753_s7 + $0xf68] sm:$0xff] }
  0x94   : > { %v678_v56 = vld [vmem:[%s3753_s7 + $0xf80] sm:$0xff]  ;;  %675 = vst [vmem:[%s3758_s8 + $0x7b0] sm:$0xff] %v674_v54  ;;  %677 = vst [vmem:[%s3758_s8 + $0x7b8] sm:$0xff] %v676_v55  ;;  %v680_v57 = vld [vmem:[%s3753_s7 + $0xf88] sm:$0xff] }
  0x95   : > { %679 = vst [vmem:[%s3758_s8 + $0x7c0] sm:$0xff] %v678_v56  ;;  %v682_v58 = vld [vmem:[%s3753_s7 + $0xfa0] sm:$0xff]  ;;  %v684_v59 = vld [vmem:[%s3753_s7 + $0xfa8] sm:$0xff]  ;;  %681 = vst [vmem:[%s3758_s8 + $0x7c8] sm:$0xff] %v680_v57 }
  0x96   : > { %683 = vst [vmem:[%s3758_s8 + $0x7d0] sm:$0xff] %v682_v58  ;;  %685 = vst [vmem:[%s3758_s8 + $0x7d8] sm:$0xff] %v684_v59  ;;  %v686_v60 = vld [vmem:[%s3753_s7 + $0xfc0] sm:$0xff]  ;;  %v688_v61 = vld [vmem:[%s3753_s7 + $0xfc8] sm:$0xff] }
  0x97   : > { %v690_v62 = vld [vmem:[%s3753_s7 + $0xfe0] sm:$0xff]  ;;  %687 = vst [vmem:[%s3758_s8 + $0x7e0] sm:$0xff] %v686_v60  ;;  %689 = vst [vmem:[%s3758_s8 + $0x7e8] sm:$0xff] %v688_v61  ;;  %v692_v63 = vld [vmem:[%s3753_s7 + $0xfe8] sm:$0xff] }
  0x98   : > { %691 = vst [vmem:[%s3758_s8 + $0x7f0] sm:$0xff] %v690_v62  ;;  %693 = vst [vmem:[%s3758_s8 + $0x7f8] sm:$0xff] %v692_v63 }
  0x99 PF: > { %p2878_p7 = scmp.ge.s32.totalorder %s3669_s18, 1  ;;  %p710_p8 = scmp.lt.s32.totalorder %s3669_s18, 5 }
  0x9b   : > { %p711_p9 = pnand %p2878_p7, %p710_p8 }
  0x9c   : > { %s717_s9 = sand.u32 (!%p711_p9), 1, %s3645_s12   ;;  %s2880_s12 = sshll.u32 (!%p711_p9), %s3657_s15, 3  ;;  %v1040_v36 = vlaneseq (!%p711_p9)  ;;  %v3671_v37 = vmov (!%p711_p9), 1966171168  }
  0x9d   : > { %714 = sbr.rel (%p711_p9) target bundleno = 640 (0x280), region = 51  ;;  %s2879_s10 = sshll.u32 (!%p711_p9), %s717_s9, 11  ;;  %v1063_v38 = vunpack.c.l.s4 (!%p711_p9), %v3671_v37 }
  0x9e   : > { %s4272_s11 = scalar_lea.vmem (!%p711_p9), [#allocation2], %s2879_s10  ;;  %p757_p10 = scmp.lt.s32.totalorder (!%p711_p9), %s2880_s12, 15  ;;  %v4314_v42 = vshrl.u32 (!%p711_p9), %v1040_v36, 7 }
  0x9f   : > { %v3230_v0 = vld [vmem:[%s4272_s11 + $0x4] ss:$16 sps:$4 sm:$0xff] (!%p711_p9)   ;;  %v3232_v1 = vld [vmem:[%s4272_s11 + $0xc] ss:$16 sps:$4 sm:$0xff] (!%p711_p9)   ;;  %v3234_v2 = vld [vmem:[%s4272_s11] ss:$16 sps:$4 sm:$0xff] (!%p711_p9)   ;;  %v1064_v43 = vunpack.c.0.s8 (!%p711_p9), %v1063_v38 }
  0xa0   : > { %2398 = vmatprep.subr.bf16.mxu0 (!%p711_p9), %v3230_v0  ;;  %v3235_v3 = vld [vmem:[%s4272_s11 + $0x8] ss:$16 sps:$4 sm:$0xff] (!%p711_p9)   ;;  %2562 = vmatprep.subr.bf16.mxu1 (!%p711_p9), %v3232_v1  ;;  %v3236_v4 = vld [vmem:[%s4272_s11 + $0x24] ss:$16 sps:$4 sm:$0xff] (!%p711_p9)   ;;  %v3238_v5 = vld [vmem:[%s4272_s11 + $0x2c] ss:$16 sps:$4 sm:$0xff] (!%p711_p9)  }
  0xa1   : > { %2399 = vmatpush1.bf16.msra.mxu0 (!%p711_p9), %v3234_v2  ;;  %2563 = vmatpush1.bf16.msra.mxu1 (!%p711_p9), %v3235_v3  ;;  %v3240_v6 = vld [vmem:[%s4272_s11 + $0x20] ss:$16 sps:$4 sm:$0xff] (!%p711_p9)   ;;  %v3241_v7 = vld [vmem:[%s4272_s11 + $0x28] ss:$16 sps:$4 sm:$0xff] (!%p711_p9)   ;;  %v3242_v8 = vld [vmem:[%s4272_s11 + $0x44] ss:$16 sps:$4 sm:$0xff] (!%p711_p9)   ;;  %v4325_v49 = vsub.s32 (!%p711_p9), %v1064_v43, %v4314_v42 }
  0xa2   : > { %2400 = vmatprep.subr.bf16.mxu0 (!%p711_p9), %v3236_v4  ;;  %2564 = vmatprep.subr.bf16.mxu1 (!%p711_p9), %v3238_v5  ;;  %v3244_v9 = vld [vmem:[%s4272_s11 + $0x4c] ss:$16 sps:$4 sm:$0xff] (!%p711_p9)   ;;  %v3246_v10 = vld [vmem:[%s4272_s11 + $0x40] ss:$16 sps:$4 sm:$0xff] (!%p711_p9)   ;;  %v3247_v11 = vld [vmem:[%s4272_s11 + $0x48] ss:$16 sps:$4 sm:$0xff] (!%p711_p9)  }
  0xa3   : > { %v3248_v12 = vld [vmem:[%s4272_s11 + $0x64] ss:$16 sps:$4 sm:$0xff] (!%p711_p9)   ;;  %v3250_v13 = vld [vmem:[%s4272_s11 + $0x6c] ss:$16 sps:$4 sm:$0xff] (!%p711_p9)   ;;  %v3252_v14 = vld [vmem:[%s4272_s11 + $0x60] ss:$16 sps:$4 sm:$0xff] (!%p711_p9)  }
  0xa4   : > { %v3253_v15 = vld [vmem:[%s4272_s11 + $0x68] ss:$16 sps:$4 sm:$0xff]   ;;  %v3254_v16 = vld [vmem:[%s4272_s11 + $0x84] ss:$16 sps:$4 sm:$0xff]   ;;  %v3256_v17 = vld [vmem:[%s4272_s11 + $0x8c] ss:$16 sps:$4 sm:$0xff]  }
  0xa5   : > { %2401 = vmatpush1.bf16.msra.mxu0 %v3240_v6  ;;  %2565 = vmatpush1.bf16.msra.mxu1 %v3241_v7  ;;  %v3258_v18 = vld [vmem:[%s4272_s11 + $0x80] ss:$16 sps:$4 sm:$0xff]   ;;  %v3259_v19 = vld [vmem:[%s4272_s11 + $0x88] ss:$16 sps:$4 sm:$0xff]   ;;  %v3260_v20 = vld [vmem:[%s4272_s11 + $0xa4] ss:$16 sps:$4 sm:$0xff]  }
  0xa6   : > { %2402 = vmatprep.subr.bf16.mxu0 %v3242_v8  ;;  %2566 = vmatprep.subr.bf16.mxu1 %v3244_v9  ;;  %v3262_v21 = vld [vmem:[%s4272_s11 + $0xac] ss:$16 sps:$4 sm:$0xff]   ;;  %v3264_v22 = vld [vmem:[%s4272_s11 + $0xa0] ss:$16 sps:$4 sm:$0xff]   ;;  %v3265_v23 = vld [vmem:[%s4272_s11 + $0xa8] ss:$16 sps:$4 sm:$0xff]  }
  0xa7   : > { %v3266_v24 = vld [vmem:[%s4272_s11 + $0xc4] ss:$16 sps:$4 sm:$0xff]   ;;  %v3268_v25 = vld [vmem:[%s4272_s11 + $0xcc] ss:$16 sps:$4 sm:$0xff]   ;;  %v3270_v26 = vld [vmem:[%s4272_s11 + $0xc0] ss:$16 sps:$4 sm:$0xff]  }
  0xa8   : > { %v3271_v27 = vld [vmem:[%s4272_s11 + $0xc8] ss:$16 sps:$4 sm:$0xff]   ;;  %v3272_v28 = vld [vmem:[%s4272_s11 + $0xe4] ss:$16 sps:$4 sm:$0xff]   ;;  %v3274_v29 = vld [vmem:[%s4272_s11 + $0xec] ss:$16 sps:$4 sm:$0xff]  }
  0xa9   : > { %2403 = vmatpush1.bf16.msra.mxu0 %v3246_v10  ;;  %2567 = vmatpush1.bf16.msra.mxu1 %v3247_v11  ;;  %v3276_v30 = vld [vmem:[%s4272_s11 + $0xe0] ss:$16 sps:$4 sm:$0xff]   ;;  %v3277_v31 = vld [vmem:[%s4272_s11 + $0xe8] ss:$16 sps:$4 sm:$0xff]   ;;  %v3278_v32 = vld [vmem:[%s4272_s11 + $0x104] ss:$16 sps:$4 sm:$0xff]  }
  0xaa   : > { %2404 = vmatprep.subr.bf16.mxu0 %v3248_v12  ;;  %2568 = vmatprep.subr.bf16.mxu1 %v3250_v13  ;;  %v3280_v33 = vld [vmem:[%s4272_s11 + $0x10c] ss:$16 sps:$4 sm:$0xff]   ;;  %v3282_v34 = vld [vmem:[%s4272_s11 + $0x100] ss:$16 sps:$4 sm:$0xff]   ;;  %v3283_v35 = vld [vmem:[%s4272_s11 + $0x108] ss:$16 sps:$4 sm:$0xff]  }
  0xab   : > { %v3284_v39 = vld [vmem:[%s4272_s11 + $0x124] ss:$16 sps:$4 sm:$0xff]   ;;  %v3286_v40 = vld [vmem:[%s4272_s11 + $0x12c] ss:$16 sps:$4 sm:$0xff]   ;;  %v3288_v41 = vld [vmem:[%s4272_s11 + $0x120] ss:$16 sps:$4 sm:$0xff]  }
  0xac   : > { %s4619_s12 = smov (!%p757_p10, %s2880_s12), 15  ;;  %v3289_v44 = vld [vmem:[%s4272_s11 + $0x128] ss:$16 sps:$4 sm:$0xff]   ;;  %v3290_v45 = vld [vmem:[%s4272_s11 + $0x144] ss:$16 sps:$4 sm:$0xff]   ;;  %s2881_s24 = sshll.u32 %s3653_s14, 2 }
  0xad   : > { %2405 = vmatpush1.bf16.msra.mxu0 %v3252_v14  ;;  %2569 = vmatpush1.bf16.msra.mxu1 %v3253_v15  ;;  %v3292_v46 = vld [vmem:[%s4272_s11 + $0x14c] ss:$16 sps:$4 sm:$0xff]   ;;  %v3294_v47 = vld [vmem:[%s4272_s11 + $0x140] ss:$16 sps:$4 sm:$0xff]   ;;  %v3295_v48 = vld [vmem:[%s4272_s11 + $0x148] ss:$16 sps:$4 sm:$0xff]   ;;  %s759_s23 = scalar_lea.vmem %s4602_s0, %s4619_s12 }
  0xae   : > { %2406 = vmatprep.subr.bf16.mxu0 %v3254_v16  ;;  %2570 = vmatprep.subr.bf16.mxu1 %v3256_v17  ;;  %v3296_v50 = vld [vmem:[%s4272_s11 + $0x164] ss:$16 sps:$4 sm:$0xff]   ;;  %v3298_v51 = vld [vmem:[%s4272_s11 + $0x16c] ss:$16 sps:$4 sm:$0xff]   ;;  %v3300_v53 = vld [vmem:[%s4272_s11 + $0x160] ss:$16 sps:$4 sm:$0xff]  }
  0xaf   : > { %v781_v52 = vld [vmem:[%s759_s23] sm:$0xff]  ;;  %v3301_v55 = vld [vmem:[%s4272_s11 + $0x168] ss:$16 sps:$4 sm:$0xff]   ;;  %v3304_v57 = vld [vmem:[%s4272_s11 + $0x18c] ss:$16 sps:$4 sm:$0xff]   ;;  %p763_p11 = scmp.lt.s32.totalorder %s3657_s15, 1 }
  0xb0   : > { %v1068_v54 = vrot.slane %v781_v52, %v4325_v49  ;;  %v3302_v56 = vld [vmem:[%s4272_s11 + $0x184] ss:$16 sps:$4 sm:$0xff]   ;;  %v3306_v59 = vld [vmem:[%s4272_s11 + $0x180] ss:$16 sps:$4 sm:$0xff]   ;;  %v3307_v61 = vld [vmem:[%s4272_s11 + $0x188] ss:$16 sps:$4 sm:$0xff]   ;;  %v1061_v9 = vcombine.high %v781_v52, %v781_v52 }
  0xb1   : > { %2407 = vmatpush1.bf16.msra.mxu0 %v3258_v18  ;;  %2571 = vmatpush1.bf16.msra.mxu1 %v3259_v19  ;;  %v3308_v62 = vld [vmem:[%s4272_s11 + $0x1a4] ss:$16 sps:$4 sm:$0xff]   ;;  %v3310_v63 = vld [vmem:[%s4272_s11 + $0x1ac] ss:$16 sps:$4 sm:$0xff]   ;;  %v3312_v0 = vld [vmem:[%s4272_s11 + $0x1a0] ss:$16 sps:$4 sm:$0xff]  }
  0xb2   : > { %2408 = vmatprep.subr.bf16.mxu0 %v3260_v20  ;;  %2572 = vmatprep.subr.bf16.mxu1 %v3262_v21  ;;  %v1076_v58 = vcombine.high %v1068_v54, %v1068_v54  ;;  %v3313_v1 = vld [vmem:[%s4272_s11 + $0x1a8] ss:$16 sps:$4 sm:$0xff]   ;;  %v3314_v2 = vld [vmem:[%s4272_s11 + $0x1c4] ss:$16 sps:$4 sm:$0xff]   ;;  %v3316_v3 = vld [vmem:[%s4272_s11 + $0x1cc] ss:$16 sps:$4 sm:$0xff]   ;;  %v1075_v13 = vrot.slane %v1061_v9, %v4325_v49  ;;  %v4354_v15 = vrot.slane %v1068_v54, %v4325_v49 }
  0xb3   : > { %v3318_v4 = vld [vmem:[%s4272_s11 + $0x1c0] ss:$16 sps:$4 sm:$0xff]   ;;  %v3319_v5 = vld [vmem:[%s4272_s11 + $0x1c8] ss:$16 sps:$4 sm:$0xff]   ;;  %v3320_v6 = vld [vmem:[%s4272_s11 + $0x1e4] ss:$16 sps:$4 sm:$0xff]  }
  0xb4   : > { %v1098_v60 = vrot.slane %v1076_v58, %v4325_v49  ;;  %v3322_v7 = vld [vmem:[%s4272_s11 + $0x1ec] ss:$16 sps:$4 sm:$0xff]   ;;  %v3324_v8 = vld [vmem:[%s4272_s11 + $0x1e0] ss:$16 sps:$4 sm:$0xff]   ;;  %v3325_v10 = vld [vmem:[%s4272_s11 + $0x1e8] ss:$16 sps:$4 sm:$0xff]   ;;  %v1077_v16 = vcombine.high %v1075_v13, %v1075_v13  ;;  %v4363_v21 = vrot.slane %v1075_v13, %v4325_v49 }
  0xb5   : > { %2409 = vmatpush1.bf16.msra.mxu0 %v3264_v22  ;;  %2573 = vmatpush1.bf16.msra.mxu1 %v3265_v23  ;;  %v3328_v11 = vld [vmem:[%s4272_s11 + $0x204] ss:$16 sps:$4 sm:$0xff]   ;;  %v3331_v12 = vld [vmem:[%s4272_s11 + $0x20c] ss:$16 sps:$4 sm:$0xff]   ;;  %v3326_v14 = vld [vmem:[%s4272_s11 + $0x200] ss:$16 sps:$4 sm:$0xff]  }
  0xb6   : > { %2410 = vmatprep.subr.bf16.mxu0 %v3266_v24  ;;  %2574 = vmatprep.subr.bf16.mxu1 %v3268_v25  ;;  %v3329_v17 = vld [vmem:[%s4272_s11 + $0x208] ss:$16 sps:$4 sm:$0xff]   ;;  %v3334_v18 = vld [vmem:[%s4272_s11 + $0x224] ss:$16 sps:$4 sm:$0xff]   ;;  %v3337_v19 = vld [vmem:[%s4272_s11 + $0x22c] ss:$16 sps:$4 sm:$0xff]   ;;  %v4360_v20 = vrot.slane %v1077_v16, %v4325_v49  ;;  %v1108_v22 = vcombine.high %v1098_v60, %v1098_v60 }
  0xb7   : > { %2430 = vmatprep.mubr.bf16.mxu0 %v1098_v60  ;;  %2594 = vmatprep.mubr.bf16.mxu1 %v1098_v60  ;;  %v3332_v23 = vld [vmem:[%s4272_s11 + $0x220] ss:$16 sps:$4 sm:$0xff]   ;;  %v3335_v24 = vld [vmem:[%s4272_s11 + $0x228] ss:$16 sps:$4 sm:$0xff]   ;;  %v3340_v25 = vld [vmem:[%s4272_s11 + $0x244] ss:$16 sps:$4 sm:$0xff]  }
  0xb8   : > { %v3353_v36 = vld [vmem:[%s4272_s11 + $0x288] ss:$16 sps:$4 sm:$0xff]   ;;  %v3358_v37 = vld [vmem:[%s4272_s11 + $0x2a4] ss:$16 sps:$4 sm:$0xff]   ;;  %v3361_v38 = vld [vmem:[%s4272_s11 + $0x2ac] ss:$16 sps:$4 sm:$0xff]  }
  0xb9   : > { %2411 = vmatpush1.bf16.msra.mxu0 %v3270_v26  ;;  %2575 = vmatpush1.bf16.msra.mxu1 %v3271_v27  ;;  %v3343_v26 = vld [vmem:[%s4272_s11 + $0x24c] ss:$16 sps:$4 sm:$0xff]   ;;  %v3338_v27 = vld [vmem:[%s4272_s11 + $0x240] ss:$16 sps:$4 sm:$0xff]   ;;  %v3371_v49 = vld [vmem:[%s4272_s11 + $0x2e8] ss:$16 sps:$4 sm:$0xff]  }
  0xba   : > { %2412 = vmatprep.subr.bf16.mxu0 %v3272_v28  ;;  %2576 = vmatprep.subr.bf16.mxu1 %v3274_v29  ;;  %v3341_v28 = vld [vmem:[%s4272_s11 + $0x248] ss:$16 sps:$4 sm:$0xff]   ;;  %v3346_v29 = vld [vmem:[%s4272_s11 + $0x264] ss:$16 sps:$4 sm:$0xff]   ;;  %v3367_v43 = vld [vmem:[%s4272_s11 + $0x2cc] ss:$16 sps:$4 sm:$0xff]  }
  0xbb   : > { %v3374_v52 = vld [vmem:[%s4272_s11 + $0x300] ss:$16 sps:$4 sm:$0xff]   ;;  %v3382_v54 = vld [vmem:[%s4272_s11 + $0x324] ss:$16 sps:$4 sm:$0xff]   ;;  %v3407_v9 = vld [vmem:[%s4272_s11 + $0x3a8] ss:$16 sps:$4 sm:$0xff]  }
  0xbc   : > { %v3388_v58 = vld [vmem:[%s4272_s11 + $0x344] ss:$16 sps:$4 sm:$0xff]   ;;  %v3386_v60 = vld [vmem:[%s4272_s11 + $0x340] ss:$16 sps:$4 sm:$0xff]   ;;  %v3413_v13 = vld [vmem:[%s4272_s11 + $0x3c8] ss:$16 sps:$4 sm:$0xff]  }
  0xbd   : > { %2413 = vmatpush1.bf16.msra.mxu0 %v3276_v30  ;;  %2577 = vmatpush1.bf16.msra.mxu1 %v3277_v31  ;;  %v3349_v30 = vld [vmem:[%s4272_s11 + $0x26c] ss:$16 sps:$4 sm:$0xff]   ;;  %v3344_v31 = vld [vmem:[%s4272_s11 + $0x260] ss:$16 sps:$4 sm:$0xff]   ;;  %p765_p12 = scmp.lt.s32.totalorder %s2881_s24, 7  ;;  %s4621_s15 = smov (!%p763_p11, %s3657_s15), 1 }
  0xbe   : > { %2414 = vmatprep.subr.bf16.mxu0 %v3278_v32  ;;  %2578 = vmatprep.subr.bf16.mxu1 %v3280_v33  ;;  %v3347_v32 = vld [vmem:[%s4272_s11 + $0x268] ss:$16 sps:$4 sm:$0xff]   ;;  %v3352_v33 = vld [vmem:[%s4272_s11 + $0x284] ss:$16 sps:$4 sm:$0xff]   ;;  %v3421_v16 = vld [vmem:[%s4272_s11 + $0x3ec] ss:$16 sps:$4 sm:$0xff]  }
  0xbf   : > { %s4623_s24 = smov (!%p765_p12, %s2881_s24), 7  ;;  %s2882_s26 = sshll.u32 %s4621_s15, 3 }
  0xc0   : > { %s4566_s27 = sadd.s32 %s2882_s26, %s4623_s24 }
  0xc1   : > { %2415 = vmatpush1.bf16.msra.mxu0 %v3282_v34  ;;  %2579 = vmatpush1.bf16.msra.mxu1 %v3283_v35  ;;  %v3355_v34 = vld [vmem:[%s4272_s11 + $0x28c] ss:$16 sps:$4 sm:$0xff]   ;;  %v3350_v35 = vld [vmem:[%s4272_s11 + $0x280] ss:$16 sps:$4 sm:$0xff]   ;;  %s769_s30 = scalar_lea.vmem %s4604_s2, %s4566_s27  ;;  %s2885_s14 = sshll.u32 %s4566_s27, 1 }
  0xc2   : > { %2416 = vmatprep.subr.bf16.mxu0 %v3284_v39  ;;  %2580 = vmatprep.subr.bf16.mxu1 %v3286_v40  ;;  %v3356_v39 = vld [vmem:[%s4272_s11 + $0x2a0] ss:$16 sps:$4 sm:$0xff]   ;;  %v3359_v40 = vld [vmem:[%s4272_s11 + $0x2a8] ss:$16 sps:$4 sm:$0xff]   ;;  %s779_s5 = scalar_lea.vmem %s4605_s3, %s2885_s14 }
  0xc5   : > { %2417 = vmatpush1.bf16.msra.mxu0 %v3288_v41  ;;  %2581 = vmatpush1.bf16.msra.mxu1 %v3289_v44  ;;  %v3364_v41 = vld [vmem:[%s4272_s11 + $0x2c4] ss:$16 sps:$4 sm:$0xff]   ;;  %v3362_v44 = vld [vmem:[%s4272_s11 + $0x2c0] ss:$16 sps:$4 sm:$0xff]  }
  0xc6   : > { %2418 = vmatprep.subr.bf16.mxu0 %v3290_v45  ;;  %2582 = vmatprep.subr.bf16.mxu1 %v3292_v46  ;;  %v3365_v45 = vld [vmem:[%s4272_s11 + $0x2c8] ss:$16 sps:$4 sm:$0xff]   ;;  %v3370_v46 = vld [vmem:[%s4272_s11 + $0x2e4] ss:$16 sps:$4 sm:$0xff]  }
  0xc9   : > { %2419 = vmatpush1.bf16.msra.mxu0 %v3294_v47  ;;  %2583 = vmatpush1.bf16.msra.mxu1 %v3295_v48  ;;  %v3373_v47 = vld [vmem:[%s4272_s11 + $0x2ec] ss:$16 sps:$4 sm:$0xff]   ;;  %v3368_v48 = vld [vmem:[%s4272_s11 + $0x2e0] ss:$16 sps:$4 sm:$0xff]  }
  0xca   : > { %2420 = vmatprep.subr.bf16.mxu0 %v3296_v50  ;;  %2584 = vmatprep.subr.bf16.mxu1 %v3298_v51  ;;  %v3376_v50 = vld [vmem:[%s4272_s11 + $0x304] ss:$16 sps:$4 sm:$0xff]   ;;  %v3379_v51 = vld [vmem:[%s4272_s11 + $0x30c] ss:$16 sps:$4 sm:$0xff]  }
  0xcd   : > { %2421 = vmatpush1.bf16.msra.mxu0 %v3300_v53  ;;  %2585 = vmatpush1.bf16.msra.mxu1 %v3301_v55  ;;  %v3377_v53 = vld [vmem:[%s4272_s11 + $0x308] ss:$16 sps:$4 sm:$0xff]   ;;  %v3385_v55 = vld [vmem:[%s4272_s11 + $0x32c] ss:$16 sps:$4 sm:$0xff]  }
  0xce   : > { %2422 = vmatprep.subr.bf16.mxu0 %v3302_v56  ;;  %2586 = vmatprep.subr.bf16.mxu1 %v3304_v57  ;;  %v3380_v56 = vld [vmem:[%s4272_s11 + $0x320] ss:$16 sps:$4 sm:$0xff]   ;;  %v3383_v57 = vld [vmem:[%s4272_s11 + $0x328] ss:$16 sps:$4 sm:$0xff]  }
  0xd1   : > { %2423 = vmatpush1.bf16.msra.mxu0 %v3306_v59  ;;  %2587 = vmatpush1.bf16.msra.mxu1 %v3307_v61  ;;  %v3391_v59 = vld [vmem:[%s4272_s11 + $0x34c] ss:$16 sps:$4 sm:$0xff]   ;;  %v3389_v61 = vld [vmem:[%s4272_s11 + $0x348] ss:$16 sps:$4 sm:$0xff]  }
  0xd2   : > { %2424 = vmatprep.subr.bf16.mxu0 %v3308_v62  ;;  %2588 = vmatprep.subr.bf16.mxu1 %v3310_v63  ;;  %v3394_v62 = vld [vmem:[%s4272_s11 + $0x364] ss:$16 sps:$4 sm:$0xff]   ;;  %v3397_v63 = vld [vmem:[%s4272_s11 + $0x36c] ss:$16 sps:$4 sm:$0xff]  }
  0xd5   : > { %2425 = vmatpush1.bf16.msra.mxu0 %v3312_v0  ;;  %2589 = vmatpush1.bf16.msra.mxu1 %v3313_v1  ;;  %v3392_v0 = vld [vmem:[%s4272_s11 + $0x360] ss:$16 sps:$4 sm:$0xff]   ;;  %v3395_v1 = vld [vmem:[%s4272_s11 + $0x368] ss:$16 sps:$4 sm:$0xff]  }
  0xd6   : > { %2426 = vmatprep.subr.bf16.mxu0 %v3314_v2  ;;  %2590 = vmatprep.subr.bf16.mxu1 %v3316_v3  ;;  %v3400_v2 = vld [vmem:[%s4272_s11 + $0x384] ss:$16 sps:$4 sm:$0xff]   ;;  %v3403_v3 = vld [vmem:[%s4272_s11 + $0x38c] ss:$16 sps:$4 sm:$0xff]  }
  0xd9   : > { %2427 = vmatpush1.bf16.msra.mxu0 %v3318_v4  ;;  %2591 = vmatpush1.bf16.msra.mxu1 %v3319_v5  ;;  %v3398_v4 = vld [vmem:[%s4272_s11 + $0x380] ss:$16 sps:$4 sm:$0xff]   ;;  %v3401_v5 = vld [vmem:[%s4272_s11 + $0x388] ss:$16 sps:$4 sm:$0xff]  }
  0xda   : > { %2428 = vmatprep.subr.bf16.mxu0 %v3320_v6  ;;  %2592 = vmatprep.subr.bf16.mxu1 %v3322_v7  ;;  %v3406_v6 = vld [vmem:[%s4272_s11 + $0x3a4] ss:$16 sps:$4 sm:$0xff]   ;;  %v3409_v7 = vld [vmem:[%s4272_s11 + $0x3ac] ss:$16 sps:$4 sm:$0xff]  }
  0xdd   : > { %2429 = vmatpush1.bf16.msra.mxu0 %v3324_v8  ;;  %2593 = vmatpush1.bf16.msra.mxu1 %v3325_v10  ;;  %v3404_v8 = vld [vmem:[%s4272_s11 + $0x3a0] ss:$16 sps:$4 sm:$0xff]   ;;  %v3412_v10 = vld [vmem:[%s4272_s11 + $0x3c4] ss:$16 sps:$4 sm:$0xff]  }
  0xde   : > { %2439 = vmatprep.subr.bf16.mxu0 %v3328_v11  ;;  %2603 = vmatprep.subr.bf16.mxu1 %v3331_v12  ;;  %v3415_v11 = vld [vmem:[%s4272_s11 + $0x3cc] ss:$16 sps:$4 sm:$0xff]   ;;  %v3410_v12 = vld [vmem:[%s4272_s11 + $0x3c0] ss:$16 sps:$4 sm:$0xff]  }
  0xe0   : > { %2431 = vmatmul.mubr.bf16.vlgmr.msra.gmra.mrb[0].mxu0 %v4354_v15  ;;  %2595 = vmatmul.mubr.bf16.vlgmr.msra.gmra.mrb[0].mxu1 %v4354_v15 }
  0xe1   : > { %2440 = vmatpush1.bf16.msra.mxu0 %v3326_v14  ;;  %2604 = vmatpush1.bf16.msra.mxu1 %v3329_v17  ;;  %v3418_v14 = vld [vmem:[%s4272_s11 + $0x3e4] ss:$16 sps:$4 sm:$0xff]   ;;  %v3416_v17 = vld [vmem:[%s4272_s11 + $0x3e0] ss:$16 sps:$4 sm:$0xff]  }
  0xe2   : > { %2441 = vmatprep.subr.bf16.mxu0 %v3334_v18  ;;  %2605 = vmatprep.subr.bf16.mxu1 %v3337_v19  ;;  %v3419_v18 = vld [vmem:[%s4272_s11 + $0x3e8] ss:$16 sps:$4 sm:$0xff]   ;;  %v3424_v19 = vld [vmem:[%s4272_s11 + $0x404] ss:$16 sps:$4 sm:$0xff]  }
  0xe3   : > { %2471 = vmatprep.mubr.bf16.mxu0 %v1108_v22  ;;  %2635 = vmatprep.mubr.bf16.mxu1 %v1108_v22  ;;  %v3427_v22 = vld [vmem:[%s4272_s11 + $0x40c] ss:$16 sps:$4 sm:$0xff]  }
  0xe5   : > { %2442 = vmatpush1.bf16.msra.mxu0 %v3332_v23  ;;  %2606 = vmatpush1.bf16.msra.mxu1 %v3335_v24  ;;  %v3422_v23 = vld [vmem:[%s4272_s11 + $0x400] ss:$16 sps:$4 sm:$0xff]   ;;  %v1106_v24 = vcombine.high %v4354_v15, %v4354_v15  ;;  %v3431_v15 = vld [vmem:[%s4272_s11 + $0x428] ss:$16 sps:$4 sm:$0xff]  }
  0xe6   : > { %2443 = vmatprep.subr.bf16.mxu0 %v3340_v25  ;;  %2607 = vmatprep.subr.bf16.mxu1 %v3343_v26  ;;  %v3425_v25 = vld [vmem:[%s4272_s11 + $0x408] ss:$16 sps:$4 sm:$0xff]   ;;  %v3430_v26 = vld [vmem:[%s4272_s11 + $0x424] ss:$16 sps:$4 sm:$0xff]  }
  0xe9   : > { %2444 = vmatpush1.bf16.msra.mxu0 %v3338_v27  ;;  %2608 = vmatpush1.bf16.msra.mxu1 %v3341_v28  ;;  %v3433_v27 = vld [vmem:[%s4272_s11 + $0x42c] ss:$16 sps:$4 sm:$0xff]   ;;  %v3428_v28 = vld [vmem:[%s4272_s11 + $0x420] ss:$16 sps:$4 sm:$0xff]  }
  0xea   : > { %2445 = vmatprep.subr.bf16.mxu0 %v3346_v29  ;;  %2609 = vmatprep.subr.bf16.mxu1 %v3349_v30  ;;  %v3436_v29 = vld [vmem:[%s4272_s11 + $0x444] ss:$16 sps:$4 sm:$0xff]   ;;  %v3439_v30 = vld [vmem:[%s4272_s11 + $0x44c] ss:$16 sps:$4 sm:$0xff]  }
  0xed   : > { %2446 = vmatpush1.bf16.msra.mxu0 %v3344_v31  ;;  %2610 = vmatpush1.bf16.msra.mxu1 %v3347_v32  ;;  %v3434_v31 = vld [vmem:[%s4272_s11 + $0x440] ss:$16 sps:$4 sm:$0xff]   ;;  %v3437_v32 = vld [vmem:[%s4272_s11 + $0x448] ss:$16 sps:$4 sm:$0xff]  }
  0xee   : > { %2447 = vmatprep.subr.bf16.mxu0 %v3352_v33  ;;  %2611 = vmatprep.subr.bf16.mxu1 %v3355_v34  ;;  %v3442_v33 = vld [vmem:[%s4272_s11 + $0x464] ss:$16 sps:$4 sm:$0xff]   ;;  %v3445_v34 = vld [vmem:[%s4272_s11 + $0x46c] ss:$16 sps:$4 sm:$0xff]  }
  0xf1   : > { %2448 = vmatpush1.bf16.msra.mxu0 %v3350_v35  ;;  %2612 = vmatpush1.bf16.msra.mxu1 %v3353_v36  ;;  %v3440_v35 = vld [vmem:[%s4272_s11 + $0x460] ss:$16 sps:$4 sm:$0xff]   ;;  %v3443_v36 = vld [vmem:[%s4272_s11 + $0x468] ss:$16 sps:$4 sm:$0xff]  }
  0xf2   : > { %2449 = vmatprep.subr.bf16.mxu0 %v3358_v37  ;;  %2613 = vmatprep.subr.bf16.mxu1 %v3361_v38  ;;  %v3448_v37 = vld [vmem:[%s4272_s11 + $0x484] ss:$16 sps:$4 sm:$0xff]   ;;  %v3451_v38 = vld [vmem:[%s4272_s11 + $0x48c] ss:$16 sps:$4 sm:$0xff]  }
  0xf5   : > { %2450 = vmatpush1.bf16.msra.mxu0 %v3356_v39  ;;  %2614 = vmatpush1.bf16.msra.mxu1 %v3359_v40  ;;  %v3446_v39 = vld [vmem:[%s4272_s11 + $0x480] ss:$16 sps:$4 sm:$0xff]   ;;  %v3449_v40 = vld [vmem:[%s4272_s11 + $0x488] ss:$16 sps:$4 sm:$0xff]  }
  0xf6   : > { %2451 = vmatprep.subr.bf16.mxu0 %v3364_v41  ;;  %2615 = vmatprep.subr.bf16.mxu1 %v3367_v43  ;;  %v3454_v41 = vld [vmem:[%s4272_s11 + $0x4a4] ss:$16 sps:$4 sm:$0xff]   ;;  %v3457_v43 = vld [vmem:[%s4272_s11 + $0x4ac] ss:$16 sps:$4 sm:$0xff]  }
  0xf9   : > { %2452 = vmatpush1.bf16.msra.mxu0 %v3362_v44  ;;  %2616 = vmatpush1.bf16.msra.mxu1 %v3365_v45  ;;  %v3452_v44 = vld [vmem:[%s4272_s11 + $0x4a0] ss:$16 sps:$4 sm:$0xff]   ;;  %v3455_v45 = vld [vmem:[%s4272_s11 + $0x4a8] ss:$16 sps:$4 sm:$0xff]  }
  0xfa   : > { %2453 = vmatprep.subr.bf16.mxu0 %v3370_v46  ;;  %2617 = vmatprep.subr.bf16.mxu1 %v3373_v47  ;;  %v3460_v46 = vld [vmem:[%s4272_s11 + $0x4c4] ss:$16 sps:$4 sm:$0xff]   ;;  %v3463_v47 = vld [vmem:[%s4272_s11 + $0x4cc] ss:$16 sps:$4 sm:$0xff]  }
  0xfd   : > { %2454 = vmatpush1.bf16.msra.mxu0 %v3368_v48  ;;  %2618 = vmatpush1.bf16.msra.mxu1 %v3371_v49  ;;  %v3458_v48 = vld [vmem:[%s4272_s11 + $0x4c0] ss:$16 sps:$4 sm:$0xff]   ;;  %v3461_v49 = vld [vmem:[%s4272_s11 + $0x4c8] ss:$16 sps:$4 sm:$0xff]  }
  0xfe   : > { %2455 = vmatprep.subr.bf16.mxu0 %v3376_v50  ;;  %2619 = vmatprep.subr.bf16.mxu1 %v3379_v51  ;;  %v3466_v50 = vld [vmem:[%s4272_s11 + $0x4e4] ss:$16 sps:$4 sm:$0xff]   ;;  %v3469_v51 = vld [vmem:[%s4272_s11 + $0x4ec] ss:$16 sps:$4 sm:$0xff]  }
 0x101   : > { %2456 = vmatpush1.bf16.msra.mxu0 %v3374_v52  ;;  %2620 = vmatpush1.bf16.msra.mxu1 %v3377_v53  ;;  %v3464_v52 = vld [vmem:[%s4272_s11 + $0x4e0] ss:$16 sps:$4 sm:$0xff]   ;;  %v3467_v53 = vld [vmem:[%s4272_s11 + $0x4e8] ss:$16 sps:$4 sm:$0xff]  }
 0x102   : > { %2457 = vmatprep.subr.bf16.mxu0 %v3382_v54  ;;  %2621 = vmatprep.subr.bf16.mxu1 %v3385_v55  ;;  %v3472_v54 = vld [vmem:[%s4272_s11 + $0x504] ss:$16 sps:$4 sm:$0xff]   ;;  %v3475_v55 = vld [vmem:[%s4272_s11 + $0x50c] ss:$16 sps:$4 sm:$0xff]  }
 0x105   : > { %2458 = vmatpush1.bf16.msra.mxu0 %v3380_v56  ;;  %2622 = vmatpush1.bf16.msra.mxu1 %v3383_v57  ;;  %v3470_v56 = vld [vmem:[%s4272_s11 + $0x500] ss:$16 sps:$4 sm:$0xff]   ;;  %v3473_v57 = vld [vmem:[%s4272_s11 + $0x508] ss:$16 sps:$4 sm:$0xff]  }
 0x106   : > { %2459 = vmatprep.subr.bf16.mxu0 %v3388_v58  ;;  %2623 = vmatprep.subr.bf16.mxu1 %v3391_v59  ;;  %v3478_v58 = vld [vmem:[%s4272_s11 + $0x524] ss:$16 sps:$4 sm:$0xff]   ;;  %v3481_v59 = vld [vmem:[%s4272_s11 + $0x52c] ss:$16 sps:$4 sm:$0xff]  }
 0x109   : > { %2460 = vmatpush1.bf16.msra.mxu0 %v3386_v60  ;;  %2624 = vmatpush1.bf16.msra.mxu1 %v3389_v61  ;;  %v3476_v60 = vld [vmem:[%s4272_s11 + $0x520] ss:$16 sps:$4 sm:$0xff]   ;;  %v3479_v61 = vld [vmem:[%s4272_s11 + $0x528] ss:$16 sps:$4 sm:$0xff]  }
 0x10a   : > { %2461 = vmatprep.subr.bf16.mxu0 %v3394_v62  ;;  %2625 = vmatprep.subr.bf16.mxu1 %v3397_v63  ;;  %v3484_v62 = vld [vmem:[%s4272_s11 + $0x544] ss:$16 sps:$4 sm:$0xff]   ;;  %v3487_v63 = vld [vmem:[%s4272_s11 + $0x54c] ss:$16 sps:$4 sm:$0xff]  }
 0x10d   : > { %2462 = vmatpush1.bf16.msra.mxu0 %v3392_v0  ;;  %2626 = vmatpush1.bf16.msra.mxu1 %v3395_v1  ;;  %v3482_v0 = vld [vmem:[%s4272_s11 + $0x540] ss:$16 sps:$4 sm:$0xff]   ;;  %v3485_v1 = vld [vmem:[%s4272_s11 + $0x548] ss:$16 sps:$4 sm:$0xff]  }
 0x10e   : > { %2463 = vmatprep.subr.bf16.mxu0 %v3400_v2  ;;  %2627 = vmatprep.subr.bf16.mxu1 %v3403_v3  ;;  %v3490_v2 = vld [vmem:[%s4272_s11 + $0x564] ss:$16 sps:$4 sm:$0xff]   ;;  %v3493_v3 = vld [vmem:[%s4272_s11 + $0x56c] ss:$16 sps:$4 sm:$0xff]  }
 0x111   : > { %2464 = vmatpush1.bf16.msra.mxu0 %v3398_v4  ;;  %2628 = vmatpush1.bf16.msra.mxu1 %v3401_v5  ;;  %v3488_v4 = vld [vmem:[%s4272_s11 + $0x560] ss:$16 sps:$4 sm:$0xff]   ;;  %v3491_v5 = vld [vmem:[%s4272_s11 + $0x568] ss:$16 sps:$4 sm:$0xff]  }
 0x112   : > { %2465 = vmatprep.subr.bf16.mxu0 %v3406_v6  ;;  %2629 = vmatprep.subr.bf16.mxu1 %v3409_v7  ;;  %v3496_v6 = vld [vmem:[%s4272_s11 + $0x584] ss:$16 sps:$4 sm:$0xff]   ;;  %v3499_v7 = vld [vmem:[%s4272_s11 + $0x58c] ss:$16 sps:$4 sm:$0xff]  }
 0x115   : > { %2466 = vmatpush1.bf16.msra.mxu0 %v3404_v8  ;;  %2630 = vmatpush1.bf16.msra.mxu1 %v3407_v9  ;;  %v3494_v8 = vld [vmem:[%s4272_s11 + $0x580] ss:$16 sps:$4 sm:$0xff]   ;;  %v3497_v9 = vld [vmem:[%s4272_s11 + $0x588] ss:$16 sps:$4 sm:$0xff]  }
 0x116   : > { %2467 = vmatprep.subr.bf16.mxu0 %v3412_v10  ;;  %2631 = vmatprep.subr.bf16.mxu1 %v3415_v11  ;;  %v3502_v10 = vld [vmem:[%s4272_s11 + $0x5a4] ss:$16 sps:$4 sm:$0xff]   ;;  %v3505_v11 = vld [vmem:[%s4272_s11 + $0x5ac] ss:$16 sps:$4 sm:$0xff]  }
 0x119   : > { %2468 = vmatpush1.bf16.msra.mxu0 %v3410_v12  ;;  %2632 = vmatpush1.bf16.msra.mxu1 %v3413_v13  ;;  %v3500_v12 = vld [vmem:[%s4272_s11 + $0x5a0] ss:$16 sps:$4 sm:$0xff]   ;;  %v3503_v13 = vld [vmem:[%s4272_s11 + $0x5a8] ss:$16 sps:$4 sm:$0xff]  }
 0x11a   : > { %2469 = vmatprep.subr.bf16.mxu0 %v3418_v14  ;;  %2633 = vmatprep.subr.bf16.mxu1 %v3421_v16  ;;  %v3508_v14 = vld [vmem:[%s4272_s11 + $0x5c4] ss:$16 sps:$4 sm:$0xff]   ;;  %v3511_v16 = vld [vmem:[%s4272_s11 + $0x5cc] ss:$16 sps:$4 sm:$0xff]  }
 0x11d   : > { %2470 = vmatpush1.bf16.msra.mxu0 %v3416_v17  ;;  %2634 = vmatpush1.bf16.msra.mxu1 %v3419_v18  ;;  %v3506_v17 = vld [vmem:[%s4272_s11 + $0x5c0] ss:$16 sps:$4 sm:$0xff]   ;;  %v3509_v18 = vld [vmem:[%s4272_s11 + $0x5c8] ss:$16 sps:$4 sm:$0xff]  }
 0x11e   : > { %2480 = vmatprep.subr.bf16.mxu0 %v3424_v19  ;;  %2644 = vmatprep.subr.bf16.mxu1 %v3427_v22  ;;  %v3514_v19 = vld [vmem:[%s4272_s11 + $0x5e4] ss:$16 sps:$4 sm:$0xff]   ;;  %v3517_v22 = vld [vmem:[%s4272_s11 + $0x5ec] ss:$16 sps:$4 sm:$0xff]  }
 0x120   : > { %2472 = vmatmul.mubr.bf16.vlgmr.msra.gmra.mrb[0].mxu0 %v1106_v24  ;;  %2636 = vmatmul.mubr.bf16.vlgmr.msra.gmra.mrb[0].mxu1 %v1106_v24  ;;  %v3515_v24 = vld [vmem:[%s4272_s11 + $0x5e8] ss:$16 sps:$4 sm:$0xff]  }
 0x121   : > { %2481 = vmatpush1.bf16.msra.mxu0 %v3422_v23  ;;  %2645 = vmatpush1.bf16.msra.mxu1 %v3425_v25  ;;  %v3512_v23 = vld [vmem:[%s4272_s11 + $0x5e0] ss:$16 sps:$4 sm:$0xff]   ;;  %v3521_v25 = vld [vmem:[%s4272_s11 + $0x604] ss:$16 sps:$4 sm:$0xff]  }
 0x122   : > { %2482 = vmatprep.subr.bf16.mxu0 %v3430_v26  ;;  %2646 = vmatprep.subr.bf16.mxu1 %v3433_v27  ;;  %v3524_v26 = vld [vmem:[%s4272_s11 + $0x60c] ss:$16 sps:$4 sm:$0xff]   ;;  %v3519_v27 = vld [vmem:[%s4272_s11 + $0x600] ss:$16 sps:$4 sm:$0xff]  }
 0x123   : > { %2512 = vmatprep.mubr.bf16.mxu0 %v4360_v20  ;;  %2676 = vmatprep.mubr.bf16.mxu1 %v4360_v20 }
 0x125   : > { %2483 = vmatpush1.bf16.msra.mxu0 %v3428_v28  ;;  %2647 = vmatpush1.bf16.msra.mxu1 %v3431_v15  ;;  %v3522_v28 = vld [vmem:[%s4272_s11 + $0x608] ss:$16 sps:$4 sm:$0xff]   ;;  %v3527_v15 = vld [vmem:[%s4272_s11 + $0x624] ss:$16 sps:$4 sm:$0xff]  }
 0x126   : > { %2484 = vmatprep.subr.bf16.mxu0 %v3436_v29  ;;  %2648 = vmatprep.subr.bf16.mxu1 %v3439_v30  ;;  %v3530_v29 = vld [vmem:[%s4272_s11 + $0x62c] ss:$16 sps:$4 sm:$0xff]   ;;  %v1109_v30 = vcombine.high %v4360_v20, %v4360_v20  ;;  %v3531_v20 = vld [vmem:[%s4272_s11 + $0x640] ss:$16 sps:$4 sm:$0xff]  }
 0x129   : > { %2485 = vmatpush1.bf16.msra.mxu0 %v3434_v31  ;;  %2649 = vmatpush1.bf16.msra.mxu1 %v3437_v32  ;;  %v3525_v31 = vld [vmem:[%s4272_s11 + $0x620] ss:$16 sps:$4 sm:$0xff]   ;;  %v3528_v32 = vld [vmem:[%s4272_s11 + $0x628] ss:$16 sps:$4 sm:$0xff]  }
 0x12a   : > { %2486 = vmatprep.subr.bf16.mxu0 %v3442_v33  ;;  %2650 = vmatprep.subr.bf16.mxu1 %v3445_v34  ;;  %v3533_v33 = vld [vmem:[%s4272_s11 + $0x644] ss:$16 sps:$4 sm:$0xff]   ;;  %v3536_v34 = vld [vmem:[%s4272_s11 + $0x64c] ss:$16 sps:$4 sm:$0xff]  }
 0x12d   : > { %2487 = vmatpush1.bf16.msra.mxu0 %v3440_v35  ;;  %2651 = vmatpush1.bf16.msra.mxu1 %v3443_v36  ;;  %v3534_v35 = vld [vmem:[%s4272_s11 + $0x648] ss:$16 sps:$4 sm:$0xff]   ;;  %v3539_v36 = vld [vmem:[%s4272_s11 + $0x664] ss:$16 sps:$4 sm:$0xff]  }
 0x12e   : > { %2488 = vmatprep.subr.bf16.mxu0 %v3448_v37  ;;  %2652 = vmatprep.subr.bf16.mxu1 %v3451_v38  ;;  %v3542_v37 = vld [vmem:[%s4272_s11 + $0x66c] ss:$16 sps:$4 sm:$0xff]   ;;  %v3537_v38 = vld [vmem:[%s4272_s11 + $0x660] ss:$16 sps:$4 sm:$0xff]  }
 0x131   : > { %2489 = vmatpush1.bf16.msra.mxu0 %v3446_v39  ;;  %2653 = vmatpush1.bf16.msra.mxu1 %v3449_v40  ;;  %v3540_v39 = vld [vmem:[%s4272_s11 + $0x668] ss:$16 sps:$4 sm:$0xff]   ;;  %v3545_v40 = vld [vmem:[%s4272_s11 + $0x684] ss:$16 sps:$4 sm:$0xff]  }
 0x132   : > { %2490 = vmatprep.subr.bf16.mxu0 %v3454_v41  ;;  %2654 = vmatprep.subr.bf16.mxu1 %v3457_v43  ;;  %v3548_v41 = vld [vmem:[%s4272_s11 + $0x68c] ss:$16 sps:$4 sm:$0xff]   ;;  %v3543_v43 = vld [vmem:[%s4272_s11 + $0x680] ss:$16 sps:$4 sm:$0xff]  }
 0x135   : > { %2491 = vmatpush1.bf16.msra.mxu0 %v3452_v44  ;;  %2655 = vmatpush1.bf16.msra.mxu1 %v3455_v45  ;;  %v3546_v44 = vld [vmem:[%s4272_s11 + $0x688] ss:$16 sps:$4 sm:$0xff]   ;;  %v3551_v45 = vld [vmem:[%s4272_s11 + $0x6a4] ss:$16 sps:$4 sm:$0xff]  }
 0x136   : > { %2492 = vmatprep.subr.bf16.mxu0 %v3460_v46  ;;  %2656 = vmatprep.subr.bf16.mxu1 %v3463_v47  ;;  %v3554_v46 = vld [vmem:[%s4272_s11 + $0x6ac] ss:$16 sps:$4 sm:$0xff]   ;;  %v3549_v47 = vld [vmem:[%s4272_s11 + $0x6a0] ss:$16 sps:$4 sm:$0xff]  }
 0x139   : > { %2493 = vmatpush1.bf16.msra.mxu0 %v3458_v48  ;;  %2657 = vmatpush1.bf16.msra.mxu1 %v3461_v49  ;;  %v3552_v48 = vld [vmem:[%s4272_s11 + $0x6a8] ss:$16 sps:$4 sm:$0xff]   ;;  %v3557_v49 = vld [vmem:[%s4272_s11 + $0x6c4] ss:$16 sps:$4 sm:$0xff]  }
 0x13a   : > { %2494 = vmatprep.subr.bf16.mxu0 %v3466_v50  ;;  %2658 = vmatprep.subr.bf16.mxu1 %v3469_v51  ;;  %v3560_v50 = vld [vmem:[%s4272_s11 + $0x6cc] ss:$16 sps:$4 sm:$0xff]   ;;  %v3555_v51 = vld [vmem:[%s4272_s11 + $0x6c0] ss:$16 sps:$4 sm:$0xff]  }
 0x13d   : > { %2495 = vmatpush1.bf16.msra.mxu0 %v3464_v52  ;;  %2659 = vmatpush1.bf16.msra.mxu1 %v3467_v53  ;;  %v3558_v52 = vld [vmem:[%s4272_s11 + $0x6c8] ss:$16 sps:$4 sm:$0xff]   ;;  %v3563_v53 = vld [vmem:[%s4272_s11 + $0x6e4] ss:$16 sps:$4 sm:$0xff]  }
 0x13e   : > { %2496 = vmatprep.subr.bf16.mxu0 %v3472_v54  ;;  %2660 = vmatprep.subr.bf16.mxu1 %v3475_v55  ;;  %v3566_v54 = vld [vmem:[%s4272_s11 + $0x6ec] ss:$16 sps:$4 sm:$0xff]   ;;  %v3561_v55 = vld [vmem:[%s4272_s11 + $0x6e0] ss:$16 sps:$4 sm:$0xff]  }
 0x141   : > { %2497 = vmatpush1.bf16.msra.mxu0 %v3470_v56  ;;  %2661 = vmatpush1.bf16.msra.mxu1 %v3473_v57  ;;  %v3564_v56 = vld [vmem:[%s4272_s11 + $0x6e8] ss:$16 sps:$4 sm:$0xff]   ;;  %v3569_v57 = vld [vmem:[%s4272_s11 + $0x704] ss:$16 sps:$4 sm:$0xff]  }
 0x142   : > { %2498 = vmatprep.subr.bf16.mxu0 %v3478_v58  ;;  %2662 = vmatprep.subr.bf16.mxu1 %v3481_v59  ;;  %v3572_v58 = vld [vmem:[%s4272_s11 + $0x70c] ss:$16 sps:$4 sm:$0xff]   ;;  %v3567_v59 = vld [vmem:[%s4272_s11 + $0x700] ss:$16 sps:$4 sm:$0xff]  }
 0x145   : > { %2499 = vmatpush1.bf16.msra.mxu0 %v3476_v60  ;;  %2663 = vmatpush1.bf16.msra.mxu1 %v3479_v61  ;;  %v3570_v60 = vld [vmem:[%s4272_s11 + $0x708] ss:$16 sps:$4 sm:$0xff]   ;;  %v3575_v61 = vld [vmem:[%s4272_s11 + $0x724] ss:$16 sps:$4 sm:$0xff]  }
 0x146   : > { %2500 = vmatprep.subr.bf16.mxu0 %v3484_v62  ;;  %2664 = vmatprep.subr.bf16.mxu1 %v3487_v63  ;;  %v3578_v62 = vld [vmem:[%s4272_s11 + $0x72c] ss:$16 sps:$4 sm:$0xff]   ;;  %v3573_v63 = vld [vmem:[%s4272_s11 + $0x720] ss:$16 sps:$4 sm:$0xff]  }
 0x149   : > { %2501 = vmatpush1.bf16.msra.mxu0 %v3482_v0  ;;  %2665 = vmatpush1.bf16.msra.mxu1 %v3485_v1  ;;  %v3576_v0 = vld [vmem:[%s4272_s11 + $0x728] ss:$16 sps:$4 sm:$0xff]   ;;  %v3581_v1 = vld [vmem:[%s4272_s11 + $0x744] ss:$16 sps:$4 sm:$0xff]  }
 0x14a   : > { %2502 = vmatprep.subr.bf16.mxu0 %v3490_v2  ;;  %2666 = vmatprep.subr.bf16.mxu1 %v3493_v3  ;;  %v3584_v2 = vld [vmem:[%s4272_s11 + $0x74c] ss:$16 sps:$4 sm:$0xff]   ;;  %v3579_v3 = vld [vmem:[%s4272_s11 + $0x740] ss:$16 sps:$4 sm:$0xff]  }
 0x14d   : > { %2503 = vmatpush1.bf16.msra.mxu0 %v3488_v4  ;;  %2667 = vmatpush1.bf16.msra.mxu1 %v3491_v5  ;;  %v3582_v4 = vld [vmem:[%s4272_s11 + $0x748] ss:$16 sps:$4 sm:$0xff]   ;;  %v3587_v5 = vld [vmem:[%s4272_s11 + $0x764] ss:$16 sps:$4 sm:$0xff]  }
 0x14e   : > { %2504 = vmatprep.subr.bf16.mxu0 %v3496_v6  ;;  %2668 = vmatprep.subr.bf16.mxu1 %v3499_v7  ;;  %v3590_v6 = vld [vmem:[%s4272_s11 + $0x76c] ss:$16 sps:$4 sm:$0xff]   ;;  %v3585_v7 = vld [vmem:[%s4272_s11 + $0x760] ss:$16 sps:$4 sm:$0xff]  }
 0x151   : > { %2505 = vmatpush1.bf16.msra.mxu0 %v3494_v8  ;;  %2669 = vmatpush1.bf16.msra.mxu1 %v3497_v9  ;;  %v3588_v8 = vld [vmem:[%s4272_s11 + $0x768] ss:$16 sps:$4 sm:$0xff]   ;;  %v3593_v9 = vld [vmem:[%s4272_s11 + $0x784] ss:$16 sps:$4 sm:$0xff]  }
 0x152   : > { %2506 = vmatprep.subr.bf16.mxu0 %v3502_v10  ;;  %2670 = vmatprep.subr.bf16.mxu1 %v3505_v11  ;;  %v3596_v10 = vld [vmem:[%s4272_s11 + $0x78c] ss:$16 sps:$4 sm:$0xff]   ;;  %v3591_v11 = vld [vmem:[%s4272_s11 + $0x780] ss:$16 sps:$4 sm:$0xff]  }
 0x155   : > { %2507 = vmatpush1.bf16.msra.mxu0 %v3500_v12  ;;  %2671 = vmatpush1.bf16.msra.mxu1 %v3503_v13  ;;  %v3594_v12 = vld [vmem:[%s4272_s11 + $0x788] ss:$16 sps:$4 sm:$0xff]   ;;  %v3599_v13 = vld [vmem:[%s4272_s11 + $0x7a4] ss:$16 sps:$4 sm:$0xff]  }
 0x156   : > { %2508 = vmatprep.subr.bf16.mxu0 %v3508_v14  ;;  %2672 = vmatprep.subr.bf16.mxu1 %v3511_v16  ;;  %v3602_v14 = vld [vmem:[%s4272_s11 + $0x7ac] ss:$16 sps:$4 sm:$0xff]   ;;  %v3597_v16 = vld [vmem:[%s4272_s11 + $0x7a0] ss:$16 sps:$4 sm:$0xff]  }
 0x159   : > { %2509 = vmatpush1.bf16.msra.mxu0 %v3506_v17  ;;  %2673 = vmatpush1.bf16.msra.mxu1 %v3509_v18  ;;  %v3600_v17 = vld [vmem:[%s4272_s11 + $0x7a8] ss:$16 sps:$4 sm:$0xff]   ;;  %v3605_v18 = vld [vmem:[%s4272_s11 + $0x7c4] ss:$16 sps:$4 sm:$0xff]  }
 0x15a   : > { %2510 = vmatprep.subr.bf16.mxu0 %v3514_v19  ;;  %2674 = vmatprep.subr.bf16.mxu1 %v3517_v22  ;;  %v3608_v19 = vld [vmem:[%s4272_s11 + $0x7cc] ss:$16 sps:$4 sm:$0xff]   ;;  %v3603_v22 = vld [vmem:[%s4272_s11 + $0x7c0] ss:$16 sps:$4 sm:$0xff]  }
 0x15d   : > { %2511 = vmatpush1.bf16.msra.mxu0 %v3512_v23  ;;  %2675 = vmatpush1.bf16.msra.mxu1 %v3515_v24  ;;  %v3606_v23 = vld [vmem:[%s4272_s11 + $0x7c8] ss:$16 sps:$4 sm:$0xff]   ;;  %v3611_v24 = vld [vmem:[%s4272_s11 + $0x7e4] ss:$16 sps:$4 sm:$0xff]  }
 0x15e   : > { %2521 = vmatprep.subr.bf16.mxu0 %v3521_v25  ;;  %2685 = vmatprep.subr.bf16.mxu1 %v3524_v26  ;;  %v3614_v25 = vld [vmem:[%s4272_s11 + $0x7ec] ss:$16 sps:$4 sm:$0xff]   ;;  %v3609_v26 = vld [vmem:[%s4272_s11 + $0x7e0] ss:$16 sps:$4 sm:$0xff]  }
 0x160   : > { %2513 = vmatmul.mubr.bf16.vlgmr.msra.gmra.mrb[0].mxu0 %v4363_v21  ;;  %2677 = vmatmul.mubr.bf16.vlgmr.msra.gmra.mrb[0].mxu1 %v4363_v21 }
 0x161   : > { %2522 = vmatpush1.bf16.msra.mxu0 %v3519_v27  ;;  %2686 = vmatpush1.bf16.msra.mxu1 %v3522_v28  ;;  %v3612_v27 = vld [vmem:[%s4272_s11 + $0x7e8] ss:$16 sps:$4 sm:$0xff]   ;;  %v1107_v28 = vcombine.high %v4363_v21, %v4363_v21  ;;  %v1050_v21 = vsub.s32 2, %v4314_v42 }
 0x162   : > { %2523 = vmatprep.subr.bf16.mxu0 %v3527_v15  ;;  %2687 = vmatprep.subr.bf16.mxu1 %v3530_v29  ;;  %v1042_v15 = vsub.s32 0, %v4314_v42  ;;  %v1038_v29 = vld [vmem:[%s769_s30] sm:$0xf] }
 0x163   : > { %2553 = vmatprep.mubr.bf16.mxu0 %v1109_v30  ;;  %2717 = vmatprep.mubr.bf16.mxu1 %v1109_v30  ;;  %v1046_v30 = vsub.s32 1, %v4314_v42 }
 0x165   : > { %2524 = vmatpush1.bf16.msra.mxu0 %v3525_v31  ;;  %2688 = vmatpush1.bf16.msra.mxu1 %v3528_v32  ;;  %v1054_v31 = vsub.s32 3, %v4314_v42  ;;  %v3672_v32 = vmov 1983009808  }
 0x166   : > { %2525 = vmatprep.subr.bf16.mxu0 %v3533_v33  ;;  %2689 = vmatprep.subr.bf16.mxu1 %v3536_v34  ;;  %v2737_v33 = vunpack.c.l.s4 %v3672_v32  ;;  %v1043_v34 = vrot.slane %v1038_v29, %v1042_v15 }
 0x169   : > { %2526 = vmatpush1.bf16.msra.mxu0 %v3531_v20  ;;  %2690 = vmatpush1.bf16.msra.mxu1 %v3534_v35  ;;  %v1051_v20 = vrot.slane %v1038_v29, %v1050_v21  ;;  %v1047_v35 = vrot.slane %v1038_v29, %v1046_v30 }
 0x16a   : > { %2527 = vmatprep.subr.bf16.mxu0 %v3539_v36  ;;  %2691 = vmatprep.subr.bf16.mxu1 %v3542_v37  ;;  %v1055_v36 = vrot.slane %v1038_v29, %v1054_v31 }
 0x16d   : > { %2528 = vmatpush1.bf16.msra.mxu0 %v3537_v38  ;;  %2692 = vmatpush1.bf16.msra.mxu1 %v3540_v39  ;;  %v2738_v39 = vunpack.c.0.s8 %v2737_v33 }
 0x16e   : > { %2529 = vmatprep.subr.bf16.mxu0 %v3545_v40  ;;  %2693 = vmatprep.subr.bf16.mxu1 %v3548_v41 }
 0x171   : > { %2530 = vmatpush1.bf16.msra.mxu0 %v3543_v43  ;;  %2694 = vmatpush1.bf16.msra.mxu1 %v3546_v44 }
 0x172   : > { %2531 = vmatprep.subr.bf16.mxu0 %v3551_v45  ;;  %2695 = vmatprep.subr.bf16.mxu1 %v3554_v46 }
 0x175   : > { %2532 = vmatpush1.bf16.msra.mxu0 %v3549_v47  ;;  %2696 = vmatpush1.bf16.msra.mxu1 %v3552_v48 }
 0x176   : > { %2533 = vmatprep.subr.bf16.mxu0 %v3557_v49  ;;  %2697 = vmatprep.subr.bf16.mxu1 %v3560_v50 }
 0x179   : > { %2534 = vmatpush1.bf16.msra.mxu0 %v3555_v51  ;;  %2698 = vmatpush1.bf16.msra.mxu1 %v3558_v52 }
 0x17a   : > { %2535 = vmatprep.subr.bf16.mxu0 %v3563_v53  ;;  %2699 = vmatprep.subr.bf16.mxu1 %v3566_v54  ;;  %v2741_v54 = vsub.s32 %v2738_v39, %v4314_v42 }
 0x17d   : > { %2536 = vmatpush1.bf16.msra.mxu0 %v3561_v55  ;;  %2700 = vmatpush1.bf16.msra.mxu1 %v3564_v56 }
 0x17e   : > { %2537 = vmatprep.subr.bf16.mxu0 %v3569_v57  ;;  %2701 = vmatprep.subr.bf16.mxu1 %v3572_v58 }
 0x181   : > { %2538 = vmatpush1.bf16.msra.mxu0 %v3567_v59  ;;  %2702 = vmatpush1.bf16.msra.mxu1 %v3570_v60 }
 0x182   : > { %2539 = vmatprep.subr.bf16.mxu0 %v3575_v61  ;;  %2703 = vmatprep.subr.bf16.mxu1 %v3578_v62 }
 0x185   : > { %2540 = vmatpush1.bf16.msra.mxu0 %v3573_v63  ;;  %2704 = vmatpush1.bf16.msra.mxu1 %v3576_v0 }
 0x186   : > { %2541 = vmatprep.subr.bf16.mxu0 %v3581_v1  ;;  %2705 = vmatprep.subr.bf16.mxu1 %v3584_v2 }
 0x189   : > { %2542 = vmatpush1.bf16.msra.mxu0 %v3579_v3  ;;  %2706 = vmatpush1.bf16.msra.mxu1 %v3582_v4 }
 0x18a   : > { %2543 = vmatprep.subr.bf16.mxu0 %v3587_v5  ;;  %2707 = vmatprep.subr.bf16.mxu1 %v3590_v6 }
 0x18d   : > { %2544 = vmatpush1.bf16.msra.mxu0 %v3585_v7  ;;  %2708 = vmatpush1.bf16.msra.mxu1 %v3588_v8 }
 0x18e   : > { %2545 = vmatprep.subr.bf16.mxu0 %v3593_v9  ;;  %2709 = vmatprep.subr.bf16.mxu1 %v3596_v10 }
 0x191   : > { %2546 = vmatpush1.bf16.msra.mxu0 %v3591_v11  ;;  %2710 = vmatpush1.bf16.msra.mxu1 %v3594_v12 }
 0x192   : > { %2547 = vmatprep.subr.bf16.mxu0 %v3599_v13  ;;  %2711 = vmatprep.subr.bf16.mxu1 %v3602_v14 }
 0x195   : > { %2548 = vmatpush1.bf16.msra.mxu0 %v3597_v16  ;;  %2712 = vmatpush1.bf16.msra.mxu1 %v3600_v17 }
 0x196   : > { %2549 = vmatprep.subr.bf16.mxu0 %v3605_v18  ;;  %2713 = vmatprep.subr.bf16.mxu1 %v3608_v19 }
 0x199   : > { %2550 = vmatpush1.bf16.msra.mxu0 %v3603_v22  ;;  %2714 = vmatpush1.bf16.msra.mxu1 %v3606_v23 }
 0x19a   : > { %2551 = vmatprep.subr.bf16.mxu0 %v3611_v24  ;;  %2715 = vmatprep.subr.bf16.mxu1 %v3614_v25 }
 0x19d   : > { %2552 = vmatpush1.bf16.msra.mxu0 %v3609_v26  ;;  %2716 = vmatpush1.bf16.msra.mxu1 %v3612_v27 }
 0x1a0   : > { %2554 = vmatmul.mubr.bf16.vlgmr.msra.gmra.mrb[0].mxu0 %v1107_v28  ;;  %2718 = vmatmul.mubr.bf16.vlgmr.msra.gmra.mrb[0].mxu1 %v1107_v28 }
 0x273   : > { %v2555_v37 = vpop.f32.mrb[0].mxu0  ;;  %v2719_v38 = vpop.f32.mrb[0].mxu1 }
 0x274   : > { %v3144_v40 = vadd.f32 %v2555_v37, %v1043_v34  ;;  %v3146_v41 = vadd.f32 %v2719_v38, %v1051_v20  ;;  %v2557_v43 = vpop.f32.mrb[1].mxu0  ;;  %v2721_v44 = vpop.f32.mrb[1].mxu1 }
 0x275   : > { %v3145_v45 = vadd.f32 %v2557_v43, %v1047_v35  ;;  %v3147_v46 = vadd.f32 %v2721_v44, %v1055_v36  ;;  %v2559_v47 = vpop.f32.mrb[2].mxu0  ;;  %v2723_v48 = vpop.f32.mrb[2].mxu1 }
 0x276   : > { %v2726_v49 = vmax.f32 %v3144_v40, 0.0  ;;  %v2728_v50 = vmax.f32 %v3146_v41, 0.0  ;;  %v2560_v51 = vpop.f32.mrb[3].mxu0  ;;  %v2724_v52 = vpop.f32.mrb[3].mxu1 }
 0x277   : > { %v2727_v53 = vmax.f32 %v3145_v45, 0.0  ;;  %v2729_v55 = vmax.f32 %v3147_v46, 0.0 }
 0x279   : > { %v2734_v56 = vcombine.low %v2726_v49, %v2727_v53  ;;  %v2735_v57 = vcombine.low %v2728_v50, %v2729_v55 }
 0x27b   : > { %v2742_v58 = vrot.slane %v2734_v56, %v2741_v54  ;;  %v2749_v59 = vrot.slane %v2735_v57, %v2741_v54 }
 0x27d   : > { %v2750_v60 = vcombine.low %v2742_v58, %v2749_v59 }
 0x27f   : > { %2752 = vst [vmem:[%s779_s5] sm:$0xff] %v2750_v60 }
 0x280 PF: > { %s13_s18 = sadd.s32 1, %s3669_s18   ;;  %s4606_s12 = smov %s3649_s13 }
 0x281   : > { %p10_p13 = scmp.ge.s32.totalorder %s13_s18, 6   ;;  %s4607_s13 = smov %s3744_s25 }
 0x282   : > { %s4608_s14 = smov %s3661_s16  ;;  %s4609_s15 = smov %s3665_s17 }
 0x283   : > { %s4610_s16 = smov %s4613_s19  ;;  %s4611_s17 = smov %s4617_s20 }
 0x284   :  { %12 = sbr.rel (!%p10_p13) target bundleno = 4 (0x4), region = 96 }

// kernel: atari_net_forward.8
= control target key start
LH: loop header
LB: loop body
LE: loop exit
PB: predicated region body
PF: predicated region fallthrough
CT: control target
= control target key end

     0   :  { %s10026_s12 = smov 0   ;;  %s10028_s13 = smov 0   ;;  %s12599_s0 = inlined_call_operand.vmem [shape: bf16[2,3136], index: 0, kind: input, shape index: {}]   ;;  %s12600_s1 = inlined_call_operand.vmem [shape: bf16[3136,2048], index: 1, kind: input, shape index: {}]   ;;  %s12601_s2 = inlined_call_operand.vmem [shape: f32[1,2048], index: 2, kind: input, shape index: {}]   ;;  %s12602_s3 = inlined_call_operand.vmem [shape: bf16[2,2048], index: 3, kind: output, shape index: {}]  }
   0x1   :  { %s10030_s14 = smov 0  }
   0x2 LB: > { %s7869_s15 = sadd.s32 4294967295, %s10002_s14   ;;  %s10043_s16 = sadd.s32 1, %s10002_s14   ;;  %s10002_s14 = sphi %s10030_s14, %s12605_s14   ;;  %s9998_s13 = sphi %s10028_s13, %s12604_s13   ;;  %s9994_s12 = sphi %s10026_s12, %s12603_s12  }
   0x3   : > { %s38_s17 = ssub.s32 %s10002_s14, %s10043_s16  ;;  %s41_s18 = sadd.s32 1, %s9998_s13 }
   0x4   : > { %p39_p0 = scmp.eq.s32.totalorder %s38_s17, 0  ;;  %p48_p1 = scmp.ne.s32.totalorder %s9998_s13, %s9994_s12 }
   0x5   : > { %p49_p2 = scmp.eq.s32.totalorder %s10002_s14, 0  ;;  %p7872_p4 = scmp.ge.s32.totalorder %s10002_s14, 4 }
   0x6   : > { %s10052_s19 = scalar_select %p39_p0, %s9998_s13, %s41_s18  }
   0x7   : > { %p50_p3 = por %p49_p2, %p48_p1  ;;  %129 = sbr.rel (%p7872_p4) target bundleno = 410 (0x19a), region = 20 }
   0xe   : > { %132 = sbr.rel (!%p50_p3) target bundleno = 410 (0x19a), region = 24  ;;  %s134_s20 = sand.u32 (%p50_p3), 1, %s9998_s13  }
   0xf   : > { %s8670_s21 = sshll.u32 (%p50_p3), %s10002_s14, 4  ;;  %s8771_s22 = smul.u32 (%p50_p3), 6272, %s134_s20 }
  0x10   : > { %s10060_s25 = scalar_lea.vmem (%p50_p3), %s12600_s1, %s8670_s21 }
  0x11   : > { %v152_v0 = vld [vmem:[%s10060_s25] sm:$0xff] (%p50_p3)  ;;  %v154_v1 = vld [vmem:[%s10060_s25 + $0x8] sm:$0xff] (%p50_p3)  ;;  %s10068_s26 = scalar_lea.vmem (%p50_p3), [#allocation2], %s8771_s22 }
  0x12   : > { %v156_v2 = vld [vmem:[%s10060_s25 + $0x40] sm:$0xff] (%p50_p3)  ;;  %v158_v3 = vld [vmem:[%s10060_s25 + $0x48] sm:$0xff] (%p50_p3)  ;;  %153 = vst [vmem:[%s10068_s26] sm:$0xff] (%p50_p3), %v152_v0  ;;  %155 = vst [vmem:[%s10068_s26 + $0x8] sm:$0xff] (%p50_p3), %v154_v1 }
  0x13   : > { %v160_v4 = vld [vmem:[%s10060_s25 + $0x80] sm:$0xff] (%p50_p3)  ;;  %v162_v5 = vld [vmem:[%s10060_s25 + $0x88] sm:$0xff] (%p50_p3)  ;;  %157 = vst [vmem:[%s10068_s26 + $0x10] sm:$0xff] (%p50_p3), %v156_v2  ;;  %159 = vst [vmem:[%s10068_s26 + $0x18] sm:$0xff] (%p50_p3), %v158_v3 }
  0x14   : > { %161 = vst [vmem:[%s10068_s26 + $0x20] sm:$0xff] (%p50_p3), %v160_v4  ;;  %163 = vst [vmem:[%s10068_s26 + $0x28] sm:$0xff] (%p50_p3), %v162_v5  ;;  %v164_v6 = vld [vmem:[%s10060_s25 + $0xc0] sm:$0xff] (%p50_p3)  ;;  %v166_v7 = vld [vmem:[%s10060_s25 + $0xc8] sm:$0xff] (%p50_p3) }
  0x15   : > { %v168_v8 = vld [vmem:[%s10060_s25 + $0x100] sm:$0xff]  ;;  %165 = vst [vmem:[%s10068_s26 + $0x30] sm:$0xff] %v164_v6  ;;  %167 = vst [vmem:[%s10068_s26 + $0x38] sm:$0xff] %v166_v7  ;;  %v170_v9 = vld [vmem:[%s10060_s25 + $0x108] sm:$0xff] }
  0x16   : > { %169 = vst [vmem:[%s10068_s26 + $0x40] sm:$0xff] %v168_v8  ;;  %v172_v10 = vld [vmem:[%s10060_s25 + $0x140] sm:$0xff]  ;;  %v174_v11 = vld [vmem:[%s10060_s25 + $0x148] sm:$0xff]  ;;  %171 = vst [vmem:[%s10068_s26 + $0x48] sm:$0xff] %v170_v9 }
  0x17   : > { %173 = vst [vmem:[%s10068_s26 + $0x50] sm:$0xff] %v172_v10  ;;  %175 = vst [vmem:[%s10068_s26 + $0x58] sm:$0xff] %v174_v11  ;;  %v176_v12 = vld [vmem:[%s10060_s25 + $0x180] sm:$0xff]  ;;  %v178_v13 = vld [vmem:[%s10060_s25 + $0x188] sm:$0xff] }
  0x18   : > { %v180_v14 = vld [vmem:[%s10060_s25 + $0x1c0] sm:$0xff]  ;;  %177 = vst [vmem:[%s10068_s26 + $0x60] sm:$0xff] %v176_v12  ;;  %179 = vst [vmem:[%s10068_s26 + $0x68] sm:$0xff] %v178_v13  ;;  %v182_v15 = vld [vmem:[%s10060_s25 + $0x1c8] sm:$0xff] }
  0x19   : > { %181 = vst [vmem:[%s10068_s26 + $0x70] sm:$0xff] %v180_v14  ;;  %v184_v16 = vld [vmem:[%s10060_s25 + $0x200] sm:$0xff]  ;;  %v186_v17 = vld [vmem:[%s10060_s25 + $0x208] sm:$0xff]  ;;  %183 = vst [vmem:[%s10068_s26 + $0x78] sm:$0xff] %v182_v15 }
  0x1a   : > { %185 = vst [vmem:[%s10068_s26 + $0x80] sm:$0xff] %v184_v16  ;;  %187 = vst [vmem:[%s10068_s26 + $0x88] sm:$0xff] %v186_v17  ;;  %v188_v18 = vld [vmem:[%s10060_s25 + $0x240] sm:$0xff]  ;;  %v190_v19 = vld [vmem:[%s10060_s25 + $0x248] sm:$0xff] }
  0x1b   : > { %v192_v20 = vld [vmem:[%s10060_s25 + $0x280] sm:$0xff]  ;;  %189 = vst [vmem:[%s10068_s26 + $0x90] sm:$0xff] %v188_v18  ;;  %191 = vst [vmem:[%s10068_s26 + $0x98] sm:$0xff] %v190_v19  ;;  %v194_v21 = vld [vmem:[%s10060_s25 + $0x288] sm:$0xff] }
  0x1c   : > { %193 = vst [vmem:[%s10068_s26 + $0xa0] sm:$0xff] %v192_v20  ;;  %v196_v22 = vld [vmem:[%s10060_s25 + $0x2c0] sm:$0xff]  ;;  %v198_v23 = vld [vmem:[%s10060_s25 + $0x2c8] sm:$0xff]  ;;  %195 = vst [vmem:[%s10068_s26 + $0xa8] sm:$0xff] %v194_v21 }
  0x1d   : > { %197 = vst [vmem:[%s10068_s26 + $0xb0] sm:$0xff] %v196_v22  ;;  %199 = vst [vmem:[%s10068_s26 + $0xb8] sm:$0xff] %v198_v23  ;;  %v200_v24 = vld [vmem:[%s10060_s25 + $0x300] sm:$0xff]  ;;  %v202_v25 = vld [vmem:[%s10060_s25 + $0x308] sm:$0xff] }
  0x1e   : > { %v204_v26 = vld [vmem:[%s10060_s25 + $0x340] sm:$0xff]  ;;  %201 = vst [vmem:[%s10068_s26 + $0xc0] sm:$0xff] %v200_v24  ;;  %203 = vst [vmem:[%s10068_s26 + $0xc8] sm:$0xff] %v202_v25  ;;  %v206_v27 = vld [vmem:[%s10060_s25 + $0x348] sm:$0xff] }
  0x1f   : > { %205 = vst [vmem:[%s10068_s26 + $0xd0] sm:$0xff] %v204_v26  ;;  %v208_v28 = vld [vmem:[%s10060_s25 + $0x380] sm:$0xff]  ;;  %v210_v29 = vld [vmem:[%s10060_s25 + $0x388] sm:$0xff]  ;;  %207 = vst [vmem:[%s10068_s26 + $0xd8] sm:$0xff] %v206_v27 }
  0x20   : > { %209 = vst [vmem:[%s10068_s26 + $0xe0] sm:$0xff] %v208_v28  ;;  %211 = vst [vmem:[%s10068_s26 + $0xe8] sm:$0xff] %v210_v29  ;;  %v212_v30 = vld [vmem:[%s10060_s25 + $0x3c0] sm:$0xff]  ;;  %v214_v31 = vld [vmem:[%s10060_s25 + $0x3c8] sm:$0xff] }
  0x21   : > { %v216_v32 = vld [vmem:[%s10060_s25 + $0x400] sm:$0xff]  ;;  %213 = vst [vmem:[%s10068_s26 + $0xf0] sm:$0xff] %v212_v30  ;;  %215 = vst [vmem:[%s10068_s26 + $0xf8] sm:$0xff] %v214_v31  ;;  %v218_v33 = vld [vmem:[%s10060_s25 + $0x408] sm:$0xff] }
  0x22   : > { %217 = vst [vmem:[%s10068_s26 + $0x100] sm:$0xff] %v216_v32  ;;  %v220_v34 = vld [vmem:[%s10060_s25 + $0x440] sm:$0xff]  ;;  %v222_v35 = vld [vmem:[%s10060_s25 + $0x448] sm:$0xff]  ;;  %219 = vst [vmem:[%s10068_s26 + $0x108] sm:$0xff] %v218_v33 }
  0x23   : > { %221 = vst [vmem:[%s10068_s26 + $0x110] sm:$0xff] %v220_v34  ;;  %223 = vst [vmem:[%s10068_s26 + $0x118] sm:$0xff] %v222_v35  ;;  %v224_v36 = vld [vmem:[%s10060_s25 + $0x480] sm:$0xff]  ;;  %v226_v37 = vld [vmem:[%s10060_s25 + $0x488] sm:$0xff] }
  0x24   : > { %v228_v38 = vld [vmem:[%s10060_s25 + $0x4c0] sm:$0xff]  ;;  %225 = vst [vmem:[%s10068_s26 + $0x120] sm:$0xff] %v224_v36  ;;  %227 = vst [vmem:[%s10068_s26 + $0x128] sm:$0xff] %v226_v37  ;;  %v230_v39 = vld [vmem:[%s10060_s25 + $0x4c8] sm:$0xff] }
  0x25   : > { %229 = vst [vmem:[%s10068_s26 + $0x130] sm:$0xff] %v228_v38  ;;  %v232_v40 = vld [vmem:[%s10060_s25 + $0x500] sm:$0xff]  ;;  %v234_v41 = vld [vmem:[%s10060_s25 + $0x508] sm:$0xff]  ;;  %231 = vst [vmem:[%s10068_s26 + $0x138] sm:$0xff] %v230_v39 }
  0x26   : > { %233 = vst [vmem:[%s10068_s26 + $0x140] sm:$0xff] %v232_v40  ;;  %235 = vst [vmem:[%s10068_s26 + $0x148] sm:$0xff] %v234_v41  ;;  %v236_v42 = vld [vmem:[%s10060_s25 + $0x540] sm:$0xff]  ;;  %v238_v43 = vld [vmem:[%s10060_s25 + $0x548] sm:$0xff] }
  0x27   : > { %v240_v44 = vld [vmem:[%s10060_s25 + $0x580] sm:$0xff]  ;;  %237 = vst [vmem:[%s10068_s26 + $0x150] sm:$0xff] %v236_v42  ;;  %239 = vst [vmem:[%s10068_s26 + $0x158] sm:$0xff] %v238_v43  ;;  %v242_v45 = vld [vmem:[%s10060_s25 + $0x588] sm:$0xff] }
  0x28   : > { %241 = vst [vmem:[%s10068_s26 + $0x160] sm:$0xff] %v240_v44  ;;  %v244_v46 = vld [vmem:[%s10060_s25 + $0x5c0] sm:$0xff]  ;;  %v246_v47 = vld [vmem:[%s10060_s25 + $0x5c8] sm:$0xff]  ;;  %243 = vst [vmem:[%s10068_s26 + $0x168] sm:$0xff] %v242_v45 }
  0x29   : > { %245 = vst [vmem:[%s10068_s26 + $0x170] sm:$0xff] %v244_v46  ;;  %247 = vst [vmem:[%s10068_s26 + $0x178] sm:$0xff] %v246_v47  ;;  %v248_v48 = vld [vmem:[%s10060_s25 + $0x600] sm:$0xff]  ;;  %v250_v49 = vld [vmem:[%s10060_s25 + $0x608] sm:$0xff] }
  0x2a   : > { %v252_v50 = vld [vmem:[%s10060_s25 + $0x640] sm:$0xff]  ;;  %249 = vst [vmem:[%s10068_s26 + $0x180] sm:$0xff] %v248_v48  ;;  %251 = vst [vmem:[%s10068_s26 + $0x188] sm:$0xff] %v250_v49  ;;  %v254_v51 = vld [vmem:[%s10060_s25 + $0x648] sm:$0xff] }
  0x2b   : > { %253 = vst [vmem:[%s10068_s26 + $0x190] sm:$0xff] %v252_v50  ;;  %v256_v52 = vld [vmem:[%s10060_s25 + $0x680] sm:$0xff]  ;;  %v258_v53 = vld [vmem:[%s10060_s25 + $0x688] sm:$0xff]  ;;  %255 = vst [vmem:[%s10068_s26 + $0x198] sm:$0xff] %v254_v51 }
  0x2c   : > { %257 = vst [vmem:[%s10068_s26 + $0x1a0] sm:$0xff] %v256_v52  ;;  %259 = vst [vmem:[%s10068_s26 + $0x1a8] sm:$0xff] %v258_v53  ;;  %v260_v54 = vld [vmem:[%s10060_s25 + $0x6c0] sm:$0xff]  ;;  %v262_v55 = vld [vmem:[%s10060_s25 + $0x6c8] sm:$0xff] }
  0x2d   : > { %v264_v56 = vld [vmem:[%s10060_s25 + $0x700] sm:$0xff]  ;;  %261 = vst [vmem:[%s10068_s26 + $0x1b0] sm:$0xff] %v260_v54  ;;  %263 = vst [vmem:[%s10068_s26 + $0x1b8] sm:$0xff] %v262_v55  ;;  %v266_v57 = vld [vmem:[%s10060_s25 + $0x708] sm:$0xff] }
  0x2e   : > { %265 = vst [vmem:[%s10068_s26 + $0x1c0] sm:$0xff] %v264_v56  ;;  %v268_v58 = vld [vmem:[%s10060_s25 + $0x740] sm:$0xff]  ;;  %v270_v59 = vld [vmem:[%s10060_s25 + $0x748] sm:$0xff]  ;;  %267 = vst [vmem:[%s10068_s26 + $0x1c8] sm:$0xff] %v266_v57 }
  0x2f   : > { %269 = vst [vmem:[%s10068_s26 + $0x1d0] sm:$0xff] %v268_v58  ;;  %271 = vst [vmem:[%s10068_s26 + $0x1d8] sm:$0xff] %v270_v59  ;;  %v272_v60 = vld [vmem:[%s10060_s25 + $0x780] sm:$0xff]  ;;  %v274_v61 = vld [vmem:[%s10060_s25 + $0x788] sm:$0xff] }
  0x30   : > { %v276_v62 = vld [vmem:[%s10060_s25 + $0x7c0] sm:$0xff]  ;;  %273 = vst [vmem:[%s10068_s26 + $0x1e0] sm:$0xff] %v272_v60  ;;  %275 = vst [vmem:[%s10068_s26 + $0x1e8] sm:$0xff] %v274_v61  ;;  %v278_v63 = vld [vmem:[%s10060_s25 + $0x7c8] sm:$0xff] }
  0x31   : > { %277 = vst [vmem:[%s10068_s26 + $0x1f0] sm:$0xff] %v276_v62  ;;  %v280_v0 = vld [vmem:[%s10060_s25 + $0x800] sm:$0xff]  ;;  %v282_v1 = vld [vmem:[%s10060_s25 + $0x808] sm:$0xff]  ;;  %279 = vst [vmem:[%s10068_s26 + $0x1f8] sm:$0xff] %v278_v63 }
  0x32   : > { %281 = vst [vmem:[%s10068_s26 + $0x200] sm:$0xff] %v280_v0  ;;  %283 = vst [vmem:[%s10068_s26 + $0x208] sm:$0xff] %v282_v1  ;;  %v284_v2 = vld [vmem:[%s10060_s25 + $0x840] sm:$0xff]  ;;  %v286_v3 = vld [vmem:[%s10060_s25 + $0x848] sm:$0xff] }
  0x33   : > { %v288_v4 = vld [vmem:[%s10060_s25 + $0x880] sm:$0xff]  ;;  %285 = vst [vmem:[%s10068_s26 + $0x210] sm:$0xff] %v284_v2  ;;  %287 = vst [vmem:[%s10068_s26 + $0x218] sm:$0xff] %v286_v3  ;;  %v290_v5 = vld [vmem:[%s10060_s25 + $0x888] sm:$0xff] }
  0x34   : > { %289 = vst [vmem:[%s10068_s26 + $0x220] sm:$0xff] %v288_v4  ;;  %v292_v6 = vld [vmem:[%s10060_s25 + $0x8c0] sm:$0xff]  ;;  %v294_v7 = vld [vmem:[%s10060_s25 + $0x8c8] sm:$0xff]  ;;  %291 = vst [vmem:[%s10068_s26 + $0x228] sm:$0xff] %v290_v5 }
  0x35   : > { %293 = vst [vmem:[%s10068_s26 + $0x230] sm:$0xff] %v292_v6  ;;  %295 = vst [vmem:[%s10068_s26 + $0x238] sm:$0xff] %v294_v7  ;;  %v296_v8 = vld [vmem:[%s10060_s25 + $0x900] sm:$0xff]  ;;  %v298_v9 = vld [vmem:[%s10060_s25 + $0x908] sm:$0xff] }
  0x36   : > { %v300_v10 = vld [vmem:[%s10060_s25 + $0x940] sm:$0xff]  ;;  %297 = vst [vmem:[%s10068_s26 + $0x240] sm:$0xff] %v296_v8  ;;  %299 = vst [vmem:[%s10068_s26 + $0x248] sm:$0xff] %v298_v9  ;;  %v302_v11 = vld [vmem:[%s10060_s25 + $0x948] sm:$0xff] }
  0x37   : > { %301 = vst [vmem:[%s10068_s26 + $0x250] sm:$0xff] %v300_v10  ;;  %v304_v12 = vld [vmem:[%s10060_s25 + $0x980] sm:$0xff]  ;;  %v306_v13 = vld [vmem:[%s10060_s25 + $0x988] sm:$0xff]  ;;  %303 = vst [vmem:[%s10068_s26 + $0x258] sm:$0xff] %v302_v11 }
  0x38   : > { %305 = vst [vmem:[%s10068_s26 + $0x260] sm:$0xff] %v304_v12  ;;  %307 = vst [vmem:[%s10068_s26 + $0x268] sm:$0xff] %v306_v13  ;;  %v308_v14 = vld [vmem:[%s10060_s25 + $0x9c0] sm:$0xff]  ;;  %v310_v15 = vld [vmem:[%s10060_s25 + $0x9c8] sm:$0xff] }
  0x39   : > { %v312_v16 = vld [vmem:[%s10060_s25 + $0xa00] sm:$0xff]  ;;  %309 = vst [vmem:[%s10068_s26 + $0x270] sm:$0xff] %v308_v14  ;;  %311 = vst [vmem:[%s10068_s26 + $0x278] sm:$0xff] %v310_v15  ;;  %v314_v17 = vld [vmem:[%s10060_s25 + $0xa08] sm:$0xff] }
  0x3a   : > { %313 = vst [vmem:[%s10068_s26 + $0x280] sm:$0xff] %v312_v16  ;;  %v316_v18 = vld [vmem:[%s10060_s25 + $0xa40] sm:$0xff]  ;;  %v318_v19 = vld [vmem:[%s10060_s25 + $0xa48] sm:$0xff]  ;;  %315 = vst [vmem:[%s10068_s26 + $0x288] sm:$0xff] %v314_v17 }
  0x3b   : > { %317 = vst [vmem:[%s10068_s26 + $0x290] sm:$0xff] %v316_v18  ;;  %319 = vst [vmem:[%s10068_s26 + $0x298] sm:$0xff] %v318_v19  ;;  %v320_v20 = vld [vmem:[%s10060_s25 + $0xa80] sm:$0xff]  ;;  %v322_v21 = vld [vmem:[%s10060_s25 + $0xa88] sm:$0xff] }
  0x3c   : > { %v324_v22 = vld [vmem:[%s10060_s25 + $0xac0] sm:$0xff]  ;;  %321 = vst [vmem:[%s10068_s26 + $0x2a0] sm:$0xff] %v320_v20  ;;  %323 = vst [vmem:[%s10068_s26 + $0x2a8] sm:$0xff] %v322_v21  ;;  %v326_v23 = vld [vmem:[%s10060_s25 + $0xac8] sm:$0xff] }
  0x3d   : > { %325 = vst [vmem:[%s10068_s26 + $0x2b0] sm:$0xff] %v324_v22  ;;  %v328_v24 = vld [vmem:[%s10060_s25 + $0xb00] sm:$0xff]  ;;  %v330_v25 = vld [vmem:[%s10060_s25 + $0xb08] sm:$0xff]  ;;  %327 = vst [vmem:[%s10068_s26 + $0x2b8] sm:$0xff] %v326_v23 }
  0x3e   : > { %329 = vst [vmem:[%s10068_s26 + $0x2c0] sm:$0xff] %v328_v24  ;;  %331 = vst [vmem:[%s10068_s26 + $0x2c8] sm:$0xff] %v330_v25  ;;  %v332_v26 = vld [vmem:[%s10060_s25 + $0xb40] sm:$0xff]  ;;  %v334_v27 = vld [vmem:[%s10060_s25 + $0xb48] sm:$0xff] }
  0x3f   : > { %v336_v28 = vld [vmem:[%s10060_s25 + $0xb80] sm:$0xff]  ;;  %333 = vst [vmem:[%s10068_s26 + $0x2d0] sm:$0xff] %v332_v26  ;;  %335 = vst [vmem:[%s10068_s26 + $0x2d8] sm:$0xff] %v334_v27  ;;  %v338_v29 = vld [vmem:[%s10060_s25 + $0xb88] sm:$0xff] }
  0x40   : > { %337 = vst [vmem:[%s10068_s26 + $0x2e0] sm:$0xff] %v336_v28  ;;  %v340_v30 = vld [vmem:[%s10060_s25 + $0xbc0] sm:$0xff]  ;;  %v342_v31 = vld [vmem:[%s10060_s25 + $0xbc8] sm:$0xff]  ;;  %339 = vst [vmem:[%s10068_s26 + $0x2e8] sm:$0xff] %v338_v29 }
  0x41   : > { %341 = vst [vmem:[%s10068_s26 + $0x2f0] sm:$0xff] %v340_v30  ;;  %343 = vst [vmem:[%s10068_s26 + $0x2f8] sm:$0xff] %v342_v31  ;;  %v344_v32 = vld [vmem:[%s10060_s25 + $0xc00] sm:$0xff]  ;;  %v346_v33 = vld [vmem:[%s10060_s25 + $0xc08] sm:$0xff] }
  0x42   : > { %v348_v34 = vld [vmem:[%s10060_s25 + $0xc40] sm:$0xff]  ;;  %345 = vst [vmem:[%s10068_s26 + $0x300] sm:$0xff] %v344_v32  ;;  %347 = vst [vmem:[%s10068_s26 + $0x308] sm:$0xff] %v346_v33  ;;  %v350_v35 = vld [vmem:[%s10060_s25 + $0xc48] sm:$0xff] }
  0x43   : > { %349 = vst [vmem:[%s10068_s26 + $0x310] sm:$0xff] %v348_v34  ;;  %v352_v36 = vld [vmem:[%s10060_s25 + $0xc80] sm:$0xff]  ;;  %v354_v37 = vld [vmem:[%s10060_s25 + $0xc88] sm:$0xff]  ;;  %351 = vst [vmem:[%s10068_s26 + $0x318] sm:$0xff] %v350_v35 }
  0x44   : > { %353 = vst [vmem:[%s10068_s26 + $0x320] sm:$0xff] %v352_v36  ;;  %355 = vst [vmem:[%s10068_s26 + $0x328] sm:$0xff] %v354_v37  ;;  %v356_v38 = vld [vmem:[%s10060_s25 + $0xcc0] sm:$0xff]  ;;  %v358_v39 = vld [vmem:[%s10060_s25 + $0xcc8] sm:$0xff] }
  0x45   : > { %v360_v40 = vld [vmem:[%s10060_s25 + $0xd00] sm:$0xff]  ;;  %357 = vst [vmem:[%s10068_s26 + $0x330] sm:$0xff] %v356_v38  ;;  %359 = vst [vmem:[%s10068_s26 + $0x338] sm:$0xff] %v358_v39  ;;  %v362_v41 = vld [vmem:[%s10060_s25 + $0xd08] sm:$0xff] }
  0x46   : > { %361 = vst [vmem:[%s10068_s26 + $0x340] sm:$0xff] %v360_v40  ;;  %v364_v42 = vld [vmem:[%s10060_s25 + $0xd40] sm:$0xff]  ;;  %v366_v43 = vld [vmem:[%s10060_s25 + $0xd48] sm:$0xff]  ;;  %363 = vst [vmem:[%s10068_s26 + $0x348] sm:$0xff] %v362_v41 }
  0x47   : > { %365 = vst [vmem:[%s10068_s26 + $0x350] sm:$0xff] %v364_v42  ;;  %367 = vst [vmem:[%s10068_s26 + $0x358] sm:$0xff] %v366_v43  ;;  %v368_v44 = vld [vmem:[%s10060_s25 + $0xd80] sm:$0xff]  ;;  %v370_v45 = vld [vmem:[%s10060_s25 + $0xd88] sm:$0xff] }
  0x48   : > { %v372_v46 = vld [vmem:[%s10060_s25 + $0xdc0] sm:$0xff]  ;;  %369 = vst [vmem:[%s10068_s26 + $0x360] sm:$0xff] %v368_v44  ;;  %371 = vst [vmem:[%s10068_s26 + $0x368] sm:$0xff] %v370_v45  ;;  %v374_v47 = vld [vmem:[%s10060_s25 + $0xdc8] sm:$0xff] }
  0x49   : > { %373 = vst [vmem:[%s10068_s26 + $0x370] sm:$0xff] %v372_v46  ;;  %v376_v48 = vld [vmem:[%s10060_s25 + $0xe00] sm:$0xff]  ;;  %v378_v49 = vld [vmem:[%s10060_s25 + $0xe08] sm:$0xff]  ;;  %375 = vst [vmem:[%s10068_s26 + $0x378] sm:$0xff] %v374_v47 }
  0x4a   : > { %377 = vst [vmem:[%s10068_s26 + $0x380] sm:$0xff] %v376_v48  ;;  %379 = vst [vmem:[%s10068_s26 + $0x388] sm:$0xff] %v378_v49  ;;  %v380_v50 = vld [vmem:[%s10060_s25 + $0xe40] sm:$0xff]  ;;  %v382_v51 = vld [vmem:[%s10060_s25 + $0xe48] sm:$0xff] }
  0x4b   : > { %v384_v52 = vld [vmem:[%s10060_s25 + $0xe80] sm:$0xff]  ;;  %381 = vst [vmem:[%s10068_s26 + $0x390] sm:$0xff] %v380_v50  ;;  %383 = vst [vmem:[%s10068_s26 + $0x398] sm:$0xff] %v382_v51  ;;  %v386_v53 = vld [vmem:[%s10060_s25 + $0xe88] sm:$0xff] }
  0x4c   : > { %385 = vst [vmem:[%s10068_s26 + $0x3a0] sm:$0xff] %v384_v52  ;;  %v388_v54 = vld [vmem:[%s10060_s25 + $0xec0] sm:$0xff]  ;;  %v390_v55 = vld [vmem:[%s10060_s25 + $0xec8] sm:$0xff]  ;;  %387 = vst [vmem:[%s10068_s26 + $0x3a8] sm:$0xff] %v386_v53 }
  0x4d   : > { %389 = vst [vmem:[%s10068_s26 + $0x3b0] sm:$0xff] %v388_v54  ;;  %391 = vst [vmem:[%s10068_s26 + $0x3b8] sm:$0xff] %v390_v55  ;;  %v392_v56 = vld [vmem:[%s10060_s25 + $0xf00] sm:$0xff]  ;;  %v394_v57 = vld [vmem:[%s10060_s25 + $0xf08] sm:$0xff] }
  0x4e   : > { %v396_v58 = vld [vmem:[%s10060_s25 + $0xf40] sm:$0xff]  ;;  %393 = vst [vmem:[%s10068_s26 + $0x3c0] sm:$0xff] %v392_v56  ;;  %395 = vst [vmem:[%s10068_s26 + $0x3c8] sm:$0xff] %v394_v57  ;;  %v398_v59 = vld [vmem:[%s10060_s25 + $0xf48] sm:$0xff] }
  0x4f   : > { %397 = vst [vmem:[%s10068_s26 + $0x3d0] sm:$0xff] %v396_v58  ;;  %v400_v60 = vld [vmem:[%s10060_s25 + $0xf80] sm:$0xff]  ;;  %v402_v61 = vld [vmem:[%s10060_s25 + $0xf88] sm:$0xff]  ;;  %399 = vst [vmem:[%s10068_s26 + $0x3d8] sm:$0xff] %v398_v59 }
  0x50   : > { %401 = vst [vmem:[%s10068_s26 + $0x3e0] sm:$0xff] %v400_v60  ;;  %403 = vst [vmem:[%s10068_s26 + $0x3e8] sm:$0xff] %v402_v61  ;;  %v404_v62 = vld [vmem:[%s10060_s25 + $0xfc0] sm:$0xff]  ;;  %v406_v63 = vld [vmem:[%s10060_s25 + $0xfc8] sm:$0xff] }
  0x51   : > { %v408_v0 = vld [vmem:[%s10060_s25 + $0x1000] sm:$0xff]  ;;  %405 = vst [vmem:[%s10068_s26 + $0x3f0] sm:$0xff] %v404_v62  ;;  %407 = vst [vmem:[%s10068_s26 + $0x3f8] sm:$0xff] %v406_v63  ;;  %v410_v1 = vld [vmem:[%s10060_s25 + $0x1008] sm:$0xff] }
  0x52   : > { %409 = vst [vmem:[%s10068_s26 + $0x400] sm:$0xff] %v408_v0  ;;  %v412_v2 = vld [vmem:[%s10060_s25 + $0x1040] sm:$0xff]  ;;  %v414_v3 = vld [vmem:[%s10060_s25 + $0x1048] sm:$0xff]  ;;  %411 = vst [vmem:[%s10068_s26 + $0x408] sm:$0xff] %v410_v1 }
  0x53   : > { %413 = vst [vmem:[%s10068_s26 + $0x410] sm:$0xff] %v412_v2  ;;  %415 = vst [vmem:[%s10068_s26 + $0x418] sm:$0xff] %v414_v3  ;;  %v416_v4 = vld [vmem:[%s10060_s25 + $0x1080] sm:$0xff]  ;;  %v418_v5 = vld [vmem:[%s10060_s25 + $0x1088] sm:$0xff] }
  0x54   : > { %v420_v6 = vld [vmem:[%s10060_s25 + $0x10c0] sm:$0xff]  ;;  %417 = vst [vmem:[%s10068_s26 + $0x420] sm:$0xff] %v416_v4  ;;  %419 = vst [vmem:[%s10068_s26 + $0x428] sm:$0xff] %v418_v5  ;;  %v422_v7 = vld [vmem:[%s10060_s25 + $0x10c8] sm:$0xff] }
  0x55   : > { %421 = vst [vmem:[%s10068_s26 + $0x430] sm:$0xff] %v420_v6  ;;  %v424_v8 = vld [vmem:[%s10060_s25 + $0x1100] sm:$0xff]  ;;  %v426_v9 = vld [vmem:[%s10060_s25 + $0x1108] sm:$0xff]  ;;  %423 = vst [vmem:[%s10068_s26 + $0x438] sm:$0xff] %v422_v7 }
  0x56   : > { %425 = vst [vmem:[%s10068_s26 + $0x440] sm:$0xff] %v424_v8  ;;  %427 = vst [vmem:[%s10068_s26 + $0x448] sm:$0xff] %v426_v9  ;;  %v428_v10 = vld [vmem:[%s10060_s25 + $0x1140] sm:$0xff]  ;;  %v430_v11 = vld [vmem:[%s10060_s25 + $0x1148] sm:$0xff] }
  0x57   : > { %v432_v12 = vld [vmem:[%s10060_s25 + $0x1180] sm:$0xff]  ;;  %429 = vst [vmem:[%s10068_s26 + $0x450] sm:$0xff] %v428_v10  ;;  %431 = vst [vmem:[%s10068_s26 + $0x458] sm:$0xff] %v430_v11  ;;  %v434_v13 = vld [vmem:[%s10060_s25 + $0x1188] sm:$0xff] }
  0x58   : > { %433 = vst [vmem:[%s10068_s26 + $0x460] sm:$0xff] %v432_v12  ;;  %v436_v14 = vld [vmem:[%s10060_s25 + $0x11c0] sm:$0xff]  ;;  %v438_v15 = vld [vmem:[%s10060_s25 + $0x11c8] sm:$0xff]  ;;  %435 = vst [vmem:[%s10068_s26 + $0x468] sm:$0xff] %v434_v13 }
  0x59   : > { %437 = vst [vmem:[%s10068_s26 + $0x470] sm:$0xff] %v436_v14  ;;  %439 = vst [vmem:[%s10068_s26 + $0x478] sm:$0xff] %v438_v15  ;;  %v440_v16 = vld [vmem:[%s10060_s25 + $0x1200] sm:$0xff]  ;;  %v442_v17 = vld [vmem:[%s10060_s25 + $0x1208] sm:$0xff] }
  0x5a   : > { %v444_v18 = vld [vmem:[%s10060_s25 + $0x1240] sm:$0xff]  ;;  %441 = vst [vmem:[%s10068_s26 + $0x480] sm:$0xff] %v440_v16  ;;  %443 = vst [vmem:[%s10068_s26 + $0x488] sm:$0xff] %v442_v17  ;;  %v446_v19 = vld [vmem:[%s10060_s25 + $0x1248] sm:$0xff] }
  0x5b   : > { %445 = vst [vmem:[%s10068_s26 + $0x490] sm:$0xff] %v444_v18  ;;  %v448_v20 = vld [vmem:[%s10060_s25 + $0x1280] sm:$0xff]  ;;  %v450_v21 = vld [vmem:[%s10060_s25 + $0x1288] sm:$0xff]  ;;  %447 = vst [vmem:[%s10068_s26 + $0x498] sm:$0xff] %v446_v19 }
  0x5c   : > { %449 = vst [vmem:[%s10068_s26 + $0x4a0] sm:$0xff] %v448_v20  ;;  %451 = vst [vmem:[%s10068_s26 + $0x4a8] sm:$0xff] %v450_v21  ;;  %v452_v22 = vld [vmem:[%s10060_s25 + $0x12c0] sm:$0xff]  ;;  %v454_v23 = vld [vmem:[%s10060_s25 + $0x12c8] sm:$0xff] }
  0x5d   : > { %v456_v24 = vld [vmem:[%s10060_s25 + $0x1300] sm:$0xff]  ;;  %453 = vst [vmem:[%s10068_s26 + $0x4b0] sm:$0xff] %v452_v22  ;;  %455 = vst [vmem:[%s10068_s26 + $0x4b8] sm:$0xff] %v454_v23  ;;  %v458_v25 = vld [vmem:[%s10060_s25 + $0x1308] sm:$0xff] }
  0x5e   : > { %457 = vst [vmem:[%s10068_s26 + $0x4c0] sm:$0xff] %v456_v24  ;;  %v460_v26 = vld [vmem:[%s10060_s25 + $0x1340] sm:$0xff]  ;;  %v462_v27 = vld [vmem:[%s10060_s25 + $0x1348] sm:$0xff]  ;;  %459 = vst [vmem:[%s10068_s26 + $0x4c8] sm:$0xff] %v458_v25 }
  0x5f   : > { %461 = vst [vmem:[%s10068_s26 + $0x4d0] sm:$0xff] %v460_v26  ;;  %463 = vst [vmem:[%s10068_s26 + $0x4d8] sm:$0xff] %v462_v27  ;;  %v464_v28 = vld [vmem:[%s10060_s25 + $0x1380] sm:$0xff]  ;;  %v466_v29 = vld [vmem:[%s10060_s25 + $0x1388] sm:$0xff] }
  0x60   : > { %v468_v30 = vld [vmem:[%s10060_s25 + $0x13c0] sm:$0xff]  ;;  %465 = vst [vmem:[%s10068_s26 + $0x4e0] sm:$0xff] %v464_v28  ;;  %467 = vst [vmem:[%s10068_s26 + $0x4e8] sm:$0xff] %v466_v29  ;;  %v470_v31 = vld [vmem:[%s10060_s25 + $0x13c8] sm:$0xff] }
  0x61   : > { %469 = vst [vmem:[%s10068_s26 + $0x4f0] sm:$0xff] %v468_v30  ;;  %v472_v32 = vld [vmem:[%s10060_s25 + $0x1400] sm:$0xff]  ;;  %v474_v33 = vld [vmem:[%s10060_s25 + $0x1408] sm:$0xff]  ;;  %471 = vst [vmem:[%s10068_s26 + $0x4f8] sm:$0xff] %v470_v31 }
  0x62   : > { %473 = vst [vmem:[%s10068_s26 + $0x500] sm:$0xff] %v472_v32  ;;  %475 = vst [vmem:[%s10068_s26 + $0x508] sm:$0xff] %v474_v33  ;;  %v476_v34 = vld [vmem:[%s10060_s25 + $0x1440] sm:$0xff]  ;;  %v478_v35 = vld [vmem:[%s10060_s25 + $0x1448] sm:$0xff] }
  0x63   : > { %v480_v36 = vld [vmem:[%s10060_s25 + $0x1480] sm:$0xff]  ;;  %477 = vst [vmem:[%s10068_s26 + $0x510] sm:$0xff] %v476_v34  ;;  %479 = vst [vmem:[%s10068_s26 + $0x518] sm:$0xff] %v478_v35  ;;  %v482_v37 = vld [vmem:[%s10060_s25 + $0x1488] sm:$0xff] }
  0x64   : > { %481 = vst [vmem:[%s10068_s26 + $0x520] sm:$0xff] %v480_v36  ;;  %v484_v38 = vld [vmem:[%s10060_s25 + $0x14c0] sm:$0xff]  ;;  %v486_v39 = vld [vmem:[%s10060_s25 + $0x14c8] sm:$0xff]  ;;  %483 = vst [vmem:[%s10068_s26 + $0x528] sm:$0xff] %v482_v37 }
  0x65   : > { %485 = vst [vmem:[%s10068_s26 + $0x530] sm:$0xff] %v484_v38  ;;  %487 = vst [vmem:[%s10068_s26 + $0x538] sm:$0xff] %v486_v39  ;;  %v488_v40 = vld [vmem:[%s10060_s25 + $0x1500] sm:$0xff]  ;;  %v490_v41 = vld [vmem:[%s10060_s25 + $0x1508] sm:$0xff] }
  0x66   : > { %v492_v42 = vld [vmem:[%s10060_s25 + $0x1540] sm:$0xff]  ;;  %489 = vst [vmem:[%s10068_s26 + $0x540] sm:$0xff] %v488_v40  ;;  %491 = vst [vmem:[%s10068_s26 + $0x548] sm:$0xff] %v490_v41  ;;  %v494_v43 = vld [vmem:[%s10060_s25 + $0x1548] sm:$0xff] }
  0x67   : > { %493 = vst [vmem:[%s10068_s26 + $0x550] sm:$0xff] %v492_v42  ;;  %v496_v44 = vld [vmem:[%s10060_s25 + $0x1580] sm:$0xff]  ;;  %v498_v45 = vld [vmem:[%s10060_s25 + $0x1588] sm:$0xff]  ;;  %495 = vst [vmem:[%s10068_s26 + $0x558] sm:$0xff] %v494_v43 }
  0x68   : > { %497 = vst [vmem:[%s10068_s26 + $0x560] sm:$0xff] %v496_v44  ;;  %499 = vst [vmem:[%s10068_s26 + $0x568] sm:$0xff] %v498_v45  ;;  %v500_v46 = vld [vmem:[%s10060_s25 + $0x15c0] sm:$0xff]  ;;  %v502_v47 = vld [vmem:[%s10060_s25 + $0x15c8] sm:$0xff] }
  0x69   : > { %v504_v48 = vld [vmem:[%s10060_s25 + $0x1600] sm:$0xff]  ;;  %501 = vst [vmem:[%s10068_s26 + $0x570] sm:$0xff] %v500_v46  ;;  %503 = vst [vmem:[%s10068_s26 + $0x578] sm:$0xff] %v502_v47  ;;  %v506_v49 = vld [vmem:[%s10060_s25 + $0x1608] sm:$0xff] }
  0x6a   : > { %505 = vst [vmem:[%s10068_s26 + $0x580] sm:$0xff] %v504_v48  ;;  %v508_v50 = vld [vmem:[%s10060_s25 + $0x1640] sm:$0xff]  ;;  %v510_v51 = vld [vmem:[%s10060_s25 + $0x1648] sm:$0xff]  ;;  %507 = vst [vmem:[%s10068_s26 + $0x588] sm:$0xff] %v506_v49 }
  0x6b   : > { %509 = vst [vmem:[%s10068_s26 + $0x590] sm:$0xff] %v508_v50  ;;  %511 = vst [vmem:[%s10068_s26 + $0x598] sm:$0xff] %v510_v51  ;;  %v512_v52 = vld [vmem:[%s10060_s25 + $0x1680] sm:$0xff]  ;;  %v514_v53 = vld [vmem:[%s10060_s25 + $0x1688] sm:$0xff] }
  0x6c   : > { %v516_v54 = vld [vmem:[%s10060_s25 + $0x16c0] sm:$0xff]  ;;  %513 = vst [vmem:[%s10068_s26 + $0x5a0] sm:$0xff] %v512_v52  ;;  %515 = vst [vmem:[%s10068_s26 + $0x5a8] sm:$0xff] %v514_v53  ;;  %v518_v55 = vld [vmem:[%s10060_s25 + $0x16c8] sm:$0xff] }
  0x6d   : > { %517 = vst [vmem:[%s10068_s26 + $0x5b0] sm:$0xff] %v516_v54  ;;  %v520_v56 = vld [vmem:[%s10060_s25 + $0x1700] sm:$0xff]  ;;  %v522_v57 = vld [vmem:[%s10060_s25 + $0x1708] sm:$0xff]  ;;  %519 = vst [vmem:[%s10068_s26 + $0x5b8] sm:$0xff] %v518_v55 }
  0x6e   : > { %521 = vst [vmem:[%s10068_s26 + $0x5c0] sm:$0xff] %v520_v56  ;;  %523 = vst [vmem:[%s10068_s26 + $0x5c8] sm:$0xff] %v522_v57  ;;  %v524_v58 = vld [vmem:[%s10060_s25 + $0x1740] sm:$0xff]  ;;  %v526_v59 = vld [vmem:[%s10060_s25 + $0x1748] sm:$0xff] }
  0x6f   : > { %v528_v60 = vld [vmem:[%s10060_s25 + $0x1780] sm:$0xff]  ;;  %525 = vst [vmem:[%s10068_s26 + $0x5d0] sm:$0xff] %v524_v58  ;;  %527 = vst [vmem:[%s10068_s26 + $0x5d8] sm:$0xff] %v526_v59  ;;  %v530_v61 = vld [vmem:[%s10060_s25 + $0x1788] sm:$0xff] }
  0x70   : > { %529 = vst [vmem:[%s10068_s26 + $0x5e0] sm:$0xff] %v528_v60  ;;  %v532_v62 = vld [vmem:[%s10060_s25 + $0x17c0] sm:$0xff]  ;;  %v534_v63 = vld [vmem:[%s10060_s25 + $0x17c8] sm:$0xff]  ;;  %531 = vst [vmem:[%s10068_s26 + $0x5e8] sm:$0xff] %v530_v61 }
  0x71   : > { %533 = vst [vmem:[%s10068_s26 + $0x5f0] sm:$0xff] %v532_v62  ;;  %535 = vst [vmem:[%s10068_s26 + $0x5f8] sm:$0xff] %v534_v63  ;;  %v536_v0 = vld [vmem:[%s10060_s25 + $0x1800] sm:$0xff]  ;;  %v538_v1 = vld [vmem:[%s10060_s25 + $0x1808] sm:$0xff] }
  0x72   : > { %v540_v2 = vld [vmem:[%s10060_s25 + $0x1840] sm:$0xff]  ;;  %537 = vst [vmem:[%s10068_s26 + $0x600] sm:$0xff] %v536_v0  ;;  %539 = vst [vmem:[%s10068_s26 + $0x608] sm:$0xff] %v538_v1  ;;  %v542_v3 = vld [vmem:[%s10060_s25 + $0x1848] sm:$0xff] }
  0x73   : > { %541 = vst [vmem:[%s10068_s26 + $0x610] sm:$0xff] %v540_v2  ;;  %v544_v4 = vld [vmem:[%s10060_s25 + $0x1880] sm:$0xff]  ;;  %v546_v5 = vld [vmem:[%s10060_s25 + $0x1888] sm:$0xff]  ;;  %543 = vst [vmem:[%s10068_s26 + $0x618] sm:$0xff] %v542_v3 }
  0x74   : > { %545 = vst [vmem:[%s10068_s26 + $0x620] sm:$0xff] %v544_v4  ;;  %547 = vst [vmem:[%s10068_s26 + $0x628] sm:$0xff] %v546_v5  ;;  %v548_v6 = vld [vmem:[%s10060_s25 + $0x18c0] sm:$0xff]  ;;  %v550_v7 = vld [vmem:[%s10060_s25 + $0x18c8] sm:$0xff] }
  0x75   : > { %v552_v8 = vld [vmem:[%s10060_s25 + $0x1900] sm:$0xff]  ;;  %549 = vst [vmem:[%s10068_s26 + $0x630] sm:$0xff] %v548_v6  ;;  %551 = vst [vmem:[%s10068_s26 + $0x638] sm:$0xff] %v550_v7  ;;  %v554_v9 = vld [vmem:[%s10060_s25 + $0x1908] sm:$0xff] }
  0x76   : > { %553 = vst [vmem:[%s10068_s26 + $0x640] sm:$0xff] %v552_v8  ;;  %v556_v10 = vld [vmem:[%s10060_s25 + $0x1940] sm:$0xff]  ;;  %v558_v11 = vld [vmem:[%s10060_s25 + $0x1948] sm:$0xff]  ;;  %555 = vst [vmem:[%s10068_s26 + $0x648] sm:$0xff] %v554_v9 }
  0x77   : > { %557 = vst [vmem:[%s10068_s26 + $0x650] sm:$0xff] %v556_v10  ;;  %559 = vst [vmem:[%s10068_s26 + $0x658] sm:$0xff] %v558_v11  ;;  %v560_v12 = vld [vmem:[%s10060_s25 + $0x1980] sm:$0xff]  ;;  %v562_v13 = vld [vmem:[%s10060_s25 + $0x1988] sm:$0xff] }
  0x78   : > { %v564_v14 = vld [vmem:[%s10060_s25 + $0x19c0] sm:$0xff]  ;;  %561 = vst [vmem:[%s10068_s26 + $0x660] sm:$0xff] %v560_v12  ;;  %563 = vst [vmem:[%s10068_s26 + $0x668] sm:$0xff] %v562_v13  ;;  %v566_v15 = vld [vmem:[%s10060_s25 + $0x19c8] sm:$0xff] }
  0x79   : > { %565 = vst [vmem:[%s10068_s26 + $0x670] sm:$0xff] %v564_v14  ;;  %v568_v16 = vld [vmem:[%s10060_s25 + $0x1a00] sm:$0xff]  ;;  %v570_v17 = vld [vmem:[%s10060_s25 + $0x1a08] sm:$0xff]  ;;  %567 = vst [vmem:[%s10068_s26 + $0x678] sm:$0xff] %v566_v15 }
  0x7a   : > { %569 = vst [vmem:[%s10068_s26 + $0x680] sm:$0xff] %v568_v16  ;;  %571 = vst [vmem:[%s10068_s26 + $0x688] sm:$0xff] %v570_v17  ;;  %v572_v18 = vld [vmem:[%s10060_s25 + $0x1a40] sm:$0xff]  ;;  %v574_v19 = vld [vmem:[%s10060_s25 + $0x1a48] sm:$0xff] }
  0x7b   : > { %v576_v20 = vld [vmem:[%s10060_s25 + $0x1a80] sm:$0xff]  ;;  %573 = vst [vmem:[%s10068_s26 + $0x690] sm:$0xff] %v572_v18  ;;  %575 = vst [vmem:[%s10068_s26 + $0x698] sm:$0xff] %v574_v19  ;;  %v578_v21 = vld [vmem:[%s10060_s25 + $0x1a88] sm:$0xff] }
  0x7c   : > { %577 = vst [vmem:[%s10068_s26 + $0x6a0] sm:$0xff] %v576_v20  ;;  %v580_v22 = vld [vmem:[%s10060_s25 + $0x1ac0] sm:$0xff]  ;;  %v582_v23 = vld [vmem:[%s10060_s25 + $0x1ac8] sm:$0xff]  ;;  %579 = vst [vmem:[%s10068_s26 + $0x6a8] sm:$0xff] %v578_v21 }
  0x7d   : > { %581 = vst [vmem:[%s10068_s26 + $0x6b0] sm:$0xff] %v580_v22  ;;  %583 = vst [vmem:[%s10068_s26 + $0x6b8] sm:$0xff] %v582_v23  ;;  %v584_v24 = vld [vmem:[%s10060_s25 + $0x1b00] sm:$0xff]  ;;  %v586_v25 = vld [vmem:[%s10060_s25 + $0x1b08] sm:$0xff] }
  0x7e   : > { %v588_v26 = vld [vmem:[%s10060_s25 + $0x1b40] sm:$0xff]  ;;  %585 = vst [vmem:[%s10068_s26 + $0x6c0] sm:$0xff] %v584_v24  ;;  %587 = vst [vmem:[%s10068_s26 + $0x6c8] sm:$0xff] %v586_v25  ;;  %v590_v27 = vld [vmem:[%s10060_s25 + $0x1b48] sm:$0xff] }
  0x7f   : > { %589 = vst [vmem:[%s10068_s26 + $0x6d0] sm:$0xff] %v588_v26  ;;  %v592_v28 = vld [vmem:[%s10060_s25 + $0x1b80] sm:$0xff]  ;;  %v594_v29 = vld [vmem:[%s10060_s25 + $0x1b88] sm:$0xff]  ;;  %591 = vst [vmem:[%s10068_s26 + $0x6d8] sm:$0xff] %v590_v27 }
  0x80   : > { %593 = vst [vmem:[%s10068_s26 + $0x6e0] sm:$0xff] %v592_v28  ;;  %595 = vst [vmem:[%s10068_s26 + $0x6e8] sm:$0xff] %v594_v29  ;;  %v596_v30 = vld [vmem:[%s10060_s25 + $0x1bc0] sm:$0xff]  ;;  %v598_v31 = vld [vmem:[%s10060_s25 + $0x1bc8] sm:$0xff] }
  0x81   : > { %v600_v32 = vld [vmem:[%s10060_s25 + $0x1c00] sm:$0xff]  ;;  %597 = vst [vmem:[%s10068_s26 + $0x6f0] sm:$0xff] %v596_v30  ;;  %599 = vst [vmem:[%s10068_s26 + $0x6f8] sm:$0xff] %v598_v31  ;;  %v602_v33 = vld [vmem:[%s10060_s25 + $0x1c08] sm:$0xff] }
  0x82   : > { %601 = vst [vmem:[%s10068_s26 + $0x700] sm:$0xff] %v600_v32  ;;  %v604_v34 = vld [vmem:[%s10060_s25 + $0x1c40] sm:$0xff]  ;;  %v606_v35 = vld [vmem:[%s10060_s25 + $0x1c48] sm:$0xff]  ;;  %603 = vst [vmem:[%s10068_s26 + $0x708] sm:$0xff] %v602_v33 }
  0x83   : > { %605 = vst [vmem:[%s10068_s26 + $0x710] sm:$0xff] %v604_v34  ;;  %607 = vst [vmem:[%s10068_s26 + $0x718] sm:$0xff] %v606_v35  ;;  %v608_v36 = vld [vmem:[%s10060_s25 + $0x1c80] sm:$0xff]  ;;  %v610_v37 = vld [vmem:[%s10060_s25 + $0x1c88] sm:$0xff] }
  0x84   : > { %v612_v38 = vld [vmem:[%s10060_s25 + $0x1cc0] sm:$0xff]  ;;  %609 = vst [vmem:[%s10068_s26 + $0x720] sm:$0xff] %v608_v36  ;;  %611 = vst [vmem:[%s10068_s26 + $0x728] sm:$0xff] %v610_v37  ;;  %v614_v39 = vld [vmem:[%s10060_s25 + $0x1cc8] sm:$0xff] }
  0x85   : > { %613 = vst [vmem:[%s10068_s26 + $0x730] sm:$0xff] %v612_v38  ;;  %v616_v40 = vld [vmem:[%s10060_s25 + $0x1d00] sm:$0xff]  ;;  %v618_v41 = vld [vmem:[%s10060_s25 + $0x1d08] sm:$0xff]  ;;  %615 = vst [vmem:[%s10068_s26 + $0x738] sm:$0xff] %v614_v39 }
  0x86   : > { %617 = vst [vmem:[%s10068_s26 + $0x740] sm:$0xff] %v616_v40  ;;  %619 = vst [vmem:[%s10068_s26 + $0x748] sm:$0xff] %v618_v41  ;;  %v620_v42 = vld [vmem:[%s10060_s25 + $0x1d40] sm:$0xff]  ;;  %v622_v43 = vld [vmem:[%s10060_s25 + $0x1d48] sm:$0xff] }
  0x87   : > { %v624_v44 = vld [vmem:[%s10060_s25 + $0x1d80] sm:$0xff]  ;;  %621 = vst [vmem:[%s10068_s26 + $0x750] sm:$0xff] %v620_v42  ;;  %623 = vst [vmem:[%s10068_s26 + $0x758] sm:$0xff] %v622_v43  ;;  %v626_v45 = vld [vmem:[%s10060_s25 + $0x1d88] sm:$0xff] }
  0x88   : > { %625 = vst [vmem:[%s10068_s26 + $0x760] sm:$0xff] %v624_v44  ;;  %v628_v46 = vld [vmem:[%s10060_s25 + $0x1dc0] sm:$0xff]  ;;  %v630_v47 = vld [vmem:[%s10060_s25 + $0x1dc8] sm:$0xff]  ;;  %627 = vst [vmem:[%s10068_s26 + $0x768] sm:$0xff] %v626_v45 }
  0x89   : > { %629 = vst [vmem:[%s10068_s26 + $0x770] sm:$0xff] %v628_v46  ;;  %631 = vst [vmem:[%s10068_s26 + $0x778] sm:$0xff] %v630_v47  ;;  %v632_v48 = vld [vmem:[%s10060_s25 + $0x1e00] sm:$0xff]  ;;  %v634_v49 = vld [vmem:[%s10060_s25 + $0x1e08] sm:$0xff] }
  0x8a   : > { %v636_v50 = vld [vmem:[%s10060_s25 + $0x1e40] sm:$0xff]  ;;  %633 = vst [vmem:[%s10068_s26 + $0x780] sm:$0xff] %v632_v48  ;;  %635 = vst [vmem:[%s10068_s26 + $0x788] sm:$0xff] %v634_v49  ;;  %v638_v51 = vld [vmem:[%s10060_s25 + $0x1e48] sm:$0xff] }
  0x8b   : > { %637 = vst [vmem:[%s10068_s26 + $0x790] sm:$0xff] %v636_v50  ;;  %v640_v52 = vld [vmem:[%s10060_s25 + $0x1e80] sm:$0xff]  ;;  %v642_v53 = vld [vmem:[%s10060_s25 + $0x1e88] sm:$0xff]  ;;  %639 = vst [vmem:[%s10068_s26 + $0x798] sm:$0xff] %v638_v51 }
  0x8c   : > { %641 = vst [vmem:[%s10068_s26 + $0x7a0] sm:$0xff] %v640_v52  ;;  %643 = vst [vmem:[%s10068_s26 + $0x7a8] sm:$0xff] %v642_v53  ;;  %v644_v54 = vld [vmem:[%s10060_s25 + $0x1ec0] sm:$0xff]  ;;  %v646_v55 = vld [vmem:[%s10060_s25 + $0x1ec8] sm:$0xff] }
  0x8d   : > { %v648_v56 = vld [vmem:[%s10060_s25 + $0x1f00] sm:$0xff]  ;;  %645 = vst [vmem:[%s10068_s26 + $0x7b0] sm:$0xff] %v644_v54  ;;  %647 = vst [vmem:[%s10068_s26 + $0x7b8] sm:$0xff] %v646_v55  ;;  %v650_v57 = vld [vmem:[%s10060_s25 + $0x1f08] sm:$0xff] }
  0x8e   : > { %649 = vst [vmem:[%s10068_s26 + $0x7c0] sm:$0xff] %v648_v56  ;;  %v652_v58 = vld [vmem:[%s10060_s25 + $0x1f40] sm:$0xff]  ;;  %v654_v59 = vld [vmem:[%s10060_s25 + $0x1f48] sm:$0xff]  ;;  %651 = vst [vmem:[%s10068_s26 + $0x7c8] sm:$0xff] %v650_v57 }
  0x8f   : > { %653 = vst [vmem:[%s10068_s26 + $0x7d0] sm:$0xff] %v652_v58  ;;  %655 = vst [vmem:[%s10068_s26 + $0x7d8] sm:$0xff] %v654_v59  ;;  %v656_v60 = vld [vmem:[%s10060_s25 + $0x1f80] sm:$0xff]  ;;  %v658_v61 = vld [vmem:[%s10060_s25 + $0x1f88] sm:$0xff] }
  0x90   : > { %v660_v62 = vld [vmem:[%s10060_s25 + $0x1fc0] sm:$0xff]  ;;  %657 = vst [vmem:[%s10068_s26 + $0x7e0] sm:$0xff] %v656_v60  ;;  %659 = vst [vmem:[%s10068_s26 + $0x7e8] sm:$0xff] %v658_v61  ;;  %v662_v63 = vld [vmem:[%s10060_s25 + $0x1fc8] sm:$0xff] }
  0x91   : > { %661 = vst [vmem:[%s10068_s26 + $0x7f0] sm:$0xff] %v660_v62  ;;  %v664_v0 = vld [vmem:[%s10060_s25 + $0x2000] sm:$0xff]  ;;  %v666_v1 = vld [vmem:[%s10060_s25 + $0x2008] sm:$0xff]  ;;  %663 = vst [vmem:[%s10068_s26 + $0x7f8] sm:$0xff] %v662_v63 }
  0x92   : > { %665 = vst [vmem:[%s10068_s26 + $0x800] sm:$0xff] %v664_v0  ;;  %667 = vst [vmem:[%s10068_s26 + $0x808] sm:$0xff] %v666_v1  ;;  %v668_v2 = vld [vmem:[%s10060_s25 + $0x2040] sm:$0xff]  ;;  %v670_v3 = vld [vmem:[%s10060_s25 + $0x2048] sm:$0xff] }
  0x93   : > { %v672_v4 = vld [vmem:[%s10060_s25 + $0x2080] sm:$0xff]  ;;  %669 = vst [vmem:[%s10068_s26 + $0x810] sm:$0xff] %v668_v2  ;;  %671 = vst [vmem:[%s10068_s26 + $0x818] sm:$0xff] %v670_v3  ;;  %v674_v5 = vld [vmem:[%s10060_s25 + $0x2088] sm:$0xff] }
  0x94   : > { %673 = vst [vmem:[%s10068_s26 + $0x820] sm:$0xff] %v672_v4  ;;  %v676_v6 = vld [vmem:[%s10060_s25 + $0x20c0] sm:$0xff]  ;;  %v678_v7 = vld [vmem:[%s10060_s25 + $0x20c8] sm:$0xff]  ;;  %675 = vst [vmem:[%s10068_s26 + $0x828] sm:$0xff] %v674_v5 }
  0x95   : > { %677 = vst [vmem:[%s10068_s26 + $0x830] sm:$0xff] %v676_v6  ;;  %679 = vst [vmem:[%s10068_s26 + $0x838] sm:$0xff] %v678_v7  ;;  %v680_v8 = vld [vmem:[%s10060_s25 + $0x2100] sm:$0xff]  ;;  %v682_v9 = vld [vmem:[%s10060_s25 + $0x2108] sm:$0xff] }
  0x96   : > { %v684_v10 = vld [vmem:[%s10060_s25 + $0x2140] sm:$0xff]  ;;  %681 = vst [vmem:[%s10068_s26 + $0x840] sm:$0xff] %v680_v8  ;;  %683 = vst [vmem:[%s10068_s26 + $0x848] sm:$0xff] %v682_v9  ;;  %v686_v11 = vld [vmem:[%s10060_s25 + $0x2148] sm:$0xff] }
  0x97   : > { %685 = vst [vmem:[%s10068_s26 + $0x850] sm:$0xff] %v684_v10  ;;  %v688_v12 = vld [vmem:[%s10060_s25 + $0x2180] sm:$0xff]  ;;  %v690_v13 = vld [vmem:[%s10060_s25 + $0x2188] sm:$0xff]  ;;  %687 = vst [vmem:[%s10068_s26 + $0x858] sm:$0xff] %v686_v11 }
  0x98   : > { %689 = vst [vmem:[%s10068_s26 + $0x860] sm:$0xff] %v688_v12  ;;  %691 = vst [vmem:[%s10068_s26 + $0x868] sm:$0xff] %v690_v13  ;;  %v692_v14 = vld [vmem:[%s10060_s25 + $0x21c0] sm:$0xff]  ;;  %v694_v15 = vld [vmem:[%s10060_s25 + $0x21c8] sm:$0xff] }
  0x99   : > { %v696_v16 = vld [vmem:[%s10060_s25 + $0x2200] sm:$0xff]  ;;  %693 = vst [vmem:[%s10068_s26 + $0x870] sm:$0xff] %v692_v14  ;;  %695 = vst [vmem:[%s10068_s26 + $0x878] sm:$0xff] %v694_v15  ;;  %v698_v17 = vld [vmem:[%s10060_s25 + $0x2208] sm:$0xff] }
  0x9a   : > { %697 = vst [vmem:[%s10068_s26 + $0x880] sm:$0xff] %v696_v16  ;;  %v700_v18 = vld [vmem:[%s10060_s25 + $0x2240] sm:$0xff]  ;;  %v702_v19 = vld [vmem:[%s10060_s25 + $0x2248] sm:$0xff]  ;;  %699 = vst [vmem:[%s10068_s26 + $0x888] sm:$0xff] %v698_v17 }
  0x9b   : > { %701 = vst [vmem:[%s10068_s26 + $0x890] sm:$0xff] %v700_v18  ;;  %703 = vst [vmem:[%s10068_s26 + $0x898] sm:$0xff] %v702_v19  ;;  %v704_v20 = vld [vmem:[%s10060_s25 + $0x2280] sm:$0xff]  ;;  %v706_v21 = vld [vmem:[%s10060_s25 + $0x2288] sm:$0xff] }
  0x9c   : > { %v708_v22 = vld [vmem:[%s10060_s25 + $0x22c0] sm:$0xff]  ;;  %705 = vst [vmem:[%s10068_s26 + $0x8a0] sm:$0xff] %v704_v20  ;;  %707 = vst [vmem:[%s10068_s26 + $0x8a8] sm:$0xff] %v706_v21  ;;  %v710_v23 = vld [vmem:[%s10060_s25 + $0x22c8] sm:$0xff] }
  0x9d   : > { %709 = vst [vmem:[%s10068_s26 + $0x8b0] sm:$0xff] %v708_v22  ;;  %v712_v24 = vld [vmem:[%s10060_s25 + $0x2300] sm:$0xff]  ;;  %v714_v25 = vld [vmem:[%s10060_s25 + $0x2308] sm:$0xff]  ;;  %711 = vst [vmem:[%s10068_s26 + $0x8b8] sm:$0xff] %v710_v23 }
  0x9e   : > { %713 = vst [vmem:[%s10068_s26 + $0x8c0] sm:$0xff] %v712_v24  ;;  %715 = vst [vmem:[%s10068_s26 + $0x8c8] sm:$0xff] %v714_v25  ;;  %v716_v26 = vld [vmem:[%s10060_s25 + $0x2340] sm:$0xff]  ;;  %v718_v27 = vld [vmem:[%s10060_s25 + $0x2348] sm:$0xff] }
  0x9f   : > { %v720_v28 = vld [vmem:[%s10060_s25 + $0x2380] sm:$0xff]  ;;  %717 = vst [vmem:[%s10068_s26 + $0x8d0] sm:$0xff] %v716_v26  ;;  %719 = vst [vmem:[%s10068_s26 + $0x8d8] sm:$0xff] %v718_v27  ;;  %v722_v29 = vld [vmem:[%s10060_s25 + $0x2388] sm:$0xff] }
  0xa0   : > { %721 = vst [vmem:[%s10068_s26 + $0x8e0] sm:$0xff] %v720_v28  ;;  %v724_v30 = vld [vmem:[%s10060_s25 + $0x23c0] sm:$0xff]  ;;  %v726_v31 = vld [vmem:[%s10060_s25 + $0x23c8] sm:$0xff]  ;;  %723 = vst [vmem:[%s10068_s26 + $0x8e8] sm:$0xff] %v722_v29 }
  0xa1   : > { %725 = vst [vmem:[%s10068_s26 + $0x8f0] sm:$0xff] %v724_v30  ;;  %727 = vst [vmem:[%s10068_s26 + $0x8f8] sm:$0xff] %v726_v31  ;;  %v728_v32 = vld [vmem:[%s10060_s25 + $0x2400] sm:$0xff]  ;;  %v730_v33 = vld [vmem:[%s10060_s25 + $0x2408] sm:$0xff] }
  0xa2   : > { %v732_v34 = vld [vmem:[%s10060_s25 + $0x2440] sm:$0xff]  ;;  %729 = vst [vmem:[%s10068_s26 + $0x900] sm:$0xff] %v728_v32  ;;  %731 = vst [vmem:[%s10068_s26 + $0x908] sm:$0xff] %v730_v33  ;;  %v734_v35 = vld [vmem:[%s10060_s25 + $0x2448] sm:$0xff] }
  0xa3   : > { %733 = vst [vmem:[%s10068_s26 + $0x910] sm:$0xff] %v732_v34  ;;  %v736_v36 = vld [vmem:[%s10060_s25 + $0x2480] sm:$0xff]  ;;  %v738_v37 = vld [vmem:[%s10060_s25 + $0x2488] sm:$0xff]  ;;  %735 = vst [vmem:[%s10068_s26 + $0x918] sm:$0xff] %v734_v35 }
  0xa4   : > { %737 = vst [vmem:[%s10068_s26 + $0x920] sm:$0xff] %v736_v36  ;;  %739 = vst [vmem:[%s10068_s26 + $0x928] sm:$0xff] %v738_v37  ;;  %v740_v38 = vld [vmem:[%s10060_s25 + $0x24c0] sm:$0xff]  ;;  %v742_v39 = vld [vmem:[%s10060_s25 + $0x24c8] sm:$0xff] }
  0xa5   : > { %v744_v40 = vld [vmem:[%s10060_s25 + $0x2500] sm:$0xff]  ;;  %741 = vst [vmem:[%s10068_s26 + $0x930] sm:$0xff] %v740_v38  ;;  %743 = vst [vmem:[%s10068_s26 + $0x938] sm:$0xff] %v742_v39  ;;  %v746_v41 = vld [vmem:[%s10060_s25 + $0x2508] sm:$0xff] }
  0xa6   : > { %745 = vst [vmem:[%s10068_s26 + $0x940] sm:$0xff] %v744_v40  ;;  %v748_v42 = vld [vmem:[%s10060_s25 + $0x2540] sm:$0xff]  ;;  %v750_v43 = vld [vmem:[%s10060_s25 + $0x2548] sm:$0xff]  ;;  %747 = vst [vmem:[%s10068_s26 + $0x948] sm:$0xff] %v746_v41 }
  0xa7   : > { %749 = vst [vmem:[%s10068_s26 + $0x950] sm:$0xff] %v748_v42  ;;  %751 = vst [vmem:[%s10068_s26 + $0x958] sm:$0xff] %v750_v43  ;;  %v752_v44 = vld [vmem:[%s10060_s25 + $0x2580] sm:$0xff]  ;;  %v754_v45 = vld [vmem:[%s10060_s25 + $0x2588] sm:$0xff] }
  0xa8   : > { %v756_v46 = vld [vmem:[%s10060_s25 + $0x25c0] sm:$0xff]  ;;  %753 = vst [vmem:[%s10068_s26 + $0x960] sm:$0xff] %v752_v44  ;;  %755 = vst [vmem:[%s10068_s26 + $0x968] sm:$0xff] %v754_v45  ;;  %v758_v47 = vld [vmem:[%s10060_s25 + $0x25c8] sm:$0xff] }
  0xa9   : > { %757 = vst [vmem:[%s10068_s26 + $0x970] sm:$0xff] %v756_v46  ;;  %v760_v48 = vld [vmem:[%s10060_s25 + $0x2600] sm:$0xff]  ;;  %v762_v49 = vld [vmem:[%s10060_s25 + $0x2608] sm:$0xff]  ;;  %759 = vst [vmem:[%s10068_s26 + $0x978] sm:$0xff] %v758_v47 }
  0xaa   : > { %761 = vst [vmem:[%s10068_s26 + $0x980] sm:$0xff] %v760_v48  ;;  %763 = vst [vmem:[%s10068_s26 + $0x988] sm:$0xff] %v762_v49  ;;  %v764_v50 = vld [vmem:[%s10060_s25 + $0x2640] sm:$0xff]  ;;  %v766_v51 = vld [vmem:[%s10060_s25 + $0x2648] sm:$0xff] }
  0xab   : > { %v768_v52 = vld [vmem:[%s10060_s25 + $0x2680] sm:$0xff]  ;;  %765 = vst [vmem:[%s10068_s26 + $0x990] sm:$0xff] %v764_v50  ;;  %767 = vst [vmem:[%s10068_s26 + $0x998] sm:$0xff] %v766_v51  ;;  %v770_v53 = vld [vmem:[%s10060_s25 + $0x2688] sm:$0xff] }
  0xac   : > { %769 = vst [vmem:[%s10068_s26 + $0x9a0] sm:$0xff] %v768_v52  ;;  %v772_v54 = vld [vmem:[%s10060_s25 + $0x26c0] sm:$0xff]  ;;  %v774_v55 = vld [vmem:[%s10060_s25 + $0x26c8] sm:$0xff]  ;;  %771 = vst [vmem:[%s10068_s26 + $0x9a8] sm:$0xff] %v770_v53 }
  0xad   : > { %773 = vst [vmem:[%s10068_s26 + $0x9b0] sm:$0xff] %v772_v54  ;;  %775 = vst [vmem:[%s10068_s26 + $0x9b8] sm:$0xff] %v774_v55  ;;  %v776_v56 = vld [vmem:[%s10060_s25 + $0x2700] sm:$0xff]  ;;  %v778_v57 = vld [vmem:[%s10060_s25 + $0x2708] sm:$0xff] }
  0xae   : > { %v780_v58 = vld [vmem:[%s10060_s25 + $0x2740] sm:$0xff]  ;;  %777 = vst [vmem:[%s10068_s26 + $0x9c0] sm:$0xff] %v776_v56  ;;  %779 = vst [vmem:[%s10068_s26 + $0x9c8] sm:$0xff] %v778_v57  ;;  %v782_v59 = vld [vmem:[%s10060_s25 + $0x2748] sm:$0xff] }
  0xaf   : > { %781 = vst [vmem:[%s10068_s26 + $0x9d0] sm:$0xff] %v780_v58  ;;  %v784_v60 = vld [vmem:[%s10060_s25 + $0x2780] sm:$0xff]  ;;  %v786_v61 = vld [vmem:[%s10060_s25 + $0x2788] sm:$0xff]  ;;  %783 = vst [vmem:[%s10068_s26 + $0x9d8] sm:$0xff] %v782_v59 }
  0xb0   : > { %785 = vst [vmem:[%s10068_s26 + $0x9e0] sm:$0xff] %v784_v60  ;;  %787 = vst [vmem:[%s10068_s26 + $0x9e8] sm:$0xff] %v786_v61  ;;  %v788_v62 = vld [vmem:[%s10060_s25 + $0x27c0] sm:$0xff]  ;;  %v790_v63 = vld [vmem:[%s10060_s25 + $0x27c8] sm:$0xff] }
  0xb1   : > { %v792_v0 = vld [vmem:[%s10060_s25 + $0x2800] sm:$0xff]  ;;  %789 = vst [vmem:[%s10068_s26 + $0x9f0] sm:$0xff] %v788_v62  ;;  %791 = vst [vmem:[%s10068_s26 + $0x9f8] sm:$0xff] %v790_v63  ;;  %v794_v1 = vld [vmem:[%s10060_s25 + $0x2808] sm:$0xff] }
  0xb2   : > { %793 = vst [vmem:[%s10068_s26 + $0xa00] sm:$0xff] %v792_v0  ;;  %v796_v2 = vld [vmem:[%s10060_s25 + $0x2840] sm:$0xff]  ;;  %v798_v3 = vld [vmem:[%s10060_s25 + $0x2848] sm:$0xff]  ;;  %795 = vst [vmem:[%s10068_s26 + $0xa08] sm:$0xff] %v794_v1 }
  0xb3   : > { %797 = vst [vmem:[%s10068_s26 + $0xa10] sm:$0xff] %v796_v2  ;;  %799 = vst [vmem:[%s10068_s26 + $0xa18] sm:$0xff] %v798_v3  ;;  %v800_v4 = vld [vmem:[%s10060_s25 + $0x2880] sm:$0xff]  ;;  %v802_v5 = vld [vmem:[%s10060_s25 + $0x2888] sm:$0xff] }
  0xb4   : > { %v804_v6 = vld [vmem:[%s10060_s25 + $0x28c0] sm:$0xff]  ;;  %801 = vst [vmem:[%s10068_s26 + $0xa20] sm:$0xff] %v800_v4  ;;  %803 = vst [vmem:[%s10068_s26 + $0xa28] sm:$0xff] %v802_v5  ;;  %v806_v7 = vld [vmem:[%s10060_s25 + $0x28c8] sm:$0xff] }
  0xb5   : > { %805 = vst [vmem:[%s10068_s26 + $0xa30] sm:$0xff] %v804_v6  ;;  %v808_v8 = vld [vmem:[%s10060_s25 + $0x2900] sm:$0xff]  ;;  %v810_v9 = vld [vmem:[%s10060_s25 + $0x2908] sm:$0xff]  ;;  %807 = vst [vmem:[%s10068_s26 + $0xa38] sm:$0xff] %v806_v7 }
  0xb6   : > { %809 = vst [vmem:[%s10068_s26 + $0xa40] sm:$0xff] %v808_v8  ;;  %811 = vst [vmem:[%s10068_s26 + $0xa48] sm:$0xff] %v810_v9  ;;  %v812_v10 = vld [vmem:[%s10060_s25 + $0x2940] sm:$0xff]  ;;  %v814_v11 = vld [vmem:[%s10060_s25 + $0x2948] sm:$0xff] }
  0xb7   : > { %v816_v12 = vld [vmem:[%s10060_s25 + $0x2980] sm:$0xff]  ;;  %813 = vst [vmem:[%s10068_s26 + $0xa50] sm:$0xff] %v812_v10  ;;  %815 = vst [vmem:[%s10068_s26 + $0xa58] sm:$0xff] %v814_v11  ;;  %v818_v13 = vld [vmem:[%s10060_s25 + $0x2988] sm:$0xff] }
  0xb8   : > { %817 = vst [vmem:[%s10068_s26 + $0xa60] sm:$0xff] %v816_v12  ;;  %v820_v14 = vld [vmem:[%s10060_s25 + $0x29c0] sm:$0xff]  ;;  %v822_v15 = vld [vmem:[%s10060_s25 + $0x29c8] sm:$0xff]  ;;  %819 = vst [vmem:[%s10068_s26 + $0xa68] sm:$0xff] %v818_v13 }
  0xb9   : > { %821 = vst [vmem:[%s10068_s26 + $0xa70] sm:$0xff] %v820_v14  ;;  %823 = vst [vmem:[%s10068_s26 + $0xa78] sm:$0xff] %v822_v15  ;;  %v824_v16 = vld [vmem:[%s10060_s25 + $0x2a00] sm:$0xff]  ;;  %v826_v17 = vld [vmem:[%s10060_s25 + $0x2a08] sm:$0xff] }
  0xba   : > { %v828_v18 = vld [vmem:[%s10060_s25 + $0x2a40] sm:$0xff]  ;;  %825 = vst [vmem:[%s10068_s26 + $0xa80] sm:$0xff] %v824_v16  ;;  %827 = vst [vmem:[%s10068_s26 + $0xa88] sm:$0xff] %v826_v17  ;;  %v830_v19 = vld [vmem:[%s10060_s25 + $0x2a48] sm:$0xff] }
  0xbb   : > { %829 = vst [vmem:[%s10068_s26 + $0xa90] sm:$0xff] %v828_v18  ;;  %v832_v20 = vld [vmem:[%s10060_s25 + $0x2a80] sm:$0xff]  ;;  %v834_v21 = vld [vmem:[%s10060_s25 + $0x2a88] sm:$0xff]  ;;  %831 = vst [vmem:[%s10068_s26 + $0xa98] sm:$0xff] %v830_v19 }
  0xbc   : > { %833 = vst [vmem:[%s10068_s26 + $0xaa0] sm:$0xff] %v832_v20  ;;  %835 = vst [vmem:[%s10068_s26 + $0xaa8] sm:$0xff] %v834_v21  ;;  %v836_v22 = vld [vmem:[%s10060_s25 + $0x2ac0] sm:$0xff]  ;;  %v838_v23 = vld [vmem:[%s10060_s25 + $0x2ac8] sm:$0xff] }
  0xbd   : > { %v840_v24 = vld [vmem:[%s10060_s25 + $0x2b00] sm:$0xff]  ;;  %837 = vst [vmem:[%s10068_s26 + $0xab0] sm:$0xff] %v836_v22  ;;  %839 = vst [vmem:[%s10068_s26 + $0xab8] sm:$0xff] %v838_v23  ;;  %v842_v25 = vld [vmem:[%s10060_s25 + $0x2b08] sm:$0xff] }
  0xbe   : > { %841 = vst [vmem:[%s10068_s26 + $0xac0] sm:$0xff] %v840_v24  ;;  %v844_v26 = vld [vmem:[%s10060_s25 + $0x2b40] sm:$0xff]  ;;  %v846_v27 = vld [vmem:[%s10060_s25 + $0x2b48] sm:$0xff]  ;;  %843 = vst [vmem:[%s10068_s26 + $0xac8] sm:$0xff] %v842_v25 }
  0xbf   : > { %845 = vst [vmem:[%s10068_s26 + $0xad0] sm:$0xff] %v844_v26  ;;  %847 = vst [vmem:[%s10068_s26 + $0xad8] sm:$0xff] %v846_v27  ;;  %v848_v28 = vld [vmem:[%s10060_s25 + $0x2b80] sm:$0xff]  ;;  %v850_v29 = vld [vmem:[%s10060_s25 + $0x2b88] sm:$0xff] }
  0xc0   : > { %v852_v30 = vld [vmem:[%s10060_s25 + $0x2bc0] sm:$0xff]  ;;  %849 = vst [vmem:[%s10068_s26 + $0xae0] sm:$0xff] %v848_v28  ;;  %851 = vst [vmem:[%s10068_s26 + $0xae8] sm:$0xff] %v850_v29  ;;  %v854_v31 = vld [vmem:[%s10060_s25 + $0x2bc8] sm:$0xff] }
  0xc1   : > { %853 = vst [vmem:[%s10068_s26 + $0xaf0] sm:$0xff] %v852_v30  ;;  %v856_v32 = vld [vmem:[%s10060_s25 + $0x2c00] sm:$0xff]  ;;  %v858_v33 = vld [vmem:[%s10060_s25 + $0x2c08] sm:$0xff]  ;;  %855 = vst [vmem:[%s10068_s26 + $0xaf8] sm:$0xff] %v854_v31 }
  0xc2   : > { %857 = vst [vmem:[%s10068_s26 + $0xb00] sm:$0xff] %v856_v32  ;;  %859 = vst [vmem:[%s10068_s26 + $0xb08] sm:$0xff] %v858_v33  ;;  %v860_v34 = vld [vmem:[%s10060_s25 + $0x2c40] sm:$0xff]  ;;  %v862_v35 = vld [vmem:[%s10060_s25 + $0x2c48] sm:$0xff] }
  0xc3   : > { %v864_v36 = vld [vmem:[%s10060_s25 + $0x2c80] sm:$0xff]  ;;  %861 = vst [vmem:[%s10068_s26 + $0xb10] sm:$0xff] %v860_v34  ;;  %863 = vst [vmem:[%s10068_s26 + $0xb18] sm:$0xff] %v862_v35  ;;  %v866_v37 = vld [vmem:[%s10060_s25 + $0x2c88] sm:$0xff] }
  0xc4   : > { %865 = vst [vmem:[%s10068_s26 + $0xb20] sm:$0xff] %v864_v36  ;;  %v868_v38 = vld [vmem:[%s10060_s25 + $0x2cc0] sm:$0xff]  ;;  %v870_v39 = vld [vmem:[%s10060_s25 + $0x2cc8] sm:$0xff]  ;;  %867 = vst [vmem:[%s10068_s26 + $0xb28] sm:$0xff] %v866_v37 }
  0xc5   : > { %869 = vst [vmem:[%s10068_s26 + $0xb30] sm:$0xff] %v868_v38  ;;  %871 = vst [vmem:[%s10068_s26 + $0xb38] sm:$0xff] %v870_v39  ;;  %v872_v40 = vld [vmem:[%s10060_s25 + $0x2d00] sm:$0xff]  ;;  %v874_v41 = vld [vmem:[%s10060_s25 + $0x2d08] sm:$0xff] }
  0xc6   : > { %v876_v42 = vld [vmem:[%s10060_s25 + $0x2d40] sm:$0xff]  ;;  %873 = vst [vmem:[%s10068_s26 + $0xb40] sm:$0xff] %v872_v40  ;;  %875 = vst [vmem:[%s10068_s26 + $0xb48] sm:$0xff] %v874_v41  ;;  %v878_v43 = vld [vmem:[%s10060_s25 + $0x2d48] sm:$0xff] }
  0xc7   : > { %877 = vst [vmem:[%s10068_s26 + $0xb50] sm:$0xff] %v876_v42  ;;  %v880_v44 = vld [vmem:[%s10060_s25 + $0x2d80] sm:$0xff]  ;;  %v882_v45 = vld [vmem:[%s10060_s25 + $0x2d88] sm:$0xff]  ;;  %879 = vst [vmem:[%s10068_s26 + $0xb58] sm:$0xff] %v878_v43 }
  0xc8   : > { %881 = vst [vmem:[%s10068_s26 + $0xb60] sm:$0xff] %v880_v44  ;;  %883 = vst [vmem:[%s10068_s26 + $0xb68] sm:$0xff] %v882_v45  ;;  %v884_v46 = vld [vmem:[%s10060_s25 + $0x2dc0] sm:$0xff]  ;;  %v886_v47 = vld [vmem:[%s10060_s25 + $0x2dc8] sm:$0xff] }
  0xc9   : > { %v888_v48 = vld [vmem:[%s10060_s25 + $0x2e00] sm:$0xff]  ;;  %885 = vst [vmem:[%s10068_s26 + $0xb70] sm:$0xff] %v884_v46  ;;  %887 = vst [vmem:[%s10068_s26 + $0xb78] sm:$0xff] %v886_v47  ;;  %v890_v49 = vld [vmem:[%s10060_s25 + $0x2e08] sm:$0xff] }
  0xca   : > { %889 = vst [vmem:[%s10068_s26 + $0xb80] sm:$0xff] %v888_v48  ;;  %v892_v50 = vld [vmem:[%s10060_s25 + $0x2e40] sm:$0xff]  ;;  %v894_v51 = vld [vmem:[%s10060_s25 + $0x2e48] sm:$0xff]  ;;  %891 = vst [vmem:[%s10068_s26 + $0xb88] sm:$0xff] %v890_v49 }
  0xcb   : > { %893 = vst [vmem:[%s10068_s26 + $0xb90] sm:$0xff] %v892_v50  ;;  %895 = vst [vmem:[%s10068_s26 + $0xb98] sm:$0xff] %v894_v51  ;;  %v896_v52 = vld [vmem:[%s10060_s25 + $0x2e80] sm:$0xff]  ;;  %v898_v53 = vld [vmem:[%s10060_s25 + $0x2e88] sm:$0xff] }
  0xcc   : > { %v900_v54 = vld [vmem:[%s10060_s25 + $0x2ec0] sm:$0xff]  ;;  %897 = vst [vmem:[%s10068_s26 + $0xba0] sm:$0xff] %v896_v52  ;;  %899 = vst [vmem:[%s10068_s26 + $0xba8] sm:$0xff] %v898_v53  ;;  %v902_v55 = vld [vmem:[%s10060_s25 + $0x2ec8] sm:$0xff] }
  0xcd   : > { %901 = vst [vmem:[%s10068_s26 + $0xbb0] sm:$0xff] %v900_v54  ;;  %v904_v56 = vld [vmem:[%s10060_s25 + $0x2f00] sm:$0xff]  ;;  %v906_v57 = vld [vmem:[%s10060_s25 + $0x2f08] sm:$0xff]  ;;  %903 = vst [vmem:[%s10068_s26 + $0xbb8] sm:$0xff] %v902_v55 }
  0xce   : > { %905 = vst [vmem:[%s10068_s26 + $0xbc0] sm:$0xff] %v904_v56  ;;  %907 = vst [vmem:[%s10068_s26 + $0xbc8] sm:$0xff] %v906_v57  ;;  %v908_v58 = vld [vmem:[%s10060_s25 + $0x2f40] sm:$0xff]  ;;  %v910_v59 = vld [vmem:[%s10060_s25 + $0x2f48] sm:$0xff] }
  0xcf   : > { %v912_v60 = vld [vmem:[%s10060_s25 + $0x2f80] sm:$0xff]  ;;  %909 = vst [vmem:[%s10068_s26 + $0xbd0] sm:$0xff] %v908_v58  ;;  %911 = vst [vmem:[%s10068_s26 + $0xbd8] sm:$0xff] %v910_v59  ;;  %v914_v61 = vld [vmem:[%s10060_s25 + $0x2f88] sm:$0xff] }
  0xd0   : > { %913 = vst [vmem:[%s10068_s26 + $0xbe0] sm:$0xff] %v912_v60  ;;  %v916_v62 = vld [vmem:[%s10060_s25 + $0x2fc0] sm:$0xff]  ;;  %v918_v63 = vld [vmem:[%s10060_s25 + $0x2fc8] sm:$0xff]  ;;  %915 = vst [vmem:[%s10068_s26 + $0xbe8] sm:$0xff] %v914_v61 }
  0xd1   : > { %917 = vst [vmem:[%s10068_s26 + $0xbf0] sm:$0xff] %v916_v62  ;;  %919 = vst [vmem:[%s10068_s26 + $0xbf8] sm:$0xff] %v918_v63  ;;  %v920_v0 = vld [vmem:[%s10060_s25 + $0x3000] sm:$0xff]  ;;  %v922_v1 = vld [vmem:[%s10060_s25 + $0x3008] sm:$0xff] }
  0xd2   : > { %v924_v2 = vld [vmem:[%s10060_s25 + $0x3040] sm:$0xff]  ;;  %921 = vst [vmem:[%s10068_s26 + $0xc00] sm:$0xff] %v920_v0  ;;  %923 = vst [vmem:[%s10068_s26 + $0xc08] sm:$0xff] %v922_v1  ;;  %v926_v3 = vld [vmem:[%s10060_s25 + $0x3048] sm:$0xff] }
  0xd3   : > { %925 = vst [vmem:[%s10068_s26 + $0xc10] sm:$0xff] %v924_v2  ;;  %v928_v4 = vld [vmem:[%s10060_s25 + $0x3080] sm:$0xff]  ;;  %v930_v5 = vld [vmem:[%s10060_s25 + $0x3088] sm:$0xff]  ;;  %927 = vst [vmem:[%s10068_s26 + $0xc18] sm:$0xff] %v926_v3 }
  0xd4   : > { %929 = vst [vmem:[%s10068_s26 + $0xc20] sm:$0xff] %v928_v4  ;;  %931 = vst [vmem:[%s10068_s26 + $0xc28] sm:$0xff] %v930_v5  ;;  %v932_v6 = vld [vmem:[%s10060_s25 + $0x30c0] sm:$0xff]  ;;  %v934_v7 = vld [vmem:[%s10060_s25 + $0x30c8] sm:$0xff] }
  0xd5   : > { %v936_v8 = vld [vmem:[%s10060_s25 + $0x3100] sm:$0xff]  ;;  %933 = vst [vmem:[%s10068_s26 + $0xc30] sm:$0xff] %v932_v6  ;;  %935 = vst [vmem:[%s10068_s26 + $0xc38] sm:$0xff] %v934_v7  ;;  %v938_v9 = vld [vmem:[%s10060_s25 + $0x3108] sm:$0xff] }
  0xd6   : > { %937 = vst [vmem:[%s10068_s26 + $0xc40] sm:$0xff] %v936_v8  ;;  %v940_v10 = vld [vmem:[%s10060_s25 + $0x3140] sm:$0xff]  ;;  %v942_v11 = vld [vmem:[%s10060_s25 + $0x3148] sm:$0xff]  ;;  %939 = vst [vmem:[%s10068_s26 + $0xc48] sm:$0xff] %v938_v9 }
  0xd7   : > { %941 = vst [vmem:[%s10068_s26 + $0xc50] sm:$0xff] %v940_v10  ;;  %943 = vst [vmem:[%s10068_s26 + $0xc58] sm:$0xff] %v942_v11  ;;  %v944_v12 = vld [vmem:[%s10060_s25 + $0x3180] sm:$0xff]  ;;  %v946_v13 = vld [vmem:[%s10060_s25 + $0x3188] sm:$0xff] }
  0xd8   : > { %v948_v14 = vld [vmem:[%s10060_s25 + $0x31c0] sm:$0xff]  ;;  %945 = vst [vmem:[%s10068_s26 + $0xc60] sm:$0xff] %v944_v12  ;;  %947 = vst [vmem:[%s10068_s26 + $0xc68] sm:$0xff] %v946_v13  ;;  %v950_v15 = vld [vmem:[%s10060_s25 + $0x31c8] sm:$0xff] }
  0xd9   : > { %949 = vst [vmem:[%s10068_s26 + $0xc70] sm:$0xff] %v948_v14  ;;  %v952_v16 = vld [vmem:[%s10060_s25 + $0x3200] sm:$0xff]  ;;  %v954_v17 = vld [vmem:[%s10060_s25 + $0x3208] sm:$0xff]  ;;  %951 = vst [vmem:[%s10068_s26 + $0xc78] sm:$0xff] %v950_v15 }
  0xda   : > { %953 = vst [vmem:[%s10068_s26 + $0xc80] sm:$0xff] %v952_v16  ;;  %955 = vst [vmem:[%s10068_s26 + $0xc88] sm:$0xff] %v954_v17  ;;  %v956_v18 = vld [vmem:[%s10060_s25 + $0x3240] sm:$0xff]  ;;  %v958_v19 = vld [vmem:[%s10060_s25 + $0x3248] sm:$0xff] }
  0xdb   : > { %v960_v20 = vld [vmem:[%s10060_s25 + $0x3280] sm:$0xff]  ;;  %957 = vst [vmem:[%s10068_s26 + $0xc90] sm:$0xff] %v956_v18  ;;  %959 = vst [vmem:[%s10068_s26 + $0xc98] sm:$0xff] %v958_v19  ;;  %v962_v21 = vld [vmem:[%s10060_s25 + $0x3288] sm:$0xff] }
  0xdc   : > { %961 = vst [vmem:[%s10068_s26 + $0xca0] sm:$0xff] %v960_v20  ;;  %v964_v22 = vld [vmem:[%s10060_s25 + $0x32c0] sm:$0xff]  ;;  %v966_v23 = vld [vmem:[%s10060_s25 + $0x32c8] sm:$0xff]  ;;  %963 = vst [vmem:[%s10068_s26 + $0xca8] sm:$0xff] %v962_v21 }
  0xdd   : > { %965 = vst [vmem:[%s10068_s26 + $0xcb0] sm:$0xff] %v964_v22  ;;  %967 = vst [vmem:[%s10068_s26 + $0xcb8] sm:$0xff] %v966_v23  ;;  %v968_v24 = vld [vmem:[%s10060_s25 + $0x3300] sm:$0xff]  ;;  %v970_v25 = vld [vmem:[%s10060_s25 + $0x3308] sm:$0xff] }
  0xde   : > { %v972_v26 = vld [vmem:[%s10060_s25 + $0x3340] sm:$0xff]  ;;  %969 = vst [vmem:[%s10068_s26 + $0xcc0] sm:$0xff] %v968_v24  ;;  %971 = vst [vmem:[%s10068_s26 + $0xcc8] sm:$0xff] %v970_v25  ;;  %v974_v27 = vld [vmem:[%s10060_s25 + $0x3348] sm:$0xff] }
  0xdf   : > { %973 = vst [vmem:[%s10068_s26 + $0xcd0] sm:$0xff] %v972_v26  ;;  %v976_v28 = vld [vmem:[%s10060_s25 + $0x3380] sm:$0xff]  ;;  %v978_v29 = vld [vmem:[%s10060_s25 + $0x3388] sm:$0xff]  ;;  %975 = vst [vmem:[%s10068_s26 + $0xcd8] sm:$0xff] %v974_v27 }
  0xe0   : > { %977 = vst [vmem:[%s10068_s26 + $0xce0] sm:$0xff] %v976_v28  ;;  %979 = vst [vmem:[%s10068_s26 + $0xce8] sm:$0xff] %v978_v29  ;;  %v980_v30 = vld [vmem:[%s10060_s25 + $0x33c0] sm:$0xff]  ;;  %v982_v31 = vld [vmem:[%s10060_s25 + $0x33c8] sm:$0xff] }
  0xe1   : > { %v984_v32 = vld [vmem:[%s10060_s25 + $0x3400] sm:$0xff]  ;;  %981 = vst [vmem:[%s10068_s26 + $0xcf0] sm:$0xff] %v980_v30  ;;  %983 = vst [vmem:[%s10068_s26 + $0xcf8] sm:$0xff] %v982_v31  ;;  %v986_v33 = vld [vmem:[%s10060_s25 + $0x3408] sm:$0xff] }
  0xe2   : > { %985 = vst [vmem:[%s10068_s26 + $0xd00] sm:$0xff] %v984_v32  ;;  %v988_v34 = vld [vmem:[%s10060_s25 + $0x3440] sm:$0xff]  ;;  %v990_v35 = vld [vmem:[%s10060_s25 + $0x3448] sm:$0xff]  ;;  %987 = vst [vmem:[%s10068_s26 + $0xd08] sm:$0xff] %v986_v33 }
  0xe3   : > { %989 = vst [vmem:[%s10068_s26 + $0xd10] sm:$0xff] %v988_v34  ;;  %991 = vst [vmem:[%s10068_s26 + $0xd18] sm:$0xff] %v990_v35  ;;  %v992_v36 = vld [vmem:[%s10060_s25 + $0x3480] sm:$0xff]  ;;  %v994_v37 = vld [vmem:[%s10060_s25 + $0x3488] sm:$0xff] }
  0xe4   : > { %v996_v38 = vld [vmem:[%s10060_s25 + $0x34c0] sm:$0xff]  ;;  %993 = vst [vmem:[%s10068_s26 + $0xd20] sm:$0xff] %v992_v36  ;;  %995 = vst [vmem:[%s10068_s26 + $0xd28] sm:$0xff] %v994_v37  ;;  %v998_v39 = vld [vmem:[%s10060_s25 + $0x34c8] sm:$0xff] }
  0xe5   : > { %997 = vst [vmem:[%s10068_s26 + $0xd30] sm:$0xff] %v996_v38  ;;  %v1000_v40 = vld [vmem:[%s10060_s25 + $0x3500] sm:$0xff]  ;;  %v1002_v41 = vld [vmem:[%s10060_s25 + $0x3508] sm:$0xff]  ;;  %999 = vst [vmem:[%s10068_s26 + $0xd38] sm:$0xff] %v998_v39 }
  0xe6   : > { %1001 = vst [vmem:[%s10068_s26 + $0xd40] sm:$0xff] %v1000_v40  ;;  %1003 = vst [vmem:[%s10068_s26 + $0xd48] sm:$0xff] %v1002_v41  ;;  %v1004_v42 = vld [vmem:[%s10060_s25 + $0x3540] sm:$0xff]  ;;  %v1006_v43 = vld [vmem:[%s10060_s25 + $0x3548] sm:$0xff] }
  0xe7   : > { %v1008_v44 = vld [vmem:[%s10060_s25 + $0x3580] sm:$0xff]  ;;  %1005 = vst [vmem:[%s10068_s26 + $0xd50] sm:$0xff] %v1004_v42  ;;  %1007 = vst [vmem:[%s10068_s26 + $0xd58] sm:$0xff] %v1006_v43  ;;  %v1010_v45 = vld [vmem:[%s10060_s25 + $0x3588] sm:$0xff] }
  0xe8   : > { %1009 = vst [vmem:[%s10068_s26 + $0xd60] sm:$0xff] %v1008_v44  ;;  %v1012_v46 = vld [vmem:[%s10060_s25 + $0x35c0] sm:$0xff]  ;;  %v1014_v47 = vld [vmem:[%s10060_s25 + $0x35c8] sm:$0xff]  ;;  %1011 = vst [vmem:[%s10068_s26 + $0xd68] sm:$0xff] %v1010_v45 }
  0xe9   : > { %1013 = vst [vmem:[%s10068_s26 + $0xd70] sm:$0xff] %v1012_v46  ;;  %1015 = vst [vmem:[%s10068_s26 + $0xd78] sm:$0xff] %v1014_v47  ;;  %v1016_v48 = vld [vmem:[%s10060_s25 + $0x3600] sm:$0xff]  ;;  %v1018_v49 = vld [vmem:[%s10060_s25 + $0x3608] sm:$0xff] }
  0xea   : > { %v1020_v50 = vld [vmem:[%s10060_s25 + $0x3640] sm:$0xff]  ;;  %1017 = vst [vmem:[%s10068_s26 + $0xd80] sm:$0xff] %v1016_v48  ;;  %1019 = vst [vmem:[%s10068_s26 + $0xd88] sm:$0xff] %v1018_v49  ;;  %v1022_v51 = vld [vmem:[%s10060_s25 + $0x3648] sm:$0xff] }
  0xeb   : > { %1021 = vst [vmem:[%s10068_s26 + $0xd90] sm:$0xff] %v1020_v50  ;;  %v1024_v52 = vld [vmem:[%s10060_s25 + $0x3680] sm:$0xff]  ;;  %v1026_v53 = vld [vmem:[%s10060_s25 + $0x3688] sm:$0xff]  ;;  %1023 = vst [vmem:[%s10068_s26 + $0xd98] sm:$0xff] %v1022_v51 }
  0xec   : > { %1025 = vst [vmem:[%s10068_s26 + $0xda0] sm:$0xff] %v1024_v52  ;;  %1027 = vst [vmem:[%s10068_s26 + $0xda8] sm:$0xff] %v1026_v53  ;;  %v1028_v54 = vld [vmem:[%s10060_s25 + $0x36c0] sm:$0xff]  ;;  %v1030_v55 = vld [vmem:[%s10060_s25 + $0x36c8] sm:$0xff] }
  0xed   : > { %v1032_v56 = vld [vmem:[%s10060_s25 + $0x3700] sm:$0xff]  ;;  %1029 = vst [vmem:[%s10068_s26 + $0xdb0] sm:$0xff] %v1028_v54  ;;  %1031 = vst [vmem:[%s10068_s26 + $0xdb8] sm:$0xff] %v1030_v55  ;;  %v1034_v57 = vld [vmem:[%s10060_s25 + $0x3708] sm:$0xff] }
  0xee   : > { %1033 = vst [vmem:[%s10068_s26 + $0xdc0] sm:$0xff] %v1032_v56  ;;  %v1036_v58 = vld [vmem:[%s10060_s25 + $0x3740] sm:$0xff]  ;;  %v1038_v59 = vld [vmem:[%s10060_s25 + $0x3748] sm:$0xff]  ;;  %1035 = vst [vmem:[%s10068_s26 + $0xdc8] sm:$0xff] %v1034_v57 }
  0xef   : > { %1037 = vst [vmem:[%s10068_s26 + $0xdd0] sm:$0xff] %v1036_v58  ;;  %1039 = vst [vmem:[%s10068_s26 + $0xdd8] sm:$0xff] %v1038_v59  ;;  %v1040_v60 = vld [vmem:[%s10060_s25 + $0x3780] sm:$0xff]  ;;  %v1042_v61 = vld [vmem:[%s10060_s25 + $0x3788] sm:$0xff] }
  0xf0   : > { %v1044_v62 = vld [vmem:[%s10060_s25 + $0x37c0] sm:$0xff]  ;;  %1041 = vst [vmem:[%s10068_s26 + $0xde0] sm:$0xff] %v1040_v60  ;;  %1043 = vst [vmem:[%s10068_s26 + $0xde8] sm:$0xff] %v1042_v61  ;;  %v1046_v63 = vld [vmem:[%s10060_s25 + $0x37c8] sm:$0xff] }
  0xf1   : > { %1045 = vst [vmem:[%s10068_s26 + $0xdf0] sm:$0xff] %v1044_v62  ;;  %v1048_v0 = vld [vmem:[%s10060_s25 + $0x3800] sm:$0xff]  ;;  %v1050_v1 = vld [vmem:[%s10060_s25 + $0x3808] sm:$0xff]  ;;  %1047 = vst [vmem:[%s10068_s26 + $0xdf8] sm:$0xff] %v1046_v63 }
  0xf2   : > { %1049 = vst [vmem:[%s10068_s26 + $0xe00] sm:$0xff] %v1048_v0  ;;  %1051 = vst [vmem:[%s10068_s26 + $0xe08] sm:$0xff] %v1050_v1  ;;  %v1052_v2 = vld [vmem:[%s10060_s25 + $0x3840] sm:$0xff]  ;;  %v1054_v3 = vld [vmem:[%s10060_s25 + $0x3848] sm:$0xff] }
  0xf3   : > { %v1056_v4 = vld [vmem:[%s10060_s25 + $0x3880] sm:$0xff]  ;;  %1053 = vst [vmem:[%s10068_s26 + $0xe10] sm:$0xff] %v1052_v2  ;;  %1055 = vst [vmem:[%s10068_s26 + $0xe18] sm:$0xff] %v1054_v3  ;;  %v1058_v5 = vld [vmem:[%s10060_s25 + $0x3888] sm:$0xff] }
  0xf4   : > { %1057 = vst [vmem:[%s10068_s26 + $0xe20] sm:$0xff] %v1056_v4  ;;  %v1060_v6 = vld [vmem:[%s10060_s25 + $0x38c0] sm:$0xff]  ;;  %v1062_v7 = vld [vmem:[%s10060_s25 + $0x38c8] sm:$0xff]  ;;  %1059 = vst [vmem:[%s10068_s26 + $0xe28] sm:$0xff] %v1058_v5 }
  0xf5   : > { %1061 = vst [vmem:[%s10068_s26 + $0xe30] sm:$0xff] %v1060_v6  ;;  %1063 = vst [vmem:[%s10068_s26 + $0xe38] sm:$0xff] %v1062_v7  ;;  %v1064_v8 = vld [vmem:[%s10060_s25 + $0x3900] sm:$0xff]  ;;  %v1066_v9 = vld [vmem:[%s10060_s25 + $0x3908] sm:$0xff] }
  0xf6   : > { %v1068_v10 = vld [vmem:[%s10060_s25 + $0x3940] sm:$0xff]  ;;  %1065 = vst [vmem:[%s10068_s26 + $0xe40] sm:$0xff] %v1064_v8  ;;  %1067 = vst [vmem:[%s10068_s26 + $0xe48] sm:$0xff] %v1066_v9  ;;  %v1070_v11 = vld [vmem:[%s10060_s25 + $0x3948] sm:$0xff] }
  0xf7   : > { %1069 = vst [vmem:[%s10068_s26 + $0xe50] sm:$0xff] %v1068_v10  ;;  %v1072_v12 = vld [vmem:[%s10060_s25 + $0x3980] sm:$0xff]  ;;  %v1074_v13 = vld [vmem:[%s10060_s25 + $0x3988] sm:$0xff]  ;;  %1071 = vst [vmem:[%s10068_s26 + $0xe58] sm:$0xff] %v1070_v11 }
  0xf8   : > { %1073 = vst [vmem:[%s10068_s26 + $0xe60] sm:$0xff] %v1072_v12  ;;  %1075 = vst [vmem:[%s10068_s26 + $0xe68] sm:$0xff] %v1074_v13  ;;  %v1076_v14 = vld [vmem:[%s10060_s25 + $0x39c0] sm:$0xff]  ;;  %v1078_v15 = vld [vmem:[%s10060_s25 + $0x39c8] sm:$0xff] }
  0xf9   : > { %v1080_v16 = vld [vmem:[%s10060_s25 + $0x3a00] sm:$0xff]  ;;  %1077 = vst [vmem:[%s10068_s26 + $0xe70] sm:$0xff] %v1076_v14  ;;  %1079 = vst [vmem:[%s10068_s26 + $0xe78] sm:$0xff] %v1078_v15  ;;  %v1082_v17 = vld [vmem:[%s10060_s25 + $0x3a08] sm:$0xff] }
  0xfa   : > { %1081 = vst [vmem:[%s10068_s26 + $0xe80] sm:$0xff] %v1080_v16  ;;  %v1084_v18 = vld [vmem:[%s10060_s25 + $0x3a40] sm:$0xff]  ;;  %v1086_v19 = vld [vmem:[%s10060_s25 + $0x3a48] sm:$0xff]  ;;  %1083 = vst [vmem:[%s10068_s26 + $0xe88] sm:$0xff] %v1082_v17 }
  0xfb   : > { %1085 = vst [vmem:[%s10068_s26 + $0xe90] sm:$0xff] %v1084_v18  ;;  %1087 = vst [vmem:[%s10068_s26 + $0xe98] sm:$0xff] %v1086_v19  ;;  %v1088_v20 = vld [vmem:[%s10060_s25 + $0x3a80] sm:$0xff]  ;;  %v1090_v21 = vld [vmem:[%s10060_s25 + $0x3a88] sm:$0xff] }
  0xfc   : > { %v1092_v22 = vld [vmem:[%s10060_s25 + $0x3ac0] sm:$0xff]  ;;  %1089 = vst [vmem:[%s10068_s26 + $0xea0] sm:$0xff] %v1088_v20  ;;  %1091 = vst [vmem:[%s10068_s26 + $0xea8] sm:$0xff] %v1090_v21  ;;  %v1094_v23 = vld [vmem:[%s10060_s25 + $0x3ac8] sm:$0xff] }
  0xfd   : > { %1093 = vst [vmem:[%s10068_s26 + $0xeb0] sm:$0xff] %v1092_v22  ;;  %v1096_v24 = vld [vmem:[%s10060_s25 + $0x3b00] sm:$0xff]  ;;  %v1098_v25 = vld [vmem:[%s10060_s25 + $0x3b08] sm:$0xff]  ;;  %1095 = vst [vmem:[%s10068_s26 + $0xeb8] sm:$0xff] %v1094_v23 }
  0xfe   : > { %1097 = vst [vmem:[%s10068_s26 + $0xec0] sm:$0xff] %v1096_v24  ;;  %1099 = vst [vmem:[%s10068_s26 + $0xec8] sm:$0xff] %v1098_v25  ;;  %v1100_v26 = vld [vmem:[%s10060_s25 + $0x3b40] sm:$0xff]  ;;  %v1102_v27 = vld [vmem:[%s10060_s25 + $0x3b48] sm:$0xff] }
  0xff   : > { %v1104_v28 = vld [vmem:[%s10060_s25 + $0x3b80] sm:$0xff]  ;;  %1101 = vst [vmem:[%s10068_s26 + $0xed0] sm:$0xff] %v1100_v26  ;;  %1103 = vst [vmem:[%s10068_s26 + $0xed8] sm:$0xff] %v1102_v27  ;;  %v1106_v29 = vld [vmem:[%s10060_s25 + $0x3b88] sm:$0xff] }
 0x100   : > { %1105 = vst [vmem:[%s10068_s26 + $0xee0] sm:$0xff] %v1104_v28  ;;  %v1108_v30 = vld [vmem:[%s10060_s25 + $0x3bc0] sm:$0xff]  ;;  %v1110_v31 = vld [vmem:[%s10060_s25 + $0x3bc8] sm:$0xff]  ;;  %1107 = vst [vmem:[%s10068_s26 + $0xee8] sm:$0xff] %v1106_v29 }
 0x101   : > { %1109 = vst [vmem:[%s10068_s26 + $0xef0] sm:$0xff] %v1108_v30  ;;  %1111 = vst [vmem:[%s10068_s26 + $0xef8] sm:$0xff] %v1110_v31  ;;  %v1112_v32 = vld [vmem:[%s10060_s25 + $0x3c00] sm:$0xff]  ;;  %v1114_v33 = vld [vmem:[%s10060_s25 + $0x3c08] sm:$0xff] }
 0x102   : > { %v1116_v34 = vld [vmem:[%s10060_s25 + $0x3c40] sm:$0xff]  ;;  %1113 = vst [vmem:[%s10068_s26 + $0xf00] sm:$0xff] %v1112_v32  ;;  %1115 = vst [vmem:[%s10068_s26 + $0xf08] sm:$0xff] %v1114_v33  ;;  %v1118_v35 = vld [vmem:[%s10060_s25 + $0x3c48] sm:$0xff] }
 0x103   : > { %1117 = vst [vmem:[%s10068_s26 + $0xf10] sm:$0xff] %v1116_v34  ;;  %v1120_v36 = vld [vmem:[%s10060_s25 + $0x3c80] sm:$0xff]  ;;  %v1122_v37 = vld [vmem:[%s10060_s25 + $0x3c88] sm:$0xff]  ;;  %1119 = vst [vmem:[%s10068_s26 + $0xf18] sm:$0xff] %v1118_v35 }
 0x104   : > { %1121 = vst [vmem:[%s10068_s26 + $0xf20] sm:$0xff] %v1120_v36  ;;  %1123 = vst [vmem:[%s10068_s26 + $0xf28] sm:$0xff] %v1122_v37  ;;  %v1124_v38 = vld [vmem:[%s10060_s25 + $0x3cc0] sm:$0xff]  ;;  %v1126_v39 = vld [vmem:[%s10060_s25 + $0x3cc8] sm:$0xff] }
 0x105   : > { %v1128_v40 = vld [vmem:[%s10060_s25 + $0x3d00] sm:$0xff]  ;;  %1125 = vst [vmem:[%s10068_s26 + $0xf30] sm:$0xff] %v1124_v38  ;;  %1127 = vst [vmem:[%s10068_s26 + $0xf38] sm:$0xff] %v1126_v39  ;;  %v1130_v41 = vld [vmem:[%s10060_s25 + $0x3d08] sm:$0xff] }
 0x106   : > { %1129 = vst [vmem:[%s10068_s26 + $0xf40] sm:$0xff] %v1128_v40  ;;  %v1132_v42 = vld [vmem:[%s10060_s25 + $0x3d40] sm:$0xff]  ;;  %v1134_v43 = vld [vmem:[%s10060_s25 + $0x3d48] sm:$0xff]  ;;  %1131 = vst [vmem:[%s10068_s26 + $0xf48] sm:$0xff] %v1130_v41 }
 0x107   : > { %1133 = vst [vmem:[%s10068_s26 + $0xf50] sm:$0xff] %v1132_v42  ;;  %1135 = vst [vmem:[%s10068_s26 + $0xf58] sm:$0xff] %v1134_v43  ;;  %v1136_v44 = vld [vmem:[%s10060_s25 + $0x3d80] sm:$0xff]  ;;  %v1138_v45 = vld [vmem:[%s10060_s25 + $0x3d88] sm:$0xff] }
 0x108   : > { %v1140_v46 = vld [vmem:[%s10060_s25 + $0x3dc0] sm:$0xff]  ;;  %1137 = vst [vmem:[%s10068_s26 + $0xf60] sm:$0xff] %v1136_v44  ;;  %1139 = vst [vmem:[%s10068_s26 + $0xf68] sm:$0xff] %v1138_v45  ;;  %v1142_v47 = vld [vmem:[%s10060_s25 + $0x3dc8] sm:$0xff] }
 0x109   : > { %1141 = vst [vmem:[%s10068_s26 + $0xf70] sm:$0xff] %v1140_v46  ;;  %v1144_v48 = vld [vmem:[%s10060_s25 + $0x3e00] sm:$0xff]  ;;  %v1146_v49 = vld [vmem:[%s10060_s25 + $0x3e08] sm:$0xff]  ;;  %1143 = vst [vmem:[%s10068_s26 + $0xf78] sm:$0xff] %v1142_v47 }
 0x10a   : > { %1145 = vst [vmem:[%s10068_s26 + $0xf80] sm:$0xff] %v1144_v48  ;;  %1147 = vst [vmem:[%s10068_s26 + $0xf88] sm:$0xff] %v1146_v49  ;;  %v1148_v50 = vld [vmem:[%s10060_s25 + $0x3e40] sm:$0xff]  ;;  %v1150_v51 = vld [vmem:[%s10060_s25 + $0x3e48] sm:$0xff] }
 0x10b   : > { %v1152_v52 = vld [vmem:[%s10060_s25 + $0x3e80] sm:$0xff]  ;;  %1149 = vst [vmem:[%s10068_s26 + $0xf90] sm:$0xff] %v1148_v50  ;;  %1151 = vst [vmem:[%s10068_s26 + $0xf98] sm:$0xff] %v1150_v51  ;;  %v1154_v53 = vld [vmem:[%s10060_s25 + $0x3e88] sm:$0xff] }
 0x10c   : > { %1153 = vst [vmem:[%s10068_s26 + $0xfa0] sm:$0xff] %v1152_v52  ;;  %v1156_v54 = vld [vmem:[%s10060_s25 + $0x3ec0] sm:$0xff]  ;;  %v1158_v55 = vld [vmem:[%s10060_s25 + $0x3ec8] sm:$0xff]  ;;  %1155 = vst [vmem:[%s10068_s26 + $0xfa8] sm:$0xff] %v1154_v53 }
 0x10d   : > { %1157 = vst [vmem:[%s10068_s26 + $0xfb0] sm:$0xff] %v1156_v54  ;;  %1159 = vst [vmem:[%s10068_s26 + $0xfb8] sm:$0xff] %v1158_v55  ;;  %v1160_v56 = vld [vmem:[%s10060_s25 + $0x3f00] sm:$0xff]  ;;  %v1162_v57 = vld [vmem:[%s10060_s25 + $0x3f08] sm:$0xff] }
 0x10e   : > { %v1164_v58 = vld [vmem:[%s10060_s25 + $0x3f40] sm:$0xff]  ;;  %1161 = vst [vmem:[%s10068_s26 + $0xfc0] sm:$0xff] %v1160_v56  ;;  %1163 = vst [vmem:[%s10068_s26 + $0xfc8] sm:$0xff] %v1162_v57  ;;  %v1166_v59 = vld [vmem:[%s10060_s25 + $0x3f48] sm:$0xff] }
 0x10f   : > { %1165 = vst [vmem:[%s10068_s26 + $0xfd0] sm:$0xff] %v1164_v58  ;;  %v1168_v60 = vld [vmem:[%s10060_s25 + $0x3f80] sm:$0xff]  ;;  %v1170_v61 = vld [vmem:[%s10060_s25 + $0x3f88] sm:$0xff]  ;;  %1167 = vst [vmem:[%s10068_s26 + $0xfd8] sm:$0xff] %v1166_v59 }
 0x110   : > { %1169 = vst [vmem:[%s10068_s26 + $0xfe0] sm:$0xff] %v1168_v60  ;;  %1171 = vst [vmem:[%s10068_s26 + $0xfe8] sm:$0xff] %v1170_v61  ;;  %v1172_v62 = vld [vmem:[%s10060_s25 + $0x3fc0] sm:$0xff]  ;;  %v1174_v63 = vld [vmem:[%s10060_s25 + $0x3fc8] sm:$0xff] }
 0x111   : > { %v1176_v0 = vld [vmem:[%s10060_s25 + $0x4000] sm:$0xff]  ;;  %1173 = vst [vmem:[%s10068_s26 + $0xff0] sm:$0xff] %v1172_v62  ;;  %1175 = vst [vmem:[%s10068_s26 + $0xff8] sm:$0xff] %v1174_v63  ;;  %v1178_v1 = vld [vmem:[%s10060_s25 + $0x4008] sm:$0xff] }
 0x112   : > { %1177 = vst [vmem:[%s10068_s26 + $0x1000] sm:$0xff] %v1176_v0  ;;  %v1180_v2 = vld [vmem:[%s10060_s25 + $0x4040] sm:$0xff]  ;;  %v1182_v3 = vld [vmem:[%s10060_s25 + $0x4048] sm:$0xff]  ;;  %1179 = vst [vmem:[%s10068_s26 + $0x1008] sm:$0xff] %v1178_v1 }
 0x113   : > { %1181 = vst [vmem:[%s10068_s26 + $0x1010] sm:$0xff] %v1180_v2  ;;  %1183 = vst [vmem:[%s10068_s26 + $0x1018] sm:$0xff] %v1182_v3  ;;  %v1184_v4 = vld [vmem:[%s10060_s25 + $0x4080] sm:$0xff]  ;;  %v1186_v5 = vld [vmem:[%s10060_s25 + $0x4088] sm:$0xff] }
 0x114   : > { %v1188_v6 = vld [vmem:[%s10060_s25 + $0x40c0] sm:$0xff]  ;;  %1185 = vst [vmem:[%s10068_s26 + $0x1020] sm:$0xff] %v1184_v4  ;;  %1187 = vst [vmem:[%s10068_s26 + $0x1028] sm:$0xff] %v1186_v5  ;;  %v1190_v7 = vld [vmem:[%s10060_s25 + $0x40c8] sm:$0xff] }
 0x115   : > { %1189 = vst [vmem:[%s10068_s26 + $0x1030] sm:$0xff] %v1188_v6  ;;  %v1192_v8 = vld [vmem:[%s10060_s25 + $0x4100] sm:$0xff]  ;;  %v1194_v9 = vld [vmem:[%s10060_s25 + $0x4108] sm:$0xff]  ;;  %1191 = vst [vmem:[%s10068_s26 + $0x1038] sm:$0xff] %v1190_v7 }
 0x116   : > { %1193 = vst [vmem:[%s10068_s26 + $0x1040] sm:$0xff] %v1192_v8  ;;  %1195 = vst [vmem:[%s10068_s26 + $0x1048] sm:$0xff] %v1194_v9  ;;  %v1196_v10 = vld [vmem:[%s10060_s25 + $0x4140] sm:$0xff]  ;;  %v1198_v11 = vld [vmem:[%s10060_s25 + $0x4148] sm:$0xff] }
 0x117   : > { %v1200_v12 = vld [vmem:[%s10060_s25 + $0x4180] sm:$0xff]  ;;  %1197 = vst [vmem:[%s10068_s26 + $0x1050] sm:$0xff] %v1196_v10  ;;  %1199 = vst [vmem:[%s10068_s26 + $0x1058] sm:$0xff] %v1198_v11  ;;  %v1202_v13 = vld [vmem:[%s10060_s25 + $0x4188] sm:$0xff] }
 0x118   : > { %1201 = vst [vmem:[%s10068_s26 + $0x1060] sm:$0xff] %v1200_v12  ;;  %v1204_v14 = vld [vmem:[%s10060_s25 + $0x41c0] sm:$0xff]  ;;  %v1206_v15 = vld [vmem:[%s10060_s25 + $0x41c8] sm:$0xff]  ;;  %1203 = vst [vmem:[%s10068_s26 + $0x1068] sm:$0xff] %v1202_v13 }
 0x119   : > { %1205 = vst [vmem:[%s10068_s26 + $0x1070] sm:$0xff] %v1204_v14  ;;  %1207 = vst [vmem:[%s10068_s26 + $0x1078] sm:$0xff] %v1206_v15  ;;  %v1208_v16 = vld [vmem:[%s10060_s25 + $0x4200] sm:$0xff]  ;;  %v1210_v17 = vld [vmem:[%s10060_s25 + $0x4208] sm:$0xff] }
 0x11a   : > { %v1212_v18 = vld [vmem:[%s10060_s25 + $0x4240] sm:$0xff]  ;;  %1209 = vst [vmem:[%s10068_s26 + $0x1080] sm:$0xff] %v1208_v16  ;;  %1211 = vst [vmem:[%s10068_s26 + $0x1088] sm:$0xff] %v1210_v17  ;;  %v1214_v19 = vld [vmem:[%s10060_s25 + $0x4248] sm:$0xff] }
 0x11b   : > { %1213 = vst [vmem:[%s10068_s26 + $0x1090] sm:$0xff] %v1212_v18  ;;  %v1216_v20 = vld [vmem:[%s10060_s25 + $0x4280] sm:$0xff]  ;;  %v1218_v21 = vld [vmem:[%s10060_s25 + $0x4288] sm:$0xff]  ;;  %1215 = vst [vmem:[%s10068_s26 + $0x1098] sm:$0xff] %v1214_v19 }
 0x11c   : > { %1217 = vst [vmem:[%s10068_s26 + $0x10a0] sm:$0xff] %v1216_v20  ;;  %1219 = vst [vmem:[%s10068_s26 + $0x10a8] sm:$0xff] %v1218_v21  ;;  %v1220_v22 = vld [vmem:[%s10060_s25 + $0x42c0] sm:$0xff]  ;;  %v1222_v23 = vld [vmem:[%s10060_s25 + $0x42c8] sm:$0xff] }
 0x11d   : > { %v1224_v24 = vld [vmem:[%s10060_s25 + $0x4300] sm:$0xff]  ;;  %1221 = vst [vmem:[%s10068_s26 + $0x10b0] sm:$0xff] %v1220_v22  ;;  %1223 = vst [vmem:[%s10068_s26 + $0x10b8] sm:$0xff] %v1222_v23  ;;  %v1226_v25 = vld [vmem:[%s10060_s25 + $0x4308] sm:$0xff] }
 0x11e   : > { %1225 = vst [vmem:[%s10068_s26 + $0x10c0] sm:$0xff] %v1224_v24  ;;  %v1228_v26 = vld [vmem:[%s10060_s25 + $0x4340] sm:$0xff]  ;;  %v1230_v27 = vld [vmem:[%s10060_s25 + $0x4348] sm:$0xff]  ;;  %1227 = vst [vmem:[%s10068_s26 + $0x10c8] sm:$0xff] %v1226_v25 }
 0x11f   : > { %1229 = vst [vmem:[%s10068_s26 + $0x10d0] sm:$0xff] %v1228_v26  ;;  %1231 = vst [vmem:[%s10068_s26 + $0x10d8] sm:$0xff] %v1230_v27  ;;  %v1232_v28 = vld [vmem:[%s10060_s25 + $0x4380] sm:$0xff]  ;;  %v1234_v29 = vld [vmem:[%s10060_s25 + $0x4388] sm:$0xff] }
 0x120   : > { %v1236_v30 = vld [vmem:[%s10060_s25 + $0x43c0] sm:$0xff]  ;;  %1233 = vst [vmem:[%s10068_s26 + $0x10e0] sm:$0xff] %v1232_v28  ;;  %1235 = vst [vmem:[%s10068_s26 + $0x10e8] sm:$0xff] %v1234_v29  ;;  %v1238_v31 = vld [vmem:[%s10060_s25 + $0x43c8] sm:$0xff] }
 0x121   : > { %1237 = vst [vmem:[%s10068_s26 + $0x10f0] sm:$0xff] %v1236_v30  ;;  %v1240_v32 = vld [vmem:[%s10060_s25 + $0x4400] sm:$0xff]  ;;  %v1242_v33 = vld [vmem:[%s10060_s25 + $0x4408] sm:$0xff]  ;;  %1239 = vst [vmem:[%s10068_s26 + $0x10f8] sm:$0xff] %v1238_v31 }
 0x122   : > { %1241 = vst [vmem:[%s10068_s26 + $0x1100] sm:$0xff] %v1240_v32  ;;  %1243 = vst [vmem:[%s10068_s26 + $0x1108] sm:$0xff] %v1242_v33  ;;  %v1244_v34 = vld [vmem:[%s10060_s25 + $0x4440] sm:$0xff]  ;;  %v1246_v35 = vld [vmem:[%s10060_s25 + $0x4448] sm:$0xff] }
 0x123   : > { %v1248_v36 = vld [vmem:[%s10060_s25 + $0x4480] sm:$0xff]  ;;  %1245 = vst [vmem:[%s10068_s26 + $0x1110] sm:$0xff] %v1244_v34  ;;  %1247 = vst [vmem:[%s10068_s26 + $0x1118] sm:$0xff] %v1246_v35  ;;  %v1250_v37 = vld [vmem:[%s10060_s25 + $0x4488] sm:$0xff] }
 0x124   : > { %1249 = vst [vmem:[%s10068_s26 + $0x1120] sm:$0xff] %v1248_v36  ;;  %v1252_v38 = vld [vmem:[%s10060_s25 + $0x44c0] sm:$0xff]  ;;  %v1254_v39 = vld [vmem:[%s10060_s25 + $0x44c8] sm:$0xff]  ;;  %1251 = vst [vmem:[%s10068_s26 + $0x1128] sm:$0xff] %v1250_v37 }
 0x125   : > { %1253 = vst [vmem:[%s10068_s26 + $0x1130] sm:$0xff] %v1252_v38  ;;  %1255 = vst [vmem:[%s10068_s26 + $0x1138] sm:$0xff] %v1254_v39  ;;  %v1256_v40 = vld [vmem:[%s10060_s25 + $0x4500] sm:$0xff]  ;;  %v1258_v41 = vld [vmem:[%s10060_s25 + $0x4508] sm:$0xff] }
 0x126   : > { %v1260_v42 = vld [vmem:[%s10060_s25 + $0x4540] sm:$0xff]  ;;  %1257 = vst [vmem:[%s10068_s26 + $0x1140] sm:$0xff] %v1256_v40  ;;  %1259 = vst [vmem:[%s10068_s26 + $0x1148] sm:$0xff] %v1258_v41  ;;  %v1262_v43 = vld [vmem:[%s10060_s25 + $0x4548] sm:$0xff] }
 0x127   : > { %1261 = vst [vmem:[%s10068_s26 + $0x1150] sm:$0xff] %v1260_v42  ;;  %v1264_v44 = vld [vmem:[%s10060_s25 + $0x4580] sm:$0xff]  ;;  %v1266_v45 = vld [vmem:[%s10060_s25 + $0x4588] sm:$0xff]  ;;  %1263 = vst [vmem:[%s10068_s26 + $0x1158] sm:$0xff] %v1262_v43 }
 0x128   : > { %1265 = vst [vmem:[%s10068_s26 + $0x1160] sm:$0xff] %v1264_v44  ;;  %1267 = vst [vmem:[%s10068_s26 + $0x1168] sm:$0xff] %v1266_v45  ;;  %v1268_v46 = vld [vmem:[%s10060_s25 + $0x45c0] sm:$0xff]  ;;  %v1270_v47 = vld [vmem:[%s10060_s25 + $0x45c8] sm:$0xff] }
 0x129   : > { %v1272_v48 = vld [vmem:[%s10060_s25 + $0x4600] sm:$0xff]  ;;  %1269 = vst [vmem:[%s10068_s26 + $0x1170] sm:$0xff] %v1268_v46  ;;  %1271 = vst [vmem:[%s10068_s26 + $0x1178] sm:$0xff] %v1270_v47  ;;  %v1274_v49 = vld [vmem:[%s10060_s25 + $0x4608] sm:$0xff] }
 0x12a   : > { %1273 = vst [vmem:[%s10068_s26 + $0x1180] sm:$0xff] %v1272_v48  ;;  %v1276_v50 = vld [vmem:[%s10060_s25 + $0x4640] sm:$0xff]  ;;  %v1278_v51 = vld [vmem:[%s10060_s25 + $0x4648] sm:$0xff]  ;;  %1275 = vst [vmem:[%s10068_s26 + $0x1188] sm:$0xff] %v1274_v49 }
 0x12b   : > { %1277 = vst [vmem:[%s10068_s26 + $0x1190] sm:$0xff] %v1276_v50  ;;  %1279 = vst [vmem:[%s10068_s26 + $0x1198] sm:$0xff] %v1278_v51  ;;  %v1280_v52 = vld [vmem:[%s10060_s25 + $0x4680] sm:$0xff]  ;;  %v1282_v53 = vld [vmem:[%s10060_s25 + $0x4688] sm:$0xff] }
 0x12c   : > { %v1284_v54 = vld [vmem:[%s10060_s25 + $0x46c0] sm:$0xff]  ;;  %1281 = vst [vmem:[%s10068_s26 + $0x11a0] sm:$0xff] %v1280_v52  ;;  %1283 = vst [vmem:[%s10068_s26 + $0x11a8] sm:$0xff] %v1282_v53  ;;  %v1286_v55 = vld [vmem:[%s10060_s25 + $0x46c8] sm:$0xff] }
 0x12d   : > { %1285 = vst [vmem:[%s10068_s26 + $0x11b0] sm:$0xff] %v1284_v54  ;;  %v1288_v56 = vld [vmem:[%s10060_s25 + $0x4700] sm:$0xff]  ;;  %v1290_v57 = vld [vmem:[%s10060_s25 + $0x4708] sm:$0xff]  ;;  %1287 = vst [vmem:[%s10068_s26 + $0x11b8] sm:$0xff] %v1286_v55 }
 0x12e   : > { %1289 = vst [vmem:[%s10068_s26 + $0x11c0] sm:$0xff] %v1288_v56  ;;  %1291 = vst [vmem:[%s10068_s26 + $0x11c8] sm:$0xff] %v1290_v57  ;;  %v1292_v58 = vld [vmem:[%s10060_s25 + $0x4740] sm:$0xff]  ;;  %v1294_v59 = vld [vmem:[%s10060_s25 + $0x4748] sm:$0xff] }
 0x12f   : > { %v1296_v60 = vld [vmem:[%s10060_s25 + $0x4780] sm:$0xff]  ;;  %1293 = vst [vmem:[%s10068_s26 + $0x11d0] sm:$0xff] %v1292_v58  ;;  %1295 = vst [vmem:[%s10068_s26 + $0x11d8] sm:$0xff] %v1294_v59  ;;  %v1298_v61 = vld [vmem:[%s10060_s25 + $0x4788] sm:$0xff] }
 0x130   : > { %1297 = vst [vmem:[%s10068_s26 + $0x11e0] sm:$0xff] %v1296_v60  ;;  %v1300_v62 = vld [vmem:[%s10060_s25 + $0x47c0] sm:$0xff]  ;;  %v1302_v63 = vld [vmem:[%s10060_s25 + $0x47c8] sm:$0xff]  ;;  %1299 = vst [vmem:[%s10068_s26 + $0x11e8] sm:$0xff] %v1298_v61 }
 0x131   : > { %1301 = vst [vmem:[%s10068_s26 + $0x11f0] sm:$0xff] %v1300_v62  ;;  %1303 = vst [vmem:[%s10068_s26 + $0x11f8] sm:$0xff] %v1302_v63  ;;  %v1304_v0 = vld [vmem:[%s10060_s25 + $0x4800] sm:$0xff]  ;;  %v1306_v1 = vld [vmem:[%s10060_s25 + $0x4808] sm:$0xff] }
 0x132   : > { %v1308_v2 = vld [vmem:[%s10060_s25 + $0x4840] sm:$0xff]  ;;  %1305 = vst [vmem:[%s10068_s26 + $0x1200] sm:$0xff] %v1304_v0  ;;  %1307 = vst [vmem:[%s10068_s26 + $0x1208] sm:$0xff] %v1306_v1  ;;  %v1310_v3 = vld [vmem:[%s10060_s25 + $0x4848] sm:$0xff] }
 0x133   : > { %1309 = vst [vmem:[%s10068_s26 + $0x1210] sm:$0xff] %v1308_v2  ;;  %v1312_v4 = vld [vmem:[%s10060_s25 + $0x4880] sm:$0xff]  ;;  %v1314_v5 = vld [vmem:[%s10060_s25 + $0x4888] sm:$0xff]  ;;  %1311 = vst [vmem:[%s10068_s26 + $0x1218] sm:$0xff] %v1310_v3 }
 0x134   : > { %1313 = vst [vmem:[%s10068_s26 + $0x1220] sm:$0xff] %v1312_v4  ;;  %1315 = vst [vmem:[%s10068_s26 + $0x1228] sm:$0xff] %v1314_v5  ;;  %v1316_v6 = vld [vmem:[%s10060_s25 + $0x48c0] sm:$0xff]  ;;  %v1318_v7 = vld [vmem:[%s10060_s25 + $0x48c8] sm:$0xff] }
 0x135   : > { %v1320_v8 = vld [vmem:[%s10060_s25 + $0x4900] sm:$0xff]  ;;  %1317 = vst [vmem:[%s10068_s26 + $0x1230] sm:$0xff] %v1316_v6  ;;  %1319 = vst [vmem:[%s10068_s26 + $0x1238] sm:$0xff] %v1318_v7  ;;  %v1322_v9 = vld [vmem:[%s10060_s25 + $0x4908] sm:$0xff] }
 0x136   : > { %1321 = vst [vmem:[%s10068_s26 + $0x1240] sm:$0xff] %v1320_v8  ;;  %v1324_v10 = vld [vmem:[%s10060_s25 + $0x4940] sm:$0xff]  ;;  %v1326_v11 = vld [vmem:[%s10060_s25 + $0x4948] sm:$0xff]  ;;  %1323 = vst [vmem:[%s10068_s26 + $0x1248] sm:$0xff] %v1322_v9 }
 0x137   : > { %1325 = vst [vmem:[%s10068_s26 + $0x1250] sm:$0xff] %v1324_v10  ;;  %1327 = vst [vmem:[%s10068_s26 + $0x1258] sm:$0xff] %v1326_v11  ;;  %v1328_v12 = vld [vmem:[%s10060_s25 + $0x4980] sm:$0xff]  ;;  %v1330_v13 = vld [vmem:[%s10060_s25 + $0x4988] sm:$0xff] }
 0x138   : > { %v1332_v14 = vld [vmem:[%s10060_s25 + $0x49c0] sm:$0xff]  ;;  %1329 = vst [vmem:[%s10068_s26 + $0x1260] sm:$0xff] %v1328_v12  ;;  %1331 = vst [vmem:[%s10068_s26 + $0x1268] sm:$0xff] %v1330_v13  ;;  %v1334_v15 = vld [vmem:[%s10060_s25 + $0x49c8] sm:$0xff] }
 0x139   : > { %1333 = vst [vmem:[%s10068_s26 + $0x1270] sm:$0xff] %v1332_v14  ;;  %v1336_v16 = vld [vmem:[%s10060_s25 + $0x4a00] sm:$0xff]  ;;  %v1338_v17 = vld [vmem:[%s10060_s25 + $0x4a08] sm:$0xff]  ;;  %1335 = vst [vmem:[%s10068_s26 + $0x1278] sm:$0xff] %v1334_v15 }
 0x13a   : > { %1337 = vst [vmem:[%s10068_s26 + $0x1280] sm:$0xff] %v1336_v16  ;;  %1339 = vst [vmem:[%s10068_s26 + $0x1288] sm:$0xff] %v1338_v17  ;;  %v1340_v18 = vld [vmem:[%s10060_s25 + $0x4a40] sm:$0xff]  ;;  %v1342_v19 = vld [vmem:[%s10060_s25 + $0x4a48] sm:$0xff] }
 0x13b   : > { %v1344_v20 = vld [vmem:[%s10060_s25 + $0x4a80] sm:$0xff]  ;;  %1341 = vst [vmem:[%s10068_s26 + $0x1290] sm:$0xff] %v1340_v18  ;;  %1343 = vst [vmem:[%s10068_s26 + $0x1298] sm:$0xff] %v1342_v19  ;;  %v1346_v21 = vld [vmem:[%s10060_s25 + $0x4a88] sm:$0xff] }
 0x13c   : > { %1345 = vst [vmem:[%s10068_s26 + $0x12a0] sm:$0xff] %v1344_v20  ;;  %v1348_v22 = vld [vmem:[%s10060_s25 + $0x4ac0] sm:$0xff]  ;;  %v1350_v23 = vld [vmem:[%s10060_s25 + $0x4ac8] sm:$0xff]  ;;  %1347 = vst [vmem:[%s10068_s26 + $0x12a8] sm:$0xff] %v1346_v21 }
 0x13d   : > { %1349 = vst [vmem:[%s10068_s26 + $0x12b0] sm:$0xff] %v1348_v22  ;;  %1351 = vst [vmem:[%s10068_s26 + $0x12b8] sm:$0xff] %v1350_v23  ;;  %v1352_v24 = vld [vmem:[%s10060_s25 + $0x4b00] sm:$0xff]  ;;  %v1354_v25 = vld [vmem:[%s10060_s25 + $0x4b08] sm:$0xff] }
 0x13e   : > { %v1356_v26 = vld [vmem:[%s10060_s25 + $0x4b40] sm:$0xff]  ;;  %1353 = vst [vmem:[%s10068_s26 + $0x12c0] sm:$0xff] %v1352_v24  ;;  %1355 = vst [vmem:[%s10068_s26 + $0x12c8] sm:$0xff] %v1354_v25  ;;  %v1358_v27 = vld [vmem:[%s10060_s25 + $0x4b48] sm:$0xff] }
 0x13f   : > { %1357 = vst [vmem:[%s10068_s26 + $0x12d0] sm:$0xff] %v1356_v26  ;;  %v1360_v28 = vld [vmem:[%s10060_s25 + $0x4b80] sm:$0xff]  ;;  %v1362_v29 = vld [vmem:[%s10060_s25 + $0x4b88] sm:$0xff]  ;;  %1359 = vst [vmem:[%s10068_s26 + $0x12d8] sm:$0xff] %v1358_v27 }
 0x140   : > { %1361 = vst [vmem:[%s10068_s26 + $0x12e0] sm:$0xff] %v1360_v28  ;;  %1363 = vst [vmem:[%s10068_s26 + $0x12e8] sm:$0xff] %v1362_v29  ;;  %v1364_v30 = vld [vmem:[%s10060_s25 + $0x4bc0] sm:$0xff]  ;;  %v1366_v31 = vld [vmem:[%s10060_s25 + $0x4bc8] sm:$0xff] }
 0x141   : > { %v1368_v32 = vld [vmem:[%s10060_s25 + $0x4c00] sm:$0xff]  ;;  %1365 = vst [vmem:[%s10068_s26 + $0x12f0] sm:$0xff] %v1364_v30  ;;  %1367 = vst [vmem:[%s10068_s26 + $0x12f8] sm:$0xff] %v1366_v31  ;;  %v1370_v33 = vld [vmem:[%s10060_s25 + $0x4c08] sm:$0xff] }
 0x142   : > { %1369 = vst [vmem:[%s10068_s26 + $0x1300] sm:$0xff] %v1368_v32  ;;  %v1372_v34 = vld [vmem:[%s10060_s25 + $0x4c40] sm:$0xff]  ;;  %v1374_v35 = vld [vmem:[%s10060_s25 + $0x4c48] sm:$0xff]  ;;  %1371 = vst [vmem:[%s10068_s26 + $0x1308] sm:$0xff] %v1370_v33 }
 0x143   : > { %1373 = vst [vmem:[%s10068_s26 + $0x1310] sm:$0xff] %v1372_v34  ;;  %1375 = vst [vmem:[%s10068_s26 + $0x1318] sm:$0xff] %v1374_v35  ;;  %v1376_v36 = vld [vmem:[%s10060_s25 + $0x4c80] sm:$0xff]  ;;  %v1378_v37 = vld [vmem:[%s10060_s25 + $0x4c88] sm:$0xff] }
 0x144   : > { %v1380_v38 = vld [vmem:[%s10060_s25 + $0x4cc0] sm:$0xff]  ;;  %1377 = vst [vmem:[%s10068_s26 + $0x1320] sm:$0xff] %v1376_v36  ;;  %1379 = vst [vmem:[%s10068_s26 + $0x1328] sm:$0xff] %v1378_v37  ;;  %v1382_v39 = vld [vmem:[%s10060_s25 + $0x4cc8] sm:$0xff] }
 0x145   : > { %1381 = vst [vmem:[%s10068_s26 + $0x1330] sm:$0xff] %v1380_v38  ;;  %v1384_v40 = vld [vmem:[%s10060_s25 + $0x4d00] sm:$0xff]  ;;  %v1386_v41 = vld [vmem:[%s10060_s25 + $0x4d08] sm:$0xff]  ;;  %1383 = vst [vmem:[%s10068_s26 + $0x1338] sm:$0xff] %v1382_v39 }
 0x146   : > { %1385 = vst [vmem:[%s10068_s26 + $0x1340] sm:$0xff] %v1384_v40  ;;  %1387 = vst [vmem:[%s10068_s26 + $0x1348] sm:$0xff] %v1386_v41  ;;  %v1388_v42 = vld [vmem:[%s10060_s25 + $0x4d40] sm:$0xff]  ;;  %v1390_v43 = vld [vmem:[%s10060_s25 + $0x4d48] sm:$0xff] }
 0x147   : > { %v1392_v44 = vld [vmem:[%s10060_s25 + $0x4d80] sm:$0xff]  ;;  %1389 = vst [vmem:[%s10068_s26 + $0x1350] sm:$0xff] %v1388_v42  ;;  %1391 = vst [vmem:[%s10068_s26 + $0x1358] sm:$0xff] %v1390_v43  ;;  %v1394_v45 = vld [vmem:[%s10060_s25 + $0x4d88] sm:$0xff] }
 0x148   : > { %1393 = vst [vmem:[%s10068_s26 + $0x1360] sm:$0xff] %v1392_v44  ;;  %v1396_v46 = vld [vmem:[%s10060_s25 + $0x4dc0] sm:$0xff]  ;;  %v1398_v47 = vld [vmem:[%s10060_s25 + $0x4dc8] sm:$0xff]  ;;  %1395 = vst [vmem:[%s10068_s26 + $0x1368] sm:$0xff] %v1394_v45 }
 0x149   : > { %1397 = vst [vmem:[%s10068_s26 + $0x1370] sm:$0xff] %v1396_v46  ;;  %1399 = vst [vmem:[%s10068_s26 + $0x1378] sm:$0xff] %v1398_v47  ;;  %v1400_v48 = vld [vmem:[%s10060_s25 + $0x4e00] sm:$0xff]  ;;  %v1402_v49 = vld [vmem:[%s10060_s25 + $0x4e08] sm:$0xff] }
 0x14a   : > { %v1404_v50 = vld [vmem:[%s10060_s25 + $0x4e40] sm:$0xff]  ;;  %1401 = vst [vmem:[%s10068_s26 + $0x1380] sm:$0xff] %v1400_v48  ;;  %1403 = vst [vmem:[%s10068_s26 + $0x1388] sm:$0xff] %v1402_v49  ;;  %v1406_v51 = vld [vmem:[%s10060_s25 + $0x4e48] sm:$0xff] }
 0x14b   : > { %1405 = vst [vmem:[%s10068_s26 + $0x1390] sm:$0xff] %v1404_v50  ;;  %v1408_v52 = vld [vmem:[%s10060_s25 + $0x4e80] sm:$0xff]  ;;  %v1410_v53 = vld [vmem:[%s10060_s25 + $0x4e88] sm:$0xff]  ;;  %1407 = vst [vmem:[%s10068_s26 + $0x1398] sm:$0xff] %v1406_v51 }
 0x14c   : > { %1409 = vst [vmem:[%s10068_s26 + $0x13a0] sm:$0xff] %v1408_v52  ;;  %1411 = vst [vmem:[%s10068_s26 + $0x13a8] sm:$0xff] %v1410_v53  ;;  %v1412_v54 = vld [vmem:[%s10060_s25 + $0x4ec0] sm:$0xff]  ;;  %v1414_v55 = vld [vmem:[%s10060_s25 + $0x4ec8] sm:$0xff] }
 0x14d   : > { %v1416_v56 = vld [vmem:[%s10060_s25 + $0x4f00] sm:$0xff]  ;;  %1413 = vst [vmem:[%s10068_s26 + $0x13b0] sm:$0xff] %v1412_v54  ;;  %1415 = vst [vmem:[%s10068_s26 + $0x13b8] sm:$0xff] %v1414_v55  ;;  %v1418_v57 = vld [vmem:[%s10060_s25 + $0x4f08] sm:$0xff] }
 0x14e   : > { %1417 = vst [vmem:[%s10068_s26 + $0x13c0] sm:$0xff] %v1416_v56  ;;  %v1420_v58 = vld [vmem:[%s10060_s25 + $0x4f40] sm:$0xff]  ;;  %v1422_v59 = vld [vmem:[%s10060_s25 + $0x4f48] sm:$0xff]  ;;  %1419 = vst [vmem:[%s10068_s26 + $0x13c8] sm:$0xff] %v1418_v57 }
 0x14f   : > { %1421 = vst [vmem:[%s10068_s26 + $0x13d0] sm:$0xff] %v1420_v58  ;;  %1423 = vst [vmem:[%s10068_s26 + $0x13d8] sm:$0xff] %v1422_v59  ;;  %v1424_v60 = vld [vmem:[%s10060_s25 + $0x4f80] sm:$0xff]  ;;  %v1426_v61 = vld [vmem:[%s10060_s25 + $0x4f88] sm:$0xff] }
 0x150   : > { %v1428_v62 = vld [vmem:[%s10060_s25 + $0x4fc0] sm:$0xff]  ;;  %1425 = vst [vmem:[%s10068_s26 + $0x13e0] sm:$0xff] %v1424_v60  ;;  %1427 = vst [vmem:[%s10068_s26 + $0x13e8] sm:$0xff] %v1426_v61  ;;  %v1430_v63 = vld [vmem:[%s10060_s25 + $0x4fc8] sm:$0xff] }
 0x151   : > { %1429 = vst [vmem:[%s10068_s26 + $0x13f0] sm:$0xff] %v1428_v62  ;;  %v1432_v0 = vld [vmem:[%s10060_s25 + $0x5000] sm:$0xff]  ;;  %v1434_v1 = vld [vmem:[%s10060_s25 + $0x5008] sm:$0xff]  ;;  %1431 = vst [vmem:[%s10068_s26 + $0x13f8] sm:$0xff] %v1430_v63 }
 0x152   : > { %1433 = vst [vmem:[%s10068_s26 + $0x1400] sm:$0xff] %v1432_v0  ;;  %1435 = vst [vmem:[%s10068_s26 + $0x1408] sm:$0xff] %v1434_v1  ;;  %v1436_v2 = vld [vmem:[%s10060_s25 + $0x5040] sm:$0xff]  ;;  %v1438_v3 = vld [vmem:[%s10060_s25 + $0x5048] sm:$0xff] }
 0x153   : > { %v1440_v4 = vld [vmem:[%s10060_s25 + $0x5080] sm:$0xff]  ;;  %1437 = vst [vmem:[%s10068_s26 + $0x1410] sm:$0xff] %v1436_v2  ;;  %1439 = vst [vmem:[%s10068_s26 + $0x1418] sm:$0xff] %v1438_v3  ;;  %v1442_v5 = vld [vmem:[%s10060_s25 + $0x5088] sm:$0xff] }
 0x154   : > { %1441 = vst [vmem:[%s10068_s26 + $0x1420] sm:$0xff] %v1440_v4  ;;  %v1444_v6 = vld [vmem:[%s10060_s25 + $0x50c0] sm:$0xff]  ;;  %v1446_v7 = vld [vmem:[%s10060_s25 + $0x50c8] sm:$0xff]  ;;  %1443 = vst [vmem:[%s10068_s26 + $0x1428] sm:$0xff] %v1442_v5 }
 0x155   : > { %1445 = vst [vmem:[%s10068_s26 + $0x1430] sm:$0xff] %v1444_v6  ;;  %1447 = vst [vmem:[%s10068_s26 + $0x1438] sm:$0xff] %v1446_v7  ;;  %v1448_v8 = vld [vmem:[%s10060_s25 + $0x5100] sm:$0xff]  ;;  %v1450_v9 = vld [vmem:[%s10060_s25 + $0x5108] sm:$0xff] }
 0x156   : > { %v1452_v10 = vld [vmem:[%s10060_s25 + $0x5140] sm:$0xff]  ;;  %1449 = vst [vmem:[%s10068_s26 + $0x1440] sm:$0xff] %v1448_v8  ;;  %1451 = vst [vmem:[%s10068_s26 + $0x1448] sm:$0xff] %v1450_v9  ;;  %v1454_v11 = vld [vmem:[%s10060_s25 + $0x5148] sm:$0xff] }
 0x157   : > { %1453 = vst [vmem:[%s10068_s26 + $0x1450] sm:$0xff] %v1452_v10  ;;  %v1456_v12 = vld [vmem:[%s10060_s25 + $0x5180] sm:$0xff]  ;;  %v1458_v13 = vld [vmem:[%s10060_s25 + $0x5188] sm:$0xff]  ;;  %1455 = vst [vmem:[%s10068_s26 + $0x1458] sm:$0xff] %v1454_v11 }
 0x158   : > { %1457 = vst [vmem:[%s10068_s26 + $0x1460] sm:$0xff] %v1456_v12  ;;  %1459 = vst [vmem:[%s10068_s26 + $0x1468] sm:$0xff] %v1458_v13  ;;  %v1460_v14 = vld [vmem:[%s10060_s25 + $0x51c0] sm:$0xff]  ;;  %v1462_v15 = vld [vmem:[%s10060_s25 + $0x51c8] sm:$0xff] }
 0x159   : > { %v1464_v16 = vld [vmem:[%s10060_s25 + $0x5200] sm:$0xff]  ;;  %1461 = vst [vmem:[%s10068_s26 + $0x1470] sm:$0xff] %v1460_v14  ;;  %1463 = vst [vmem:[%s10068_s26 + $0x1478] sm:$0xff] %v1462_v15  ;;  %v1466_v17 = vld [vmem:[%s10060_s25 + $0x5208] sm:$0xff] }
 0x15a   : > { %1465 = vst [vmem:[%s10068_s26 + $0x1480] sm:$0xff] %v1464_v16  ;;  %v1468_v18 = vld [vmem:[%s10060_s25 + $0x5240] sm:$0xff]  ;;  %v1470_v19 = vld [vmem:[%s10060_s25 + $0x5248] sm:$0xff]  ;;  %1467 = vst [vmem:[%s10068_s26 + $0x1488] sm:$0xff] %v1466_v17 }
 0x15b   : > { %1469 = vst [vmem:[%s10068_s26 + $0x1490] sm:$0xff] %v1468_v18  ;;  %1471 = vst [vmem:[%s10068_s26 + $0x1498] sm:$0xff] %v1470_v19  ;;  %v1472_v20 = vld [vmem:[%s10060_s25 + $0x5280] sm:$0xff]  ;;  %v1474_v21 = vld [vmem:[%s10060_s25 + $0x5288] sm:$0xff] }
 0x15c   : > { %v1476_v22 = vld [vmem:[%s10060_s25 + $0x52c0] sm:$0xff]  ;;  %1473 = vst [vmem:[%s10068_s26 + $0x14a0] sm:$0xff] %v1472_v20  ;;  %1475 = vst [vmem:[%s10068_s26 + $0x14a8] sm:$0xff] %v1474_v21  ;;  %v1478_v23 = vld [vmem:[%s10060_s25 + $0x52c8] sm:$0xff] }
 0x15d   : > { %1477 = vst [vmem:[%s10068_s26 + $0x14b0] sm:$0xff] %v1476_v22  ;;  %v1480_v24 = vld [vmem:[%s10060_s25 + $0x5300] sm:$0xff]  ;;  %v1482_v25 = vld [vmem:[%s10060_s25 + $0x5308] sm:$0xff]  ;;  %1479 = vst [vmem:[%s10068_s26 + $0x14b8] sm:$0xff] %v1478_v23 }
 0x15e   : > { %1481 = vst [vmem:[%s10068_s26 + $0x14c0] sm:$0xff] %v1480_v24  ;;  %1483 = vst [vmem:[%s10068_s26 + $0x14c8] sm:$0xff] %v1482_v25  ;;  %v1484_v26 = vld [vmem:[%s10060_s25 + $0x5340] sm:$0xff]  ;;  %v1486_v27 = vld [vmem:[%s10060_s25 + $0x5348] sm:$0xff] }
 0x15f   : > { %v1488_v28 = vld [vmem:[%s10060_s25 + $0x5380] sm:$0xff]  ;;  %1485 = vst [vmem:[%s10068_s26 + $0x14d0] sm:$0xff] %v1484_v26  ;;  %1487 = vst [vmem:[%s10068_s26 + $0x14d8] sm:$0xff] %v1486_v27  ;;  %v1490_v29 = vld [vmem:[%s10060_s25 + $0x5388] sm:$0xff] }
 0x160   : > { %1489 = vst [vmem:[%s10068_s26 + $0x14e0] sm:$0xff] %v1488_v28  ;;  %v1492_v30 = vld [vmem:[%s10060_s25 + $0x53c0] sm:$0xff]  ;;  %v1494_v31 = vld [vmem:[%s10060_s25 + $0x53c8] sm:$0xff]  ;;  %1491 = vst [vmem:[%s10068_s26 + $0x14e8] sm:$0xff] %v1490_v29 }
 0x161   : > { %1493 = vst [vmem:[%s10068_s26 + $0x14f0] sm:$0xff] %v1492_v30  ;;  %1495 = vst [vmem:[%s10068_s26 + $0x14f8] sm:$0xff] %v1494_v31  ;;  %v1496_v32 = vld [vmem:[%s10060_s25 + $0x5400] sm:$0xff]  ;;  %v1498_v33 = vld [vmem:[%s10060_s25 + $0x5408] sm:$0xff] }
 0x162   : > { %v1500_v34 = vld [vmem:[%s10060_s25 + $0x5440] sm:$0xff]  ;;  %1497 = vst [vmem:[%s10068_s26 + $0x1500] sm:$0xff] %v1496_v32  ;;  %1499 = vst [vmem:[%s10068_s26 + $0x1508] sm:$0xff] %v1498_v33  ;;  %v1502_v35 = vld [vmem:[%s10060_s25 + $0x5448] sm:$0xff] }
 0x163   : > { %1501 = vst [vmem:[%s10068_s26 + $0x1510] sm:$0xff] %v1500_v34  ;;  %v1504_v36 = vld [vmem:[%s10060_s25 + $0x5480] sm:$0xff]  ;;  %v1506_v37 = vld [vmem:[%s10060_s25 + $0x5488] sm:$0xff]  ;;  %1503 = vst [vmem:[%s10068_s26 + $0x1518] sm:$0xff] %v1502_v35 }
 0x164   : > { %1505 = vst [vmem:[%s10068_s26 + $0x1520] sm:$0xff] %v1504_v36  ;;  %1507 = vst [vmem:[%s10068_s26 + $0x1528] sm:$0xff] %v1506_v37  ;;  %v1508_v38 = vld [vmem:[%s10060_s25 + $0x54c0] sm:$0xff]  ;;  %v1510_v39 = vld [vmem:[%s10060_s25 + $0x54c8] sm:$0xff] }
 0x165   : > { %v1512_v40 = vld [vmem:[%s10060_s25 + $0x5500] sm:$0xff]  ;;  %1509 = vst [vmem:[%s10068_s26 + $0x1530] sm:$0xff] %v1508_v38  ;;  %1511 = vst [vmem:[%s10068_s26 + $0x1538] sm:$0xff] %v1510_v39  ;;  %v1514_v41 = vld [vmem:[%s10060_s25 + $0x5508] sm:$0xff] }
 0x166   : > { %1513 = vst [vmem:[%s10068_s26 + $0x1540] sm:$0xff] %v1512_v40  ;;  %v1516_v42 = vld [vmem:[%s10060_s25 + $0x5540] sm:$0xff]  ;;  %v1518_v43 = vld [vmem:[%s10060_s25 + $0x5548] sm:$0xff]  ;;  %1515 = vst [vmem:[%s10068_s26 + $0x1548] sm:$0xff] %v1514_v41 }
 0x167   : > { %1517 = vst [vmem:[%s10068_s26 + $0x1550] sm:$0xff] %v1516_v42  ;;  %1519 = vst [vmem:[%s10068_s26 + $0x1558] sm:$0xff] %v1518_v43  ;;  %v1520_v44 = vld [vmem:[%s10060_s25 + $0x5580] sm:$0xff]  ;;  %v1522_v45 = vld [vmem:[%s10060_s25 + $0x5588] sm:$0xff] }
 0x168   : > { %v1524_v46 = vld [vmem:[%s10060_s25 + $0x55c0] sm:$0xff]  ;;  %1521 = vst [vmem:[%s10068_s26 + $0x1560] sm:$0xff] %v1520_v44  ;;  %1523 = vst [vmem:[%s10068_s26 + $0x1568] sm:$0xff] %v1522_v45  ;;  %v1526_v47 = vld [vmem:[%s10060_s25 + $0x55c8] sm:$0xff] }
 0x169   : > { %1525 = vst [vmem:[%s10068_s26 + $0x1570] sm:$0xff] %v1524_v46  ;;  %v1528_v48 = vld [vmem:[%s10060_s25 + $0x5600] sm:$0xff]  ;;  %v1530_v49 = vld [vmem:[%s10060_s25 + $0x5608] sm:$0xff]  ;;  %1527 = vst [vmem:[%s10068_s26 + $0x1578] sm:$0xff] %v1526_v47 }
 0x16a   : > { %1529 = vst [vmem:[%s10068_s26 + $0x1580] sm:$0xff] %v1528_v48  ;;  %1531 = vst [vmem:[%s10068_s26 + $0x1588] sm:$0xff] %v1530_v49  ;;  %v1532_v50 = vld [vmem:[%s10060_s25 + $0x5640] sm:$0xff]  ;;  %v1534_v51 = vld [vmem:[%s10060_s25 + $0x5648] sm:$0xff] }
 0x16b   : > { %v1536_v52 = vld [vmem:[%s10060_s25 + $0x5680] sm:$0xff]  ;;  %1533 = vst [vmem:[%s10068_s26 + $0x1590] sm:$0xff] %v1532_v50  ;;  %1535 = vst [vmem:[%s10068_s26 + $0x1598] sm:$0xff] %v1534_v51  ;;  %v1538_v53 = vld [vmem:[%s10060_s25 + $0x5688] sm:$0xff] }
 0x16c   : > { %1537 = vst [vmem:[%s10068_s26 + $0x15a0] sm:$0xff] %v1536_v52  ;;  %v1540_v54 = vld [vmem:[%s10060_s25 + $0x56c0] sm:$0xff]  ;;  %v1542_v55 = vld [vmem:[%s10060_s25 + $0x56c8] sm:$0xff]  ;;  %1539 = vst [vmem:[%s10068_s26 + $0x15a8] sm:$0xff] %v1538_v53 }
 0x16d   : > { %1541 = vst [vmem:[%s10068_s26 + $0x15b0] sm:$0xff] %v1540_v54  ;;  %1543 = vst [vmem:[%s10068_s26 + $0x15b8] sm:$0xff] %v1542_v55  ;;  %v1544_v56 = vld [vmem:[%s10060_s25 + $0x5700] sm:$0xff]  ;;  %v1546_v57 = vld [vmem:[%s10060_s25 + $0x5708] sm:$0xff] }
 0x16e   : > { %v1548_v58 = vld [vmem:[%s10060_s25 + $0x5740] sm:$0xff]  ;;  %1545 = vst [vmem:[%s10068_s26 + $0x15c0] sm:$0xff] %v1544_v56  ;;  %1547 = vst [vmem:[%s10068_s26 + $0x15c8] sm:$0xff] %v1546_v57  ;;  %v1550_v59 = vld [vmem:[%s10060_s25 + $0x5748] sm:$0xff] }
 0x16f   : > { %1549 = vst [vmem:[%s10068_s26 + $0x15d0] sm:$0xff] %v1548_v58  ;;  %v1552_v60 = vld [vmem:[%s10060_s25 + $0x5780] sm:$0xff]  ;;  %v1554_v61 = vld [vmem:[%s10060_s25 + $0x5788] sm:$0xff]  ;;  %1551 = vst [vmem:[%s10068_s26 + $0x15d8] sm:$0xff] %v1550_v59 }
 0x170   : > { %1553 = vst [vmem:[%s10068_s26 + $0x15e0] sm:$0xff] %v1552_v60  ;;  %1555 = vst [vmem:[%s10068_s26 + $0x15e8] sm:$0xff] %v1554_v61  ;;  %v1556_v62 = vld [vmem:[%s10060_s25 + $0x57c0] sm:$0xff]  ;;  %v1558_v63 = vld [vmem:[%s10060_s25 + $0x57c8] sm:$0xff] }
 0x171   : > { %v1560_v0 = vld [vmem:[%s10060_s25 + $0x5800] sm:$0xff]  ;;  %1557 = vst [vmem:[%s10068_s26 + $0x15f0] sm:$0xff] %v1556_v62  ;;  %1559 = vst [vmem:[%s10068_s26 + $0x15f8] sm:$0xff] %v1558_v63  ;;  %v1562_v1 = vld [vmem:[%s10060_s25 + $0x5808] sm:$0xff] }
 0x172   : > { %1561 = vst [vmem:[%s10068_s26 + $0x1600] sm:$0xff] %v1560_v0  ;;  %v1564_v2 = vld [vmem:[%s10060_s25 + $0x5840] sm:$0xff]  ;;  %v1566_v3 = vld [vmem:[%s10060_s25 + $0x5848] sm:$0xff]  ;;  %1563 = vst [vmem:[%s10068_s26 + $0x1608] sm:$0xff] %v1562_v1 }
 0x173   : > { %1565 = vst [vmem:[%s10068_s26 + $0x1610] sm:$0xff] %v1564_v2  ;;  %1567 = vst [vmem:[%s10068_s26 + $0x1618] sm:$0xff] %v1566_v3  ;;  %v1568_v4 = vld [vmem:[%s10060_s25 + $0x5880] sm:$0xff]  ;;  %v1570_v5 = vld [vmem:[%s10060_s25 + $0x5888] sm:$0xff] }
 0x174   : > { %v1572_v6 = vld [vmem:[%s10060_s25 + $0x58c0] sm:$0xff]  ;;  %1569 = vst [vmem:[%s10068_s26 + $0x1620] sm:$0xff] %v1568_v4  ;;  %1571 = vst [vmem:[%s10068_s26 + $0x1628] sm:$0xff] %v1570_v5  ;;  %v1574_v7 = vld [vmem:[%s10060_s25 + $0x58c8] sm:$0xff] }
 0x175   : > { %1573 = vst [vmem:[%s10068_s26 + $0x1630] sm:$0xff] %v1572_v6  ;;  %v1576_v8 = vld [vmem:[%s10060_s25 + $0x5900] sm:$0xff]  ;;  %v1578_v9 = vld [vmem:[%s10060_s25 + $0x5908] sm:$0xff]  ;;  %1575 = vst [vmem:[%s10068_s26 + $0x1638] sm:$0xff] %v1574_v7 }
 0x176   : > { %1577 = vst [vmem:[%s10068_s26 + $0x1640] sm:$0xff] %v1576_v8  ;;  %1579 = vst [vmem:[%s10068_s26 + $0x1648] sm:$0xff] %v1578_v9  ;;  %v1580_v10 = vld [vmem:[%s10060_s25 + $0x5940] sm:$0xff]  ;;  %v1582_v11 = vld [vmem:[%s10060_s25 + $0x5948] sm:$0xff] }
 0x177   : > { %v1584_v12 = vld [vmem:[%s10060_s25 + $0x5980] sm:$0xff]  ;;  %1581 = vst [vmem:[%s10068_s26 + $0x1650] sm:$0xff] %v1580_v10  ;;  %1583 = vst [vmem:[%s10068_s26 + $0x1658] sm:$0xff] %v1582_v11  ;;  %v1586_v13 = vld [vmem:[%s10060_s25 + $0x5988] sm:$0xff] }
 0x178   : > { %1585 = vst [vmem:[%s10068_s26 + $0x1660] sm:$0xff] %v1584_v12  ;;  %v1588_v14 = vld [vmem:[%s10060_s25 + $0x59c0] sm:$0xff]  ;;  %v1590_v15 = vld [vmem:[%s10060_s25 + $0x59c8] sm:$0xff]  ;;  %1587 = vst [vmem:[%s10068_s26 + $0x1668] sm:$0xff] %v1586_v13 }
 0x179   : > { %1589 = vst [vmem:[%s10068_s26 + $0x1670] sm:$0xff] %v1588_v14  ;;  %1591 = vst [vmem:[%s10068_s26 + $0x1678] sm:$0xff] %v1590_v15  ;;  %v1592_v16 = vld [vmem:[%s10060_s25 + $0x5a00] sm:$0xff]  ;;  %v1594_v17 = vld [vmem:[%s10060_s25 + $0x5a08] sm:$0xff] }
 0x17a   : > { %v1596_v18 = vld [vmem:[%s10060_s25 + $0x5a40] sm:$0xff]  ;;  %1593 = vst [vmem:[%s10068_s26 + $0x1680] sm:$0xff] %v1592_v16  ;;  %1595 = vst [vmem:[%s10068_s26 + $0x1688] sm:$0xff] %v1594_v17  ;;  %v1598_v19 = vld [vmem:[%s10060_s25 + $0x5a48] sm:$0xff] }
 0x17b   : > { %1597 = vst [vmem:[%s10068_s26 + $0x1690] sm:$0xff] %v1596_v18  ;;  %v1600_v20 = vld [vmem:[%s10060_s25 + $0x5a80] sm:$0xff]  ;;  %v1602_v21 = vld [vmem:[%s10060_s25 + $0x5a88] sm:$0xff]  ;;  %1599 = vst [vmem:[%s10068_s26 + $0x1698] sm:$0xff] %v1598_v19 }
 0x17c   : > { %1601 = vst [vmem:[%s10068_s26 + $0x16a0] sm:$0xff] %v1600_v20  ;;  %1603 = vst [vmem:[%s10068_s26 + $0x16a8] sm:$0xff] %v1602_v21  ;;  %v1604_v22 = vld [vmem:[%s10060_s25 + $0x5ac0] sm:$0xff]  ;;  %v1606_v23 = vld [vmem:[%s10060_s25 + $0x5ac8] sm:$0xff] }
 0x17d   : > { %v1608_v24 = vld [vmem:[%s10060_s25 + $0x5b00] sm:$0xff]  ;;  %1605 = vst [vmem:[%s10068_s26 + $0x16b0] sm:$0xff] %v1604_v22  ;;  %1607 = vst [vmem:[%s10068_s26 + $0x16b8] sm:$0xff] %v1606_v23  ;;  %v1610_v25 = vld [vmem:[%s10060_s25 + $0x5b08] sm:$0xff] }
 0x17e   : > { %1609 = vst [vmem:[%s10068_s26 + $0x16c0] sm:$0xff] %v1608_v24  ;;  %v1612_v26 = vld [vmem:[%s10060_s25 + $0x5b40] sm:$0xff]  ;;  %v1614_v27 = vld [vmem:[%s10060_s25 + $0x5b48] sm:$0xff]  ;;  %1611 = vst [vmem:[%s10068_s26 + $0x16c8] sm:$0xff] %v1610_v25 }
 0x17f   : > { %1613 = vst [vmem:[%s10068_s26 + $0x16d0] sm:$0xff] %v1612_v26  ;;  %1615 = vst [vmem:[%s10068_s26 + $0x16d8] sm:$0xff] %v1614_v27  ;;  %v1616_v28 = vld [vmem:[%s10060_s25 + $0x5b80] sm:$0xff]  ;;  %v1618_v29 = vld [vmem:[%s10060_s25 + $0x5b88] sm:$0xff] }
 0x180   : > { %v1620_v30 = vld [vmem:[%s10060_s25 + $0x5bc0] sm:$0xff]  ;;  %1617 = vst [vmem:[%s10068_s26 + $0x16e0] sm:$0xff] %v1616_v28  ;;  %1619 = vst [vmem:[%s10068_s26 + $0x16e8] sm:$0xff] %v1618_v29  ;;  %v1622_v31 = vld [vmem:[%s10060_s25 + $0x5bc8] sm:$0xff] }
 0x181   : > { %1621 = vst [vmem:[%s10068_s26 + $0x16f0] sm:$0xff] %v1620_v30  ;;  %v1624_v32 = vld [vmem:[%s10060_s25 + $0x5c00] sm:$0xff]  ;;  %v1626_v33 = vld [vmem:[%s10060_s25 + $0x5c08] sm:$0xff]  ;;  %1623 = vst [vmem:[%s10068_s26 + $0x16f8] sm:$0xff] %v1622_v31 }
 0x182   : > { %1625 = vst [vmem:[%s10068_s26 + $0x1700] sm:$0xff] %v1624_v32  ;;  %1627 = vst [vmem:[%s10068_s26 + $0x1708] sm:$0xff] %v1626_v33  ;;  %v1628_v34 = vld [vmem:[%s10060_s25 + $0x5c40] sm:$0xff]  ;;  %v1630_v35 = vld [vmem:[%s10060_s25 + $0x5c48] sm:$0xff] }
 0x183   : > { %v1632_v36 = vld [vmem:[%s10060_s25 + $0x5c80] sm:$0xff]  ;;  %1629 = vst [vmem:[%s10068_s26 + $0x1710] sm:$0xff] %v1628_v34  ;;  %1631 = vst [vmem:[%s10068_s26 + $0x1718] sm:$0xff] %v1630_v35  ;;  %v1634_v37 = vld [vmem:[%s10060_s25 + $0x5c88] sm:$0xff] }
 0x184   : > { %1633 = vst [vmem:[%s10068_s26 + $0x1720] sm:$0xff] %v1632_v36  ;;  %v1636_v38 = vld [vmem:[%s10060_s25 + $0x5cc0] sm:$0xff]  ;;  %v1638_v39 = vld [vmem:[%s10060_s25 + $0x5cc8] sm:$0xff]  ;;  %1635 = vst [vmem:[%s10068_s26 + $0x1728] sm:$0xff] %v1634_v37 }
 0x185   : > { %1637 = vst [vmem:[%s10068_s26 + $0x1730] sm:$0xff] %v1636_v38  ;;  %1639 = vst [vmem:[%s10068_s26 + $0x1738] sm:$0xff] %v1638_v39  ;;  %v1640_v40 = vld [vmem:[%s10060_s25 + $0x5d00] sm:$0xff]  ;;  %v1642_v41 = vld [vmem:[%s10060_s25 + $0x5d08] sm:$0xff] }
 0x186   : > { %v1644_v42 = vld [vmem:[%s10060_s25 + $0x5d40] sm:$0xff]  ;;  %1641 = vst [vmem:[%s10068_s26 + $0x1740] sm:$0xff] %v1640_v40  ;;  %1643 = vst [vmem:[%s10068_s26 + $0x1748] sm:$0xff] %v1642_v41  ;;  %v1646_v43 = vld [vmem:[%s10060_s25 + $0x5d48] sm:$0xff] }
 0x187   : > { %1645 = vst [vmem:[%s10068_s26 + $0x1750] sm:$0xff] %v1644_v42  ;;  %v1648_v44 = vld [vmem:[%s10060_s25 + $0x5d80] sm:$0xff]  ;;  %v1650_v45 = vld [vmem:[%s10060_s25 + $0x5d88] sm:$0xff]  ;;  %1647 = vst [vmem:[%s10068_s26 + $0x1758] sm:$0xff] %v1646_v43 }
 0x188   : > { %1649 = vst [vmem:[%s10068_s26 + $0x1760] sm:$0xff] %v1648_v44  ;;  %1651 = vst [vmem:[%s10068_s26 + $0x1768] sm:$0xff] %v1650_v45  ;;  %v1652_v46 = vld [vmem:[%s10060_s25 + $0x5dc0] sm:$0xff]  ;;  %v1654_v47 = vld [vmem:[%s10060_s25 + $0x5dc8] sm:$0xff] }
 0x189   : > { %v1656_v48 = vld [vmem:[%s10060_s25 + $0x5e00] sm:$0xff]  ;;  %1653 = vst [vmem:[%s10068_s26 + $0x1770] sm:$0xff] %v1652_v46  ;;  %1655 = vst [vmem:[%s10068_s26 + $0x1778] sm:$0xff] %v1654_v47  ;;  %v1658_v49 = vld [vmem:[%s10060_s25 + $0x5e08] sm:$0xff] }
 0x18a   : > { %1657 = vst [vmem:[%s10068_s26 + $0x1780] sm:$0xff] %v1656_v48  ;;  %v1660_v50 = vld [vmem:[%s10060_s25 + $0x5e40] sm:$0xff]  ;;  %v1662_v51 = vld [vmem:[%s10060_s25 + $0x5e48] sm:$0xff]  ;;  %1659 = vst [vmem:[%s10068_s26 + $0x1788] sm:$0xff] %v1658_v49 }
 0x18b   : > { %1661 = vst [vmem:[%s10068_s26 + $0x1790] sm:$0xff] %v1660_v50  ;;  %1663 = vst [vmem:[%s10068_s26 + $0x1798] sm:$0xff] %v1662_v51  ;;  %v1664_v52 = vld [vmem:[%s10060_s25 + $0x5e80] sm:$0xff]  ;;  %v1666_v53 = vld [vmem:[%s10060_s25 + $0x5e88] sm:$0xff] }
 0x18c   : > { %v1668_v54 = vld [vmem:[%s10060_s25 + $0x5ec0] sm:$0xff]  ;;  %1665 = vst [vmem:[%s10068_s26 + $0x17a0] sm:$0xff] %v1664_v52  ;;  %1667 = vst [vmem:[%s10068_s26 + $0x17a8] sm:$0xff] %v1666_v53  ;;  %v1670_v55 = vld [vmem:[%s10060_s25 + $0x5ec8] sm:$0xff] }
 0x18d   : > { %1669 = vst [vmem:[%s10068_s26 + $0x17b0] sm:$0xff] %v1668_v54  ;;  %v1672_v56 = vld [vmem:[%s10060_s25 + $0x5f00] sm:$0xff]  ;;  %v1674_v57 = vld [vmem:[%s10060_s25 + $0x5f08] sm:$0xff]  ;;  %1671 = vst [vmem:[%s10068_s26 + $0x17b8] sm:$0xff] %v1670_v55 }
 0x18e   : > { %1673 = vst [vmem:[%s10068_s26 + $0x17c0] sm:$0xff] %v1672_v56  ;;  %1675 = vst [vmem:[%s10068_s26 + $0x17c8] sm:$0xff] %v1674_v57  ;;  %v1676_v58 = vld [vmem:[%s10060_s25 + $0x5f40] sm:$0xff]  ;;  %v1678_v59 = vld [vmem:[%s10060_s25 + $0x5f48] sm:$0xff] }
 0x18f   : > { %v1680_v60 = vld [vmem:[%s10060_s25 + $0x5f80] sm:$0xff]  ;;  %1677 = vst [vmem:[%s10068_s26 + $0x17d0] sm:$0xff] %v1676_v58  ;;  %1679 = vst [vmem:[%s10068_s26 + $0x17d8] sm:$0xff] %v1678_v59  ;;  %v1682_v61 = vld [vmem:[%s10060_s25 + $0x5f88] sm:$0xff] }
 0x190   : > { %1681 = vst [vmem:[%s10068_s26 + $0x17e0] sm:$0xff] %v1680_v60  ;;  %v1684_v62 = vld [vmem:[%s10060_s25 + $0x5fc0] sm:$0xff]  ;;  %v1686_v63 = vld [vmem:[%s10060_s25 + $0x5fc8] sm:$0xff]  ;;  %1683 = vst [vmem:[%s10068_s26 + $0x17e8] sm:$0xff] %v1682_v61 }
 0x191   : > { %1685 = vst [vmem:[%s10068_s26 + $0x17f0] sm:$0xff] %v1684_v62  ;;  %1687 = vst [vmem:[%s10068_s26 + $0x17f8] sm:$0xff] %v1686_v63  ;;  %v1688_v0 = vld [vmem:[%s10060_s25 + $0x6000] sm:$0xff]  ;;  %v1690_v1 = vld [vmem:[%s10060_s25 + $0x6008] sm:$0xff] }
 0x192   : > { %v1692_v2 = vld [vmem:[%s10060_s25 + $0x6040] sm:$0xff]  ;;  %1689 = vst [vmem:[%s10068_s26 + $0x1800] sm:$0xff] %v1688_v0  ;;  %1691 = vst [vmem:[%s10068_s26 + $0x1808] sm:$0xff] %v1690_v1  ;;  %v1694_v3 = vld [vmem:[%s10060_s25 + $0x6048] sm:$0xff] }
 0x193   : > { %1693 = vst [vmem:[%s10068_s26 + $0x1810] sm:$0xff] %v1692_v2  ;;  %v1696_v4 = vld [vmem:[%s10060_s25 + $0x6080] sm:$0xff]  ;;  %v1698_v5 = vld [vmem:[%s10060_s25 + $0x6088] sm:$0xff]  ;;  %1695 = vst [vmem:[%s10068_s26 + $0x1818] sm:$0xff] %v1694_v3 }
 0x194   : > { %1697 = vst [vmem:[%s10068_s26 + $0x1820] sm:$0xff] %v1696_v4  ;;  %1699 = vst [vmem:[%s10068_s26 + $0x1828] sm:$0xff] %v1698_v5  ;;  %v1700_v6 = vld [vmem:[%s10060_s25 + $0x60c0] sm:$0xff]  ;;  %v1702_v7 = vld [vmem:[%s10060_s25 + $0x60c8] sm:$0xff] }
 0x195   : > { %v1704_v8 = vld [vmem:[%s10060_s25 + $0x6100] sm:$0xff]  ;;  %1701 = vst [vmem:[%s10068_s26 + $0x1830] sm:$0xff] %v1700_v6  ;;  %1703 = vst [vmem:[%s10068_s26 + $0x1838] sm:$0xff] %v1702_v7  ;;  %v1706_v9 = vld [vmem:[%s10060_s25 + $0x6108] sm:$0xff] }
 0x196   : > { %1705 = vst [vmem:[%s10068_s26 + $0x1840] sm:$0xff] %v1704_v8  ;;  %v1708_v10 = vld [vmem:[%s10060_s25 + $0x6140] sm:$0xff]  ;;  %v1710_v11 = vld [vmem:[%s10060_s25 + $0x6148] sm:$0xff]  ;;  %1707 = vst [vmem:[%s10068_s26 + $0x1848] sm:$0xff] %v1706_v9 }
 0x197   : > { %1709 = vst [vmem:[%s10068_s26 + $0x1850] sm:$0xff] %v1708_v10  ;;  %1711 = vst [vmem:[%s10068_s26 + $0x1858] sm:$0xff] %v1710_v11  ;;  %v1712_v12 = vld [vmem:[%s10060_s25 + $0x6180] sm:$0xff]  ;;  %v1714_v13 = vld [vmem:[%s10060_s25 + $0x6188] sm:$0xff] }
 0x198   : > { %v1716_v14 = vld [vmem:[%s10060_s25 + $0x61c0] sm:$0xff]  ;;  %1713 = vst [vmem:[%s10068_s26 + $0x1860] sm:$0xff] %v1712_v12  ;;  %1715 = vst [vmem:[%s10068_s26 + $0x1868] sm:$0xff] %v1714_v13  ;;  %v1718_v15 = vld [vmem:[%s10060_s25 + $0x61c8] sm:$0xff] }
 0x199   : > { %1717 = vst [vmem:[%s10068_s26 + $0x1870] sm:$0xff] %v1716_v14  ;;  %1719 = vst [vmem:[%s10068_s26 + $0x1878] sm:$0xff] %v1718_v15 }
 0x19a PF: > { %p7875_p5 = scmp.ge.s32.totalorder %s10002_s14, 1  ;;  %p1732_p6 = scmp.lt.s32.totalorder %s10002_s14, 5 }
 0x19c   : > { %p1733_p7 = pnand %p7875_p5, %p1732_p6 }
 0x19d   : > { %s1739_s27 = sand.u32 (!%p1733_p7), 1, %s9994_s12   ;;  %v2567_v16 = vlaneseq (!%p1733_p7)  ;;  %v10004_v17 = vmov (!%p1733_p7), 1966171168   ;;  %v11640_v20 = vld [vmem:[%s12599_s0] sm:$0xff] (!%p1733_p7)  ;;  %vm6696_vm0 = vcmask (!%p1733_p7), 523264   ;;  %s7876_s17 = sshll.u32 (!%p1733_p7), %s7869_s15, 2 }
 0x19e   : > { %1736 = sbr.rel (%p1733_p7) target bundleno = 1427 (0x593), region = 51  ;;  %v2593_v18 = vunpack.c.l.s4 (!%p1733_p7), %v10004_v17  ;;  %p1767_p8 = scmp.lt.s32.totalorder (!%p1733_p7), %s7876_s17, 15 }
 0x19f   : > { %s8772_s28 = smul.u32 (!%p1733_p7), 6272, %s1739_s27  ;;  %v11635_v19 = vshrl.u32 (!%p1733_p7), %v2567_v16, 7 }
 0x1a0   : > { %v2594_v21 = vunpack.c.0.s8 (!%p1733_p7), %v2593_v18 }
 0x1a1   : > { %s11642_s4 = scalar_lea.vmem (!%p1733_p7), [#allocation2], %s8772_s28 }
 0x1a2   : > { %v8799_v22 = vld [vmem:[%s11642_s4 + $0x4] ss:$16 sps:$4 sm:$0xff] (!%p1733_p7)   ;;  %v8801_v23 = vld [vmem:[%s11642_s4 + $0xc] ss:$16 sps:$4 sm:$0xff] (!%p1733_p7)   ;;  %v11647_v24 = vsub.s32 (!%p1733_p7), %v2594_v21, %v11635_v19  ;;  %v8803_v25 = vld [vmem:[%s11642_s4] ss:$16 sps:$4 sm:$0xff] (!%p1733_p7)  }
 0x1a3   : > { %6700 = vmatprep.subr.bf16.mxu0 (!%p1733_p7), %v8799_v22  ;;  %v8804_v26 = vld [vmem:[%s11642_s4 + $0x8] ss:$16 sps:$4 sm:$0xff] (!%p1733_p7)   ;;  %7233 = vmatprep.subr.bf16.mxu1 (!%p1733_p7), %v8801_v23  ;;  %v8805_v27 = vld [vmem:[%s11642_s4 + $0x24] ss:$16 sps:$4 sm:$0xff] (!%p1733_p7)   ;;  %v8807_v29 = vld [vmem:[%s11642_s4 + $0x2c] ss:$16 sps:$4 sm:$0xff] (!%p1733_p7)  }
 0x1a4   : > { %v11654_v28 = vrot.slane (!%p1733_p7), %v11640_v20, %v11647_v24  ;;  %6701 = vmatpush1.bf16.msra.mxu0 (!%p1733_p7), %v8803_v25  ;;  %7234 = vmatpush1.bf16.msra.mxu1 (!%p1733_p7), %v8804_v26  ;;  %v8809_v30 = vld [vmem:[%s11642_s4 + $0x20] ss:$16 sps:$4 sm:$0xff] (!%p1733_p7)   ;;  %v8810_v31 = vld [vmem:[%s11642_s4 + $0x28] ss:$16 sps:$4 sm:$0xff] (!%p1733_p7)   ;;  %v8811_v33 = vld [vmem:[%s11642_s4 + $0x44] ss:$16 sps:$4 sm:$0xff] (!%p1733_p7)  }
 0x1a5   : > { %6702 = vmatprep.subr.bf16.mxu0 %v8805_v27  ;;  %7235 = vmatprep.subr.bf16.mxu1 %v8807_v29  ;;  %v8813_v34 = vld [vmem:[%s11642_s4 + $0x4c] ss:$16 sps:$4 sm:$0xff]   ;;  %v8815_v35 = vld [vmem:[%s11642_s4 + $0x40] ss:$16 sps:$4 sm:$0xff]   ;;  %v8816_v36 = vld [vmem:[%s11642_s4 + $0x48] ss:$16 sps:$4 sm:$0xff]  }
 0x1a6   : > { %v2606_v32 = vcombine.high %v11654_v28, %v11654_v28  ;;  %v8817_v38 = vld [vmem:[%s11642_s4 + $0x64] ss:$16 sps:$4 sm:$0xff]   ;;  %v8819_v39 = vld [vmem:[%s11642_s4 + $0x6c] ss:$16 sps:$4 sm:$0xff]   ;;  %v8821_v40 = vld [vmem:[%s11642_s4 + $0x60] ss:$16 sps:$4 sm:$0xff]  }
 0x1a7   : > { %v8822_v41 = vld [vmem:[%s11642_s4 + $0x68] ss:$16 sps:$4 sm:$0xff]   ;;  %v8823_v42 = vld [vmem:[%s11642_s4 + $0x84] ss:$16 sps:$4 sm:$0xff]   ;;  %v8825_v43 = vld [vmem:[%s11642_s4 + $0x8c] ss:$16 sps:$4 sm:$0xff]  }
 0x1a8   : > { %v11666_v37 = vrot.slane %v2606_v32, %v11647_v24  ;;  %6703 = vmatpush1.bf16.msra.mxu0 %v8809_v30  ;;  %7236 = vmatpush1.bf16.msra.mxu1 %v8810_v31  ;;  %v8827_v44 = vld [vmem:[%s11642_s4 + $0x80] ss:$16 sps:$4 sm:$0xff]   ;;  %v8828_v45 = vld [vmem:[%s11642_s4 + $0x88] ss:$16 sps:$4 sm:$0xff]   ;;  %v8829_v46 = vld [vmem:[%s11642_s4 + $0xa4] ss:$16 sps:$4 sm:$0xff]  }
 0x1a9   : > { %6704 = vmatprep.subr.bf16.mxu0 %v8811_v33  ;;  %7237 = vmatprep.subr.bf16.mxu1 %v8813_v34  ;;  %v8831_v47 = vld [vmem:[%s11642_s4 + $0xac] ss:$16 sps:$4 sm:$0xff]   ;;  %v8833_v48 = vld [vmem:[%s11642_s4 + $0xa0] ss:$16 sps:$4 sm:$0xff]   ;;  %v8834_v49 = vld [vmem:[%s11642_s4 + $0xa8] ss:$16 sps:$4 sm:$0xff]   ;;  %v11728_v34 = vrot.slane %v11654_v28, %v11647_v24 }
 0x1aa   : > { %6732 = vmatprep.mubr.bf16.mxu0 %v11666_v37  ;;  %7265 = vmatprep.mubr.bf16.mxu1 %v11666_v37  ;;  %v8835_v50 = vld [vmem:[%s11642_s4 + $0xc4] ss:$16 sps:$4 sm:$0xff]   ;;  %v8837_v51 = vld [vmem:[%s11642_s4 + $0xcc] ss:$16 sps:$4 sm:$0xff]   ;;  %v8839_v52 = vld [vmem:[%s11642_s4 + $0xc0] ss:$16 sps:$4 sm:$0xff]  }
 0x1ab   : > { %v8840_v53 = vld [vmem:[%s11642_s4 + $0xc8] ss:$16 sps:$4 sm:$0xff]   ;;  %v8841_v54 = vld [vmem:[%s11642_s4 + $0xe4] ss:$16 sps:$4 sm:$0xff]   ;;  %v8843_v55 = vld [vmem:[%s11642_s4 + $0xec] ss:$16 sps:$4 sm:$0xff]  }
 0x1ac   : > { %6705 = vmatpush1.bf16.msra.mxu0 %v8815_v35  ;;  %7238 = vmatpush1.bf16.msra.mxu1 %v8816_v36  ;;  %v8845_v56 = vld [vmem:[%s11642_s4 + $0xe0] ss:$16 sps:$4 sm:$0xff]   ;;  %v8846_v57 = vld [vmem:[%s11642_s4 + $0xe8] ss:$16 sps:$4 sm:$0xff]   ;;  %v8847_v58 = vld [vmem:[%s11642_s4 + $0x104] ss:$16 sps:$4 sm:$0xff]  }
 0x1ad   : > { %6706 = vmatprep.subr.bf16.mxu0 %v8817_v38  ;;  %7239 = vmatprep.subr.bf16.mxu1 %v8819_v39  ;;  %v8849_v59 = vld [vmem:[%s11642_s4 + $0x10c] ss:$16 sps:$4 sm:$0xff]   ;;  %v8851_v60 = vld [vmem:[%s11642_s4 + $0x100] ss:$16 sps:$4 sm:$0xff]   ;;  %v8852_v61 = vld [vmem:[%s11642_s4 + $0x108] ss:$16 sps:$4 sm:$0xff]   ;;  %v2638_v38 = vcombine.high %v11666_v37, %v11666_v37 }
 0x1ae   : > { %v8853_v62 = vld [vmem:[%s11642_s4 + $0x124] ss:$16 sps:$4 sm:$0xff]   ;;  %v8855_v63 = vld [vmem:[%s11642_s4 + $0x12c] ss:$16 sps:$4 sm:$0xff]   ;;  %v8857_v0 = vld [vmem:[%s11642_s4 + $0x120] ss:$16 sps:$4 sm:$0xff]  }
 0x1af   : > { %v8858_v1 = vld [vmem:[%s11642_s4 + $0x128] ss:$16 sps:$4 sm:$0xff]   ;;  %v8859_v2 = vld [vmem:[%s11642_s4 + $0x144] ss:$16 sps:$4 sm:$0xff]   ;;  %v8861_v3 = vld [vmem:[%s11642_s4 + $0x14c] ss:$16 sps:$4 sm:$0xff]  }
 0x1b0   : > { %6707 = vmatpush1.bf16.msra.mxu0 %v8821_v40  ;;  %7240 = vmatpush1.bf16.msra.mxu1 %v8822_v41  ;;  %v8863_v4 = vld [vmem:[%s11642_s4 + $0x140] ss:$16 sps:$4 sm:$0xff]   ;;  %v8864_v5 = vld [vmem:[%s11642_s4 + $0x148] ss:$16 sps:$4 sm:$0xff]   ;;  %v8865_v6 = vld [vmem:[%s11642_s4 + $0x164] ss:$16 sps:$4 sm:$0xff]  }
 0x1b1   : > { %6708 = vmatprep.subr.bf16.mxu0 %v8823_v42  ;;  %7241 = vmatprep.subr.bf16.mxu1 %v8825_v43  ;;  %v8867_v7 = vld [vmem:[%s11642_s4 + $0x16c] ss:$16 sps:$4 sm:$0xff]   ;;  %v8869_v8 = vld [vmem:[%s11642_s4 + $0x160] ss:$16 sps:$4 sm:$0xff]   ;;  %v8870_v9 = vld [vmem:[%s11642_s4 + $0x168] ss:$16 sps:$4 sm:$0xff]  }
 0x1b2   : > { %v8871_v10 = vld [vmem:[%s11642_s4 + $0x184] ss:$16 sps:$4 sm:$0xff]   ;;  %v8873_v11 = vld [vmem:[%s11642_s4 + $0x18c] ss:$16 sps:$4 sm:$0xff]   ;;  %v8875_v12 = vld [vmem:[%s11642_s4 + $0x180] ss:$16 sps:$4 sm:$0xff]  }
 0x1b3   : > { %v8876_v13 = vld [vmem:[%s11642_s4 + $0x188] ss:$16 sps:$4 sm:$0xff]   ;;  %v8877_v14 = vld [vmem:[%s11642_s4 + $0x1a4] ss:$16 sps:$4 sm:$0xff]   ;;  %v8879_v15 = vld [vmem:[%s11642_s4 + $0x1ac] ss:$16 sps:$4 sm:$0xff]  }
 0x1b4   : > { %6709 = vmatpush1.bf16.msra.mxu0 %v8827_v44  ;;  %7242 = vmatpush1.bf16.msra.mxu1 %v8828_v45  ;;  %v8881_v16 = vld [vmem:[%s11642_s4 + $0x1a0] ss:$16 sps:$4 sm:$0xff]   ;;  %v8882_v17 = vld [vmem:[%s11642_s4 + $0x1a8] ss:$16 sps:$4 sm:$0xff]   ;;  %v8883_v18 = vld [vmem:[%s11642_s4 + $0x1c4] ss:$16 sps:$4 sm:$0xff]  }
 0x1b5   : > { %6710 = vmatprep.subr.bf16.mxu0 %v8829_v46  ;;  %7243 = vmatprep.subr.bf16.mxu1 %v8831_v47  ;;  %v8885_v21 = vld [vmem:[%s11642_s4 + $0x1cc] ss:$16 sps:$4 sm:$0xff]   ;;  %v8887_v22 = vld [vmem:[%s11642_s4 + $0x1c0] ss:$16 sps:$4 sm:$0xff]   ;;  %v8888_v23 = vld [vmem:[%s11642_s4 + $0x1c8] ss:$16 sps:$4 sm:$0xff]  }
 0x1b6   : > { %v8889_v25 = vld [vmem:[%s11642_s4 + $0x1e4] ss:$16 sps:$4 sm:$0xff]   ;;  %v8891_v26 = vld [vmem:[%s11642_s4 + $0x1ec] ss:$16 sps:$4 sm:$0xff]   ;;  %v8893_v27 = vld [vmem:[%s11642_s4 + $0x1e0] ss:$16 sps:$4 sm:$0xff]  }
 0x1b7   : > { %v8894_v29 = vld [vmem:[%s11642_s4 + $0x1e8] ss:$16 sps:$4 sm:$0xff]   ;;  %v8897_v30 = vld [vmem:[%s11642_s4 + $0x204] ss:$16 sps:$4 sm:$0xff]   ;;  %v8900_v31 = vld [vmem:[%s11642_s4 + $0x20c] ss:$16 sps:$4 sm:$0xff]  }
 0x1b8   : > { %6711 = vmatpush1.bf16.msra.mxu0 %v8833_v48  ;;  %7244 = vmatpush1.bf16.msra.mxu1 %v8834_v49  ;;  %v8895_v32 = vld [vmem:[%s11642_s4 + $0x200] ss:$16 sps:$4 sm:$0xff]   ;;  %v8898_v33 = vld [vmem:[%s11642_s4 + $0x208] ss:$16 sps:$4 sm:$0xff]   ;;  %v8903_v35 = vld [vmem:[%s11642_s4 + $0x224] ss:$16 sps:$4 sm:$0xff]  }
 0x1b9   : > { %6712 = vmatprep.subr.bf16.mxu0 %v8835_v50  ;;  %7245 = vmatprep.subr.bf16.mxu1 %v8837_v51  ;;  %v8906_v36 = vld [vmem:[%s11642_s4 + $0x22c] ss:$16 sps:$4 sm:$0xff]   ;;  %v8901_v39 = vld [vmem:[%s11642_s4 + $0x220] ss:$16 sps:$4 sm:$0xff]   ;;  %v8904_v28 = vld [vmem:[%s11642_s4 + $0x228] ss:$16 sps:$4 sm:$0xff]  }
 0x1ba   : > { %v8909_v40 = vld [vmem:[%s11642_s4 + $0x244] ss:$16 sps:$4 sm:$0xff]   ;;  %v8912_v41 = vld [vmem:[%s11642_s4 + $0x24c] ss:$16 sps:$4 sm:$0xff]   ;;  %v8907_v37 = vld [vmem:[%s11642_s4 + $0x240] ss:$16 sps:$4 sm:$0xff]  }
 0x1bb   : > { %v8910_v42 = vld [vmem:[%s11642_s4 + $0x248] ss:$16 sps:$4 sm:$0xff]   ;;  %v8915_v43 = vld [vmem:[%s11642_s4 + $0x264] ss:$16 sps:$4 sm:$0xff]   ;;  %v8918_v44 = vld [vmem:[%s11642_s4 + $0x26c] ss:$16 sps:$4 sm:$0xff]  }
 0x1bc   : > { %6713 = vmatpush1.bf16.msra.mxu0 %v8839_v52  ;;  %7246 = vmatpush1.bf16.msra.mxu1 %v8840_v53  ;;  %v8913_v45 = vld [vmem:[%s11642_s4 + $0x260] ss:$16 sps:$4 sm:$0xff]   ;;  %v8916_v46 = vld [vmem:[%s11642_s4 + $0x268] ss:$16 sps:$4 sm:$0xff]   ;;  %v8921_v47 = vld [vmem:[%s11642_s4 + $0x284] ss:$16 sps:$4 sm:$0xff]  }
 0x1bd   : > { %6714 = vmatprep.subr.bf16.mxu0 %v8841_v54  ;;  %7247 = vmatprep.subr.bf16.mxu1 %v8843_v55  ;;  %v8924_v48 = vld [vmem:[%s11642_s4 + $0x28c] ss:$16 sps:$4 sm:$0xff]   ;;  %v8919_v49 = vld [vmem:[%s11642_s4 + $0x280] ss:$16 sps:$4 sm:$0xff]   ;;  %v8922_v50 = vld [vmem:[%s11642_s4 + $0x288] ss:$16 sps:$4 sm:$0xff]  }
 0x1be   : > { %v8927_v51 = vld [vmem:[%s11642_s4 + $0x2a4] ss:$16 sps:$4 sm:$0xff]   ;;  %v8930_v52 = vld [vmem:[%s11642_s4 + $0x2ac] ss:$16 sps:$4 sm:$0xff]   ;;  %v8925_v53 = vld [vmem:[%s11642_s4 + $0x2a0] ss:$16 sps:$4 sm:$0xff]  }
 0x1bf   : > { %v8928_v54 = vld [vmem:[%s11642_s4 + $0x2a8] ss:$16 sps:$4 sm:$0xff]   ;;  %v8933_v55 = vld [vmem:[%s11642_s4 + $0x2c4] ss:$16 sps:$4 sm:$0xff]   ;;  %s12607_s17 = smov (!%p1767_p8, %s7876_s17), 15 }
 0x1c0   : > { %6715 = vmatpush1.bf16.msra.mxu0 %v8845_v56  ;;  %7248 = vmatpush1.bf16.msra.mxu1 %v8846_v57  ;;  %v8936_v56 = vld [vmem:[%s11642_s4 + $0x2cc] ss:$16 sps:$4 sm:$0xff]   ;;  %v8931_v57 = vld [vmem:[%s11642_s4 + $0x2c0] ss:$16 sps:$4 sm:$0xff]   ;;  %s1769_s21 = scalar_lea.vmem %s12601_s2, %s12607_s17  ;;  %s1774_s22 = scalar_lea.vmem %s12602_s3, %s12607_s17 }
 0x1c1   : > { %6716 = vmatprep.subr.bf16.mxu0 %v8847_v58  ;;  %7249 = vmatprep.subr.bf16.mxu1 %v8849_v59  ;;  %v8934_v58 = vld [vmem:[%s11642_s4 + $0x2c8] ss:$16 sps:$4 sm:$0xff]   ;;  %v8939_v59 = vld [vmem:[%s11642_s4 + $0x2e4] ss:$16 sps:$4 sm:$0xff]  }
 0x1c4   : > { %6717 = vmatpush1.bf16.msra.mxu0 %v8851_v60  ;;  %7250 = vmatpush1.bf16.msra.mxu1 %v8852_v61  ;;  %v8942_v60 = vld [vmem:[%s11642_s4 + $0x2ec] ss:$16 sps:$4 sm:$0xff]   ;;  %v8937_v61 = vld [vmem:[%s11642_s4 + $0x2e0] ss:$16 sps:$4 sm:$0xff]  }
 0x1c5   : > { %6718 = vmatprep.subr.bf16.mxu0 %v8853_v62  ;;  %7251 = vmatprep.subr.bf16.mxu1 %v8855_v63  ;;  %v8940_v62 = vld [vmem:[%s11642_s4 + $0x2e8] ss:$16 sps:$4 sm:$0xff]   ;;  %v8945_v63 = vld [vmem:[%s11642_s4 + $0x304] ss:$16 sps:$4 sm:$0xff]  }
 0x1c8   : > { %6719 = vmatpush1.bf16.msra.mxu0 %v8857_v0  ;;  %7252 = vmatpush1.bf16.msra.mxu1 %v8858_v1  ;;  %v8948_v0 = vld [vmem:[%s11642_s4 + $0x30c] ss:$16 sps:$4 sm:$0xff]   ;;  %v8943_v1 = vld [vmem:[%s11642_s4 + $0x300] ss:$16 sps:$4 sm:$0xff]  }
 0x1c9   : > { %6720 = vmatprep.subr.bf16.mxu0 %v8859_v2  ;;  %7253 = vmatprep.subr.bf16.mxu1 %v8861_v3  ;;  %v8946_v2 = vld [vmem:[%s11642_s4 + $0x308] ss:$16 sps:$4 sm:$0xff]   ;;  %v8951_v3 = vld [vmem:[%s11642_s4 + $0x324] ss:$16 sps:$4 sm:$0xff]  }
 0x1cc   : > { %6721 = vmatpush1.bf16.msra.mxu0 %v8863_v4  ;;  %7254 = vmatpush1.bf16.msra.mxu1 %v8864_v5  ;;  %v8954_v4 = vld [vmem:[%s11642_s4 + $0x32c] ss:$16 sps:$4 sm:$0xff]   ;;  %v8949_v5 = vld [vmem:[%s11642_s4 + $0x320] ss:$16 sps:$4 sm:$0xff]  }
 0x1cd   : > { %6722 = vmatprep.subr.bf16.mxu0 %v8865_v6  ;;  %7255 = vmatprep.subr.bf16.mxu1 %v8867_v7  ;;  %v8952_v6 = vld [vmem:[%s11642_s4 + $0x328] ss:$16 sps:$4 sm:$0xff]   ;;  %v8957_v7 = vld [vmem:[%s11642_s4 + $0x344] ss:$16 sps:$4 sm:$0xff]  }
 0x1d0   : > { %6723 = vmatpush1.bf16.msra.mxu0 %v8869_v8  ;;  %7256 = vmatpush1.bf16.msra.mxu1 %v8870_v9  ;;  %v8960_v8 = vld [vmem:[%s11642_s4 + $0x34c] ss:$16 sps:$4 sm:$0xff]   ;;  %v8955_v9 = vld [vmem:[%s11642_s4 + $0x340] ss:$16 sps:$4 sm:$0xff]  }
 0x1d1   : > { %6724 = vmatprep.subr.bf16.mxu0 %v8871_v10  ;;  %7257 = vmatprep.subr.bf16.mxu1 %v8873_v11  ;;  %v8958_v10 = vld [vmem:[%s11642_s4 + $0x348] ss:$16 sps:$4 sm:$0xff]   ;;  %v8963_v11 = vld [vmem:[%s11642_s4 + $0x364] ss:$16 sps:$4 sm:$0xff]  }
 0x1d4   : > { %6725 = vmatpush1.bf16.msra.mxu0 %v8875_v12  ;;  %7258 = vmatpush1.bf16.msra.mxu1 %v8876_v13  ;;  %v8966_v12 = vld [vmem:[%s11642_s4 + $0x36c] ss:$16 sps:$4 sm:$0xff]   ;;  %v8961_v13 = vld [vmem:[%s11642_s4 + $0x360] ss:$16 sps:$4 sm:$0xff]  }
 0x1d5   : > { %6726 = vmatprep.subr.bf16.mxu0 %v8877_v14  ;;  %7259 = vmatprep.subr.bf16.mxu1 %v8879_v15  ;;  %v8964_v14 = vld [vmem:[%s11642_s4 + $0x368] ss:$16 sps:$4 sm:$0xff]   ;;  %v8969_v15 = vld [vmem:[%s11642_s4 + $0x384] ss:$16 sps:$4 sm:$0xff]  }
 0x1d8   : > { %6727 = vmatpush1.bf16.msra.mxu0 %v8881_v16  ;;  %7260 = vmatpush1.bf16.msra.mxu1 %v8882_v17  ;;  %v8972_v16 = vld [vmem:[%s11642_s4 + $0x38c] ss:$16 sps:$4 sm:$0xff]   ;;  %v8967_v17 = vld [vmem:[%s11642_s4 + $0x380] ss:$16 sps:$4 sm:$0xff]  }
 0x1d9   : > { %6728 = vmatprep.subr.bf16.mxu0 %v8883_v18  ;;  %7261 = vmatprep.subr.bf16.mxu1 %v8885_v21  ;;  %v8970_v18 = vld [vmem:[%s11642_s4 + $0x388] ss:$16 sps:$4 sm:$0xff]   ;;  %v8975_v21 = vld [vmem:[%s11642_s4 + $0x3a4] ss:$16 sps:$4 sm:$0xff]  }
 0x1dc   : > { %6729 = vmatpush1.bf16.msra.mxu0 %v8887_v22  ;;  %7262 = vmatpush1.bf16.msra.mxu1 %v8888_v23  ;;  %v8978_v22 = vld [vmem:[%s11642_s4 + $0x3ac] ss:$16 sps:$4 sm:$0xff]   ;;  %v8973_v23 = vld [vmem:[%s11642_s4 + $0x3a0] ss:$16 sps:$4 sm:$0xff]  }
 0x1dd   : > { %6730 = vmatprep.subr.bf16.mxu0 %v8889_v25  ;;  %7263 = vmatprep.subr.bf16.mxu1 %v8891_v26  ;;  %v8976_v25 = vld [vmem:[%s11642_s4 + $0x3a8] ss:$16 sps:$4 sm:$0xff]   ;;  %v8981_v26 = vld [vmem:[%s11642_s4 + $0x3c4] ss:$16 sps:$4 sm:$0xff]  }
 0x1e0   : > { %6731 = vmatpush1.bf16.msra.mxu0 %v8893_v27  ;;  %7264 = vmatpush1.bf16.msra.mxu1 %v8894_v29  ;;  %v8984_v27 = vld [vmem:[%s11642_s4 + $0x3cc] ss:$16 sps:$4 sm:$0xff]   ;;  %v2591_v29 = vcombine.high %v11640_v20, %v11640_v20  ;;  %v8993_v20 = vld [vmem:[%s11642_s4 + $0x404] ss:$16 sps:$4 sm:$0xff]  }
 0x1e1   : > { %6741 = vmatprep.subr.bf16.mxu0 %v8897_v30  ;;  %7274 = vmatprep.subr.bf16.mxu1 %v8900_v31  ;;  %v8979_v30 = vld [vmem:[%s11642_s4 + $0x3c0] ss:$16 sps:$4 sm:$0xff]   ;;  %v8982_v31 = vld [vmem:[%s11642_s4 + $0x3c8] ss:$16 sps:$4 sm:$0xff]  }
 0x1e3   : > { %6733 = vmatmul.mubr.bf16.vlgmr.msra.gmra.mrb[0].mxu0 %v11728_v34  ;;  %7266 = vmatmul.mubr.bf16.vlgmr.msra.gmra.mrb[0].mxu1 %v11728_v34 }
 0x1e4   : > { %6742 = vmatpush1.bf16.msra.mxu0 %v8895_v32  ;;  %7275 = vmatpush1.bf16.msra.mxu1 %v8898_v33  ;;  %v8987_v32 = vld [vmem:[%s11642_s4 + $0x3e4] ss:$16 sps:$4 sm:$0xff]   ;;  %v8990_v33 = vld [vmem:[%s11642_s4 + $0x3ec] ss:$16 sps:$4 sm:$0xff]  }
 0x1e5   : > { %6743 = vmatprep.subr.bf16.mxu0 %v8903_v35  ;;  %7276 = vmatprep.subr.bf16.mxu1 %v8906_v36  ;;  %v11795_v35 = vrot.slane %v2591_v29, %v11647_v24  ;;  %v8985_v36 = vld [vmem:[%s11642_s4 + $0x3e0] ss:$16 sps:$4 sm:$0xff]   ;;  %v9066_v29 = vld [vmem:[%s11642_s4 + $0x588] ss:$16 sps:$4 sm:$0xff]  }
 0x1e6   : > { %6773 = vmatprep.mubr.bf16.mxu0 %v2638_v38  ;;  %7306 = vmatprep.mubr.bf16.mxu1 %v2638_v38  ;;  %v8988_v38 = vld [vmem:[%s11642_s4 + $0x3e8] ss:$16 sps:$4 sm:$0xff]  }
 0x1e8   : > { %6744 = vmatpush1.bf16.msra.mxu0 %v8901_v39  ;;  %7277 = vmatpush1.bf16.msra.mxu1 %v8904_v28  ;;  %v8996_v39 = vld [vmem:[%s11642_s4 + $0x40c] ss:$16 sps:$4 sm:$0xff]   ;;  %v2607_v28 = vcombine.high %v11795_v35, %v11795_v35 }
 0x1e9   : > { %6745 = vmatprep.subr.bf16.mxu0 %v8909_v40  ;;  %7278 = vmatprep.subr.bf16.mxu1 %v8912_v41  ;;  %v8991_v40 = vld [vmem:[%s11642_s4 + $0x400] ss:$16 sps:$4 sm:$0xff]   ;;  %v8994_v41 = vld [vmem:[%s11642_s4 + $0x408] ss:$16 sps:$4 sm:$0xff]  }
 0x1ec   : > { %6746 = vmatpush1.bf16.msra.mxu0 %v8907_v37  ;;  %7279 = vmatpush1.bf16.msra.mxu1 %v8910_v42  ;;  %v2636_v37 = vcombine.high %v11728_v34, %v11728_v34  ;;  %v8999_v42 = vld [vmem:[%s11642_s4 + $0x424] ss:$16 sps:$4 sm:$0xff]  }
 0x1ed   : > { %6747 = vmatprep.subr.bf16.mxu0 %v8915_v43  ;;  %7280 = vmatprep.subr.bf16.mxu1 %v8918_v44  ;;  %v9002_v43 = vld [vmem:[%s11642_s4 + $0x42c] ss:$16 sps:$4 sm:$0xff]   ;;  %v11810_v44 = vrot.slane %v2607_v28, %v11647_v24  ;;  %v9005_v34 = vld [vmem:[%s11642_s4 + $0x444] ss:$16 sps:$4 sm:$0xff]  }
 0x1ee   : > { %v9083_v28 = vld [vmem:[%s11642_s4 + $0x5e4] ss:$16 sps:$4 sm:$0xff]  }
 0x1f0   : > { %6748 = vmatpush1.bf16.msra.mxu0 %v8913_v45  ;;  %7281 = vmatpush1.bf16.msra.mxu1 %v8916_v46  ;;  %v8997_v45 = vld [vmem:[%s11642_s4 + $0x420] ss:$16 sps:$4 sm:$0xff]   ;;  %v9000_v46 = vld [vmem:[%s11642_s4 + $0x428] ss:$16 sps:$4 sm:$0xff]  }
 0x1f1   : > { %6749 = vmatprep.subr.bf16.mxu0 %v8921_v47  ;;  %7282 = vmatprep.subr.bf16.mxu1 %v8924_v48  ;;  %v9008_v47 = vld [vmem:[%s11642_s4 + $0x44c] ss:$16 sps:$4 sm:$0xff]   ;;  %v9003_v48 = vld [vmem:[%s11642_s4 + $0x440] ss:$16 sps:$4 sm:$0xff]  }
 0x1f4   : > { %6750 = vmatpush1.bf16.msra.mxu0 %v8919_v49  ;;  %7283 = vmatpush1.bf16.msra.mxu1 %v8922_v50  ;;  %v9006_v49 = vld [vmem:[%s11642_s4 + $0x448] ss:$16 sps:$4 sm:$0xff]   ;;  %v9011_v50 = vld [vmem:[%s11642_s4 + $0x464] ss:$16 sps:$4 sm:$0xff]  }
 0x1f5   : > { %6751 = vmatprep.subr.bf16.mxu0 %v8927_v51  ;;  %7284 = vmatprep.subr.bf16.mxu1 %v8930_v52  ;;  %v9014_v51 = vld [vmem:[%s11642_s4 + $0x46c] ss:$16 sps:$4 sm:$0xff]   ;;  %v9009_v52 = vld [vmem:[%s11642_s4 + $0x460] ss:$16 sps:$4 sm:$0xff]  }
 0x1f8   : > { %6752 = vmatpush1.bf16.msra.mxu0 %v8925_v53  ;;  %7285 = vmatpush1.bf16.msra.mxu1 %v8928_v54  ;;  %v9012_v53 = vld [vmem:[%s11642_s4 + $0x468] ss:$16 sps:$4 sm:$0xff]   ;;  %v9017_v54 = vld [vmem:[%s11642_s4 + $0x484] ss:$16 sps:$4 sm:$0xff]  }
 0x1f9   : > { %6753 = vmatprep.subr.bf16.mxu0 %v8933_v55  ;;  %7286 = vmatprep.subr.bf16.mxu1 %v8936_v56  ;;  %v9020_v55 = vld [vmem:[%s11642_s4 + $0x48c] ss:$16 sps:$4 sm:$0xff]   ;;  %v9015_v56 = vld [vmem:[%s11642_s4 + $0x480] ss:$16 sps:$4 sm:$0xff]  }
 0x1fc   : > { %6754 = vmatpush1.bf16.msra.mxu0 %v8931_v57  ;;  %7287 = vmatpush1.bf16.msra.mxu1 %v8934_v58  ;;  %v9018_v57 = vld [vmem:[%s11642_s4 + $0x488] ss:$16 sps:$4 sm:$0xff]   ;;  %v9023_v58 = vld [vmem:[%s11642_s4 + $0x4a4] ss:$16 sps:$4 sm:$0xff]  }
 0x1fd   : > { %6755 = vmatprep.subr.bf16.mxu0 %v8939_v59  ;;  %7288 = vmatprep.subr.bf16.mxu1 %v8942_v60  ;;  %v9026_v59 = vld [vmem:[%s11642_s4 + $0x4ac] ss:$16 sps:$4 sm:$0xff]   ;;  %v9021_v60 = vld [vmem:[%s11642_s4 + $0x4a0] ss:$16 sps:$4 sm:$0xff]  }
 0x200   : > { %6756 = vmatpush1.bf16.msra.mxu0 %v8937_v61  ;;  %7289 = vmatpush1.bf16.msra.mxu1 %v8940_v62  ;;  %v9024_v61 = vld [vmem:[%s11642_s4 + $0x4a8] ss:$16 sps:$4 sm:$0xff]   ;;  %v9029_v62 = vld [vmem:[%s11642_s4 + $0x4c4] ss:$16 sps:$4 sm:$0xff]  }
 0x201   : > { %6757 = vmatprep.subr.bf16.mxu0 %v8945_v63  ;;  %7290 = vmatprep.subr.bf16.mxu1 %v8948_v0  ;;  %v9032_v63 = vld [vmem:[%s11642_s4 + $0x4cc] ss:$16 sps:$4 sm:$0xff]   ;;  %v9027_v0 = vld [vmem:[%s11642_s4 + $0x4c0] ss:$16 sps:$4 sm:$0xff]  }
 0x204   : > { %6758 = vmatpush1.bf16.msra.mxu0 %v8943_v1  ;;  %7291 = vmatpush1.bf16.msra.mxu1 %v8946_v2  ;;  %v9030_v1 = vld [vmem:[%s11642_s4 + $0x4c8] ss:$16 sps:$4 sm:$0xff]   ;;  %v9035_v2 = vld [vmem:[%s11642_s4 + $0x4e4] ss:$16 sps:$4 sm:$0xff]  }
 0x205   : > { %6759 = vmatprep.subr.bf16.mxu0 %v8951_v3  ;;  %7292 = vmatprep.subr.bf16.mxu1 %v8954_v4  ;;  %v9038_v3 = vld [vmem:[%s11642_s4 + $0x4ec] ss:$16 sps:$4 sm:$0xff]   ;;  %v9033_v4 = vld [vmem:[%s11642_s4 + $0x4e0] ss:$16 sps:$4 sm:$0xff]  }
 0x208   : > { %6760 = vmatpush1.bf16.msra.mxu0 %v8949_v5  ;;  %7293 = vmatpush1.bf16.msra.mxu1 %v8952_v6  ;;  %v9036_v5 = vld [vmem:[%s11642_s4 + $0x4e8] ss:$16 sps:$4 sm:$0xff]   ;;  %v9041_v6 = vld [vmem:[%s11642_s4 + $0x504] ss:$16 sps:$4 sm:$0xff]  }
 0x209   : > { %6761 = vmatprep.subr.bf16.mxu0 %v8957_v7  ;;  %7294 = vmatprep.subr.bf16.mxu1 %v8960_v8  ;;  %v9044_v7 = vld [vmem:[%s11642_s4 + $0x50c] ss:$16 sps:$4 sm:$0xff]   ;;  %v9039_v8 = vld [vmem:[%s11642_s4 + $0x500] ss:$16 sps:$4 sm:$0xff]  }
 0x20c   : > { %6762 = vmatpush1.bf16.msra.mxu0 %v8955_v9  ;;  %7295 = vmatpush1.bf16.msra.mxu1 %v8958_v10  ;;  %v9042_v9 = vld [vmem:[%s11642_s4 + $0x508] ss:$16 sps:$4 sm:$0xff]   ;;  %v9047_v10 = vld [vmem:[%s11642_s4 + $0x524] ss:$16 sps:$4 sm:$0xff]  }
 0x20d   : > { %6763 = vmatprep.subr.bf16.mxu0 %v8963_v11  ;;  %7296 = vmatprep.subr.bf16.mxu1 %v8966_v12  ;;  %v9050_v11 = vld [vmem:[%s11642_s4 + $0x52c] ss:$16 sps:$4 sm:$0xff]   ;;  %v9045_v12 = vld [vmem:[%s11642_s4 + $0x520] ss:$16 sps:$4 sm:$0xff]  }
 0x210   : > { %6764 = vmatpush1.bf16.msra.mxu0 %v8961_v13  ;;  %7297 = vmatpush1.bf16.msra.mxu1 %v8964_v14  ;;  %v9048_v13 = vld [vmem:[%s11642_s4 + $0x528] ss:$16 sps:$4 sm:$0xff]   ;;  %v9053_v14 = vld [vmem:[%s11642_s4 + $0x544] ss:$16 sps:$4 sm:$0xff]  }
 0x211   : > { %6765 = vmatprep.subr.bf16.mxu0 %v8969_v15  ;;  %7298 = vmatprep.subr.bf16.mxu1 %v8972_v16  ;;  %v9056_v15 = vld [vmem:[%s11642_s4 + $0x54c] ss:$16 sps:$4 sm:$0xff]   ;;  %v9051_v16 = vld [vmem:[%s11642_s4 + $0x540] ss:$16 sps:$4 sm:$0xff]  }
 0x214   : > { %6766 = vmatpush1.bf16.msra.mxu0 %v8967_v17  ;;  %7299 = vmatpush1.bf16.msra.mxu1 %v8970_v18  ;;  %v9054_v17 = vld [vmem:[%s11642_s4 + $0x548] ss:$16 sps:$4 sm:$0xff]   ;;  %v9059_v18 = vld [vmem:[%s11642_s4 + $0x564] ss:$16 sps:$4 sm:$0xff]  }
 0x215   : > { %6767 = vmatprep.subr.bf16.mxu0 %v8975_v21  ;;  %7300 = vmatprep.subr.bf16.mxu1 %v8978_v22  ;;  %v9062_v21 = vld [vmem:[%s11642_s4 + $0x56c] ss:$16 sps:$4 sm:$0xff]   ;;  %v9057_v22 = vld [vmem:[%s11642_s4 + $0x560] ss:$16 sps:$4 sm:$0xff]  }
 0x218   : > { %6768 = vmatpush1.bf16.msra.mxu0 %v8973_v23  ;;  %7301 = vmatpush1.bf16.msra.mxu1 %v8976_v25  ;;  %v9060_v23 = vld [vmem:[%s11642_s4 + $0x568] ss:$16 sps:$4 sm:$0xff]   ;;  %v9065_v25 = vld [vmem:[%s11642_s4 + $0x584] ss:$16 sps:$4 sm:$0xff]  }
 0x219   : > { %6769 = vmatprep.subr.bf16.mxu0 %v8981_v26  ;;  %7302 = vmatprep.subr.bf16.mxu1 %v8984_v27  ;;  %v9068_v26 = vld [vmem:[%s11642_s4 + $0x58c] ss:$16 sps:$4 sm:$0xff]   ;;  %v9063_v27 = vld [vmem:[%s11642_s4 + $0x580] ss:$16 sps:$4 sm:$0xff]  }
 0x21c   : > { %6770 = vmatpush1.bf16.msra.mxu0 %v8979_v30  ;;  %7303 = vmatpush1.bf16.msra.mxu1 %v8982_v31  ;;  %v9071_v30 = vld [vmem:[%s11642_s4 + $0x5a4] ss:$16 sps:$4 sm:$0xff]   ;;  %v9074_v31 = vld [vmem:[%s11642_s4 + $0x5ac] ss:$16 sps:$4 sm:$0xff]  }
 0x21d   : > { %6771 = vmatprep.subr.bf16.mxu0 %v8987_v32  ;;  %7304 = vmatprep.subr.bf16.mxu1 %v8990_v33  ;;  %v9069_v32 = vld [vmem:[%s11642_s4 + $0x5a0] ss:$16 sps:$4 sm:$0xff]   ;;  %v9072_v33 = vld [vmem:[%s11642_s4 + $0x5a8] ss:$16 sps:$4 sm:$0xff]  }
 0x220   : > { %6772 = vmatpush1.bf16.msra.mxu0 %v8985_v36  ;;  %7305 = vmatpush1.bf16.msra.mxu1 %v8988_v38  ;;  %v9077_v36 = vld [vmem:[%s11642_s4 + $0x5c4] ss:$16 sps:$4 sm:$0xff]   ;;  %v9080_v38 = vld [vmem:[%s11642_s4 + $0x5cc] ss:$16 sps:$4 sm:$0xff]  }
 0x221   : > { %6782 = vmatprep.subr.bf16.mxu0 %v8993_v20  ;;  %7315 = vmatprep.subr.bf16.mxu1 %v8996_v39  ;;  %v9075_v20 = vld [vmem:[%s11642_s4 + $0x5c0] ss:$16 sps:$4 sm:$0xff]   ;;  %v9078_v39 = vld [vmem:[%s11642_s4 + $0x5c8] ss:$16 sps:$4 sm:$0xff]  }
 0x223   : > { %6774 = vmatmul.mubr.bf16.vlgmr.msra.gmra.mrb[0].mxu0 %v2636_v37  ;;  %7307 = vmatmul.mubr.bf16.vlgmr.msra.gmra.mrb[0].mxu1 %v2636_v37  ;;  %v9084_v37 = vld [vmem:[%s11642_s4 + $0x5e8] ss:$16 sps:$4 sm:$0xff]  }
 0x224   : > { %6783 = vmatpush1.bf16.msra.mxu0 %v8991_v40  ;;  %7316 = vmatpush1.bf16.msra.mxu1 %v8994_v41  ;;  %v9086_v40 = vld [vmem:[%s11642_s4 + $0x5ec] ss:$16 sps:$4 sm:$0xff]   ;;  %v9081_v41 = vld [vmem:[%s11642_s4 + $0x5e0] ss:$16 sps:$4 sm:$0xff]  }
 0x225   : > { %6784 = vmatprep.subr.bf16.mxu0 %v8999_v42  ;;  %7317 = vmatprep.subr.bf16.mxu1 %v9002_v43  ;;  %v9090_v42 = vld [vmem:[%s11642_s4 + $0x604] ss:$16 sps:$4 sm:$0xff]   ;;  %v9093_v43 = vld [vmem:[%s11642_s4 + $0x60c] ss:$16 sps:$4 sm:$0xff]  }
 0x226   : > { %6814 = vmatprep.mubr.bf16.mxu0 %v11810_v44  ;;  %7347 = vmatprep.mubr.bf16.mxu1 %v11810_v44 }
 0x228   : > { %6785 = vmatpush1.bf16.msra.mxu0 %v8997_v45  ;;  %7318 = vmatpush1.bf16.msra.mxu1 %v9000_v46  ;;  %v9088_v45 = vld [vmem:[%s11642_s4 + $0x600] ss:$16 sps:$4 sm:$0xff]   ;;  %v9091_v46 = vld [vmem:[%s11642_s4 + $0x608] ss:$16 sps:$4 sm:$0xff]  }
 0x229   : > { %6786 = vmatprep.subr.bf16.mxu0 %v9005_v34  ;;  %7319 = vmatprep.subr.bf16.mxu1 %v9008_v47  ;;  %v11878_v34 = vrot.slane %v11795_v35, %v11647_v24  ;;  %v9096_v47 = vld [vmem:[%s11642_s4 + $0x624] ss:$16 sps:$4 sm:$0xff]   ;;  %v9097_v35 = vld [vmem:[%s11642_s4 + $0x628] ss:$16 sps:$4 sm:$0xff]  }
 0x22c   : > { %6787 = vmatpush1.bf16.msra.mxu0 %v9003_v48  ;;  %7320 = vmatpush1.bf16.msra.mxu1 %v9006_v49  ;;  %v9099_v48 = vld [vmem:[%s11642_s4 + $0x62c] ss:$16 sps:$4 sm:$0xff]   ;;  %v2639_v49 = vcombine.high %v11810_v44, %v11810_v44  ;;  %v9100_v44 = vld [vmem:[%s11642_s4 + $0x640] ss:$16 sps:$4 sm:$0xff]  }
 0x22d   : > { %6788 = vmatprep.subr.bf16.mxu0 %v9011_v50  ;;  %7321 = vmatprep.subr.bf16.mxu1 %v9014_v51  ;;  %v9094_v50 = vld [vmem:[%s11642_s4 + $0x620] ss:$16 sps:$4 sm:$0xff]   ;;  %v9102_v51 = vld [vmem:[%s11642_s4 + $0x644] ss:$16 sps:$4 sm:$0xff]  }
 0x230   : > { %6789 = vmatpush1.bf16.msra.mxu0 %v9009_v52  ;;  %7322 = vmatpush1.bf16.msra.mxu1 %v9012_v53  ;;  %v9105_v52 = vld [vmem:[%s11642_s4 + $0x64c] ss:$16 sps:$4 sm:$0xff]   ;;  %v9103_v53 = vld [vmem:[%s11642_s4 + $0x648] ss:$16 sps:$4 sm:$0xff]  }
 0x231   : > { %6790 = vmatprep.subr.bf16.mxu0 %v9017_v54  ;;  %7323 = vmatprep.subr.bf16.mxu1 %v9020_v55  ;;  %v9108_v54 = vld [vmem:[%s11642_s4 + $0x664] ss:$16 sps:$4 sm:$0xff]   ;;  %v9111_v55 = vld [vmem:[%s11642_s4 + $0x66c] ss:$16 sps:$4 sm:$0xff]  }
 0x234   : > { %6791 = vmatpush1.bf16.msra.mxu0 %v9015_v56  ;;  %7324 = vmatpush1.bf16.msra.mxu1 %v9018_v57  ;;  %v9106_v56 = vld [vmem:[%s11642_s4 + $0x660] ss:$16 sps:$4 sm:$0xff]   ;;  %v9109_v57 = vld [vmem:[%s11642_s4 + $0x668] ss:$16 sps:$4 sm:$0xff]  }
 0x235   : > { %6792 = vmatprep.subr.bf16.mxu0 %v9023_v58  ;;  %7325 = vmatprep.subr.bf16.mxu1 %v9026_v59  ;;  %v9114_v58 = vld [vmem:[%s11642_s4 + $0x684] ss:$16 sps:$4 sm:$0xff]   ;;  %v9117_v59 = vld [vmem:[%s11642_s4 + $0x68c] ss:$16 sps:$4 sm:$0xff]  }
 0x238   : > { %6793 = vmatpush1.bf16.msra.mxu0 %v9021_v60  ;;  %7326 = vmatpush1.bf16.msra.mxu1 %v9024_v61  ;;  %v9112_v60 = vld [vmem:[%s11642_s4 + $0x680] ss:$16 sps:$4 sm:$0xff]   ;;  %v9115_v61 = vld [vmem:[%s11642_s4 + $0x688] ss:$16 sps:$4 sm:$0xff]  }
 0x239   : > { %6794 = vmatprep.subr.bf16.mxu0 %v9029_v62  ;;  %7327 = vmatprep.subr.bf16.mxu1 %v9032_v63  ;;  %v9120_v62 = vld [vmem:[%s11642_s4 + $0x6a4] ss:$16 sps:$4 sm:$0xff]   ;;  %v9123_v63 = vld [vmem:[%s11642_s4 + $0x6ac] ss:$16 sps:$4 sm:$0xff]  }
 0x23c   : > { %6795 = vmatpush1.bf16.msra.mxu0 %v9027_v0  ;;  %7328 = vmatpush1.bf16.msra.mxu1 %v9030_v1  ;;  %v9118_v0 = vld [vmem:[%s11642_s4 + $0x6a0] ss:$16 sps:$4 sm:$0xff]   ;;  %v9121_v1 = vld [vmem:[%s11642_s4 + $0x6a8] ss:$16 sps:$4 sm:$0xff]  }
 0x23d   : > { %6796 = vmatprep.subr.bf16.mxu0 %v9035_v2  ;;  %7329 = vmatprep.subr.bf16.mxu1 %v9038_v3  ;;  %v9126_v2 = vld [vmem:[%s11642_s4 + $0x6c4] ss:$16 sps:$4 sm:$0xff]   ;;  %v9129_v3 = vld [vmem:[%s11642_s4 + $0x6cc] ss:$16 sps:$4 sm:$0xff]  }
 0x240   : > { %6797 = vmatpush1.bf16.msra.mxu0 %v9033_v4  ;;  %7330 = vmatpush1.bf16.msra.mxu1 %v9036_v5  ;;  %v9124_v4 = vld [vmem:[%s11642_s4 + $0x6c0] ss:$16 sps:$4 sm:$0xff]   ;;  %v9127_v5 = vld [vmem:[%s11642_s4 + $0x6c8] ss:$16 sps:$4 sm:$0xff]  }
 0x241   : > { %6798 = vmatprep.subr.bf16.mxu0 %v9041_v6  ;;  %7331 = vmatprep.subr.bf16.mxu1 %v9044_v7  ;;  %v9132_v6 = vld [vmem:[%s11642_s4 + $0x6e4] ss:$16 sps:$4 sm:$0xff]   ;;  %v9135_v7 = vld [vmem:[%s11642_s4 + $0x6ec] ss:$16 sps:$4 sm:$0xff]  }
 0x244   : > { %6799 = vmatpush1.bf16.msra.mxu0 %v9039_v8  ;;  %7332 = vmatpush1.bf16.msra.mxu1 %v9042_v9  ;;  %v9130_v8 = vld [vmem:[%s11642_s4 + $0x6e0] ss:$16 sps:$4 sm:$0xff]   ;;  %v9133_v9 = vld [vmem:[%s11642_s4 + $0x6e8] ss:$16 sps:$4 sm:$0xff]  }
 0x245   : > { %6800 = vmatprep.subr.bf16.mxu0 %v9047_v10  ;;  %7333 = vmatprep.subr.bf16.mxu1 %v9050_v11  ;;  %v9138_v10 = vld [vmem:[%s11642_s4 + $0x704] ss:$16 sps:$4 sm:$0xff]   ;;  %v9141_v11 = vld [vmem:[%s11642_s4 + $0x70c] ss:$16 sps:$4 sm:$0xff]  }
 0x248   : > { %6801 = vmatpush1.bf16.msra.mxu0 %v9045_v12  ;;  %7334 = vmatpush1.bf16.msra.mxu1 %v9048_v13  ;;  %v9136_v12 = vld [vmem:[%s11642_s4 + $0x700] ss:$16 sps:$4 sm:$0xff]   ;;  %v9139_v13 = vld [vmem:[%s11642_s4 + $0x708] ss:$16 sps:$4 sm:$0xff]  }
 0x249   : > { %6802 = vmatprep.subr.bf16.mxu0 %v9053_v14  ;;  %7335 = vmatprep.subr.bf16.mxu1 %v9056_v15  ;;  %v9144_v14 = vld [vmem:[%s11642_s4 + $0x724] ss:$16 sps:$4 sm:$0xff]   ;;  %v9147_v15 = vld [vmem:[%s11642_s4 + $0x72c] ss:$16 sps:$4 sm:$0xff]  }
 0x24c   : > { %6803 = vmatpush1.bf16.msra.mxu0 %v9051_v16  ;;  %7336 = vmatpush1.bf16.msra.mxu1 %v9054_v17  ;;  %v9142_v16 = vld [vmem:[%s11642_s4 + $0x720] ss:$16 sps:$4 sm:$0xff]   ;;  %v9145_v17 = vld [vmem:[%s11642_s4 + $0x728] ss:$16 sps:$4 sm:$0xff]  }
 0x24d   : > { %6804 = vmatprep.subr.bf16.mxu0 %v9059_v18  ;;  %7337 = vmatprep.subr.bf16.mxu1 %v9062_v21  ;;  %v9150_v18 = vld [vmem:[%s11642_s4 + $0x744] ss:$16 sps:$4 sm:$0xff]   ;;  %v9153_v21 = vld [vmem:[%s11642_s4 + $0x74c] ss:$16 sps:$4 sm:$0xff]  }
 0x250   : > { %6805 = vmatpush1.bf16.msra.mxu0 %v9057_v22  ;;  %7338 = vmatpush1.bf16.msra.mxu1 %v9060_v23  ;;  %v9148_v22 = vld [vmem:[%s11642_s4 + $0x740] ss:$16 sps:$4 sm:$0xff]   ;;  %v9151_v23 = vld [vmem:[%s11642_s4 + $0x748] ss:$16 sps:$4 sm:$0xff]  }
 0x251   : > { %6806 = vmatprep.subr.bf16.mxu0 %v9065_v25  ;;  %7339 = vmatprep.subr.bf16.mxu1 %v9068_v26  ;;  %v9156_v25 = vld [vmem:[%s11642_s4 + $0x764] ss:$16 sps:$4 sm:$0xff]   ;;  %v9159_v26 = vld [vmem:[%s11642_s4 + $0x76c] ss:$16 sps:$4 sm:$0xff]  }
 0x254   : > { %6807 = vmatpush1.bf16.msra.mxu0 %v9063_v27  ;;  %7340 = vmatpush1.bf16.msra.mxu1 %v9066_v29  ;;  %v9154_v27 = vld [vmem:[%s11642_s4 + $0x760] ss:$16 sps:$4 sm:$0xff]   ;;  %v9157_v29 = vld [vmem:[%s11642_s4 + $0x768] ss:$16 sps:$4 sm:$0xff]  }
 0x255   : > { %6808 = vmatprep.subr.bf16.mxu0 %v9071_v30  ;;  %7341 = vmatprep.subr.bf16.mxu1 %v9074_v31  ;;  %v9162_v30 = vld [vmem:[%s11642_s4 + $0x784] ss:$16 sps:$4 sm:$0xff]   ;;  %v9165_v31 = vld [vmem:[%s11642_s4 + $0x78c] ss:$16 sps:$4 sm:$0xff]  }
 0x258   : > { %6809 = vmatpush1.bf16.msra.mxu0 %v9069_v32  ;;  %7342 = vmatpush1.bf16.msra.mxu1 %v9072_v33  ;;  %v9160_v32 = vld [vmem:[%s11642_s4 + $0x780] ss:$16 sps:$4 sm:$0xff]   ;;  %v9163_v33 = vld [vmem:[%s11642_s4 + $0x788] ss:$16 sps:$4 sm:$0xff]  }
 0x259   : > { %6810 = vmatprep.subr.bf16.mxu0 %v9077_v36  ;;  %7343 = vmatprep.subr.bf16.mxu1 %v9080_v38  ;;  %v9168_v36 = vld [vmem:[%s11642_s4 + $0x7a4] ss:$16 sps:$4 sm:$0xff]   ;;  %v9171_v38 = vld [vmem:[%s11642_s4 + $0x7ac] ss:$16 sps:$4 sm:$0xff]  }
 0x25c   : > { %6811 = vmatpush1.bf16.msra.mxu0 %v9075_v20  ;;  %7344 = vmatpush1.bf16.msra.mxu1 %v9078_v39  ;;  %v9166_v20 = vld [vmem:[%s11642_s4 + $0x7a0] ss:$16 sps:$4 sm:$0xff]   ;;  %v9169_v39 = vld [vmem:[%s11642_s4 + $0x7a8] ss:$16 sps:$4 sm:$0xff]  }
 0x25d   : > { %6812 = vmatprep.subr.bf16.mxu0 %v9083_v28  ;;  %7345 = vmatprep.subr.bf16.mxu1 %v9086_v40  ;;  %v9174_v28 = vld [vmem:[%s11642_s4 + $0x7c4] ss:$16 sps:$4 sm:$0xff]   ;;  %v9177_v40 = vld [vmem:[%s11642_s4 + $0x7cc] ss:$16 sps:$4 sm:$0xff]  }
 0x260   : > { %6813 = vmatpush1.bf16.msra.mxu0 %v9081_v41  ;;  %7346 = vmatpush1.bf16.msra.mxu1 %v9084_v37  ;;  %v9172_v41 = vld [vmem:[%s11642_s4 + $0x7c0] ss:$16 sps:$4 sm:$0xff]   ;;  %v11942_v37 = vld.sshfl [vmem:[%s12599_s0 + $0x8] sm:$0xff pattern:$0x75316420] }
 0x261   : > { %6823 = vmatprep.subr.bf16.mxu0 %v9090_v42  ;;  %7356 = vmatprep.subr.bf16.mxu1 %v9093_v43  ;;  %v9175_v42 = vld [vmem:[%s11642_s4 + $0x7c8] ss:$16 sps:$4 sm:$0xff]   ;;  %v9180_v43 = vld [vmem:[%s11642_s4 + $0x7e4] ss:$16 sps:$4 sm:$0xff]  }
 0x263   : > { %6815 = vmatmul.mubr.bf16.vlgmr.msra.gmra.mrb[0].mxu0 %v11878_v34  ;;  %7348 = vmatmul.mubr.bf16.vlgmr.msra.gmra.mrb[0].mxu1 %v11878_v34 }
 0x264   : > { %6824 = vmatpush1.bf16.msra.mxu0 %v9088_v45  ;;  %7357 = vmatpush1.bf16.msra.mxu1 %v9091_v46  ;;  %v9183_v45 = vld [vmem:[%s11642_s4 + $0x7ec] ss:$16 sps:$4 sm:$0xff]   ;;  %v9178_v46 = vld [vmem:[%s11642_s4 + $0x7e0] ss:$16 sps:$4 sm:$0xff]  }
 0x265   : > { %6825 = vmatprep.subr.bf16.mxu0 %v9096_v47  ;;  %7358 = vmatprep.subr.bf16.mxu1 %v9099_v48  ;;  %v9181_v47 = vld [vmem:[%s11642_s4 + $0x7e8] ss:$16 sps:$4 sm:$0xff]   ;;  %v9186_v48 = vld [vmem:[%s11642_s4 + $0x804] ss:$16 sps:$4 sm:$0xff]  }
 0x266   : > { %6855 = vmatprep.mubr.bf16.mxu0 %v2639_v49  ;;  %7388 = vmatprep.mubr.bf16.mxu1 %v2639_v49  ;;  %v9189_v49 = vld [vmem:[%s11642_s4 + $0x80c] ss:$16 sps:$4 sm:$0xff]  }
 0x268   : > { %6826 = vmatpush1.bf16.msra.mxu0 %v9094_v50  ;;  %7359 = vmatpush1.bf16.msra.mxu1 %v9097_v35  ;;  %v2655_v50 = vcombine.high %v11942_v37, %v11942_v37  ;;  %v9184_v35 = vld [vmem:[%s11642_s4 + $0x800] ss:$16 sps:$4 sm:$0xff]  }
 0x269   : > { %6827 = vmatprep.subr.bf16.mxu0 %v9102_v51  ;;  %7360 = vmatprep.subr.bf16.mxu1 %v9105_v52  ;;  %v2637_v51 = vcombine.high %v11878_v34, %v11878_v34  ;;  %v9187_v52 = vld [vmem:[%s11642_s4 + $0x808] ss:$16 sps:$4 sm:$0xff]   ;;  %v9190_v34 = vld [vmem:[%s11642_s4 + $0x820] ss:$16 sps:$4 sm:$0xff]  }
 0x26c   : > { %6828 = vmatpush1.bf16.msra.mxu0 %v9100_v44  ;;  %7361 = vmatpush1.bf16.msra.mxu1 %v9103_v53  ;;  %v9192_v44 = vld [vmem:[%s11642_s4 + $0x824] ss:$16 sps:$4 sm:$0xff]   ;;  %v9195_v53 = vld [vmem:[%s11642_s4 + $0x82c] ss:$16 sps:$4 sm:$0xff]  }
 0x26d   : > { %6829 = vmatprep.subr.bf16.mxu0 %v9108_v54  ;;  %7362 = vmatprep.subr.bf16.mxu1 %v9111_v55  ;;  %v11960_v54 = vrot.slane %v2655_v50, %v11647_v24  ;;  %v9193_v55 = vld [vmem:[%s11642_s4 + $0x828] ss:$16 sps:$4 sm:$0xff]   ;;  %v9276_v50 = vld [vmem:[%s11642_s4 + $0x9e4] ss:$16 sps:$4 sm:$0xff]  }
 0x270   : > { %6830 = vmatpush1.bf16.msra.mxu0 %v9106_v56  ;;  %7363 = vmatpush1.bf16.msra.mxu1 %v9109_v57  ;;  %v9198_v56 = vld [vmem:[%s11642_s4 + $0x844] ss:$16 sps:$4 sm:$0xff]   ;;  %v9201_v57 = vld [vmem:[%s11642_s4 + $0x84c] ss:$16 sps:$4 sm:$0xff]  }
 0x271   : > { %6831 = vmatprep.subr.bf16.mxu0 %v9114_v58  ;;  %7364 = vmatprep.subr.bf16.mxu1 %v9117_v59  ;;  %v9196_v58 = vld [vmem:[%s11642_s4 + $0x840] ss:$16 sps:$4 sm:$0xff]   ;;  %v9199_v59 = vld [vmem:[%s11642_s4 + $0x848] ss:$16 sps:$4 sm:$0xff]  }
 0x274   : > { %6832 = vmatpush1.bf16.msra.mxu0 %v9112_v60  ;;  %7365 = vmatpush1.bf16.msra.mxu1 %v9115_v61  ;;  %v9204_v60 = vld [vmem:[%s11642_s4 + $0x864] ss:$16 sps:$4 sm:$0xff]   ;;  %v9207_v61 = vld [vmem:[%s11642_s4 + $0x86c] ss:$16 sps:$4 sm:$0xff]  }
 0x275   : > { %6833 = vmatprep.subr.bf16.mxu0 %v9120_v62  ;;  %7366 = vmatprep.subr.bf16.mxu1 %v9123_v63  ;;  %v9202_v62 = vld [vmem:[%s11642_s4 + $0x860] ss:$16 sps:$4 sm:$0xff]   ;;  %v9205_v63 = vld [vmem:[%s11642_s4 + $0x868] ss:$16 sps:$4 sm:$0xff]  }
 0x278   : > { %6834 = vmatpush1.bf16.msra.mxu0 %v9118_v0  ;;  %7367 = vmatpush1.bf16.msra.mxu1 %v9121_v1  ;;  %v9210_v0 = vld [vmem:[%s11642_s4 + $0x884] ss:$16 sps:$4 sm:$0xff]   ;;  %v9213_v1 = vld [vmem:[%s11642_s4 + $0x88c] ss:$16 sps:$4 sm:$0xff]  }
 0x279   : > { %6835 = vmatprep.subr.bf16.mxu0 %v9126_v2  ;;  %7368 = vmatprep.subr.bf16.mxu1 %v9129_v3  ;;  %v9208_v2 = vld [vmem:[%s11642_s4 + $0x880] ss:$16 sps:$4 sm:$0xff]   ;;  %v9211_v3 = vld [vmem:[%s11642_s4 + $0x888] ss:$16 sps:$4 sm:$0xff]  }
 0x27c   : > { %6836 = vmatpush1.bf16.msra.mxu0 %v9124_v4  ;;  %7369 = vmatpush1.bf16.msra.mxu1 %v9127_v5  ;;  %v9216_v4 = vld [vmem:[%s11642_s4 + $0x8a4] ss:$16 sps:$4 sm:$0xff]   ;;  %v9219_v5 = vld [vmem:[%s11642_s4 + $0x8ac] ss:$16 sps:$4 sm:$0xff]  }
 0x27d   : > { %6837 = vmatprep.subr.bf16.mxu0 %v9132_v6  ;;  %7370 = vmatprep.subr.bf16.mxu1 %v9135_v7  ;;  %v9214_v6 = vld [vmem:[%s11642_s4 + $0x8a0] ss:$16 sps:$4 sm:$0xff]   ;;  %v9217_v7 = vld [vmem:[%s11642_s4 + $0x8a8] ss:$16 sps:$4 sm:$0xff]  }
 0x280   : > { %6838 = vmatpush1.bf16.msra.mxu0 %v9130_v8  ;;  %7371 = vmatpush1.bf16.msra.mxu1 %v9133_v9  ;;  %v9222_v8 = vld [vmem:[%s11642_s4 + $0x8c4] ss:$16 sps:$4 sm:$0xff]   ;;  %v9225_v9 = vld [vmem:[%s11642_s4 + $0x8cc] ss:$16 sps:$4 sm:$0xff]  }
 0x281   : > { %6839 = vmatprep.subr.bf16.mxu0 %v9138_v10  ;;  %7372 = vmatprep.subr.bf16.mxu1 %v9141_v11  ;;  %v9220_v10 = vld [vmem:[%s11642_s4 + $0x8c0] ss:$16 sps:$4 sm:$0xff]   ;;  %v9223_v11 = vld [vmem:[%s11642_s4 + $0x8c8] ss:$16 sps:$4 sm:$0xff]  }
 0x284   : > { %6840 = vmatpush1.bf16.msra.mxu0 %v9136_v12  ;;  %7373 = vmatpush1.bf16.msra.mxu1 %v9139_v13  ;;  %v9228_v12 = vld [vmem:[%s11642_s4 + $0x8e4] ss:$16 sps:$4 sm:$0xff]   ;;  %v9231_v13 = vld [vmem:[%s11642_s4 + $0x8ec] ss:$16 sps:$4 sm:$0xff]  }
 0x285   : > { %6841 = vmatprep.subr.bf16.mxu0 %v9144_v14  ;;  %7374 = vmatprep.subr.bf16.mxu1 %v9147_v15  ;;  %v9226_v14 = vld [vmem:[%s11642_s4 + $0x8e0] ss:$16 sps:$4 sm:$0xff]   ;;  %v9229_v15 = vld [vmem:[%s11642_s4 + $0x8e8] ss:$16 sps:$4 sm:$0xff]  }
 0x288   : > { %6842 = vmatpush1.bf16.msra.mxu0 %v9142_v16  ;;  %7375 = vmatpush1.bf16.msra.mxu1 %v9145_v17  ;;  %v9234_v16 = vld [vmem:[%s11642_s4 + $0x904] ss:$16 sps:$4 sm:$0xff]   ;;  %v9237_v17 = vld [vmem:[%s11642_s4 + $0x90c] ss:$16 sps:$4 sm:$0xff]  }
 0x289   : > { %6843 = vmatprep.subr.bf16.mxu0 %v9150_v18  ;;  %7376 = vmatprep.subr.bf16.mxu1 %v9153_v21  ;;  %v9232_v18 = vld [vmem:[%s11642_s4 + $0x900] ss:$16 sps:$4 sm:$0xff]   ;;  %v9235_v21 = vld [vmem:[%s11642_s4 + $0x908] ss:$16 sps:$4 sm:$0xff]  }
 0x28c   : > { %6844 = vmatpush1.bf16.msra.mxu0 %v9148_v22  ;;  %7377 = vmatpush1.bf16.msra.mxu1 %v9151_v23  ;;  %v9240_v22 = vld [vmem:[%s11642_s4 + $0x924] ss:$16 sps:$4 sm:$0xff]   ;;  %v9243_v23 = vld [vmem:[%s11642_s4 + $0x92c] ss:$16 sps:$4 sm:$0xff]  }
 0x28d   : > { %6845 = vmatprep.subr.bf16.mxu0 %v9156_v25  ;;  %7378 = vmatprep.subr.bf16.mxu1 %v9159_v26  ;;  %v9238_v25 = vld [vmem:[%s11642_s4 + $0x920] ss:$16 sps:$4 sm:$0xff]   ;;  %v9241_v26 = vld [vmem:[%s11642_s4 + $0x928] ss:$16 sps:$4 sm:$0xff]  }
 0x290   : > { %6846 = vmatpush1.bf16.msra.mxu0 %v9154_v27  ;;  %7379 = vmatpush1.bf16.msra.mxu1 %v9157_v29  ;;  %v9246_v27 = vld [vmem:[%s11642_s4 + $0x944] ss:$16 sps:$4 sm:$0xff]   ;;  %v9249_v29 = vld [vmem:[%s11642_s4 + $0x94c] ss:$16 sps:$4 sm:$0xff]  }
 0x291   : > { %6847 = vmatprep.subr.bf16.mxu0 %v9162_v30  ;;  %7380 = vmatprep.subr.bf16.mxu1 %v9165_v31  ;;  %v9244_v30 = vld [vmem:[%s11642_s4 + $0x940] ss:$16 sps:$4 sm:$0xff]   ;;  %v9247_v31 = vld [vmem:[%s11642_s4 + $0x948] ss:$16 sps:$4 sm:$0xff]  }
 0x294   : > { %6848 = vmatpush1.bf16.msra.mxu0 %v9160_v32  ;;  %7381 = vmatpush1.bf16.msra.mxu1 %v9163_v33  ;;  %v9252_v32 = vld [vmem:[%s11642_s4 + $0x964] ss:$16 sps:$4 sm:$0xff]   ;;  %v9255_v33 = vld [vmem:[%s11642_s4 + $0x96c] ss:$16 sps:$4 sm:$0xff]  }
 0x295   : > { %6849 = vmatprep.subr.bf16.mxu0 %v9168_v36  ;;  %7382 = vmatprep.subr.bf16.mxu1 %v9171_v38  ;;  %v9250_v36 = vld [vmem:[%s11642_s4 + $0x960] ss:$16 sps:$4 sm:$0xff]   ;;  %v9253_v38 = vld [vmem:[%s11642_s4 + $0x968] ss:$16 sps:$4 sm:$0xff]  }
 0x298   : > { %6850 = vmatpush1.bf16.msra.mxu0 %v9166_v20  ;;  %7383 = vmatpush1.bf16.msra.mxu1 %v9169_v39  ;;  %v9258_v20 = vld [vmem:[%s11642_s4 + $0x984] ss:$16 sps:$4 sm:$0xff]   ;;  %v9261_v39 = vld [vmem:[%s11642_s4 + $0x98c] ss:$16 sps:$4 sm:$0xff]  }
 0x299   : > { %6851 = vmatprep.subr.bf16.mxu0 %v9174_v28  ;;  %7384 = vmatprep.subr.bf16.mxu1 %v9177_v40  ;;  %v9256_v28 = vld [vmem:[%s11642_s4 + $0x980] ss:$16 sps:$4 sm:$0xff]   ;;  %v9259_v40 = vld [vmem:[%s11642_s4 + $0x988] ss:$16 sps:$4 sm:$0xff]  }
 0x29c   : > { %6852 = vmatpush1.bf16.msra.mxu0 %v9172_v41  ;;  %7385 = vmatpush1.bf16.msra.mxu1 %v9175_v42  ;;  %v9264_v41 = vld [vmem:[%s11642_s4 + $0x9a4] ss:$16 sps:$4 sm:$0xff]   ;;  %v9267_v42 = vld [vmem:[%s11642_s4 + $0x9ac] ss:$16 sps:$4 sm:$0xff]  }
 0x29d   : > { %6853 = vmatprep.subr.bf16.mxu0 %v9180_v43  ;;  %7386 = vmatprep.subr.bf16.mxu1 %v9183_v45  ;;  %v9262_v43 = vld [vmem:[%s11642_s4 + $0x9a0] ss:$16 sps:$4 sm:$0xff]   ;;  %v9265_v45 = vld [vmem:[%s11642_s4 + $0x9a8] ss:$16 sps:$4 sm:$0xff]  }
 0x2a0   : > { %6854 = vmatpush1.bf16.msra.mxu0 %v9178_v46  ;;  %7387 = vmatpush1.bf16.msra.mxu1 %v9181_v47  ;;  %v9270_v46 = vld [vmem:[%s11642_s4 + $0x9c4] ss:$16 sps:$4 sm:$0xff]   ;;  %v9273_v47 = vld [vmem:[%s11642_s4 + $0x9cc] ss:$16 sps:$4 sm:$0xff]  }
 0x2a1   : > { %6864 = vmatprep.subr.bf16.mxu0 %v9186_v48  ;;  %7397 = vmatprep.subr.bf16.mxu1 %v9189_v49  ;;  %v9268_v48 = vld [vmem:[%s11642_s4 + $0x9c0] ss:$16 sps:$4 sm:$0xff]   ;;  %v9271_v49 = vld [vmem:[%s11642_s4 + $0x9c8] ss:$16 sps:$4 sm:$0xff]  }
 0x2a3   : > { %6856 = vmatmul.mubr.bf16.vlgmr.msra.gmra.mrb[0].mxu0 %v2637_v51  ;;  %7389 = vmatmul.mubr.bf16.vlgmr.msra.gmra.mrb[0].mxu1 %v2637_v51  ;;  %v9274_v51 = vld [vmem:[%s11642_s4 + $0x9e0] ss:$16 sps:$4 sm:$0xff]  }
 0x2a4   : > { %6865 = vmatpush1.bf16.msra.mxu0 %v9184_v35  ;;  %7398 = vmatpush1.bf16.msra.mxu1 %v9187_v52  ;;  %v9279_v35 = vld [vmem:[%s11642_s4 + $0x9ec] ss:$16 sps:$4 sm:$0xff]   ;;  %v9277_v52 = vld [vmem:[%s11642_s4 + $0x9e8] ss:$16 sps:$4 sm:$0xff]  }
 0x2a5   : > { %6866 = vmatprep.subr.bf16.mxu0 %v9192_v44  ;;  %7399 = vmatprep.subr.bf16.mxu1 %v9195_v53  ;;  %v9282_v44 = vld [vmem:[%s11642_s4 + $0xa04] ss:$16 sps:$4 sm:$0xff]   ;;  %v9285_v53 = vld [vmem:[%s11642_s4 + $0xa0c] ss:$16 sps:$4 sm:$0xff]  }
 0x2a6   : > { %6896 = vmatprep.mubr.bf16.mxu0 %v11960_v54  ;;  %7429 = vmatprep.mubr.bf16.mxu1 %v11960_v54 }
 0x2a8   : > { %6867 = vmatpush1.bf16.msra.mxu0 %v9190_v34  ;;  %7400 = vmatpush1.bf16.msra.mxu1 %v9193_v55  ;;  %v12026_v34 = vrot.slane %v11942_v37, %v11647_v24  ;;  %v9280_v55 = vld [vmem:[%s11642_s4 + $0xa00] ss:$16 sps:$4 sm:$0xff]  }
 0x2a9   : > { %6868 = vmatprep.subr.bf16.mxu0 %v9198_v56  ;;  %7401 = vmatprep.subr.bf16.mxu1 %v9201_v57  ;;  %v9283_v56 = vld [vmem:[%s11642_s4 + $0xa08] ss:$16 sps:$4 sm:$0xff]   ;;  %v9288_v57 = vld [vmem:[%s11642_s4 + $0xa24] ss:$16 sps:$4 sm:$0xff]   ;;  %v9286_v37 = vld [vmem:[%s11642_s4 + $0xa20] ss:$16 sps:$4 sm:$0xff]  }
 0x2ac   : > { %6869 = vmatpush1.bf16.msra.mxu0 %v9196_v58  ;;  %7402 = vmatpush1.bf16.msra.mxu1 %v9199_v59  ;;  %v9291_v58 = vld [vmem:[%s11642_s4 + $0xa2c] ss:$16 sps:$4 sm:$0xff]   ;;  %v2687_v59 = vcombine.high %v11960_v54, %v11960_v54  ;;  %v9292_v54 = vld [vmem:[%s11642_s4 + $0xa40] ss:$16 sps:$4 sm:$0xff]  }
 0x2ad   : > { %6870 = vmatprep.subr.bf16.mxu0 %v9204_v60  ;;  %7403 = vmatprep.subr.bf16.mxu1 %v9207_v61  ;;  %v9289_v60 = vld [vmem:[%s11642_s4 + $0xa28] ss:$16 sps:$4 sm:$0xff]   ;;  %v9294_v61 = vld [vmem:[%s11642_s4 + $0xa44] ss:$16 sps:$4 sm:$0xff]  }
 0x2b0   : > { %6871 = vmatpush1.bf16.msra.mxu0 %v9202_v62  ;;  %7404 = vmatpush1.bf16.msra.mxu1 %v9205_v63  ;;  %v9297_v62 = vld [vmem:[%s11642_s4 + $0xa4c] ss:$16 sps:$4 sm:$0xff]   ;;  %v9295_v63 = vld [vmem:[%s11642_s4 + $0xa48] ss:$16 sps:$4 sm:$0xff]  }
 0x2b1   : > { %6872 = vmatprep.subr.bf16.mxu0 %v9210_v0  ;;  %7405 = vmatprep.subr.bf16.mxu1 %v9213_v1  ;;  %v9300_v0 = vld [vmem:[%s11642_s4 + $0xa64] ss:$16 sps:$4 sm:$0xff]   ;;  %v9303_v1 = vld [vmem:[%s11642_s4 + $0xa6c] ss:$16 sps:$4 sm:$0xff]  }
 0x2b4   : > { %6873 = vmatpush1.bf16.msra.mxu0 %v9208_v2  ;;  %7406 = vmatpush1.bf16.msra.mxu1 %v9211_v3  ;;  %v9298_v2 = vld [vmem:[%s11642_s4 + $0xa60] ss:$16 sps:$4 sm:$0xff]   ;;  %v9301_v3 = vld [vmem:[%s11642_s4 + $0xa68] ss:$16 sps:$4 sm:$0xff]  }
 0x2b5   : > { %6874 = vmatprep.subr.bf16.mxu0 %v9216_v4  ;;  %7407 = vmatprep.subr.bf16.mxu1 %v9219_v5  ;;  %v9306_v4 = vld [vmem:[%s11642_s4 + $0xa84] ss:$16 sps:$4 sm:$0xff]   ;;  %v9309_v5 = vld [vmem:[%s11642_s4 + $0xa8c] ss:$16 sps:$4 sm:$0xff]  }
 0x2b8   : > { %6875 = vmatpush1.bf16.msra.mxu0 %v9214_v6  ;;  %7408 = vmatpush1.bf16.msra.mxu1 %v9217_v7  ;;  %v9304_v6 = vld [vmem:[%s11642_s4 + $0xa80] ss:$16 sps:$4 sm:$0xff]   ;;  %v9307_v7 = vld [vmem:[%s11642_s4 + $0xa88] ss:$16 sps:$4 sm:$0xff]  }
 0x2b9   : > { %6876 = vmatprep.subr.bf16.mxu0 %v9222_v8  ;;  %7409 = vmatprep.subr.bf16.mxu1 %v9225_v9  ;;  %v9312_v8 = vld [vmem:[%s11642_s4 + $0xaa4] ss:$16 sps:$4 sm:$0xff]   ;;  %v9315_v9 = vld [vmem:[%s11642_s4 + $0xaac] ss:$16 sps:$4 sm:$0xff]  }
 0x2bc   : > { %6877 = vmatpush1.bf16.msra.mxu0 %v9220_v10  ;;  %7410 = vmatpush1.bf16.msra.mxu1 %v9223_v11  ;;  %v9310_v10 = vld [vmem:[%s11642_s4 + $0xaa0] ss:$16 sps:$4 sm:$0xff]   ;;  %v9313_v11 = vld [vmem:[%s11642_s4 + $0xaa8] ss:$16 sps:$4 sm:$0xff]  }
 0x2bd   : > { %6878 = vmatprep.subr.bf16.mxu0 %v9228_v12  ;;  %7411 = vmatprep.subr.bf16.mxu1 %v9231_v13  ;;  %v9318_v12 = vld [vmem:[%s11642_s4 + $0xac4] ss:$16 sps:$4 sm:$0xff]   ;;  %v9321_v13 = vld [vmem:[%s11642_s4 + $0xacc] ss:$16 sps:$4 sm:$0xff]  }
 0x2c0   : > { %6879 = vmatpush1.bf16.msra.mxu0 %v9226_v14  ;;  %7412 = vmatpush1.bf16.msra.mxu1 %v9229_v15  ;;  %v9316_v14 = vld [vmem:[%s11642_s4 + $0xac0] ss:$16 sps:$4 sm:$0xff]   ;;  %v9319_v15 = vld [vmem:[%s11642_s4 + $0xac8] ss:$16 sps:$4 sm:$0xff]  }
 0x2c1   : > { %6880 = vmatprep.subr.bf16.mxu0 %v9234_v16  ;;  %7413 = vmatprep.subr.bf16.mxu1 %v9237_v17  ;;  %v9324_v16 = vld [vmem:[%s11642_s4 + $0xae4] ss:$16 sps:$4 sm:$0xff]   ;;  %v9327_v17 = vld [vmem:[%s11642_s4 + $0xaec] ss:$16 sps:$4 sm:$0xff]  }
 0x2c4   : > { %6881 = vmatpush1.bf16.msra.mxu0 %v9232_v18  ;;  %7414 = vmatpush1.bf16.msra.mxu1 %v9235_v21  ;;  %v9322_v18 = vld [vmem:[%s11642_s4 + $0xae0] ss:$16 sps:$4 sm:$0xff]   ;;  %v9325_v21 = vld [vmem:[%s11642_s4 + $0xae8] ss:$16 sps:$4 sm:$0xff]  }
 0x2c5   : > { %6882 = vmatprep.subr.bf16.mxu0 %v9240_v22  ;;  %7415 = vmatprep.subr.bf16.mxu1 %v9243_v23  ;;  %v9330_v22 = vld [vmem:[%s11642_s4 + $0xb04] ss:$16 sps:$4 sm:$0xff]   ;;  %v9333_v23 = vld [vmem:[%s11642_s4 + $0xb0c] ss:$16 sps:$4 sm:$0xff]  }
 0x2c8   : > { %6883 = vmatpush1.bf16.msra.mxu0 %v9238_v25  ;;  %7416 = vmatpush1.bf16.msra.mxu1 %v9241_v26  ;;  %v9328_v25 = vld [vmem:[%s11642_s4 + $0xb00] ss:$16 sps:$4 sm:$0xff]   ;;  %v9331_v26 = vld [vmem:[%s11642_s4 + $0xb08] ss:$16 sps:$4 sm:$0xff]  }
 0x2c9   : > { %6884 = vmatprep.subr.bf16.mxu0 %v9246_v27  ;;  %7417 = vmatprep.subr.bf16.mxu1 %v9249_v29  ;;  %v9336_v27 = vld [vmem:[%s11642_s4 + $0xb24] ss:$16 sps:$4 sm:$0xff]   ;;  %v9339_v29 = vld [vmem:[%s11642_s4 + $0xb2c] ss:$16 sps:$4 sm:$0xff]  }
 0x2cc   : > { %6885 = vmatpush1.bf16.msra.mxu0 %v9244_v30  ;;  %7418 = vmatpush1.bf16.msra.mxu1 %v9247_v31  ;;  %v9334_v30 = vld [vmem:[%s11642_s4 + $0xb20] ss:$16 sps:$4 sm:$0xff]   ;;  %v9337_v31 = vld [vmem:[%s11642_s4 + $0xb28] ss:$16 sps:$4 sm:$0xff]  }
 0x2cd   : > { %6886 = vmatprep.subr.bf16.mxu0 %v9252_v32  ;;  %7419 = vmatprep.subr.bf16.mxu1 %v9255_v33  ;;  %v9342_v32 = vld [vmem:[%s11642_s4 + $0xb44] ss:$16 sps:$4 sm:$0xff]   ;;  %v9345_v33 = vld [vmem:[%s11642_s4 + $0xb4c] ss:$16 sps:$4 sm:$0xff]  }
 0x2d0   : > { %6887 = vmatpush1.bf16.msra.mxu0 %v9250_v36  ;;  %7420 = vmatpush1.bf16.msra.mxu1 %v9253_v38  ;;  %v9340_v36 = vld [vmem:[%s11642_s4 + $0xb40] ss:$16 sps:$4 sm:$0xff]   ;;  %v9343_v38 = vld [vmem:[%s11642_s4 + $0xb48] ss:$16 sps:$4 sm:$0xff]  }
 0x2d1   : > { %6888 = vmatprep.subr.bf16.mxu0 %v9258_v20  ;;  %7421 = vmatprep.subr.bf16.mxu1 %v9261_v39  ;;  %v9348_v20 = vld [vmem:[%s11642_s4 + $0xb64] ss:$16 sps:$4 sm:$0xff]   ;;  %v9351_v39 = vld [vmem:[%s11642_s4 + $0xb6c] ss:$16 sps:$4 sm:$0xff]  }
 0x2d4   : > { %6889 = vmatpush1.bf16.msra.mxu0 %v9256_v28  ;;  %7422 = vmatpush1.bf16.msra.mxu1 %v9259_v40  ;;  %v9346_v28 = vld [vmem:[%s11642_s4 + $0xb60] ss:$16 sps:$4 sm:$0xff]   ;;  %v9349_v40 = vld [vmem:[%s11642_s4 + $0xb68] ss:$16 sps:$4 sm:$0xff]  }
 0x2d5   : > { %6890 = vmatprep.subr.bf16.mxu0 %v9264_v41  ;;  %7423 = vmatprep.subr.bf16.mxu1 %v9267_v42  ;;  %v9354_v41 = vld [vmem:[%s11642_s4 + $0xb84] ss:$16 sps:$4 sm:$0xff]   ;;  %v9357_v42 = vld [vmem:[%s11642_s4 + $0xb8c] ss:$16 sps:$4 sm:$0xff]  }
 0x2d8   : > { %6891 = vmatpush1.bf16.msra.mxu0 %v9262_v43  ;;  %7424 = vmatpush1.bf16.msra.mxu1 %v9265_v45  ;;  %v9352_v43 = vld [vmem:[%s11642_s4 + $0xb80] ss:$16 sps:$4 sm:$0xff]   ;;  %v9355_v45 = vld [vmem:[%s11642_s4 + $0xb88] ss:$16 sps:$4 sm:$0xff]  }
 0x2d9   : > { %6892 = vmatprep.subr.bf16.mxu0 %v9270_v46  ;;  %7425 = vmatprep.subr.bf16.mxu1 %v9273_v47  ;;  %v9360_v46 = vld [vmem:[%s11642_s4 + $0xba4] ss:$16 sps:$4 sm:$0xff]   ;;  %v9363_v47 = vld [vmem:[%s11642_s4 + $0xbac] ss:$16 sps:$4 sm:$0xff]  }
 0x2dc   : > { %6893 = vmatpush1.bf16.msra.mxu0 %v9268_v48  ;;  %7426 = vmatpush1.bf16.msra.mxu1 %v9271_v49  ;;  %v9358_v48 = vld [vmem:[%s11642_s4 + $0xba0] ss:$16 sps:$4 sm:$0xff]   ;;  %v9361_v49 = vld [vmem:[%s11642_s4 + $0xba8] ss:$16 sps:$4 sm:$0xff]  }
 0x2dd   : > { %6894 = vmatprep.subr.bf16.mxu0 %v9276_v50  ;;  %7427 = vmatprep.subr.bf16.mxu1 %v9279_v35  ;;  %v9366_v50 = vld [vmem:[%s11642_s4 + $0xbc4] ss:$16 sps:$4 sm:$0xff]   ;;  %v9369_v35 = vld [vmem:[%s11642_s4 + $0xbcc] ss:$16 sps:$4 sm:$0xff]  }
 0x2e0   : > { %6895 = vmatpush1.bf16.msra.mxu0 %v9274_v51  ;;  %7428 = vmatpush1.bf16.msra.mxu1 %v9277_v52  ;;  %v9978_v51 = vld [vmem:[%s12599_s0 + $0x8] sm:$0xff] }
 0x2e1   : > { %6905 = vmatprep.subr.bf16.mxu0 %v9282_v44  ;;  %7438 = vmatprep.subr.bf16.mxu1 %v9285_v53  ;;  %v2640_v52 = vcombine.high %v9978_v51, %v9978_v51  ;;  %v9364_v44 = vld [vmem:[%s11642_s4 + $0xbc0] ss:$16 sps:$4 sm:$0xff]   ;;  %v9367_v53 = vld [vmem:[%s11642_s4 + $0xbc8] ss:$16 sps:$4 sm:$0xff]  }
 0x2e2   : > { %v9448_v51 = vld [vmem:[%s11642_s4 + $0xd80] ss:$16 sps:$4 sm:$0xff]  }
 0x2e3   : > { %6897 = vmatmul.mubr.bf16.vlgmr.msra.gmra.mrb[0].mxu0 %v12026_v34  ;;  %7430 = vmatmul.mubr.bf16.vlgmr.msra.gmra.mrb[0].mxu1 %v12026_v34 }
 0x2e4   : > { %6906 = vmatpush1.bf16.msra.mxu0 %v9280_v55  ;;  %7439 = vmatpush1.bf16.msra.mxu1 %v9283_v56  ;;  %v9372_v55 = vld [vmem:[%s11642_s4 + $0xbe4] ss:$16 sps:$4 sm:$0xff]   ;;  %v9375_v56 = vld [vmem:[%s11642_s4 + $0xbec] ss:$16 sps:$4 sm:$0xff]  }
 0x2e5   : > { %6907 = vmatprep.subr.bf16.mxu0 %v9288_v57  ;;  %7440 = vmatprep.subr.bf16.mxu1 %v9291_v58  ;;  %v12096_v57 = vrot.slane %v2640_v52, %v11647_v24  ;;  %v9370_v58 = vld [vmem:[%s11642_s4 + $0xbe0] ss:$16 sps:$4 sm:$0xff]   ;;  %v9451_v52 = vld [vmem:[%s11642_s4 + $0xd88] ss:$16 sps:$4 sm:$0xff]  }
 0x2e6   : > { %6937 = vmatprep.mubr.bf16.mxu0 %v2687_v59  ;;  %7470 = vmatprep.mubr.bf16.mxu1 %v2687_v59  ;;  %v9373_v59 = vld [vmem:[%s11642_s4 + $0xbe8] ss:$16 sps:$4 sm:$0xff]  }
 0x2e8   : > { %6908 = vmatpush1.bf16.msra.mxu0 %v9286_v37  ;;  %7441 = vmatpush1.bf16.msra.mxu1 %v9289_v60  ;;  %v9378_v37 = vld [vmem:[%s11642_s4 + $0xc04] ss:$16 sps:$4 sm:$0xff]   ;;  %v9381_v60 = vld [vmem:[%s11642_s4 + $0xc0c] ss:$16 sps:$4 sm:$0xff]  }
 0x2e9   : > { %6909 = vmatprep.subr.bf16.mxu0 %v9294_v61  ;;  %7442 = vmatprep.subr.bf16.mxu1 %v9297_v62  ;;  %v2656_v61 = vcombine.high %v12096_v57, %v12096_v57  ;;  %v2685_v62 = vcombine.high %v12026_v34, %v12026_v34  ;;  %v9382_v34 = vld [vmem:[%s11642_s4 + $0xc20] ss:$16 sps:$4 sm:$0xff]  }
 0x2ec   : > { %6910 = vmatpush1.bf16.msra.mxu0 %v9292_v54  ;;  %7443 = vmatpush1.bf16.msra.mxu1 %v9295_v63  ;;  %v9376_v54 = vld [vmem:[%s11642_s4 + $0xc00] ss:$16 sps:$4 sm:$0xff]   ;;  %v9379_v63 = vld [vmem:[%s11642_s4 + $0xc08] ss:$16 sps:$4 sm:$0xff]  }
 0x2ed   : > { %6911 = vmatprep.subr.bf16.mxu0 %v9300_v0  ;;  %7444 = vmatprep.subr.bf16.mxu1 %v9303_v1  ;;  %v9384_v0 = vld [vmem:[%s11642_s4 + $0xc24] ss:$16 sps:$4 sm:$0xff]   ;;  %v9387_v1 = vld [vmem:[%s11642_s4 + $0xc2c] ss:$16 sps:$4 sm:$0xff]  }
 0x2f0   : > { %6912 = vmatpush1.bf16.msra.mxu0 %v9298_v2  ;;  %7445 = vmatpush1.bf16.msra.mxu1 %v9301_v3  ;;  %v12111_v2 = vrot.slane %v2656_v61, %v11647_v24  ;;  %v9385_v3 = vld [vmem:[%s11642_s4 + $0xc28] ss:$16 sps:$4 sm:$0xff]   ;;  %v9468_v61 = vld [vmem:[%s11642_s4 + $0xde4] ss:$16 sps:$4 sm:$0xff]  }
 0x2f1   : > { %6913 = vmatprep.subr.bf16.mxu0 %v9306_v4  ;;  %7446 = vmatprep.subr.bf16.mxu1 %v9309_v5  ;;  %v9390_v4 = vld [vmem:[%s11642_s4 + $0xc44] ss:$16 sps:$4 sm:$0xff]   ;;  %v9393_v5 = vld [vmem:[%s11642_s4 + $0xc4c] ss:$16 sps:$4 sm:$0xff]  }
 0x2f4   : > { %6914 = vmatpush1.bf16.msra.mxu0 %v9304_v6  ;;  %7447 = vmatpush1.bf16.msra.mxu1 %v9307_v7  ;;  %v9388_v6 = vld [vmem:[%s11642_s4 + $0xc40] ss:$16 sps:$4 sm:$0xff]   ;;  %v9391_v7 = vld [vmem:[%s11642_s4 + $0xc48] ss:$16 sps:$4 sm:$0xff]  }
 0x2f5   : > { %6915 = vmatprep.subr.bf16.mxu0 %v9312_v8  ;;  %7448 = vmatprep.subr.bf16.mxu1 %v9315_v9  ;;  %v9396_v8 = vld [vmem:[%s11642_s4 + $0xc64] ss:$16 sps:$4 sm:$0xff]   ;;  %v9399_v9 = vld [vmem:[%s11642_s4 + $0xc6c] ss:$16 sps:$4 sm:$0xff]  }
 0x2f8   : > { %6916 = vmatpush1.bf16.msra.mxu0 %v9310_v10  ;;  %7449 = vmatpush1.bf16.msra.mxu1 %v9313_v11  ;;  %v9394_v10 = vld [vmem:[%s11642_s4 + $0xc60] ss:$16 sps:$4 sm:$0xff]   ;;  %v9397_v11 = vld [vmem:[%s11642_s4 + $0xc68] ss:$16 sps:$4 sm:$0xff]  }
 0x2f9   : > { %6917 = vmatprep.subr.bf16.mxu0 %v9318_v12  ;;  %7450 = vmatprep.subr.bf16.mxu1 %v9321_v13  ;;  %v9402_v12 = vld [vmem:[%s11642_s4 + $0xc84] ss:$16 sps:$4 sm:$0xff]   ;;  %v9405_v13 = vld [vmem:[%s11642_s4 + $0xc8c] ss:$16 sps:$4 sm:$0xff]  }
 0x2fc   : > { %6918 = vmatpush1.bf16.msra.mxu0 %v9316_v14  ;;  %7451 = vmatpush1.bf16.msra.mxu1 %v9319_v15  ;;  %v9400_v14 = vld [vmem:[%s11642_s4 + $0xc80] ss:$16 sps:$4 sm:$0xff]   ;;  %v9403_v15 = vld [vmem:[%s11642_s4 + $0xc88] ss:$16 sps:$4 sm:$0xff]  }
 0x2fd   : > { %6919 = vmatprep.subr.bf16.mxu0 %v9324_v16  ;;  %7452 = vmatprep.subr.bf16.mxu1 %v9327_v17  ;;  %v9408_v16 = vld [vmem:[%s11642_s4 + $0xca4] ss:$16 sps:$4 sm:$0xff]   ;;  %v9411_v17 = vld [vmem:[%s11642_s4 + $0xcac] ss:$16 sps:$4 sm:$0xff]  }
 0x300   : > { %6920 = vmatpush1.bf16.msra.mxu0 %v9322_v18  ;;  %7453 = vmatpush1.bf16.msra.mxu1 %v9325_v21  ;;  %v9406_v18 = vld [vmem:[%s11642_s4 + $0xca0] ss:$16 sps:$4 sm:$0xff]   ;;  %v9409_v21 = vld [vmem:[%s11642_s4 + $0xca8] ss:$16 sps:$4 sm:$0xff]  }
 0x301   : > { %6921 = vmatprep.subr.bf16.mxu0 %v9330_v22  ;;  %7454 = vmatprep.subr.bf16.mxu1 %v9333_v23  ;;  %v9414_v22 = vld [vmem:[%s11642_s4 + $0xcc4] ss:$16 sps:$4 sm:$0xff]   ;;  %v9417_v23 = vld [vmem:[%s11642_s4 + $0xccc] ss:$16 sps:$4 sm:$0xff]  }
 0x304   : > { %6922 = vmatpush1.bf16.msra.mxu0 %v9328_v25  ;;  %7455 = vmatpush1.bf16.msra.mxu1 %v9331_v26  ;;  %v9412_v25 = vld [vmem:[%s11642_s4 + $0xcc0] ss:$16 sps:$4 sm:$0xff]   ;;  %v9415_v26 = vld [vmem:[%s11642_s4 + $0xcc8] ss:$16 sps:$4 sm:$0xff]  }
 0x305   : > { %6923 = vmatprep.subr.bf16.mxu0 %v9336_v27  ;;  %7456 = vmatprep.subr.bf16.mxu1 %v9339_v29  ;;  %v9420_v27 = vld [vmem:[%s11642_s4 + $0xce4] ss:$16 sps:$4 sm:$0xff]   ;;  %v9423_v29 = vld [vmem:[%s11642_s4 + $0xcec] ss:$16 sps:$4 sm:$0xff]  }
 0x308   : > { %6924 = vmatpush1.bf16.msra.mxu0 %v9334_v30  ;;  %7457 = vmatpush1.bf16.msra.mxu1 %v9337_v31  ;;  %v9418_v30 = vld [vmem:[%s11642_s4 + $0xce0] ss:$16 sps:$4 sm:$0xff]   ;;  %v9421_v31 = vld [vmem:[%s11642_s4 + $0xce8] ss:$16 sps:$4 sm:$0xff]  }
 0x309   : > { %6925 = vmatprep.subr.bf16.mxu0 %v9342_v32  ;;  %7458 = vmatprep.subr.bf16.mxu1 %v9345_v33  ;;  %v9426_v32 = vld [vmem:[%s11642_s4 + $0xd04] ss:$16 sps:$4 sm:$0xff]   ;;  %v9429_v33 = vld [vmem:[%s11642_s4 + $0xd0c] ss:$16 sps:$4 sm:$0xff]  }
 0x30c   : > { %6926 = vmatpush1.bf16.msra.mxu0 %v9340_v36  ;;  %7459 = vmatpush1.bf16.msra.mxu1 %v9343_v38  ;;  %v9424_v36 = vld [vmem:[%s11642_s4 + $0xd00] ss:$16 sps:$4 sm:$0xff]   ;;  %v9427_v38 = vld [vmem:[%s11642_s4 + $0xd08] ss:$16 sps:$4 sm:$0xff]  }
 0x30d   : > { %6927 = vmatprep.subr.bf16.mxu0 %v9348_v20  ;;  %7460 = vmatprep.subr.bf16.mxu1 %v9351_v39  ;;  %v9432_v20 = vld [vmem:[%s11642_s4 + $0xd24] ss:$16 sps:$4 sm:$0xff]   ;;  %v9435_v39 = vld [vmem:[%s11642_s4 + $0xd2c] ss:$16 sps:$4 sm:$0xff]  }
 0x310   : > { %6928 = vmatpush1.bf16.msra.mxu0 %v9346_v28  ;;  %7461 = vmatpush1.bf16.msra.mxu1 %v9349_v40  ;;  %v9430_v28 = vld [vmem:[%s11642_s4 + $0xd20] ss:$16 sps:$4 sm:$0xff]   ;;  %v9433_v40 = vld [vmem:[%s11642_s4 + $0xd28] ss:$16 sps:$4 sm:$0xff]  }
 0x311   : > { %6929 = vmatprep.subr.bf16.mxu0 %v9354_v41  ;;  %7462 = vmatprep.subr.bf16.mxu1 %v9357_v42  ;;  %v9438_v41 = vld [vmem:[%s11642_s4 + $0xd44] ss:$16 sps:$4 sm:$0xff]   ;;  %v9441_v42 = vld [vmem:[%s11642_s4 + $0xd4c] ss:$16 sps:$4 sm:$0xff]  }
 0x314   : > { %6930 = vmatpush1.bf16.msra.mxu0 %v9352_v43  ;;  %7463 = vmatpush1.bf16.msra.mxu1 %v9355_v45  ;;  %v9436_v43 = vld [vmem:[%s11642_s4 + $0xd40] ss:$16 sps:$4 sm:$0xff]   ;;  %v9439_v45 = vld [vmem:[%s11642_s4 + $0xd48] ss:$16 sps:$4 sm:$0xff]  }
 0x315   : > { %6931 = vmatprep.subr.bf16.mxu0 %v9360_v46  ;;  %7464 = vmatprep.subr.bf16.mxu1 %v9363_v47  ;;  %v9444_v46 = vld [vmem:[%s11642_s4 + $0xd64] ss:$16 sps:$4 sm:$0xff]   ;;  %v9447_v47 = vld [vmem:[%s11642_s4 + $0xd6c] ss:$16 sps:$4 sm:$0xff]  }
 0x318   : > { %6932 = vmatpush1.bf16.msra.mxu0 %v9358_v48  ;;  %7465 = vmatpush1.bf16.msra.mxu1 %v9361_v49  ;;  %v9442_v48 = vld [vmem:[%s11642_s4 + $0xd60] ss:$16 sps:$4 sm:$0xff]   ;;  %v9445_v49 = vld [vmem:[%s11642_s4 + $0xd68] ss:$16 sps:$4 sm:$0xff]  }
 0x319   : > { %6933 = vmatprep.subr.bf16.mxu0 %v9366_v50  ;;  %7466 = vmatprep.subr.bf16.mxu1 %v9369_v35  ;;  %v9450_v50 = vld [vmem:[%s11642_s4 + $0xd84] ss:$16 sps:$4 sm:$0xff]   ;;  %v9453_v35 = vld [vmem:[%s11642_s4 + $0xd8c] ss:$16 sps:$4 sm:$0xff]  }
 0x31c   : > { %6934 = vmatpush1.bf16.msra.mxu0 %v9364_v44  ;;  %7467 = vmatpush1.bf16.msra.mxu1 %v9367_v53  ;;  %v9456_v44 = vld [vmem:[%s11642_s4 + $0xda4] ss:$16 sps:$4 sm:$0xff]   ;;  %v9459_v53 = vld [vmem:[%s11642_s4 + $0xdac] ss:$16 sps:$4 sm:$0xff]  }
 0x31d   : > { %6935 = vmatprep.subr.bf16.mxu0 %v9372_v55  ;;  %7468 = vmatprep.subr.bf16.mxu1 %v9375_v56  ;;  %v9454_v55 = vld [vmem:[%s11642_s4 + $0xda0] ss:$16 sps:$4 sm:$0xff]   ;;  %v9457_v56 = vld [vmem:[%s11642_s4 + $0xda8] ss:$16 sps:$4 sm:$0xff]  }
 0x320   : > { %6936 = vmatpush1.bf16.msra.mxu0 %v9370_v58  ;;  %7469 = vmatpush1.bf16.msra.mxu1 %v9373_v59  ;;  %v9462_v58 = vld [vmem:[%s11642_s4 + $0xdc4] ss:$16 sps:$4 sm:$0xff]   ;;  %v9465_v59 = vld [vmem:[%s11642_s4 + $0xdcc] ss:$16 sps:$4 sm:$0xff]  }
 0x321   : > { %6946 = vmatprep.subr.bf16.mxu0 %v9378_v37  ;;  %7479 = vmatprep.subr.bf16.mxu1 %v9381_v60  ;;  %v9460_v37 = vld [vmem:[%s11642_s4 + $0xdc0] ss:$16 sps:$4 sm:$0xff]   ;;  %v9463_v60 = vld [vmem:[%s11642_s4 + $0xdc8] ss:$16 sps:$4 sm:$0xff]  }
 0x323   : > { %6938 = vmatmul.mubr.bf16.vlgmr.msra.gmra.mrb[0].mxu0 %v2685_v62  ;;  %7471 = vmatmul.mubr.bf16.vlgmr.msra.gmra.mrb[0].mxu1 %v2685_v62  ;;  %v9471_v62 = vld [vmem:[%s11642_s4 + $0xdec] ss:$16 sps:$4 sm:$0xff]  }
 0x324   : > { %6947 = vmatpush1.bf16.msra.mxu0 %v9376_v54  ;;  %7480 = vmatpush1.bf16.msra.mxu1 %v9379_v63  ;;  %v9466_v54 = vld [vmem:[%s11642_s4 + $0xde0] ss:$16 sps:$4 sm:$0xff]   ;;  %v9469_v63 = vld [vmem:[%s11642_s4 + $0xde8] ss:$16 sps:$4 sm:$0xff]  }
 0x325   : > { %6948 = vmatprep.subr.bf16.mxu0 %v9384_v0  ;;  %7481 = vmatprep.subr.bf16.mxu1 %v9387_v1  ;;  %v9475_v0 = vld [vmem:[%s11642_s4 + $0xe04] ss:$16 sps:$4 sm:$0xff]   ;;  %v9478_v1 = vld [vmem:[%s11642_s4 + $0xe0c] ss:$16 sps:$4 sm:$0xff]  }
 0x326   : > { %6978 = vmatprep.mubr.bf16.mxu0 %v12111_v2  ;;  %7511 = vmatprep.mubr.bf16.mxu1 %v12111_v2 }
 0x328   : > { %6949 = vmatpush1.bf16.msra.mxu0 %v9382_v34  ;;  %7482 = vmatpush1.bf16.msra.mxu1 %v9385_v3  ;;  %v12177_v34 = vrot.slane %v12096_v57, %v11647_v24  ;;  %v9473_v3 = vld [vmem:[%s11642_s4 + $0xe00] ss:$16 sps:$4 sm:$0xff]  }
 0x329   : > { %6950 = vmatprep.subr.bf16.mxu0 %v9390_v4  ;;  %7483 = vmatprep.subr.bf16.mxu1 %v9393_v5  ;;  %v9476_v4 = vld [vmem:[%s11642_s4 + $0xe08] ss:$16 sps:$4 sm:$0xff]   ;;  %v9481_v5 = vld [vmem:[%s11642_s4 + $0xe24] ss:$16 sps:$4 sm:$0xff]   ;;  %v9479_v57 = vld [vmem:[%s11642_s4 + $0xe20] ss:$16 sps:$4 sm:$0xff]  }
 0x32c   : > { %6951 = vmatpush1.bf16.msra.mxu0 %v9388_v6  ;;  %7484 = vmatpush1.bf16.msra.mxu1 %v9391_v7  ;;  %v9484_v6 = vld [vmem:[%s11642_s4 + $0xe2c] ss:$16 sps:$4 sm:$0xff]   ;;  %v2688_v7 = vcombine.high %v12111_v2, %v12111_v2  ;;  %v9485_v2 = vld [vmem:[%s11642_s4 + $0xe40] ss:$16 sps:$4 sm:$0xff]  }
 0x32d   : > { %6952 = vmatprep.subr.bf16.mxu0 %v9396_v8  ;;  %7485 = vmatprep.subr.bf16.mxu1 %v9399_v9  ;;  %v9482_v8 = vld [vmem:[%s11642_s4 + $0xe28] ss:$16 sps:$4 sm:$0xff]   ;;  %v9487_v9 = vld [vmem:[%s11642_s4 + $0xe44] ss:$16 sps:$4 sm:$0xff]  }
 0x330   : > { %6953 = vmatpush1.bf16.msra.mxu0 %v9394_v10  ;;  %7486 = vmatpush1.bf16.msra.mxu1 %v9397_v11  ;;  %v9490_v10 = vld [vmem:[%s11642_s4 + $0xe4c] ss:$16 sps:$4 sm:$0xff]   ;;  %v9488_v11 = vld [vmem:[%s11642_s4 + $0xe48] ss:$16 sps:$4 sm:$0xff]  }
 0x331   : > { %6954 = vmatprep.subr.bf16.mxu0 %v9402_v12  ;;  %7487 = vmatprep.subr.bf16.mxu1 %v9405_v13  ;;  %v9493_v12 = vld [vmem:[%s11642_s4 + $0xe64] ss:$16 sps:$4 sm:$0xff]   ;;  %v9496_v13 = vld [vmem:[%s11642_s4 + $0xe6c] ss:$16 sps:$4 sm:$0xff]  }
 0x334   : > { %6955 = vmatpush1.bf16.msra.mxu0 %v9400_v14  ;;  %7488 = vmatpush1.bf16.msra.mxu1 %v9403_v15  ;;  %v9491_v14 = vld [vmem:[%s11642_s4 + $0xe60] ss:$16 sps:$4 sm:$0xff]   ;;  %v9494_v15 = vld [vmem:[%s11642_s4 + $0xe68] ss:$16 sps:$4 sm:$0xff]  }
 0x335   : > { %6956 = vmatprep.subr.bf16.mxu0 %v9408_v16  ;;  %7489 = vmatprep.subr.bf16.mxu1 %v9411_v17  ;;  %v9499_v16 = vld [vmem:[%s11642_s4 + $0xe84] ss:$16 sps:$4 sm:$0xff]   ;;  %v9502_v17 = vld [vmem:[%s11642_s4 + $0xe8c] ss:$16 sps:$4 sm:$0xff]  }
 0x338   : > { %6957 = vmatpush1.bf16.msra.mxu0 %v9406_v18  ;;  %7490 = vmatpush1.bf16.msra.mxu1 %v9409_v21  ;;  %v9497_v18 = vld [vmem:[%s11642_s4 + $0xe80] ss:$16 sps:$4 sm:$0xff]   ;;  %v9500_v21 = vld [vmem:[%s11642_s4 + $0xe88] ss:$16 sps:$4 sm:$0xff]  }
 0x339   : > { %6958 = vmatprep.subr.bf16.mxu0 %v9414_v22  ;;  %7491 = vmatprep.subr.bf16.mxu1 %v9417_v23  ;;  %v9505_v22 = vld [vmem:[%s11642_s4 + $0xea4] ss:$16 sps:$4 sm:$0xff]   ;;  %v9508_v23 = vld [vmem:[%s11642_s4 + $0xeac] ss:$16 sps:$4 sm:$0xff]  }
 0x33c   : > { %6959 = vmatpush1.bf16.msra.mxu0 %v9412_v25  ;;  %7492 = vmatpush1.bf16.msra.mxu1 %v9415_v26  ;;  %v9503_v25 = vld [vmem:[%s11642_s4 + $0xea0] ss:$16 sps:$4 sm:$0xff]   ;;  %v9506_v26 = vld [vmem:[%s11642_s4 + $0xea8] ss:$16 sps:$4 sm:$0xff]  }
 0x33d   : > { %6960 = vmatprep.subr.bf16.mxu0 %v9420_v27  ;;  %7493 = vmatprep.subr.bf16.mxu1 %v9423_v29  ;;  %v9511_v27 = vld [vmem:[%s11642_s4 + $0xec4] ss:$16 sps:$4 sm:$0xff]   ;;  %v9514_v29 = vld [vmem:[%s11642_s4 + $0xecc] ss:$16 sps:$4 sm:$0xff]  }
 0x340   : > { %6961 = vmatpush1.bf16.msra.mxu0 %v9418_v30  ;;  %7494 = vmatpush1.bf16.msra.mxu1 %v9421_v31  ;;  %v9509_v30 = vld [vmem:[%s11642_s4 + $0xec0] ss:$16 sps:$4 sm:$0xff]   ;;  %v9512_v31 = vld [vmem:[%s11642_s4 + $0xec8] ss:$16 sps:$4 sm:$0xff]  }
 0x341   : > { %6962 = vmatprep.subr.bf16.mxu0 %v9426_v32  ;;  %7495 = vmatprep.subr.bf16.mxu1 %v9429_v33  ;;  %v9517_v32 = vld [vmem:[%s11642_s4 + $0xee4] ss:$16 sps:$4 sm:$0xff]   ;;  %v9520_v33 = vld [vmem:[%s11642_s4 + $0xeec] ss:$16 sps:$4 sm:$0xff]  }
 0x344   : > { %6963 = vmatpush1.bf16.msra.mxu0 %v9424_v36  ;;  %7496 = vmatpush1.bf16.msra.mxu1 %v9427_v38  ;;  %v9515_v36 = vld [vmem:[%s11642_s4 + $0xee0] ss:$16 sps:$4 sm:$0xff]   ;;  %v9518_v38 = vld [vmem:[%s11642_s4 + $0xee8] ss:$16 sps:$4 sm:$0xff]  }
 0x345   : > { %6964 = vmatprep.subr.bf16.mxu0 %v9432_v20  ;;  %7497 = vmatprep.subr.bf16.mxu1 %v9435_v39  ;;  %v9523_v20 = vld [vmem:[%s11642_s4 + $0xf04] ss:$16 sps:$4 sm:$0xff]   ;;  %v9526_v39 = vld [vmem:[%s11642_s4 + $0xf0c] ss:$16 sps:$4 sm:$0xff]  }
 0x348   : > { %6965 = vmatpush1.bf16.msra.mxu0 %v9430_v28  ;;  %7498 = vmatpush1.bf16.msra.mxu1 %v9433_v40  ;;  %v9521_v28 = vld [vmem:[%s11642_s4 + $0xf00] ss:$16 sps:$4 sm:$0xff]   ;;  %v9524_v40 = vld [vmem:[%s11642_s4 + $0xf08] ss:$16 sps:$4 sm:$0xff]  }
 0x349   : > { %6966 = vmatprep.subr.bf16.mxu0 %v9438_v41  ;;  %7499 = vmatprep.subr.bf16.mxu1 %v9441_v42  ;;  %v9529_v41 = vld [vmem:[%s11642_s4 + $0xf24] ss:$16 sps:$4 sm:$0xff]   ;;  %v9532_v42 = vld [vmem:[%s11642_s4 + $0xf2c] ss:$16 sps:$4 sm:$0xff]  }
 0x34c   : > { %6967 = vmatpush1.bf16.msra.mxu0 %v9436_v43  ;;  %7500 = vmatpush1.bf16.msra.mxu1 %v9439_v45  ;;  %v9527_v43 = vld [vmem:[%s11642_s4 + $0xf20] ss:$16 sps:$4 sm:$0xff]   ;;  %v9530_v45 = vld [vmem:[%s11642_s4 + $0xf28] ss:$16 sps:$4 sm:$0xff]  }
 0x34d   : > { %6968 = vmatprep.subr.bf16.mxu0 %v9444_v46  ;;  %7501 = vmatprep.subr.bf16.mxu1 %v9447_v47  ;;  %v9535_v46 = vld [vmem:[%s11642_s4 + $0xf44] ss:$16 sps:$4 sm:$0xff]   ;;  %v9538_v47 = vld [vmem:[%s11642_s4 + $0xf4c] ss:$16 sps:$4 sm:$0xff]  }
 0x350   : > { %6969 = vmatpush1.bf16.msra.mxu0 %v9442_v48  ;;  %7502 = vmatpush1.bf16.msra.mxu1 %v9445_v49  ;;  %v9533_v48 = vld [vmem:[%s11642_s4 + $0xf40] ss:$16 sps:$4 sm:$0xff]   ;;  %v9536_v49 = vld [vmem:[%s11642_s4 + $0xf48] ss:$16 sps:$4 sm:$0xff]  }
 0x351   : > { %6970 = vmatprep.subr.bf16.mxu0 %v9450_v50  ;;  %7503 = vmatprep.subr.bf16.mxu1 %v9453_v35  ;;  %v9541_v50 = vld [vmem:[%s11642_s4 + $0xf64] ss:$16 sps:$4 sm:$0xff]   ;;  %v9544_v35 = vld [vmem:[%s11642_s4 + $0xf6c] ss:$16 sps:$4 sm:$0xff]  }
 0x354   : > { %6971 = vmatpush1.bf16.msra.mxu0 %v9448_v51  ;;  %7504 = vmatpush1.bf16.msra.mxu1 %v9451_v52  ;;  %v9539_v51 = vld [vmem:[%s11642_s4 + $0xf60] ss:$16 sps:$4 sm:$0xff]   ;;  %v9542_v52 = vld [vmem:[%s11642_s4 + $0xf68] ss:$16 sps:$4 sm:$0xff]  }
 0x355   : > { %6972 = vmatprep.subr.bf16.mxu0 %v9456_v44  ;;  %7505 = vmatprep.subr.bf16.mxu1 %v9459_v53  ;;  %v9547_v44 = vld [vmem:[%s11642_s4 + $0xf84] ss:$16 sps:$4 sm:$0xff]   ;;  %v9550_v53 = vld [vmem:[%s11642_s4 + $0xf8c] ss:$16 sps:$4 sm:$0xff]  }
 0x358   : > { %6973 = vmatpush1.bf16.msra.mxu0 %v9454_v55  ;;  %7506 = vmatpush1.bf16.msra.mxu1 %v9457_v56  ;;  %v9545_v55 = vld [vmem:[%s11642_s4 + $0xf80] ss:$16 sps:$4 sm:$0xff]   ;;  %v9548_v56 = vld [vmem:[%s11642_s4 + $0xf88] ss:$16 sps:$4 sm:$0xff]  }
 0x359   : > { %6974 = vmatprep.subr.bf16.mxu0 %v9462_v58  ;;  %7507 = vmatprep.subr.bf16.mxu1 %v9465_v59  ;;  %v9553_v58 = vld [vmem:[%s11642_s4 + $0xfa4] ss:$16 sps:$4 sm:$0xff]   ;;  %v9556_v59 = vld [vmem:[%s11642_s4 + $0xfac] ss:$16 sps:$4 sm:$0xff]  }
 0x35c   : > { %6975 = vmatpush1.bf16.msra.mxu0 %v9460_v37  ;;  %7508 = vmatpush1.bf16.msra.mxu1 %v9463_v60  ;;  %v9551_v37 = vld [vmem:[%s11642_s4 + $0xfa0] ss:$16 sps:$4 sm:$0xff]   ;;  %v9554_v60 = vld [vmem:[%s11642_s4 + $0xfa8] ss:$16 sps:$4 sm:$0xff]  }
 0x35d   : > { %6976 = vmatprep.subr.bf16.mxu0 %v9468_v61  ;;  %7509 = vmatprep.subr.bf16.mxu1 %v9471_v62  ;;  %v9559_v61 = vld [vmem:[%s11642_s4 + $0xfc4] ss:$16 sps:$4 sm:$0xff]   ;;  %v9562_v62 = vld [vmem:[%s11642_s4 + $0xfcc] ss:$16 sps:$4 sm:$0xff]  }
 0x360   : > { %6977 = vmatpush1.bf16.msra.mxu0 %v9466_v54  ;;  %7510 = vmatpush1.bf16.msra.mxu1 %v9469_v63  ;;  %v12242_v54 = vld [vmem:[%s12599_s0 + $0x10] sm:$0xff] }
 0x361   : > { %6987 = vmatprep.subr.bf16.mxu0 %v9475_v0  ;;  %7520 = vmatprep.subr.bf16.mxu1 %v9478_v1  ;;  %v9557_v63 = vld [vmem:[%s11642_s4 + $0xfc0] ss:$16 sps:$4 sm:$0xff]   ;;  %v9560_v0 = vld [vmem:[%s11642_s4 + $0xfc8] ss:$16 sps:$4 sm:$0xff]   ;;  %v9565_v1 = vld [vmem:[%s11642_s4 + $0xfe4] ss:$16 sps:$4 sm:$0xff]  }
 0x363   : > { %6979 = vmatmul.mubr.bf16.vlgmr.msra.gmra.mrb[0].mxu0 %v12177_v34  ;;  %7512 = vmatmul.mubr.bf16.vlgmr.msra.gmra.mrb[0].mxu1 %v12177_v34 }
 0x364   : > { %6988 = vmatpush1.bf16.msra.mxu0 %v9473_v3  ;;  %7521 = vmatpush1.bf16.msra.mxu1 %v9476_v4  ;;  %v9568_v3 = vld [vmem:[%s11642_s4 + $0xfec] ss:$16 sps:$4 sm:$0xff]   ;;  %v12250_v4 = vrot.slane %v12242_v54, %v11647_v24 }
 0x365   : > { %6989 = vmatprep.subr.bf16.mxu0 %v9481_v5  ;;  %7522 = vmatprep.subr.bf16.mxu1 %v9484_v6  ;;  %v9563_v5 = vld [vmem:[%s11642_s4 + $0xfe0] ss:$16 sps:$4 sm:$0xff]   ;;  %v9566_v6 = vld [vmem:[%s11642_s4 + $0xfe8] ss:$16 sps:$4 sm:$0xff]  }
 0x366   : > { %7019 = vmatprep.mubr.bf16.mxu0 %v2688_v7  ;;  %7552 = vmatprep.mubr.bf16.mxu1 %v2688_v7  ;;  %v9571_v7 = vld [vmem:[%s11642_s4 + $0x1004] ss:$16 sps:$4 sm:$0xff]  }
 0x368   : > { %6990 = vmatpush1.bf16.msra.mxu0 %v9479_v57  ;;  %7523 = vmatpush1.bf16.msra.mxu1 %v9482_v8  ;;  %v9574_v57 = vld [vmem:[%s11642_s4 + $0x100c] ss:$16 sps:$4 sm:$0xff]   ;;  %v2704_v8 = vcombine.high %v12250_v4, %v12250_v4 }
 0x369   : > { %6991 = vmatprep.subr.bf16.mxu0 %v9487_v9  ;;  %7524 = vmatprep.subr.bf16.mxu1 %v9490_v10  ;;  %v2686_v9 = vcombine.high %v12177_v34, %v12177_v34  ;;  %v9569_v10 = vld [vmem:[%s11642_s4 + $0x1000] ss:$16 sps:$4 sm:$0xff]  }
 0x36a   : > { %v9575_v34 = vld [vmem:[%s11642_s4 + $0x1020] ss:$16 sps:$4 sm:$0xff]  }
 0x36c   : > { %6992 = vmatpush1.bf16.msra.mxu0 %v9485_v2  ;;  %7525 = vmatpush1.bf16.msra.mxu1 %v9488_v11  ;;  %v9572_v2 = vld [vmem:[%s11642_s4 + $0x1008] ss:$16 sps:$4 sm:$0xff]   ;;  %v9577_v11 = vld [vmem:[%s11642_s4 + $0x1024] ss:$16 sps:$4 sm:$0xff]  }
 0x36d   : > { %6993 = vmatprep.subr.bf16.mxu0 %v9493_v12  ;;  %7526 = vmatprep.subr.bf16.mxu1 %v9496_v13  ;;  %v9580_v12 = vld [vmem:[%s11642_s4 + $0x102c] ss:$16 sps:$4 sm:$0xff]   ;;  %v12265_v13 = vrot.slane %v2704_v8, %v11647_v24  ;;  %v9656_v8 = vld [vmem:[%s11642_s4 + $0x11c8] ss:$16 sps:$4 sm:$0xff]  }
 0x370   : > { %6994 = vmatpush1.bf16.msra.mxu0 %v9491_v14  ;;  %7527 = vmatpush1.bf16.msra.mxu1 %v9494_v15  ;;  %v9578_v14 = vld [vmem:[%s11642_s4 + $0x1028] ss:$16 sps:$4 sm:$0xff]   ;;  %v9583_v15 = vld [vmem:[%s11642_s4 + $0x1044] ss:$16 sps:$4 sm:$0xff]  }
 0x371   : > { %6995 = vmatprep.subr.bf16.mxu0 %v9499_v16  ;;  %7528 = vmatprep.subr.bf16.mxu1 %v9502_v17  ;;  %v9586_v16 = vld [vmem:[%s11642_s4 + $0x104c] ss:$16 sps:$4 sm:$0xff]   ;;  %v9581_v17 = vld [vmem:[%s11642_s4 + $0x1040] ss:$16 sps:$4 sm:$0xff]  }
 0x374   : > { %6996 = vmatpush1.bf16.msra.mxu0 %v9497_v18  ;;  %7529 = vmatpush1.bf16.msra.mxu1 %v9500_v21  ;;  %v9584_v18 = vld [vmem:[%s11642_s4 + $0x1048] ss:$16 sps:$4 sm:$0xff]   ;;  %v9589_v21 = vld [vmem:[%s11642_s4 + $0x1064] ss:$16 sps:$4 sm:$0xff]  }
 0x375   : > { %6997 = vmatprep.subr.bf16.mxu0 %v9505_v22  ;;  %7530 = vmatprep.subr.bf16.mxu1 %v9508_v23  ;;  %v9592_v22 = vld [vmem:[%s11642_s4 + $0x106c] ss:$16 sps:$4 sm:$0xff]   ;;  %v9587_v23 = vld [vmem:[%s11642_s4 + $0x1060] ss:$16 sps:$4 sm:$0xff]  }
 0x378   : > { %6998 = vmatpush1.bf16.msra.mxu0 %v9503_v25  ;;  %7531 = vmatpush1.bf16.msra.mxu1 %v9506_v26  ;;  %v9590_v25 = vld [vmem:[%s11642_s4 + $0x1068] ss:$16 sps:$4 sm:$0xff]   ;;  %v9595_v26 = vld [vmem:[%s11642_s4 + $0x1084] ss:$16 sps:$4 sm:$0xff]  }
 0x379   : > { %6999 = vmatprep.subr.bf16.mxu0 %v9511_v27  ;;  %7532 = vmatprep.subr.bf16.mxu1 %v9514_v29  ;;  %v9598_v27 = vld [vmem:[%s11642_s4 + $0x108c] ss:$16 sps:$4 sm:$0xff]   ;;  %v9593_v29 = vld [vmem:[%s11642_s4 + $0x1080] ss:$16 sps:$4 sm:$0xff]  }
 0x37c   : > { %7000 = vmatpush1.bf16.msra.mxu0 %v9509_v30  ;;  %7533 = vmatpush1.bf16.msra.mxu1 %v9512_v31  ;;  %v9596_v30 = vld [vmem:[%s11642_s4 + $0x1088] ss:$16 sps:$4 sm:$0xff]   ;;  %v9601_v31 = vld [vmem:[%s11642_s4 + $0x10a4] ss:$16 sps:$4 sm:$0xff]  }
 0x37d   : > { %7001 = vmatprep.subr.bf16.mxu0 %v9517_v32  ;;  %7534 = vmatprep.subr.bf16.mxu1 %v9520_v33  ;;  %v9604_v32 = vld [vmem:[%s11642_s4 + $0x10ac] ss:$16 sps:$4 sm:$0xff]   ;;  %v9599_v33 = vld [vmem:[%s11642_s4 + $0x10a0] ss:$16 sps:$4 sm:$0xff]  }
 0x380   : > { %7002 = vmatpush1.bf16.msra.mxu0 %v9515_v36  ;;  %7535 = vmatpush1.bf16.msra.mxu1 %v9518_v38  ;;  %v9602_v36 = vld [vmem:[%s11642_s4 + $0x10a8] ss:$16 sps:$4 sm:$0xff]   ;;  %v9607_v38 = vld [vmem:[%s11642_s4 + $0x10c4] ss:$16 sps:$4 sm:$0xff]  }
 0x381   : > { %7003 = vmatprep.subr.bf16.mxu0 %v9523_v20  ;;  %7536 = vmatprep.subr.bf16.mxu1 %v9526_v39  ;;  %v9610_v20 = vld [vmem:[%s11642_s4 + $0x10cc] ss:$16 sps:$4 sm:$0xff]   ;;  %v9605_v39 = vld [vmem:[%s11642_s4 + $0x10c0] ss:$16 sps:$4 sm:$0xff]  }
 0x384   : > { %7004 = vmatpush1.bf16.msra.mxu0 %v9521_v28  ;;  %7537 = vmatpush1.bf16.msra.mxu1 %v9524_v40  ;;  %v9608_v28 = vld [vmem:[%s11642_s4 + $0x10c8] ss:$16 sps:$4 sm:$0xff]   ;;  %v9613_v40 = vld [vmem:[%s11642_s4 + $0x10e4] ss:$16 sps:$4 sm:$0xff]  }
 0x385   : > { %7005 = vmatprep.subr.bf16.mxu0 %v9529_v41  ;;  %7538 = vmatprep.subr.bf16.mxu1 %v9532_v42  ;;  %v9616_v41 = vld [vmem:[%s11642_s4 + $0x10ec] ss:$16 sps:$4 sm:$0xff]   ;;  %v9611_v42 = vld [vmem:[%s11642_s4 + $0x10e0] ss:$16 sps:$4 sm:$0xff]  }
 0x388   : > { %7006 = vmatpush1.bf16.msra.mxu0 %v9527_v43  ;;  %7539 = vmatpush1.bf16.msra.mxu1 %v9530_v45  ;;  %v9614_v43 = vld [vmem:[%s11642_s4 + $0x10e8] ss:$16 sps:$4 sm:$0xff]   ;;  %v9619_v45 = vld [vmem:[%s11642_s4 + $0x1104] ss:$16 sps:$4 sm:$0xff]  }
 0x389   : > { %7007 = vmatprep.subr.bf16.mxu0 %v9535_v46  ;;  %7540 = vmatprep.subr.bf16.mxu1 %v9538_v47  ;;  %v9622_v46 = vld [vmem:[%s11642_s4 + $0x110c] ss:$16 sps:$4 sm:$0xff]   ;;  %v9617_v47 = vld [vmem:[%s11642_s4 + $0x1100] ss:$16 sps:$4 sm:$0xff]  }
 0x38c   : > { %7008 = vmatpush1.bf16.msra.mxu0 %v9533_v48  ;;  %7541 = vmatpush1.bf16.msra.mxu1 %v9536_v49  ;;  %v9620_v48 = vld [vmem:[%s11642_s4 + $0x1108] ss:$16 sps:$4 sm:$0xff]   ;;  %v9625_v49 = vld [vmem:[%s11642_s4 + $0x1124] ss:$16 sps:$4 sm:$0xff]  }
 0x38d   : > { %7009 = vmatprep.subr.bf16.mxu0 %v9541_v50  ;;  %7542 = vmatprep.subr.bf16.mxu1 %v9544_v35  ;;  %v9628_v50 = vld [vmem:[%s11642_s4 + $0x112c] ss:$16 sps:$4 sm:$0xff]   ;;  %v9623_v35 = vld [vmem:[%s11642_s4 + $0x1120] ss:$16 sps:$4 sm:$0xff]  }
 0x390   : > { %7010 = vmatpush1.bf16.msra.mxu0 %v9539_v51  ;;  %7543 = vmatpush1.bf16.msra.mxu1 %v9542_v52  ;;  %v9626_v51 = vld [vmem:[%s11642_s4 + $0x1128] ss:$16 sps:$4 sm:$0xff]   ;;  %v9631_v52 = vld [vmem:[%s11642_s4 + $0x1144] ss:$16 sps:$4 sm:$0xff]  }
 0x391   : > { %7011 = vmatprep.subr.bf16.mxu0 %v9547_v44  ;;  %7544 = vmatprep.subr.bf16.mxu1 %v9550_v53  ;;  %v9634_v44 = vld [vmem:[%s11642_s4 + $0x114c] ss:$16 sps:$4 sm:$0xff]   ;;  %v9629_v53 = vld [vmem:[%s11642_s4 + $0x1140] ss:$16 sps:$4 sm:$0xff]  }
 0x394   : > { %7012 = vmatpush1.bf16.msra.mxu0 %v9545_v55  ;;  %7545 = vmatpush1.bf16.msra.mxu1 %v9548_v56  ;;  %v9632_v55 = vld [vmem:[%s11642_s4 + $0x1148] ss:$16 sps:$4 sm:$0xff]   ;;  %v9637_v56 = vld [vmem:[%s11642_s4 + $0x1164] ss:$16 sps:$4 sm:$0xff]  }
 0x395   : > { %7013 = vmatprep.subr.bf16.mxu0 %v9553_v58  ;;  %7546 = vmatprep.subr.bf16.mxu1 %v9556_v59  ;;  %v9640_v58 = vld [vmem:[%s11642_s4 + $0x116c] ss:$16 sps:$4 sm:$0xff]   ;;  %v9635_v59 = vld [vmem:[%s11642_s4 + $0x1160] ss:$16 sps:$4 sm:$0xff]  }
 0x398   : > { %7014 = vmatpush1.bf16.msra.mxu0 %v9551_v37  ;;  %7547 = vmatpush1.bf16.msra.mxu1 %v9554_v60  ;;  %v9638_v37 = vld [vmem:[%s11642_s4 + $0x1168] ss:$16 sps:$4 sm:$0xff]   ;;  %v9643_v60 = vld [vmem:[%s11642_s4 + $0x1184] ss:$16 sps:$4 sm:$0xff]  }
 0x399   : > { %7015 = vmatprep.subr.bf16.mxu0 %v9559_v61  ;;  %7548 = vmatprep.subr.bf16.mxu1 %v9562_v62  ;;  %v9646_v61 = vld [vmem:[%s11642_s4 + $0x118c] ss:$16 sps:$4 sm:$0xff]   ;;  %v9641_v62 = vld [vmem:[%s11642_s4 + $0x1180] ss:$16 sps:$4 sm:$0xff]  }
 0x39c   : > { %7016 = vmatpush1.bf16.msra.mxu0 %v9557_v63  ;;  %7549 = vmatpush1.bf16.msra.mxu1 %v9560_v0  ;;  %v9644_v63 = vld [vmem:[%s11642_s4 + $0x1188] ss:$16 sps:$4 sm:$0xff]   ;;  %v9649_v0 = vld [vmem:[%s11642_s4 + $0x11a4] ss:$16 sps:$4 sm:$0xff]  }
 0x39d   : > { %7017 = vmatprep.subr.bf16.mxu0 %v9565_v1  ;;  %7550 = vmatprep.subr.bf16.mxu1 %v9568_v3  ;;  %v9652_v1 = vld [vmem:[%s11642_s4 + $0x11ac] ss:$16 sps:$4 sm:$0xff]   ;;  %v9647_v3 = vld [vmem:[%s11642_s4 + $0x11a0] ss:$16 sps:$4 sm:$0xff]  }
 0x3a0   : > { %7018 = vmatpush1.bf16.msra.mxu0 %v9563_v5  ;;  %7551 = vmatpush1.bf16.msra.mxu1 %v9566_v6  ;;  %v9650_v5 = vld [vmem:[%s11642_s4 + $0x11a8] ss:$16 sps:$4 sm:$0xff]   ;;  %v9655_v6 = vld [vmem:[%s11642_s4 + $0x11c4] ss:$16 sps:$4 sm:$0xff]  }
 0x3a1   : > { %7028 = vmatprep.subr.bf16.mxu0 %v9571_v7  ;;  %7561 = vmatprep.subr.bf16.mxu1 %v9574_v57  ;;  %v9658_v7 = vld [vmem:[%s11642_s4 + $0x11cc] ss:$16 sps:$4 sm:$0xff]   ;;  %v9653_v57 = vld [vmem:[%s11642_s4 + $0x11c0] ss:$16 sps:$4 sm:$0xff]  }
 0x3a3   : > { %7020 = vmatmul.mubr.bf16.vlgmr.msra.gmra.mrb[0].mxu0 %v2686_v9  ;;  %7553 = vmatmul.mubr.bf16.vlgmr.msra.gmra.mrb[0].mxu1 %v2686_v9  ;;  %v9661_v9 = vld [vmem:[%s11642_s4 + $0x11e4] ss:$16 sps:$4 sm:$0xff]  }
 0x3a4   : > { %7029 = vmatpush1.bf16.msra.mxu0 %v9569_v10  ;;  %7562 = vmatpush1.bf16.msra.mxu1 %v9572_v2  ;;  %v9664_v10 = vld [vmem:[%s11642_s4 + $0x11ec] ss:$16 sps:$4 sm:$0xff]   ;;  %v9659_v2 = vld [vmem:[%s11642_s4 + $0x11e0] ss:$16 sps:$4 sm:$0xff]  }
 0x3a5   : > { %7030 = vmatprep.subr.bf16.mxu0 %v9577_v11  ;;  %7563 = vmatprep.subr.bf16.mxu1 %v9580_v12  ;;  %v9662_v11 = vld [vmem:[%s11642_s4 + $0x11e8] ss:$16 sps:$4 sm:$0xff]   ;;  %v9667_v12 = vld [vmem:[%s11642_s4 + $0x1204] ss:$16 sps:$4 sm:$0xff]  }
 0x3a6   : > { %7060 = vmatprep.mubr.bf16.mxu0 %v12265_v13  ;;  %7593 = vmatprep.mubr.bf16.mxu1 %v12265_v13 }
 0x3a8   : > { %7031 = vmatpush1.bf16.msra.mxu0 %v9575_v34  ;;  %7564 = vmatpush1.bf16.msra.mxu1 %v9578_v14  ;;  %v9670_v34 = vld [vmem:[%s11642_s4 + $0x120c] ss:$16 sps:$4 sm:$0xff]   ;;  %v12331_v14 = vrot.slane %v12250_v4, %v11647_v24  ;;  %v9671_v4 = vld [vmem:[%s11642_s4 + $0x1220] ss:$16 sps:$4 sm:$0xff]  }
 0x3a9   : > { %7032 = vmatprep.subr.bf16.mxu0 %v9583_v15  ;;  %7565 = vmatprep.subr.bf16.mxu1 %v9586_v16  ;;  %v9665_v15 = vld [vmem:[%s11642_s4 + $0x1200] ss:$16 sps:$4 sm:$0xff]   ;;  %v9668_v16 = vld [vmem:[%s11642_s4 + $0x1208] ss:$16 sps:$4 sm:$0xff]  }
 0x3ac   : > { %7033 = vmatpush1.bf16.msra.mxu0 %v9581_v17  ;;  %7566 = vmatpush1.bf16.msra.mxu1 %v9584_v18  ;;  %v9673_v17 = vld [vmem:[%s11642_s4 + $0x1224] ss:$16 sps:$4 sm:$0xff]   ;;  %v9676_v18 = vld [vmem:[%s11642_s4 + $0x122c] ss:$16 sps:$4 sm:$0xff]  }
 0x3ad   : > { %7034 = vmatprep.subr.bf16.mxu0 %v9589_v21  ;;  %7567 = vmatprep.subr.bf16.mxu1 %v9592_v22  ;;  %v2736_v21 = vcombine.high %v12265_v13, %v12265_v13  ;;  %v9674_v22 = vld [vmem:[%s11642_s4 + $0x1228] ss:$16 sps:$4 sm:$0xff]   ;;  %v9677_v13 = vld [vmem:[%s11642_s4 + $0x1240] ss:$16 sps:$4 sm:$0xff]  }
 0x3b0   : > { %7035 = vmatpush1.bf16.msra.mxu0 %v9587_v23  ;;  %7568 = vmatpush1.bf16.msra.mxu1 %v9590_v25  ;;  %v9679_v23 = vld [vmem:[%s11642_s4 + $0x1244] ss:$16 sps:$4 sm:$0xff]   ;;  %v9682_v25 = vld [vmem:[%s11642_s4 + $0x124c] ss:$16 sps:$4 sm:$0xff]  }
 0x3b1   : > { %7036 = vmatprep.subr.bf16.mxu0 %v9595_v26  ;;  %7569 = vmatprep.subr.bf16.mxu1 %v9598_v27  ;;  %v9680_v26 = vld [vmem:[%s11642_s4 + $0x1248] ss:$16 sps:$4 sm:$0xff]   ;;  %v9685_v27 = vld [vmem:[%s11642_s4 + $0x1264] ss:$16 sps:$4 sm:$0xff]  }
 0x3b4   : > { %7037 = vmatpush1.bf16.msra.mxu0 %v9593_v29  ;;  %7570 = vmatpush1.bf16.msra.mxu1 %v9596_v30  ;;  %v9688_v29 = vld [vmem:[%s11642_s4 + $0x126c] ss:$16 sps:$4 sm:$0xff]   ;;  %v9683_v30 = vld [vmem:[%s11642_s4 + $0x1260] ss:$16 sps:$4 sm:$0xff]  }
 0x3b5   : > { %7038 = vmatprep.subr.bf16.mxu0 %v9601_v31  ;;  %7571 = vmatprep.subr.bf16.mxu1 %v9604_v32  ;;  %v9686_v31 = vld [vmem:[%s11642_s4 + $0x1268] ss:$16 sps:$4 sm:$0xff]   ;;  %v9691_v32 = vld [vmem:[%s11642_s4 + $0x1284] ss:$16 sps:$4 sm:$0xff]  }
 0x3b8   : > { %7039 = vmatpush1.bf16.msra.mxu0 %v9599_v33  ;;  %7572 = vmatpush1.bf16.msra.mxu1 %v9602_v36  ;;  %v9694_v33 = vld [vmem:[%s11642_s4 + $0x128c] ss:$16 sps:$4 sm:$0xff]   ;;  %v9689_v36 = vld [vmem:[%s11642_s4 + $0x1280] ss:$16 sps:$4 sm:$0xff]  }
 0x3b9   : > { %7040 = vmatprep.subr.bf16.mxu0 %v9607_v38  ;;  %7573 = vmatprep.subr.bf16.mxu1 %v9610_v20  ;;  %v9692_v38 = vld [vmem:[%s11642_s4 + $0x1288] ss:$16 sps:$4 sm:$0xff]   ;;  %v9697_v20 = vld [vmem:[%s11642_s4 + $0x12a4] ss:$16 sps:$4 sm:$0xff]  }
 0x3bc   : > { %7041 = vmatpush1.bf16.msra.mxu0 %v9605_v39  ;;  %7574 = vmatpush1.bf16.msra.mxu1 %v9608_v28  ;;  %v9700_v39 = vld [vmem:[%s11642_s4 + $0x12ac] ss:$16 sps:$4 sm:$0xff]   ;;  %v9695_v28 = vld [vmem:[%s11642_s4 + $0x12a0] ss:$16 sps:$4 sm:$0xff]  }
 0x3bd   : > { %7042 = vmatprep.subr.bf16.mxu0 %v9613_v40  ;;  %7575 = vmatprep.subr.bf16.mxu1 %v9616_v41  ;;  %v9698_v40 = vld [vmem:[%s11642_s4 + $0x12a8] ss:$16 sps:$4 sm:$0xff]   ;;  %v9703_v41 = vld [vmem:[%s11642_s4 + $0x12c4] ss:$16 sps:$4 sm:$0xff]  }
 0x3c0   : > { %7043 = vmatpush1.bf16.msra.mxu0 %v9611_v42  ;;  %7576 = vmatpush1.bf16.msra.mxu1 %v9614_v43  ;;  %v9706_v42 = vld [vmem:[%s11642_s4 + $0x12cc] ss:$16 sps:$4 sm:$0xff]   ;;  %v9701_v43 = vld [vmem:[%s11642_s4 + $0x12c0] ss:$16 sps:$4 sm:$0xff]  }
 0x3c1   : > { %7044 = vmatprep.subr.bf16.mxu0 %v9619_v45  ;;  %7577 = vmatprep.subr.bf16.mxu1 %v9622_v46  ;;  %v9704_v45 = vld [vmem:[%s11642_s4 + $0x12c8] ss:$16 sps:$4 sm:$0xff]   ;;  %v9709_v46 = vld [vmem:[%s11642_s4 + $0x12e4] ss:$16 sps:$4 sm:$0xff]  }
 0x3c4   : > { %7045 = vmatpush1.bf16.msra.mxu0 %v9617_v47  ;;  %7578 = vmatpush1.bf16.msra.mxu1 %v9620_v48  ;;  %v9712_v47 = vld [vmem:[%s11642_s4 + $0x12ec] ss:$16 sps:$4 sm:$0xff]   ;;  %v9707_v48 = vld [vmem:[%s11642_s4 + $0x12e0] ss:$16 sps:$4 sm:$0xff]  }
 0x3c5   : > { %7046 = vmatprep.subr.bf16.mxu0 %v9625_v49  ;;  %7579 = vmatprep.subr.bf16.mxu1 %v9628_v50  ;;  %v9710_v49 = vld [vmem:[%s11642_s4 + $0x12e8] ss:$16 sps:$4 sm:$0xff]   ;;  %v9715_v50 = vld [vmem:[%s11642_s4 + $0x1304] ss:$16 sps:$4 sm:$0xff]  }
 0x3c8   : > { %7047 = vmatpush1.bf16.msra.mxu0 %v9623_v35  ;;  %7580 = vmatpush1.bf16.msra.mxu1 %v9626_v51  ;;  %v9718_v35 = vld [vmem:[%s11642_s4 + $0x130c] ss:$16 sps:$4 sm:$0xff]   ;;  %v9713_v51 = vld [vmem:[%s11642_s4 + $0x1300] ss:$16 sps:$4 sm:$0xff]  }
 0x3c9   : > { %7048 = vmatprep.subr.bf16.mxu0 %v9631_v52  ;;  %7581 = vmatprep.subr.bf16.mxu1 %v9634_v44  ;;  %v9716_v52 = vld [vmem:[%s11642_s4 + $0x1308] ss:$16 sps:$4 sm:$0xff]   ;;  %v9721_v44 = vld [vmem:[%s11642_s4 + $0x1324] ss:$16 sps:$4 sm:$0xff]  }
 0x3cc   : > { %7049 = vmatpush1.bf16.msra.mxu0 %v9629_v53  ;;  %7582 = vmatpush1.bf16.msra.mxu1 %v9632_v55  ;;  %v9724_v53 = vld [vmem:[%s11642_s4 + $0x132c] ss:$16 sps:$4 sm:$0xff]   ;;  %v9719_v55 = vld [vmem:[%s11642_s4 + $0x1320] ss:$16 sps:$4 sm:$0xff]  }
 0x3cd   : > { %7050 = vmatprep.subr.bf16.mxu0 %v9637_v56  ;;  %7583 = vmatprep.subr.bf16.mxu1 %v9640_v58  ;;  %v9722_v56 = vld [vmem:[%s11642_s4 + $0x1328] ss:$16 sps:$4 sm:$0xff]   ;;  %v9727_v58 = vld [vmem:[%s11642_s4 + $0x1344] ss:$16 sps:$4 sm:$0xff]  }
 0x3d0   : > { %7051 = vmatpush1.bf16.msra.mxu0 %v9635_v59  ;;  %7584 = vmatpush1.bf16.msra.mxu1 %v9638_v37  ;;  %v9730_v59 = vld [vmem:[%s11642_s4 + $0x134c] ss:$16 sps:$4 sm:$0xff]   ;;  %v9725_v37 = vld [vmem:[%s11642_s4 + $0x1340] ss:$16 sps:$4 sm:$0xff]  }
 0x3d1   : > { %7052 = vmatprep.subr.bf16.mxu0 %v9643_v60  ;;  %7585 = vmatprep.subr.bf16.mxu1 %v9646_v61  ;;  %v9728_v60 = vld [vmem:[%s11642_s4 + $0x1348] ss:$16 sps:$4 sm:$0xff]   ;;  %v9733_v61 = vld [vmem:[%s11642_s4 + $0x1364] ss:$16 sps:$4 sm:$0xff]  }
 0x3d4   : > { %7053 = vmatpush1.bf16.msra.mxu0 %v9641_v62  ;;  %7586 = vmatpush1.bf16.msra.mxu1 %v9644_v63  ;;  %v9736_v62 = vld [vmem:[%s11642_s4 + $0x136c] ss:$16 sps:$4 sm:$0xff]   ;;  %v9731_v63 = vld [vmem:[%s11642_s4 + $0x1360] ss:$16 sps:$4 sm:$0xff]  }
 0x3d5   : > { %7054 = vmatprep.subr.bf16.mxu0 %v9649_v0  ;;  %7587 = vmatprep.subr.bf16.mxu1 %v9652_v1  ;;  %v9734_v0 = vld [vmem:[%s11642_s4 + $0x1368] ss:$16 sps:$4 sm:$0xff]   ;;  %v9739_v1 = vld [vmem:[%s11642_s4 + $0x1384] ss:$16 sps:$4 sm:$0xff]  }
 0x3d8   : > { %7055 = vmatpush1.bf16.msra.mxu0 %v9647_v3  ;;  %7588 = vmatpush1.bf16.msra.mxu1 %v9650_v5  ;;  %v9742_v3 = vld [vmem:[%s11642_s4 + $0x138c] ss:$16 sps:$4 sm:$0xff]   ;;  %v9737_v5 = vld [vmem:[%s11642_s4 + $0x1380] ss:$16 sps:$4 sm:$0xff]  }
 0x3d9   : > { %7056 = vmatprep.subr.bf16.mxu0 %v9655_v6  ;;  %7589 = vmatprep.subr.bf16.mxu1 %v9658_v7  ;;  %v9740_v6 = vld [vmem:[%s11642_s4 + $0x1388] ss:$16 sps:$4 sm:$0xff]   ;;  %v9745_v7 = vld [vmem:[%s11642_s4 + $0x13a4] ss:$16 sps:$4 sm:$0xff]  }
 0x3dc   : > { %7057 = vmatpush1.bf16.msra.mxu0 %v9653_v57  ;;  %7590 = vmatpush1.bf16.msra.mxu1 %v9656_v8  ;;  %v9748_v57 = vld [vmem:[%s11642_s4 + $0x13ac] ss:$16 sps:$4 sm:$0xff]   ;;  %v9743_v8 = vld [vmem:[%s11642_s4 + $0x13a0] ss:$16 sps:$4 sm:$0xff]  }
 0x3dd   : > { %7058 = vmatprep.subr.bf16.mxu0 %v9661_v9  ;;  %7591 = vmatprep.subr.bf16.mxu1 %v9664_v10  ;;  %v9746_v9 = vld [vmem:[%s11642_s4 + $0x13a8] ss:$16 sps:$4 sm:$0xff]   ;;  %v9751_v10 = vld [vmem:[%s11642_s4 + $0x13c4] ss:$16 sps:$4 sm:$0xff]  }
 0x3e0   : > { %7059 = vmatpush1.bf16.msra.mxu0 %v9659_v2  ;;  %7592 = vmatpush1.bf16.msra.mxu1 %v9662_v11  ;;  %v9754_v2 = vld [vmem:[%s11642_s4 + $0x13cc] ss:$16 sps:$4 sm:$0xff]   ;;  %v2689_v11 = vcombine.high %v12242_v54, %v12242_v54  ;;  %v9755_v54 = vld [vmem:[%s11642_s4 + $0x13e0] ss:$16 sps:$4 sm:$0xff]  }
 0x3e1   : > { %7069 = vmatprep.subr.bf16.mxu0 %v9667_v12  ;;  %7602 = vmatprep.subr.bf16.mxu1 %v9670_v34  ;;  %v9749_v12 = vld [vmem:[%s11642_s4 + $0x13c0] ss:$16 sps:$4 sm:$0xff]   ;;  %v9752_v34 = vld [vmem:[%s11642_s4 + $0x13c8] ss:$16 sps:$4 sm:$0xff]  }
 0x3e3   : > { %7061 = vmatmul.mubr.bf16.vlgmr.msra.gmra.mrb[0].mxu0 %v12331_v14  ;;  %7594 = vmatmul.mubr.bf16.vlgmr.msra.gmra.mrb[0].mxu1 %v12331_v14 }
 0x3e4   : > { %7070 = vmatpush1.bf16.msra.mxu0 %v9665_v15  ;;  %7603 = vmatpush1.bf16.msra.mxu1 %v9668_v16  ;;  %v9757_v15 = vld [vmem:[%s11642_s4 + $0x13e4] ss:$16 sps:$4 sm:$0xff]   ;;  %v9760_v16 = vld [vmem:[%s11642_s4 + $0x13ec] ss:$16 sps:$4 sm:$0xff]  }
 0x3e5   : > { %7071 = vmatprep.subr.bf16.mxu0 %v9673_v17  ;;  %7604 = vmatprep.subr.bf16.mxu1 %v9676_v18  ;;  %v12400_v17 = vrot.slane %v2689_v11, %v11647_v24  ;;  %v9758_v18 = vld [vmem:[%s11642_s4 + $0x13e8] ss:$16 sps:$4 sm:$0xff]  }
 0x3e6   : > { %7101 = vmatprep.mubr.bf16.mxu0 %v2736_v21  ;;  %7634 = vmatprep.mubr.bf16.mxu1 %v2736_v21  ;;  %v9763_v21 = vld [vmem:[%s11642_s4 + $0x1404] ss:$16 sps:$4 sm:$0xff]   ;;  %v9836_v11 = vld [vmem:[%s11642_s4 + $0x1588] ss:$16 sps:$4 sm:$0xff]  }
 0x3e8   : > { %7072 = vmatpush1.bf16.msra.mxu0 %v9671_v4  ;;  %7605 = vmatpush1.bf16.msra.mxu1 %v9674_v22  ;;  %v9766_v4 = vld [vmem:[%s11642_s4 + $0x140c] ss:$16 sps:$4 sm:$0xff]   ;;  %v2705_v22 = vcombine.high %v12400_v17, %v12400_v17 }
 0x3e9   : > { %7073 = vmatprep.subr.bf16.mxu0 %v9679_v23  ;;  %7606 = vmatprep.subr.bf16.mxu1 %v9682_v25  ;;  %v2734_v23 = vcombine.high %v12331_v14, %v12331_v14  ;;  %v9761_v25 = vld [vmem:[%s11642_s4 + $0x1400] ss:$16 sps:$4 sm:$0xff]  }
 0x3ea   : > { %v9767_v14 = vld [vmem:[%s11642_s4 + $0x1420] ss:$16 sps:$4 sm:$0xff]  }
 0x3ec   : > { %7074 = vmatpush1.bf16.msra.mxu0 %v9677_v13  ;;  %7607 = vmatpush1.bf16.msra.mxu1 %v9680_v26  ;;  %v9764_v13 = vld [vmem:[%s11642_s4 + $0x1408] ss:$16 sps:$4 sm:$0xff]   ;;  %v9769_v26 = vld [vmem:[%s11642_s4 + $0x1424] ss:$16 sps:$4 sm:$0xff]  }
 0x3ed   : > { %7075 = vmatprep.subr.bf16.mxu0 %v9685_v27  ;;  %7608 = vmatprep.subr.bf16.mxu1 %v9688_v29  ;;  %v9772_v27 = vld [vmem:[%s11642_s4 + $0x142c] ss:$16 sps:$4 sm:$0xff]   ;;  %v12415_v29 = vrot.slane %v2705_v22, %v11647_v24  ;;  %v9853_v22 = vld [vmem:[%s11642_s4 + $0x15e4] ss:$16 sps:$4 sm:$0xff]  }
 0x3f0   : > { %7076 = vmatpush1.bf16.msra.mxu0 %v9683_v30  ;;  %7609 = vmatpush1.bf16.msra.mxu1 %v9686_v31  ;;  %v9770_v30 = vld [vmem:[%s11642_s4 + $0x1428] ss:$16 sps:$4 sm:$0xff]   ;;  %v9775_v31 = vld [vmem:[%s11642_s4 + $0x1444] ss:$16 sps:$4 sm:$0xff]  }
 0x3f1   : > { %7077 = vmatprep.subr.bf16.mxu0 %v9691_v32  ;;  %7610 = vmatprep.subr.bf16.mxu1 %v9694_v33  ;;  %v9778_v32 = vld [vmem:[%s11642_s4 + $0x144c] ss:$16 sps:$4 sm:$0xff]   ;;  %v9773_v33 = vld [vmem:[%s11642_s4 + $0x1440] ss:$16 sps:$4 sm:$0xff]  }
 0x3f4   : > { %7078 = vmatpush1.bf16.msra.mxu0 %v9689_v36  ;;  %7611 = vmatpush1.bf16.msra.mxu1 %v9692_v38  ;;  %v9776_v36 = vld [vmem:[%s11642_s4 + $0x1448] ss:$16 sps:$4 sm:$0xff]   ;;  %v9781_v38 = vld [vmem:[%s11642_s4 + $0x1464] ss:$16 sps:$4 sm:$0xff]  }
 0x3f5   : > { %7079 = vmatprep.subr.bf16.mxu0 %v9697_v20  ;;  %7612 = vmatprep.subr.bf16.mxu1 %v9700_v39  ;;  %v9784_v20 = vld [vmem:[%s11642_s4 + $0x146c] ss:$16 sps:$4 sm:$0xff]   ;;  %v9779_v39 = vld [vmem:[%s11642_s4 + $0x1460] ss:$16 sps:$4 sm:$0xff]  }
 0x3f8   : > { %7080 = vmatpush1.bf16.msra.mxu0 %v9695_v28  ;;  %7613 = vmatpush1.bf16.msra.mxu1 %v9698_v40  ;;  %v9782_v28 = vld [vmem:[%s11642_s4 + $0x1468] ss:$16 sps:$4 sm:$0xff]   ;;  %v9787_v40 = vld [vmem:[%s11642_s4 + $0x1484] ss:$16 sps:$4 sm:$0xff]  }
 0x3f9   : > { %7081 = vmatprep.subr.bf16.mxu0 %v9703_v41  ;;  %7614 = vmatprep.subr.bf16.mxu1 %v9706_v42  ;;  %v9790_v41 = vld [vmem:[%s11642_s4 + $0x148c] ss:$16 sps:$4 sm:$0xff]   ;;  %v9785_v42 = vld [vmem:[%s11642_s4 + $0x1480] ss:$16 sps:$4 sm:$0xff]  }
 0x3fc   : > { %7082 = vmatpush1.bf16.msra.mxu0 %v9701_v43  ;;  %7615 = vmatpush1.bf16.msra.mxu1 %v9704_v45  ;;  %v9788_v43 = vld [vmem:[%s11642_s4 + $0x1488] ss:$16 sps:$4 sm:$0xff]   ;;  %v9793_v45 = vld [vmem:[%s11642_s4 + $0x14a4] ss:$16 sps:$4 sm:$0xff]  }
 0x3fd   : > { %7083 = vmatprep.subr.bf16.mxu0 %v9709_v46  ;;  %7616 = vmatprep.subr.bf16.mxu1 %v9712_v47  ;;  %v9796_v46 = vld [vmem:[%s11642_s4 + $0x14ac] ss:$16 sps:$4 sm:$0xff]   ;;  %v9791_v47 = vld [vmem:[%s11642_s4 + $0x14a0] ss:$16 sps:$4 sm:$0xff]  }
 0x400   : > { %7084 = vmatpush1.bf16.msra.mxu0 %v9707_v48  ;;  %7617 = vmatpush1.bf16.msra.mxu1 %v9710_v49  ;;  %v9794_v48 = vld [vmem:[%s11642_s4 + $0x14a8] ss:$16 sps:$4 sm:$0xff]   ;;  %v9799_v49 = vld [vmem:[%s11642_s4 + $0x14c4] ss:$16 sps:$4 sm:$0xff]  }
 0x401   : > { %7085 = vmatprep.subr.bf16.mxu0 %v9715_v50  ;;  %7618 = vmatprep.subr.bf16.mxu1 %v9718_v35  ;;  %v9802_v50 = vld [vmem:[%s11642_s4 + $0x14cc] ss:$16 sps:$4 sm:$0xff]   ;;  %v9797_v35 = vld [vmem:[%s11642_s4 + $0x14c0] ss:$16 sps:$4 sm:$0xff]  }
 0x404   : > { %7086 = vmatpush1.bf16.msra.mxu0 %v9713_v51  ;;  %7619 = vmatpush1.bf16.msra.mxu1 %v9716_v52  ;;  %v9800_v51 = vld [vmem:[%s11642_s4 + $0x14c8] ss:$16 sps:$4 sm:$0xff]   ;;  %v9805_v52 = vld [vmem:[%s11642_s4 + $0x14e4] ss:$16 sps:$4 sm:$0xff]  }
 0x405   : > { %7087 = vmatprep.subr.bf16.mxu0 %v9721_v44  ;;  %7620 = vmatprep.subr.bf16.mxu1 %v9724_v53  ;;  %v9808_v44 = vld [vmem:[%s11642_s4 + $0x14ec] ss:$16 sps:$4 sm:$0xff]   ;;  %v9803_v53 = vld [vmem:[%s11642_s4 + $0x14e0] ss:$16 sps:$4 sm:$0xff]  }
 0x408   : > { %7088 = vmatpush1.bf16.msra.mxu0 %v9719_v55  ;;  %7621 = vmatpush1.bf16.msra.mxu1 %v9722_v56  ;;  %v9806_v55 = vld [vmem:[%s11642_s4 + $0x14e8] ss:$16 sps:$4 sm:$0xff]   ;;  %v9811_v56 = vld [vmem:[%s11642_s4 + $0x1504] ss:$16 sps:$4 sm:$0xff]  }
 0x409   : > { %7089 = vmatprep.subr.bf16.mxu0 %v9727_v58  ;;  %7622 = vmatprep.subr.bf16.mxu1 %v9730_v59  ;;  %v9814_v58 = vld [vmem:[%s11642_s4 + $0x150c] ss:$16 sps:$4 sm:$0xff]   ;;  %v9809_v59 = vld [vmem:[%s11642_s4 + $0x1500] ss:$16 sps:$4 sm:$0xff]  }
 0x40c   : > { %7090 = vmatpush1.bf16.msra.mxu0 %v9725_v37  ;;  %7623 = vmatpush1.bf16.msra.mxu1 %v9728_v60  ;;  %v9812_v37 = vld [vmem:[%s11642_s4 + $0x1508] ss:$16 sps:$4 sm:$0xff]   ;;  %v9817_v60 = vld [vmem:[%s11642_s4 + $0x1524] ss:$16 sps:$4 sm:$0xff]  }
 0x40d   : > { %7091 = vmatprep.subr.bf16.mxu0 %v9733_v61  ;;  %7624 = vmatprep.subr.bf16.mxu1 %v9736_v62  ;;  %v9820_v61 = vld [vmem:[%s11642_s4 + $0x152c] ss:$16 sps:$4 sm:$0xff]   ;;  %v9815_v62 = vld [vmem:[%s11642_s4 + $0x1520] ss:$16 sps:$4 sm:$0xff]  }
 0x410   : > { %7092 = vmatpush1.bf16.msra.mxu0 %v9731_v63  ;;  %7625 = vmatpush1.bf16.msra.mxu1 %v9734_v0  ;;  %v9818_v63 = vld [vmem:[%s11642_s4 + $0x1528] ss:$16 sps:$4 sm:$0xff]   ;;  %v9823_v0 = vld [vmem:[%s11642_s4 + $0x1544] ss:$16 sps:$4 sm:$0xff]  }
 0x411   : > { %7093 = vmatprep.subr.bf16.mxu0 %v9739_v1  ;;  %7626 = vmatprep.subr.bf16.mxu1 %v9742_v3  ;;  %v9826_v1 = vld [vmem:[%s11642_s4 + $0x154c] ss:$16 sps:$4 sm:$0xff]   ;;  %v9821_v3 = vld [vmem:[%s11642_s4 + $0x1540] ss:$16 sps:$4 sm:$0xff]  }
 0x414   : > { %7094 = vmatpush1.bf16.msra.mxu0 %v9737_v5  ;;  %7627 = vmatpush1.bf16.msra.mxu1 %v9740_v6  ;;  %v9824_v5 = vld [vmem:[%s11642_s4 + $0x1548] ss:$16 sps:$4 sm:$0xff]   ;;  %v9829_v6 = vld [vmem:[%s11642_s4 + $0x1564] ss:$16 sps:$4 sm:$0xff]  }
 0x415   : > { %7095 = vmatprep.subr.bf16.mxu0 %v9745_v7  ;;  %7628 = vmatprep.subr.bf16.mxu1 %v9748_v57  ;;  %v9832_v7 = vld [vmem:[%s11642_s4 + $0x156c] ss:$16 sps:$4 sm:$0xff]   ;;  %v9827_v57 = vld [vmem:[%s11642_s4 + $0x1560] ss:$16 sps:$4 sm:$0xff]  }
 0x418   : > { %7096 = vmatpush1.bf16.msra.mxu0 %v9743_v8  ;;  %7629 = vmatpush1.bf16.msra.mxu1 %v9746_v9  ;;  %v9830_v8 = vld [vmem:[%s11642_s4 + $0x1568] ss:$16 sps:$4 sm:$0xff]   ;;  %v9835_v9 = vld [vmem:[%s11642_s4 + $0x1584] ss:$16 sps:$4 sm:$0xff]  }
 0x419   : > { %7097 = vmatprep.subr.bf16.mxu0 %v9751_v10  ;;  %7630 = vmatprep.subr.bf16.mxu1 %v9754_v2  ;;  %v9838_v10 = vld [vmem:[%s11642_s4 + $0x158c] ss:$16 sps:$4 sm:$0xff]   ;;  %v9833_v2 = vld [vmem:[%s11642_s4 + $0x1580] ss:$16 sps:$4 sm:$0xff]  }
 0x41c   : > { %7098 = vmatpush1.bf16.msra.mxu0 %v9749_v12  ;;  %7631 = vmatpush1.bf16.msra.mxu1 %v9752_v34  ;;  %v9841_v12 = vld [vmem:[%s11642_s4 + $0x15a4] ss:$16 sps:$4 sm:$0xff]   ;;  %v9844_v34 = vld [vmem:[%s11642_s4 + $0x15ac] ss:$16 sps:$4 sm:$0xff]  }
 0x41d   : > { %7099 = vmatprep.subr.bf16.mxu0 %v9757_v15  ;;  %7632 = vmatprep.subr.bf16.mxu1 %v9760_v16  ;;  %v9839_v15 = vld [vmem:[%s11642_s4 + $0x15a0] ss:$16 sps:$4 sm:$0xff]   ;;  %v9842_v16 = vld [vmem:[%s11642_s4 + $0x15a8] ss:$16 sps:$4 sm:$0xff]  }
 0x420   : > { %7100 = vmatpush1.bf16.msra.mxu0 %v9755_v54  ;;  %7633 = vmatpush1.bf16.msra.mxu1 %v9758_v18  ;;  %v9847_v54 = vld [vmem:[%s11642_s4 + $0x15c4] ss:$16 sps:$4 sm:$0xff]   ;;  %v9850_v18 = vld [vmem:[%s11642_s4 + $0x15cc] ss:$16 sps:$4 sm:$0xff]  }
 0x421   : > { %7110 = vmatprep.subr.bf16.mxu0 %v9763_v21  ;;  %7643 = vmatprep.subr.bf16.mxu1 %v9766_v4  ;;  %v9845_v21 = vld [vmem:[%s11642_s4 + $0x15c0] ss:$16 sps:$4 sm:$0xff]   ;;  %v9848_v4 = vld [vmem:[%s11642_s4 + $0x15c8] ss:$16 sps:$4 sm:$0xff]  }
 0x423   : > { %7102 = vmatmul.mubr.bf16.vlgmr.msra.gmra.mrb[0].mxu0 %v2734_v23  ;;  %7635 = vmatmul.mubr.bf16.vlgmr.msra.gmra.mrb[0].mxu1 %v2734_v23  ;;  %v9856_v23 = vld [vmem:[%s11642_s4 + $0x15ec] ss:$16 sps:$4 sm:$0xff]  }
 0x424   : > { %7111 = vmatpush1.bf16.msra.mxu0 %v9761_v25  ;;  %7644 = vmatpush1.bf16.msra.mxu1 %v9764_v13  ;;  %v9851_v25 = vld [vmem:[%s11642_s4 + $0x15e0] ss:$16 sps:$4 sm:$0xff]   ;;  %v9854_v13 = vld [vmem:[%s11642_s4 + $0x15e8] ss:$16 sps:$4 sm:$0xff]  }
 0x425   : > { %7112 = vmatprep.subr.bf16.mxu0 %v9769_v26  ;;  %7645 = vmatprep.subr.bf16.mxu1 %v9772_v27  ;;  %v9860_v26 = vld [vmem:[%s11642_s4 + $0x1604] ss:$16 sps:$4 sm:$0xff]   ;;  %v9863_v27 = vld [vmem:[%s11642_s4 + $0x160c] ss:$16 sps:$4 sm:$0xff]  }
 0x426   : > { %7142 = vmatprep.mubr.bf16.mxu0 %v12415_v29  ;;  %7675 = vmatprep.mubr.bf16.mxu1 %v12415_v29 }
 0x428   : > { %7113 = vmatpush1.bf16.msra.mxu0 %v9767_v14  ;;  %7646 = vmatpush1.bf16.msra.mxu1 %v9770_v30  ;;  %v12481_v14 = vrot.slane %v12400_v17, %v11647_v24  ;;  %v9858_v30 = vld [vmem:[%s11642_s4 + $0x1600] ss:$16 sps:$4 sm:$0xff]  }
 0x429   : > { %7114 = vmatprep.subr.bf16.mxu0 %v9775_v31  ;;  %7647 = vmatprep.subr.bf16.mxu1 %v9778_v32  ;;  %v9861_v31 = vld [vmem:[%s11642_s4 + $0x1608] ss:$16 sps:$4 sm:$0xff]   ;;  %v9866_v32 = vld [vmem:[%s11642_s4 + $0x1624] ss:$16 sps:$4 sm:$0xff]   ;;  %v9864_v17 = vld [vmem:[%s11642_s4 + $0x1620] ss:$16 sps:$4 sm:$0xff]  }
 0x42c   : > { %7115 = vmatpush1.bf16.msra.mxu0 %v9773_v33  ;;  %7648 = vmatpush1.bf16.msra.mxu1 %v9776_v36  ;;  %v9869_v33 = vld [vmem:[%s11642_s4 + $0x162c] ss:$16 sps:$4 sm:$0xff]   ;;  %v2737_v36 = vcombine.high %v12415_v29, %v12415_v29  ;;  %v9870_v29 = vld [vmem:[%s11642_s4 + $0x1640] ss:$16 sps:$4 sm:$0xff]  }
 0x42d   : > { %7116 = vmatprep.subr.bf16.mxu0 %v9781_v38  ;;  %7649 = vmatprep.subr.bf16.mxu1 %v9784_v20  ;;  %v9867_v38 = vld [vmem:[%s11642_s4 + $0x1628] ss:$16 sps:$4 sm:$0xff]   ;;  %v9872_v20 = vld [vmem:[%s11642_s4 + $0x1644] ss:$16 sps:$4 sm:$0xff]  }
 0x430   : > { %7117 = vmatpush1.bf16.msra.mxu0 %v9779_v39  ;;  %7650 = vmatpush1.bf16.msra.mxu1 %v9782_v28  ;;  %v9875_v39 = vld [vmem:[%s11642_s4 + $0x164c] ss:$16 sps:$4 sm:$0xff]   ;;  %v9873_v28 = vld [vmem:[%s11642_s4 + $0x1648] ss:$16 sps:$4 sm:$0xff]  }
 0x431   : > { %7118 = vmatprep.subr.bf16.mxu0 %v9787_v40  ;;  %7651 = vmatprep.subr.bf16.mxu1 %v9790_v41  ;;  %v9878_v40 = vld [vmem:[%s11642_s4 + $0x1664] ss:$16 sps:$4 sm:$0xff]   ;;  %v9881_v41 = vld [vmem:[%s11642_s4 + $0x166c] ss:$16 sps:$4 sm:$0xff]  }
 0x434   : > { %7119 = vmatpush1.bf16.msra.mxu0 %v9785_v42  ;;  %7652 = vmatpush1.bf16.msra.mxu1 %v9788_v43  ;;  %v9876_v42 = vld [vmem:[%s11642_s4 + $0x1660] ss:$16 sps:$4 sm:$0xff]   ;;  %v9879_v43 = vld [vmem:[%s11642_s4 + $0x1668] ss:$16 sps:$4 sm:$0xff]  }
 0x435   : > { %7120 = vmatprep.subr.bf16.mxu0 %v9793_v45  ;;  %7653 = vmatprep.subr.bf16.mxu1 %v9796_v46  ;;  %v9884_v45 = vld [vmem:[%s11642_s4 + $0x1684] ss:$16 sps:$4 sm:$0xff]   ;;  %v9887_v46 = vld [vmem:[%s11642_s4 + $0x168c] ss:$16 sps:$4 sm:$0xff]  }
 0x438   : > { %7121 = vmatpush1.bf16.msra.mxu0 %v9791_v47  ;;  %7654 = vmatpush1.bf16.msra.mxu1 %v9794_v48  ;;  %v9882_v47 = vld [vmem:[%s11642_s4 + $0x1680] ss:$16 sps:$4 sm:$0xff]   ;;  %v9885_v48 = vld [vmem:[%s11642_s4 + $0x1688] ss:$16 sps:$4 sm:$0xff]  }
 0x439   : > { %7122 = vmatprep.subr.bf16.mxu0 %v9799_v49  ;;  %7655 = vmatprep.subr.bf16.mxu1 %v9802_v50  ;;  %v9890_v49 = vld [vmem:[%s11642_s4 + $0x16a4] ss:$16 sps:$4 sm:$0xff]   ;;  %v9893_v50 = vld [vmem:[%s11642_s4 + $0x16ac] ss:$16 sps:$4 sm:$0xff]  }
 0x43c   : > { %7123 = vmatpush1.bf16.msra.mxu0 %v9797_v35  ;;  %7656 = vmatpush1.bf16.msra.mxu1 %v9800_v51  ;;  %v9888_v35 = vld [vmem:[%s11642_s4 + $0x16a0] ss:$16 sps:$4 sm:$0xff]   ;;  %v9891_v51 = vld [vmem:[%s11642_s4 + $0x16a8] ss:$16 sps:$4 sm:$0xff]  }
 0x43d   : > { %7124 = vmatprep.subr.bf16.mxu0 %v9805_v52  ;;  %7657 = vmatprep.subr.bf16.mxu1 %v9808_v44  ;;  %v9896_v52 = vld [vmem:[%s11642_s4 + $0x16c4] ss:$16 sps:$4 sm:$0xff]   ;;  %v9899_v44 = vld [vmem:[%s11642_s4 + $0x16cc] ss:$16 sps:$4 sm:$0xff]  }
 0x440   : > { %7125 = vmatpush1.bf16.msra.mxu0 %v9803_v53  ;;  %7658 = vmatpush1.bf16.msra.mxu1 %v9806_v55  ;;  %v9894_v53 = vld [vmem:[%s11642_s4 + $0x16c0] ss:$16 sps:$4 sm:$0xff]   ;;  %v9897_v55 = vld [vmem:[%s11642_s4 + $0x16c8] ss:$16 sps:$4 sm:$0xff]  }
 0x441   : > { %7126 = vmatprep.subr.bf16.mxu0 %v9811_v56  ;;  %7659 = vmatprep.subr.bf16.mxu1 %v9814_v58  ;;  %v9902_v56 = vld [vmem:[%s11642_s4 + $0x16e4] ss:$16 sps:$4 sm:$0xff]   ;;  %v9905_v58 = vld [vmem:[%s11642_s4 + $0x16ec] ss:$16 sps:$4 sm:$0xff]  }
 0x444   : > { %7127 = vmatpush1.bf16.msra.mxu0 %v9809_v59  ;;  %7660 = vmatpush1.bf16.msra.mxu1 %v9812_v37  ;;  %v9900_v59 = vld [vmem:[%s11642_s4 + $0x16e0] ss:$16 sps:$4 sm:$0xff]   ;;  %v9903_v37 = vld [vmem:[%s11642_s4 + $0x16e8] ss:$16 sps:$4 sm:$0xff]  }
 0x445   : > { %7128 = vmatprep.subr.bf16.mxu0 %v9817_v60  ;;  %7661 = vmatprep.subr.bf16.mxu1 %v9820_v61  ;;  %v9908_v60 = vld [vmem:[%s11642_s4 + $0x1704] ss:$16 sps:$4 sm:$0xff]   ;;  %v9911_v61 = vld [vmem:[%s11642_s4 + $0x170c] ss:$16 sps:$4 sm:$0xff]  }
 0x448   : > { %7129 = vmatpush1.bf16.msra.mxu0 %v9815_v62  ;;  %7662 = vmatpush1.bf16.msra.mxu1 %v9818_v63  ;;  %v9906_v62 = vld [vmem:[%s11642_s4 + $0x1700] ss:$16 sps:$4 sm:$0xff]   ;;  %v9909_v63 = vld [vmem:[%s11642_s4 + $0x1708] ss:$16 sps:$4 sm:$0xff]  }
 0x449   : > { %7130 = vmatprep.subr.bf16.mxu0 %v9823_v0  ;;  %7663 = vmatprep.subr.bf16.mxu1 %v9826_v1  ;;  %v9914_v0 = vld [vmem:[%s11642_s4 + $0x1724] ss:$16 sps:$4 sm:$0xff]   ;;  %v9917_v1 = vld [vmem:[%s11642_s4 + $0x172c] ss:$16 sps:$4 sm:$0xff]  }
 0x44c   : > { %7131 = vmatpush1.bf16.msra.mxu0 %v9821_v3  ;;  %7664 = vmatpush1.bf16.msra.mxu1 %v9824_v5  ;;  %v9912_v3 = vld [vmem:[%s11642_s4 + $0x1720] ss:$16 sps:$4 sm:$0xff]   ;;  %v9915_v5 = vld [vmem:[%s11642_s4 + $0x1728] ss:$16 sps:$4 sm:$0xff]  }
 0x44d   : > { %7132 = vmatprep.subr.bf16.mxu0 %v9829_v6  ;;  %7665 = vmatprep.subr.bf16.mxu1 %v9832_v7  ;;  %v9920_v6 = vld [vmem:[%s11642_s4 + $0x1744] ss:$16 sps:$4 sm:$0xff]   ;;  %v9923_v7 = vld [vmem:[%s11642_s4 + $0x174c] ss:$16 sps:$4 sm:$0xff]  }
 0x450   : > { %7133 = vmatpush1.bf16.msra.mxu0 %v9827_v57  ;;  %7666 = vmatpush1.bf16.msra.mxu1 %v9830_v8  ;;  %v9918_v57 = vld [vmem:[%s11642_s4 + $0x1740] ss:$16 sps:$4 sm:$0xff]   ;;  %v9921_v8 = vld [vmem:[%s11642_s4 + $0x1748] ss:$16 sps:$4 sm:$0xff]  }
 0x451   : > { %7134 = vmatprep.subr.bf16.mxu0 %v9835_v9  ;;  %7667 = vmatprep.subr.bf16.mxu1 %v9838_v10  ;;  %v9926_v9 = vld [vmem:[%s11642_s4 + $0x1764] ss:$16 sps:$4 sm:$0xff]   ;;  %v9929_v10 = vld [vmem:[%s11642_s4 + $0x176c] ss:$16 sps:$4 sm:$0xff]  }
 0x454   : > { %7135 = vmatpush1.bf16.msra.mxu0 %v9833_v2  ;;  %7668 = vmatpush1.bf16.msra.mxu1 %v9836_v11  ;;  %v9924_v2 = vld [vmem:[%s11642_s4 + $0x1760] ss:$16 sps:$4 sm:$0xff]   ;;  %v9927_v11 = vld [vmem:[%s11642_s4 + $0x1768] ss:$16 sps:$4 sm:$0xff]  }
 0x455   : > { %7136 = vmatprep.subr.bf16.mxu0 %v9841_v12  ;;  %7669 = vmatprep.subr.bf16.mxu1 %v9844_v34  ;;  %v9932_v12 = vld [vmem:[%s11642_s4 + $0x1784] ss:$16 sps:$4 sm:$0xff]   ;;  %v9935_v34 = vld [vmem:[%s11642_s4 + $0x178c] ss:$16 sps:$4 sm:$0xff]  }
 0x458   : > { %7137 = vmatpush1.bf16.msra.mxu0 %v9839_v15  ;;  %7670 = vmatpush1.bf16.msra.mxu1 %v9842_v16  ;;  %v9930_v15 = vld [vmem:[%s11642_s4 + $0x1780] ss:$16 sps:$4 sm:$0xff]   ;;  %v9933_v16 = vld [vmem:[%s11642_s4 + $0x1788] ss:$16 sps:$4 sm:$0xff]  }
 0x459   : > { %7138 = vmatprep.subr.bf16.mxu0 %v9847_v54  ;;  %7671 = vmatprep.subr.bf16.mxu1 %v9850_v18  ;;  %v9938_v54 = vld [vmem:[%s11642_s4 + $0x17a4] ss:$16 sps:$4 sm:$0xff]   ;;  %v9941_v18 = vld [vmem:[%s11642_s4 + $0x17ac] ss:$16 sps:$4 sm:$0xff]  }
 0x45c   : > { %7139 = vmatpush1.bf16.msra.mxu0 %v9845_v21  ;;  %7672 = vmatpush1.bf16.msra.mxu1 %v9848_v4  ;;  %v9936_v21 = vld [vmem:[%s11642_s4 + $0x17a0] ss:$16 sps:$4 sm:$0xff]   ;;  %v9939_v4 = vld [vmem:[%s11642_s4 + $0x17a8] ss:$16 sps:$4 sm:$0xff]  }
 0x45d   : > { %7140 = vmatprep.subr.bf16.mxu0 %v9853_v22  ;;  %7673 = vmatprep.subr.bf16.mxu1 %v9856_v23  ;;  %v9944_v22 = vld [vmem:[%s11642_s4 + $0x17c4] ss:$16 sps:$4 sm:$0xff]   ;;  %v9947_v23 = vld [vmem:[%s11642_s4 + $0x17cc] ss:$16 sps:$4 sm:$0xff]  }
 0x460   : > { %7141 = vmatpush1.bf16.msra.mxu0 %v9851_v25  ;;  %7674 = vmatpush1.bf16.msra.mxu1 %v9854_v13  ;;  %v9942_v25 = vld [vmem:[%s11642_s4 + $0x17c0] ss:$16 sps:$4 sm:$0xff]   ;;  %v9945_v13 = vld [vmem:[%s11642_s4 + $0x17c8] ss:$16 sps:$4 sm:$0xff]  }
 0x461   : > { %7151 = vmatprep.subr.bf16.mxu0 %v9860_v26  ;;  %7684 = vmatprep.subr.bf16.mxu1 %v9863_v27  ;;  %v9950_v26 = vld [vmem:[%s11642_s4 + $0x17e4] ss:$16 sps:$4 sm:$0xff]   ;;  %v9953_v27 = vld [vmem:[%s11642_s4 + $0x17ec] ss:$16 sps:$4 sm:$0xff]  }
 0x463   : > { %7143 = vmatmul.mubr.bf16.vlgmr.msra.gmra.mrb[0].mxu0 %v12481_v14  ;;  %7676 = vmatmul.mubr.bf16.vlgmr.msra.gmra.mrb[0].mxu1 %v12481_v14 }
 0x464   : > { %7152 = vmatpush1.bf16.msra.mxu0 %v9858_v30  ;;  %7685 = vmatpush1.bf16.msra.mxu1 %v9861_v31  ;;  %v9948_v30 = vld [vmem:[%s11642_s4 + $0x17e0] ss:$16 sps:$4 sm:$0xff]   ;;  %v9951_v31 = vld [vmem:[%s11642_s4 + $0x17e8] ss:$16 sps:$4 sm:$0xff]  }
 0x465   : > { %7153 = vmatprep.subr.bf16.mxu0 %v9866_v32  ;;  %7686 = vmatprep.subr.bf16.mxu1 %v9869_v33  ;;  %v9956_v32 = vld [vmem:[%s11642_s4 + $0x1804] ss:$16 sps:$4 sm:$0xff]   ;;  %v9959_v33 = vld [vmem:[%s11642_s4 + $0x180c] ss:$16 sps:$4 sm:$0xff]  }
 0x466   : > { %7183 = vmatprep.mubr.bf16.mxu0 %v2737_v36  ;;  %7716 = vmatprep.mubr.bf16.mxu1 %v2737_v36  ;;  %v2735_v36 = vcombine.high %v12481_v14, %v12481_v14  ;;  %v9963_v14 = vld [vmem:[%s11642_s4 + $0x1828] ss:$16 sps:$4 sm:$0xff]  }
 0x468   : > { %7154 = vmatpush1.bf16.msra.mxu0 %v9864_v17  ;;  %7687 = vmatpush1.bf16.msra.mxu1 %v9867_v38  ;;  %v9954_v17 = vld [vmem:[%s11642_s4 + $0x1800] ss:$16 sps:$4 sm:$0xff]   ;;  %v9957_v38 = vld [vmem:[%s11642_s4 + $0x1808] ss:$16 sps:$4 sm:$0xff]  }
 0x469   : > { %7155 = vmatprep.subr.bf16.mxu0 %v9872_v20  ;;  %7688 = vmatprep.subr.bf16.mxu1 %v9875_v39  ;;  %v9962_v20 = vld [vmem:[%s11642_s4 + $0x1824] ss:$16 sps:$4 sm:$0xff]   ;;  %v9965_v39 = vld [vmem:[%s11642_s4 + $0x182c] ss:$16 sps:$4 sm:$0xff]  }
 0x46c   : > { %7156 = vmatpush1.bf16.msra.mxu0 %v9870_v29  ;;  %7689 = vmatpush1.bf16.msra.mxu1 %v9873_v28  ;;  %v9960_v29 = vld [vmem:[%s11642_s4 + $0x1820] ss:$16 sps:$4 sm:$0xff]   ;;  %v9968_v28 = vld [vmem:[%s11642_s4 + $0x1844] ss:$16 sps:$4 sm:$0xff]  }
 0x46d   : > { %7157 = vmatprep.subr.bf16.mxu0 %v9878_v40  ;;  %7690 = vmatprep.subr.bf16.mxu1 %v9881_v41  ;;  %v9971_v40 = vld [vmem:[%s11642_s4 + $0x184c] ss:$16 sps:$4 sm:$0xff]   ;;  %v10005_v41 = vmov 0  }
 0x470   : > { %7158 = vmatpush1.bf16.msra.mxu0 %v9876_v42  ;;  %7691 = vmatpush1.bf16.msra.mxu1 %v9879_v43  ;;  %v9966_v42 = vld [vmem:[%s11642_s4 + $0x1840] ss:$16 sps:$4 sm:$0xff]   ;;  %v9969_v43 = vld [vmem:[%s11642_s4 + $0x1848] ss:$16 sps:$4 sm:$0xff]  }
 0x471   : > { %7159 = vmatprep.subr.bf16.mxu0 %v9884_v45  ;;  %7692 = vmatprep.subr.bf16.mxu1 %v9887_v46  ;;  %v9974_v45 = vld [vmem:[%s11642_s4 + $0x1864] ss:$16 sps:$4 sm:$0xff]   ;;  %v9977_v46 = vld [vmem:[%s11642_s4 + $0x186c] ss:$16 sps:$4 sm:$0xff]  }
 0x474   : > { %7160 = vmatpush1.bf16.msra.mxu0 %v9882_v47  ;;  %7693 = vmatpush1.bf16.msra.mxu1 %v9885_v48  ;;  %v9972_v47 = vld [vmem:[%s11642_s4 + $0x1860] ss:$16 sps:$4 sm:$0xff]   ;;  %v9975_v48 = vld [vmem:[%s11642_s4 + $0x1868] ss:$16 sps:$4 sm:$0xff]  }
 0x475   : > { %7161 = vmatprep.subr.bf16.mxu0 %v9890_v49  ;;  %7694 = vmatprep.subr.bf16.mxu1 %v9893_v50  ;;  %v7878_v49 = vld.sshfl [vmem:[%s12599_s0 + $0x18] sm:$0x1 pattern:$0x75316420] }
 0x476   : > { %v2751_v50 = vrot.slane %v7878_v49, %v11647_v24 }
 0x478   : > { %7162 = vmatpush1.bf16.msra.mxu0 %v9888_v35  ;;  %7695 = vmatpush1.bf16.msra.mxu1 %v9891_v51  ;;  %v2569_v35 = vsub.s32 0, %v11635_v19  ;;  %v2577_v51 = vsub.s32 2, %v11635_v19 }
 0x479   : > { %7163 = vmatprep.subr.bf16.mxu0 %v9896_v52  ;;  %7696 = vmatprep.subr.bf16.mxu1 %v9899_v44  ;;  %v2565_v52 = vld [vmem:[%s1769_s21] sm:$0xf]  ;;  %v2573_v44 = vsub.s32 1, %v11635_v19 }
 0x47c   : > { %7164 = vmatpush1.bf16.msra.mxu0 %v9894_v53  ;;  %7697 = vmatpush1.bf16.msra.mxu1 %v9897_v55  ;;  %v2581_v53 = vsub.s32 3, %v11635_v19  ;;  %v2570_v55 = vrot.slane %v2565_v52, %v2569_v35 }
 0x47d   : > { %7165 = vmatprep.subr.bf16.mxu0 %v9902_v56  ;;  %7698 = vmatprep.subr.bf16.mxu1 %v9905_v58  ;;  %v2578_v56 = vrot.slane %v2565_v52, %v2577_v51  ;;  %v2574_v58 = vrot.slane %v2565_v52, %v2573_v44 }
 0x480   : > { %7166 = vmatpush1.bf16.msra.mxu0 %v9900_v59  ;;  %7699 = vmatpush1.bf16.msra.mxu1 %v9903_v37  ;;  %v2582_v59 = vrot.slane %v2565_v52, %v2581_v53 }
 0x481   : > { %7167 = vmatprep.subr.bf16.mxu0 %v9908_v60  ;;  %7700 = vmatprep.subr.bf16.mxu1 %v9911_v61 }
 0x484   : > { %7168 = vmatpush1.bf16.msra.mxu0 %v9906_v62  ;;  %7701 = vmatpush1.bf16.msra.mxu1 %v9909_v63 }
 0x485   : > { %7169 = vmatprep.subr.bf16.mxu0 %v9914_v0  ;;  %7702 = vmatprep.subr.bf16.mxu1 %v9917_v1 }
 0x488   : > { %7170 = vmatpush1.bf16.msra.mxu0 %v9912_v3  ;;  %7703 = vmatpush1.bf16.msra.mxu1 %v9915_v5 }
 0x489   : > { %7171 = vmatprep.subr.bf16.mxu0 %v9920_v6  ;;  %7704 = vmatprep.subr.bf16.mxu1 %v9923_v7 }
 0x48c   : > { %7172 = vmatpush1.bf16.msra.mxu0 %v9918_v57  ;;  %7705 = vmatpush1.bf16.msra.mxu1 %v9921_v8 }
 0x48d   : > { %7173 = vmatprep.subr.bf16.mxu0 %v9926_v9  ;;  %7706 = vmatprep.subr.bf16.mxu1 %v9929_v10 }
 0x490   : > { %7174 = vmatpush1.bf16.msra.mxu0 %v9924_v2  ;;  %7707 = vmatpush1.bf16.msra.mxu1 %v9927_v11 }
 0x491   : > { %7175 = vmatprep.subr.bf16.mxu0 %v9932_v12  ;;  %7708 = vmatprep.subr.bf16.mxu1 %v9935_v34 }
 0x494   : > { %7176 = vmatpush1.bf16.msra.mxu0 %v9930_v15  ;;  %7709 = vmatpush1.bf16.msra.mxu1 %v9933_v16 }
 0x495   : > { %7177 = vmatprep.subr.bf16.mxu0 %v9938_v54  ;;  %7710 = vmatprep.subr.bf16.mxu1 %v9941_v18 }
 0x498   : > { %7178 = vmatpush1.bf16.msra.mxu0 %v9936_v21  ;;  %7711 = vmatpush1.bf16.msra.mxu1 %v9939_v4 }
 0x499   : > { %7179 = vmatprep.subr.bf16.mxu0 %v9944_v22  ;;  %7712 = vmatprep.subr.bf16.mxu1 %v9947_v23 }
 0x49c   : > { %7180 = vmatpush1.bf16.msra.mxu0 %v9942_v25  ;;  %7713 = vmatpush1.bf16.msra.mxu1 %v9945_v13 }
 0x49d   : > { %7181 = vmatprep.subr.bf16.mxu0 %v9950_v26  ;;  %7714 = vmatprep.subr.bf16.mxu1 %v9953_v27 }
 0x4a0   : > { %7182 = vmatpush1.bf16.msra.mxu0 %v9948_v30  ;;  %7715 = vmatpush1.bf16.msra.mxu1 %v9951_v31 }
 0x4a1   : > { %7192 = vmatprep.subr.bf16.mxu0 %v9956_v32  ;;  %7725 = vmatprep.subr.bf16.mxu1 %v9959_v33 }
 0x4a3   : > { %7184 = vmatmul.mubr.bf16.vlgmr.msra.gmra.mrb[0].mxu0 %v2735_v36  ;;  %7717 = vmatmul.mubr.bf16.vlgmr.msra.gmra.mrb[0].mxu1 %v2735_v36 }
 0x4a4   : > { %7193 = vmatpush1.bf16.msra.mxu0 %v9954_v17  ;;  %7726 = vmatpush1.bf16.msra.mxu1 %v9957_v38 }
 0x4a5   : > { %7194 = vmatprep.subr.bf16.mxu0 %v9962_v20  ;;  %7727 = vmatprep.subr.bf16.mxu1 %v9965_v39 }
 0x4a6   : > { %7224 = vmatprep.mubr.bf16.mxu0 %v10005_v41  ;;  %7757 = vmatprep.mubr.bf16.mxu1 %v10005_v41 }
 0x4a8   : > { %7195 = vmatpush1.bf16.msra.mxu0 %v9960_v29  ;;  %7728 = vmatpush1.bf16.msra.mxu1 %v9963_v14 }
 0x4a9   : > { %7196 = vmatprep.subr.bf16.mxu0 %v9968_v28  ;;  %7729 = vmatprep.subr.bf16.mxu1 %v9971_v40 }
 0x4ac   : > { %7197 = vmatpush1.bf16.msra.mxu0 %v9966_v42  ;;  %7730 = vmatpush1.bf16.msra.mxu1 %v9969_v43 }
 0x4ad   : > { %7198 = vmatprep.subr.bf16.mxu0 %v9974_v45  ;;  %7731 = vmatprep.subr.bf16.mxu1 %v9977_v46 }
 0x4b0   : > { %7199 = vmatpush1.bf16.msra.mxu0 %v9972_v47  ;;  %7732 = vmatpush1.bf16.msra.mxu1 %v9975_v48 }
 0x4b3   : > { %8663 = vmatmul.mubr.msk.bf16.vlgmr.msra.gmra.mrb[0].mxu0 %vm6696_vm0, %v2751_v50  ;;  %8664 = vmatmul.mubr.msk.bf16.vlgmr.msra.gmra.mrb[0].mxu1 %vm6696_vm0, %v2751_v50 }
 0x586   : > { %v7226_v37 = vpop.f32.mrb[0].mxu0  ;;  %v7759_v60 = vpop.f32.mrb[0].mxu1 }
 0x587   : > { %v8671_v61 = vadd.f32 %v7226_v37, %v2570_v55  ;;  %v8673_v62 = vadd.f32 %v7759_v60, %v2578_v56  ;;  %v7228_v63 = vpop.f32.mrb[1].mxu0  ;;  %v7761_v0 = vpop.f32.mrb[1].mxu1 }
 0x588   : > { %v8672_v1 = vadd.f32 %v7228_v63, %v2574_v58  ;;  %v8674_v3 = vadd.f32 %v7761_v0, %v2582_v59  ;;  %v7230_v5 = vpop.f32.mrb[2].mxu0  ;;  %v7763_v6 = vpop.f32.mrb[2].mxu1 }
 0x589   : > { %v7766_v7 = vmax.f32 %v8671_v61, 0.0  ;;  %v7768_v57 = vmax.f32 %v8673_v62, 0.0  ;;  %v7231_v8 = vpop.f32.mrb[3].mxu0  ;;  %v7764_v9 = vpop.f32.mrb[3].mxu1 }
 0x58a   : > { %v7767_v19 = vmax.f32 %v8672_v1, 0.0  ;;  %v7769_v10 = vmax.f32 %v8674_v3, 0.0 }
 0x58c   : > { %v8665_v2 = vpack.c.bf16 %v7767_v19, %v7766_v7  ;;  %v8666_v11 = vpack.c.bf16 %v7769_v10, %v7768_v57 }
 0x58e   : > { %v7786_v12 = vrot.slane %v8665_v2, %v11647_v24  ;;  %v7793_v34 = vrot.slane %v8666_v11, %v11647_v24 }
 0x590   : > { %v7794_v15 = vcombine.low %v7786_v12, %v7793_v34 }
 0x592   : > { %8667 = vst.sshfl [vmem:[%s1774_s22] sm:$0x55 pattern:$0x73625140] %v7794_v15 }
 0x593 PF: > { %p10_p9 = scmp.ge.s32.totalorder %s10043_s16, 6   ;;  %s12603_s12 = smov %s9998_s13 }
 0x594   : > { %s12604_s13 = smov %s10052_s19  ;;  %s12605_s14 = smov %s10043_s16 }
 0x595   :  { %12 = sbr.rel (!%p10_p9) target bundleno = 2 (0x2), region = 93 }

</bundles_post_ra>
